<compile_context>
chip_gen: v6e
topology: v6e:2x2x1
jax: 0.10.0
libtpu: 0.0.40
codegen_flags: <defaults>
</compile_context>

<pallas_src>
import functools

import jax
import jax.numpy as jnp
from jax import lax
from jax.experimental import pallas as pl
from jax.experimental.pallas import tpu as pltpu

_SLOPE = 0.2
_EPS = 1e-5


# --------------------------------------------------------------------------- kernels

def _conv4x4_s2_kernel(*refs, oh, ow, apply_act, slope, with_stats, fuse_affine):
    """4x4 stride-2 pad-1 conv as 4 tap matmuls over a space-to-depth input.

    refs = (xs_ref, [a_ref, b_ref], w_ref, y_ref, [sum_ref, sq_ref])
      xs_ref : (bn, OH+1, OW+1, 4*Cin) bf16  padded, phase-decomposed input block
      a_ref  : (1, OH+1, OW+1, 4*Cin)  f32   fused prev-BN scale (0 on pad border)
      b_ref  : (1, OH+1, OW+1, 4*Cin)  f32   fused prev-BN shift (0 on pad border)
      w_ref  : (4, 4*Cin, Cout)        bf16  tap-major rearranged conv weights
      y_ref  : (bn*OH*OW, Cout)        bf16  raw (or post-LeakyReLU) conv output
      sum_ref, sq_ref : (1, 1, Cout)   f32   per-block batch sum / sum-of-squares
    """
    it = iter(refs)
    xs_ref = next(it)
    a_ref = next(it) if fuse_affine else None
    b_ref = next(it) if fuse_affine else None
    w_ref = next(it)
    y_ref = next(it)
    sum_ref = next(it) if with_stats else None
    sq_ref = next(it) if with_stats else None

    c4 = xs_ref.shape[-1]
    m = y_ref.shape[0]                                  # bn * OH * OW

    x = xs_ref[...]                                     # (bn, OH+1, OW+1, 4*Cin)
    if fuse_affine:
        # Previous layer's BatchNorm affine + LeakyReLU, fused into this conv's
        # input path.  Border lanes carry scale=shift=0, so the zero padding
        # stays exactly zero after the activation.
        xf = x.astype(jnp.float32) * a_ref[...] + b_ref[...]
        x = jnp.maximum(xf, slope * xf).astype(jnp.bfloat16)

    # 4x4/2 conv == 4 tap matmuls; all bn*OH*OW output positions share one M.
    acc = None
    for t, (dh, dw) in enumerate(((0, 0), (0, 1), (1, 0), (1, 1))):
        v = x[:, dh:dh + oh, dw:dw + ow, :].reshape(m, c4)
        d = jnp.dot(v, w_ref[t], preferred_element_type=jnp.float32)
        acc = d if acc is None else acc + d

    if with_stats:                                      # fused per-block BN stats
        sum_ref[...] = jnp.sum(acc, axis=0, keepdims=True)[None]
        sq_ref[...] = jnp.sum(acc * acc, axis=0, keepdims=True)[None]

    out = acc
    if apply_act:                                       # layer-0 LeakyReLU (no BN)
        out = jnp.maximum(out, slope * out)
    y_ref[...] = out.astype(y_ref.dtype)


def _final_conv_kernel(x_ref, a_ref, b_ref, w_ref, o_ref, *, slope):
    """Fused prev-BN affine + LeakyReLU + 4x4 valid conv (dense matmul) + sigmoid."""
    x = x_ref[...].astype(jnp.float32) * a_ref[...] + b_ref[...]
    x = jnp.maximum(x, slope * x)
    acc = jnp.dot(x.astype(jnp.bfloat16), w_ref[...],
                  preferred_element_type=jnp.float32)
    o_ref[...] = 1.0 / (1.0 + jnp.exp(-acc))


# --------------------------------------------------------------------------- helpers

def _pad_space_to_depth(x_nhwc, pad=1):
    """(N,H,W,C) -> (N, H/2+pad, W/2+pad, 4C) bf16; phase layout for stride-2 conv."""
    n, h, w, c = x_nhwc.shape
    xp = jnp.pad(x_nhwc, ((0, 0), (pad, pad), (pad, pad), (0, 0)))
    hp, wp = h + 2 * pad, w + 2 * pad
    xs = xp.reshape(n, hp // 2, 2, wp // 2, 2, c)        # (n, r, ph, s, pw, ci)
    xs = xs.transpose(0, 1, 3, 2, 4, 5).reshape(n, hp // 2, wp // 2, 4 * c)
    return xs.astype(jnp.bfloat16)


def _rearrange_conv_weight(w):
    """PyTorch Conv2d weight (Cout, Cin, 4, 4) -> (4 taps, 4*Cin, Cout) bf16."""
    cout, cin, kh, kw = w.shape
    assert kh == 4 and kw == 4
    wr = w.reshape(cout, cin, 2, 2, 2, 2)                # (co, ci, dh, ph, dw, pw)
    wr = wr.transpose(2, 4, 3, 5, 1, 0)                  # (dh, dw, ph, pw, ci, co)
    return wr.reshape(4, 4 * cin, cout).astype(jnp.bfloat16)


def _affine_planes(scale, shift, r, s):
    """Per-lane scale/shift planes for the (R,S,4C) space-to-depth input of the
    next conv, with the 1-pixel zero-pad border folded in (scale=shift=0 there)."""
    c = scale.shape[0]
    m = jnp.ones((r, s, 2, 2), jnp.float32)
    m = m.at[0, :, 0, :].set(0.0)      # padded row 0    -> (r=0,   ph=0)
    m = m.at[r - 1, :, 1, :].set(0.0)  # padded row H+1  -> (r=R-1, ph=1)
    m = m.at[:, 0, :, 0].set(0.0)      # padded col 0    -> (s=0,   pw=0)
    m = m.at[:, s - 1, :, 1].set(0.0)  # padded col W+1  -> (s=S-1, pw=1)
    m = m.reshape(r, s, 4, 1)
    a = (m * scale.astype(jnp.float32).reshape(1, 1, 1, c)).reshape(1, r, s, 4 * c)
    b = (m * shift.astype(jnp.float32).reshape(1, 1, 1, c)).reshape(1, r, s, 4 * c)
    return a, b


def _bn_scale_shift(ssum, ssq, gamma, beta, count, eps=_EPS):
    """Training-mode BatchNorm (batch stats, biased variance) -> affine scale/shift."""
    mean = ssum / count
    var = jnp.maximum(ssq / count - mean * mean, 0.0)    # clamp f32 cancellation
    scale = gamma * lax.rsqrt(var + eps)
    shift = beta - mean * scale
    return scale, shift


def _pick_bn(n, r, s, c4, oh, ow, cout, target_m=256, vmem_cap=8 * 1024 * 1024):
    """Images per grid step: grow until matmul M = bn*OH*OW >= target_m (or the
    batch is exhausted), keeping the double-buffered blocks under a VMEM cap."""
    def blk_bytes(b):
        lane = 128
        return 4 * b * (r * s * max(c4, lane) + oh * ow * max(cout, lane))
    bn = 1
    while (bn < n and n % (2 * bn) == 0 and bn * oh * ow < target_m
           and blk_bytes(2 * bn) <= vmem_cap):
        bn *= 2
    return bn


# --------------------------------------------------------------------------- pallas wrappers

def conv4x4_s2(xs, w_taps, *, oh, ow, apply_act, with_stats, affine=None,
               slope=_SLOPE):
    """Conv2d(k=4, s=2, p=1, bias=False) over a phase-decomposed padded input.

    Optional fusions: previous layer's BN affine + LeakyReLU on the input
    (`affine`), LeakyReLU on the output (`apply_act`), and per-block batch
    statistics for this layer's BatchNorm (`with_stats`)."""
    n, r, s, c4 = xs.shape
    cout = w_taps.shape[-1]
    bn = _pick_bn(n, r, s, c4, oh, ow, cout)
    g = n // bn
    m_blk = bn * oh * ow

    inputs = [xs]
    in_specs = [pl.BlockSpec((bn, r, s, c4), lambda i: (i, 0, 0, 0))]
    if affine is not None:
        a_plane, b_plane = affine
        inputs += [a_plane, b_plane]
        in_specs += [pl.BlockSpec((1, r, s, c4), lambda i: (0, 0, 0, 0)),
                     pl.BlockSpec((1, r, s, c4), lambda i: (0, 0, 0, 0))]
    inputs.append(w_taps)
    in_specs.append(pl.BlockSpec((4, c4, cout), lambda i: (0, 0, 0)))

    y_spec = pl.BlockSpec((m_blk, cout), lambda i: (i, 0))
    y_shape = jax.ShapeDtypeStruct((n * oh * ow, cout), jnp.bfloat16)

    kernel = functools.partial(_conv4x4_s2_kernel, oh=oh, ow=ow,
                               apply_act=apply_act, slope=slope,
                               with_stats=with_stats,
                               fuse_affine=affine is not None)
    cp = pltpu.CompilerParams(dimension_semantics=("parallel",))

    if with_stats:
        st_spec = pl.BlockSpec((1, 1, cout), lambda i: (i, 0, 0))
        st_shape = jax.ShapeDtypeStruct((g, 1, cout), jnp.float32)
        y, ssum, ssq = pl.pallas_call(
            kernel, grid=(g,), in_specs=in_specs,
            out_specs=(y_spec, st_spec, st_spec),
            out_shape=(y_shape, st_shape, st_shape),
            compiler_params=cp,
        )(*inputs)
        return (y.reshape(n, oh, ow, cout),
                jnp.sum(ssum, axis=(0, 1)), jnp.sum(ssq, axis=(0, 1)))

    y = pl.pallas_call(
        kernel, grid=(g,), in_specs=in_specs, out_specs=y_spec,
        out_shape=y_shape, compiler_params=cp,
    )(*inputs)
    return y.reshape(n, oh, ow, cout)


def final_conv_sigmoid(x_flat, a_flat, b_flat, w_pad, *, slope=_SLOPE):
    """BN3 affine + LeakyReLU + Conv2d(Cin, 1, 4, 1, 0) on a 4x4 map + sigmoid.
    The conv is a dense matmul over the flat image; weight columns are padded
    to 128 lanes (sliced back here)."""
    n, k = x_flat.shape
    out = pl.pallas_call(
        functools.partial(_final_conv_kernel, slope=slope),
        grid=(1,),
        in_specs=[pl.BlockSpec((n, k), lambda i: (0, 0)),
                  pl.BlockSpec((1, k), lambda i: (0, 0)),
                  pl.BlockSpec((1, k), lambda i: (0, 0)),
                  pl.BlockSpec((k, 128), lambda i: (0, 0))],
        out_specs=pl.BlockSpec((n, 128), lambda i: (0, 0)),
        out_shape=jax.ShapeDtypeStruct((n, 128), jnp.float32),
    )(x_flat, a_flat, b_flat, w_pad)
    return out[:, :1]                                    # (n, 1)


# --------------------------------------------------------------------------- Discriminator

def init_params(nc, ndf, key):
    """DCGAN-style init; conv weights are pre-rearranged / pre-cast for the kernels."""
    chans = [nc, ndf, ndf * 2, ndf * 4, ndf * 8, 1]
    params = {}
    for i in range(5):
        key, k1, k2 = jax.random.split(key, 3)
        cin, cout = chans[i], chans[i + 1]
        w = 0.02 * jax.random.normal(k1, (cout, cin, 4, 4), jnp.float32)
        if i < 4:
            params[f"w{i}"] = _rearrange_conv_weight(w)          # (4, 4*cin, cout) bf16
        else:
            b = jnp.transpose(w, (2, 3, 1, 0)).reshape(16 * cin, 1)
            params["w4"] = jnp.pad(b, ((0, 0), (0, 127))).astype(jnp.bfloat16)
        if 1 <= i <= 3:
            params[f"gamma{i}"] = 1.0 + 0.02 * jax.random.normal(k2, (cout,), jnp.float32)
            params[f"beta{i}"] = jnp.zeros((cout,), jnp.float32)
    return params


def discriminator_forward(x_nchw, params):
    x = jnp.transpose(x_nchw, (0, 2, 3, 1))              # NHWC internally
    n = x.shape[0]

    # layer 0: conv + fused LeakyReLU (no BatchNorm)
    oh, ow = x.shape[1] // 2, x.shape[2] // 2
    y = conv4x4_s2(_pad_space_to_depth(x), params["w0"], oh=oh, ow=ow,
                   apply_act=True, with_stats=False)

    # layers 1-3: conv with fused batch stats; the previous layer's BN affine +
    # LeakyReLU is fused into this conv's input path.
    scale = shift = None
    for i in (1, 2, 3):
        oh, ow = y.shape[1] // 2, y.shape[2] // 2
        affine = None if scale is None else _affine_planes(scale, shift, oh + 1, ow + 1)
        y, ssum, ssq = conv4x4_s2(_pad_space_to_depth(y), params[f"w{i}"],
                                  oh=oh, ow=ow, apply_act=False,
                                  with_stats=True, affine=affine)
        scale, shift = _bn_scale_shift(ssum, ssq, params[f"gamma{i}"],
                                       params[f"beta{i}"], n * oh * ow)

    # layer 4: BN3 affine + LeakyReLU + 4x4 valid conv (-> 1x1) + sigmoid
    n_, h, w_sp, c = y.shape
    k = h * w_sp * c
    a_flat = jnp.tile(scale, h * w_sp).reshape(1, k).astype(jnp.float32)
    b_flat = jnp.tile(shift, h * w_sp).reshape(1, k).astype(jnp.float32)
    out = final_conv_sigmoid(y.reshape(n_, k), a_flat, b_flat, params["w4"])
    return out.reshape(n_, 1, 1, 1)                      # NCHW (N, 1, 1, 1)


# --------------------------------------------------------------------------- main

if __name__ == "__main__":
    # small shapes consistent with the module: batch=2, nc=3, ndf=8, 64x64 input
    N, nc, ndf = 2, 3, 8

    params = init_params(nc, ndf, jax.random.PRNGKey(0))
    x = jax.random.normal(jax.random.PRNGKey(0), (N, nc, 64, 64), jnp.float32)

    fwd = jax.jit(discriminator_forward)
    out = jax.block_until_ready(fwd(x, params))

    assert out.shape == (N, 1, 1, 1), out.shape
    assert bool(jnp.all(jnp.isfinite(out)))
    assert bool(jnp.all((out >= 0.0) & (out <= 1.0)))    # sigmoid output range
    print("KERNEL_OK")
</pallas_src>

<mosaic_0001>
module attributes {stable_mosaic.version = 11 : i64} {
  func.func @_conv4x4_s2_kernel(%arg0: i32, %arg1: memref<1x33x33x12xbf16, #tpu.memory_space<vmem>>, %arg2: memref<4x12x8xbf16, #tpu.memory_space<vmem>>, %arg3: memref<1024x8xbf16, #tpu.memory_space<vmem>>) attributes {dimension_semantics = [#tpu.dimension_semantics<parallel>], iteration_bounds = array<i64: 2>, scalar_prefetch = 0 : i64, scratch_operands = 0 : i64, tpu.core_type = #tpu.core_type<tc>, window_params = [{transform_indices = @transform_0, window_bounds = array<i64: 1, 33, 33, 12>}, {pipeline_mode = #tpu.pipeline_mode<synchronous>, transform_indices = @transform_1, window_bounds = array<i64: 4, 12, 8>}, {transform_indices = @transform_2, window_bounds = array<i64: 1024, 8>}]} {
    %c0 = arith.constant 0 : index
    %c0_0 = arith.constant 0 : index
    %c0_1 = arith.constant 0 : index
    %c0_2 = arith.constant 0 : index
    %0 = vector.load %arg1[%c0, %c0_0, %c0_1, %c0_2] : memref<1x33x33x12xbf16, #tpu.memory_space<vmem>>, vector<1x33x33x12xbf16>
    %1 = vector.extract_strided_slice %0 {offsets = [0, 0, 0, 0], sizes = [1, 32, 32, 12], strides = [1, 1, 1, 1]} : vector<1x33x33x12xbf16> to vector<1x32x32x12xbf16>
    %2 = vector.shape_cast %1 : vector<1x32x32x12xbf16> to vector<1024x12xbf16>
    %c0_3 = arith.constant 0 : index
    %c0_4 = arith.constant 0 : index
    %c0_5 = arith.constant 0 : index
    %3 = vector.load %arg2[%c0_3, %c0_4, %c0_5] : memref<4x12x8xbf16, #tpu.memory_space<vmem>>, vector<1x12x8xbf16>
    %4 = vector.shape_cast %3 : vector<1x12x8xbf16> to vector<12x8xbf16>
    %cst = arith.constant dense<0.000000e+00> : vector<1024x8xf32>
    %5 = tpu.matmul %2, %4, %cst {dimension_numbers = #tpu.dot_dimension_numbers<[1], [0], [0], [1], [0, 0, 1, 1], [], []>} : vector<1024x12xbf16>, vector<12x8xbf16>, vector<1024x8xf32> -> vector<1024x8xf32>
    %6 = vector.extract_strided_slice %0 {offsets = [0, 0, 1, 0], sizes = [1, 32, 32, 12], strides = [1, 1, 1, 1]} : vector<1x33x33x12xbf16> to vector<1x32x32x12xbf16>
    %7 = vector.shape_cast %6 : vector<1x32x32x12xbf16> to vector<1024x12xbf16>
    %c1 = arith.constant 1 : index
    %c0_6 = arith.constant 0 : index
    %c0_7 = arith.constant 0 : index
    %8 = vector.load %arg2[%c1, %c0_6, %c0_7] : memref<4x12x8xbf16, #tpu.memory_space<vmem>>, vector<1x12x8xbf16>
    %9 = vector.shape_cast %8 : vector<1x12x8xbf16> to vector<12x8xbf16>
    %cst_8 = arith.constant dense<0.000000e+00> : vector<1024x8xf32>
    %10 = tpu.matmul %7, %9, %cst_8 {dimension_numbers = #tpu.dot_dimension_numbers<[1], [0], [0], [1], [0, 0, 1, 1], [], []>} : vector<1024x12xbf16>, vector<12x8xbf16>, vector<1024x8xf32> -> vector<1024x8xf32>
    %11 = arith.addf %5, %10 : vector<1024x8xf32>
    %12 = vector.extract_strided_slice %0 {offsets = [0, 1, 0, 0], sizes = [1, 32, 32, 12], strides = [1, 1, 1, 1]} : vector<1x33x33x12xbf16> to vector<1x32x32x12xbf16>
    %13 = vector.shape_cast %12 : vector<1x32x32x12xbf16> to vector<1024x12xbf16>
    %c2 = arith.constant 2 : index
    %c0_9 = arith.constant 0 : index
    %c0_10 = arith.constant 0 : index
    %14 = vector.load %arg2[%c2, %c0_9, %c0_10] : memref<4x12x8xbf16, #tpu.memory_space<vmem>>, vector<1x12x8xbf16>
    %15 = vector.shape_cast %14 : vector<1x12x8xbf16> to vector<12x8xbf16>
    %cst_11 = arith.constant dense<0.000000e+00> : vector<1024x8xf32>
    %16 = tpu.matmul %13, %15, %cst_11 {dimension_numbers = #tpu.dot_dimension_numbers<[1], [0], [0], [1], [0, 0, 1, 1], [], []>} : vector<1024x12xbf16>, vector<12x8xbf16>, vector<1024x8xf32> -> vector<1024x8xf32>
    %17 = arith.addf %11, %16 : vector<1024x8xf32>
    %18 = vector.extract_strided_slice %0 {offsets = [0, 1, 1, 0], sizes = [1, 32, 32, 12], strides = [1, 1, 1, 1]} : vector<1x33x33x12xbf16> to vector<1x32x32x12xbf16>
    %19 = vector.shape_cast %18 : vector<1x32x32x12xbf16> to vector<1024x12xbf16>
    %c3 = arith.constant 3 : index
    %c0_12 = arith.constant 0 : index
    %c0_13 = arith.constant 0 : index
    %20 = vector.load %arg2[%c3, %c0_12, %c0_13] : memref<4x12x8xbf16, #tpu.memory_space<vmem>>, vector<1x12x8xbf16>
    %21 = vector.shape_cast %20 : vector<1x12x8xbf16> to vector<12x8xbf16>
    %cst_14 = arith.constant dense<0.000000e+00> : vector<1024x8xf32>
    %22 = tpu.matmul %19, %21, %cst_14 {dimension_numbers = #tpu.dot_dimension_numbers<[1], [0], [0], [1], [0, 0, 1, 1], [], []>} : vector<1024x12xbf16>, vector<12x8xbf16>, vector<1024x8xf32> -> vector<1024x8xf32>
    %23 = arith.addf %17, %22 : vector<1024x8xf32>
    %cst_15 = arith.constant 2.000000e-01 : f32
    %24 = vector.broadcast %cst_15 : f32 to vector<1024x8xf32>
    %25 = arith.mulf %24, %23 : vector<1024x8xf32>
    %26 = arith.maximumf %23, %25 : vector<1024x8xf32>
    %27 = arith.truncf %26 : vector<1024x8xf32> to vector<1024x8xbf16>
    %c0_16 = arith.constant 0 : index
    %c0_17 = arith.constant 0 : index
    %28 = vector.load %arg3[%c0_16, %c0_17] : memref<1024x8xbf16, #tpu.memory_space<vmem>>, vector<1024x8xbf16>
    tpu.vector_store %arg3[%c0_16, %c0_17], %27 {strides = array<i32>} : memref<1024x8xbf16, #tpu.memory_space<vmem>>, vector<1024x8xbf16>,
    return
  }
  func.func @transform_0(%arg0: i32) -> (i32, i32, i32, i32) {
    %c0_i32 = arith.constant 0 : i32
    %c0_i32_0 = arith.constant 0 : i32
    %c0_i32_1 = arith.constant 0 : i32
    %c0_i32_2 = arith.constant 0 : i32
    return %arg0, %c0_i32, %c0_i32_0, %c0_i32_1 : i32, i32, i32, i32
  }
  func.func @transform_1(%arg0: i32) -> (i32, i32, i32) {
    %c0_i32 = arith.constant 0 : i32
    %c0_i32_0 = arith.constant 0 : i32
    %c0_i32_1 = arith.constant 0 : i32
    %c0_i32_2 = arith.constant 0 : i32
    return %c0_i32, %c0_i32_0, %c0_i32_1 : i32, i32, i32
  }
  func.func @transform_2(%arg0: i32) -> (i32, i32) {
    %c0_i32 = arith.constant 0 : i32
    %c0_i32_0 = arith.constant 0 : i32
    return %arg0, %c0_i32 : i32, i32
  }
}

module attributes {stable_mosaic.version = 11 : i64} {
  func.func @_conv4x4_s2_kernel(%arg0: i32, %arg1: memref<1x17x17x32xbf16, #tpu.memory_space<vmem>>, %arg2: memref<4x32x16xbf16, #tpu.memory_space<vmem>>, %arg3: memref<256x16xbf16, #tpu.memory_space<vmem>>, %arg4: memref<1x1x16xf32, #tpu.memory_space<vmem>>, %arg5: memref<1x1x16xf32, #tpu.memory_space<vmem>>) attributes {dimension_semantics = [#tpu.dimension_semantics<parallel>], iteration_bounds = array<i64: 2>, scalar_prefetch = 0 : i64, scratch_operands = 0 : i64, tpu.core_type = #tpu.core_type<tc>, window_params = [{transform_indices = @transform_0, window_bounds = array<i64: 1, 17, 17, 32>}, {pipeline_mode = #tpu.pipeline_mode<synchronous>, transform_indices = @transform_1, window_bounds = array<i64: 4, 32, 16>}, {transform_indices = @transform_2, window_bounds = array<i64: 256, 16>}, {transform_indices = @transform_3, window_bounds = array<i64: 1, 1, 16>}, {transform_indices = @transform_4, window_bounds = array<i64: 1, 1, 16>}]} {
    %c0 = arith.constant 0 : index
    %c0_0 = arith.constant 0 : index
    %c0_1 = arith.constant 0 : index
    %c0_2 = arith.constant 0 : index
    %0 = vector.load %arg1[%c0, %c0_0, %c0_1, %c0_2] : memref<1x17x17x32xbf16, #tpu.memory_space<vmem>>, vector<1x17x17x32xbf16>
    %1 = vector.extract_strided_slice %0 {offsets = [0, 0, 0, 0], sizes = [1, 16, 16, 32], strides = [1, 1, 1, 1]} : vector<1x17x17x32xbf16> to vector<1x16x16x32xbf16>
    %2 = vector.shape_cast %1 : vector<1x16x16x32xbf16> to vector<256x32xbf16>
    %c0_3 = arith.constant 0 : index
    %c0_4 = arith.constant 0 : index
    %c0_5 = arith.constant 0 : index
    %3 = vector.load %arg2[%c0_3, %c0_4, %c0_5] : memref<4x32x16xbf16, #tpu.memory_space<vmem>>, vector<1x32x16xbf16>
    %4 = vector.shape_cast %3 : vector<1x32x16xbf16> to vector<32x16xbf16>
    %cst = arith.constant dense<0.000000e+00> : vector<256x16xf32>
    %5 = tpu.matmul %2, %4, %cst {dimension_numbers = #tpu.dot_dimension_numbers<[1], [0], [0], [1], [0, 0, 1, 1], [], []>} : vector<256x32xbf16>, vector<32x16xbf16>, vector<256x16xf32> -> vector<256x16xf32>
    %6 = vector.extract_strided_slice %0 {offsets = [0, 0, 1, 0], sizes = [1, 16, 16, 32], strides = [1, 1, 1, 1]} : vector<1x17x17x32xbf16> to vector<1x16x16x32xbf16>
    %7 = vector.shape_cast %6 : vector<1x16x16x32xbf16> to vector<256x32xbf16>
    %c1 = arith.constant 1 : index
    %c0_6 = arith.constant 0 : index
    %c0_7 = arith.constant 0 : index
    %8 = vector.load %arg2[%c1, %c0_6, %c0_7] : memref<4x32x16xbf16, #tpu.memory_space<vmem>>, vector<1x32x16xbf16>
    %9 = vector.shape_cast %8 : vector<1x32x16xbf16> to vector<32x16xbf16>
    %cst_8 = arith.constant dense<0.000000e+00> : vector<256x16xf32>
    %10 = tpu.matmul %7, %9, %cst_8 {dimension_numbers = #tpu.dot_dimension_numbers<[1], [0], [0], [1], [0, 0, 1, 1], [], []>} : vector<256x32xbf16>, vector<32x16xbf16>, vector<256x16xf32> -> vector<256x16xf32>
    %11 = arith.addf %5, %10 : vector<256x16xf32>
    %12 = vector.extract_strided_slice %0 {offsets = [0, 1, 0, 0], sizes = [1, 16, 16, 32], strides = [1, 1, 1, 1]} : vector<1x17x17x32xbf16> to vector<1x16x16x32xbf16>
    %13 = vector.shape_cast %12 : vector<1x16x16x32xbf16> to vector<256x32xbf16>
    %c2 = arith.constant 2 : index
    %c0_9 = arith.constant 0 : index
    %c0_10 = arith.constant 0 : index
    %14 = vector.load %arg2[%c2, %c0_9, %c0_10] : memref<4x32x16xbf16, #tpu.memory_space<vmem>>, vector<1x32x16xbf16>
    %15 = vector.shape_cast %14 : vector<1x32x16xbf16> to vector<32x16xbf16>
    %cst_11 = arith.constant dense<0.000000e+00> : vector<256x16xf32>
    %16 = tpu.matmul %13, %15, %cst_11 {dimension_numbers = #tpu.dot_dimension_numbers<[1], [0], [0], [1], [0, 0, 1, 1], [], []>} : vector<256x32xbf16>, vector<32x16xbf16>, vector<256x16xf32> -> vector<256x16xf32>
    %17 = arith.addf %11, %16 : vector<256x16xf32>
    %18 = vector.extract_strided_slice %0 {offsets = [0, 1, 1, 0], sizes = [1, 16, 16, 32], strides = [1, 1, 1, 1]} : vector<1x17x17x32xbf16> to vector<1x16x16x32xbf16>
    %19 = vector.shape_cast %18 : vector<1x16x16x32xbf16> to vector<256x32xbf16>
    %c3 = arith.constant 3 : index
    %c0_12 = arith.constant 0 : index
    %c0_13 = arith.constant 0 : index
    %20 = vector.load %arg2[%c3, %c0_12, %c0_13] : memref<4x32x16xbf16, #tpu.memory_space<vmem>>, vector<1x32x16xbf16>
    %21 = vector.shape_cast %20 : vector<1x32x16xbf16> to vector<32x16xbf16>
    %cst_14 = arith.constant dense<0.000000e+00> : vector<256x16xf32>
    %22 = tpu.matmul %19, %21, %cst_14 {dimension_numbers = #tpu.dot_dimension_numbers<[1], [0], [0], [1], [0, 0, 1, 1], [], []>} : vector<256x32xbf16>, vector<32x16xbf16>, vector<256x16xf32> -> vector<256x16xf32>
    %23 = arith.addf %17, %22 : vector<256x16xf32>
    %cst_15 = arith.constant dense<0.000000e+00> : vector<16xf32>
    %24 = vector.multi_reduction <add>, %23, %cst_15 [0] : vector<256x16xf32> to vector<16xf32>
    %25 = vector.shape_cast %24 : vector<16xf32> to vector<1x16xf32>
    %26 = vector.shape_cast %25 : vector<1x16xf32> to vector<1x1x16xf32>
    %c0_16 = arith.constant 0 : index
    %c0_17 = arith.constant 0 : index
    %c0_18 = arith.constant 0 : index
    %27 = vector.load %arg4[%c0_16, %c0_17, %c0_18] : memref<1x1x16xf32, #tpu.memory_space<vmem>>, vector<1x1x16xf32>
    tpu.vector_store %arg4[%c0_16, %c0_17, %c0_18], %26 {strides = array<i32>} : memref<1x1x16xf32, #tpu.memory_space<vmem>>, vector<1x1x16xf32>,
    %28 = arith.mulf %23, %23 : vector<256x16xf32>
    %cst_19 = arith.constant dense<0.000000e+00> : vector<16xf32>
    %29 = vector.multi_reduction <add>, %28, %cst_19 [0] : vector<256x16xf32> to vector<16xf32>
    %30 = vector.shape_cast %29 : vector<16xf32> to vector<1x16xf32>
    %31 = vector.shape_cast %30 : vector<1x16xf32> to vector<1x1x16xf32>
    %c0_20 = arith.constant 0 : index
    %c0_21 = arith.constant 0 : index
    %c0_22 = arith.constant 0 : index
    %32 = vector.load %arg5[%c0_20, %c0_21, %c0_22] : memref<1x1x16xf32, #tpu.memory_space<vmem>>, vector<1x1x16xf32>
    tpu.vector_store %arg5[%c0_20, %c0_21, %c0_22], %31 {strides = array<i32>} : memref<1x1x16xf32, #tpu.memory_space<vmem>>, vector<1x1x16xf32>,
    %33 = arith.truncf %23 : vector<256x16xf32> to vector<256x16xbf16>
    %c0_23 = arith.constant 0 : index
    %c0_24 = arith.constant 0 : index
    %34 = vector.load %arg3[%c0_23, %c0_24] : memref<256x16xbf16, #tpu.memory_space<vmem>>, vector<256x16xbf16>
    tpu.vector_store %arg3[%c0_23, %c0_24], %33 {strides = array<i32>} : memref<256x16xbf16, #tpu.memory_space<vmem>>, vector<256x16xbf16>,
    return
  }
  func.func @transform_0(%arg0: i32) -> (i32, i32, i32, i32) {
    %c0_i32 = arith.constant 0 : i32
    %c0_i32_0 = arith.constant 0 : i32
    %c0_i32_1 = arith.constant 0 : i32
    %c0_i32_2 = arith.constant 0 : i32
    return %arg0, %c0_i32, %c0_i32_0, %c0_i32_1 : i32, i32, i32, i32
  }
  func.func @transform_1(%arg0: i32) -> (i32, i32, i32) {
    %c0_i32 = arith.constant 0 : i32
    %c0_i32_0 = arith.constant 0 : i32
    %c0_i32_1 = arith.constant 0 : i32
    %c0_i32_2 = arith.constant 0 : i32
    return %c0_i32, %c0_i32_0, %c0_i32_1 : i32, i32, i32
  }
  func.func @transform_2(%arg0: i32) -> (i32, i32) {
    %c0_i32 = arith.constant 0 : i32
    %c0_i32_0 = arith.constant 0 : i32
    return %arg0, %c0_i32 : i32, i32
  }
  func.func @transform_3(%arg0: i32) -> (i32, i32, i32) {
    %c0_i32 = arith.constant 0 : i32
    %c0_i32_0 = arith.constant 0 : i32
    %c0_i32_1 = arith.constant 0 : i32
    return %arg0, %c0_i32, %c0_i32_0 : i32, i32, i32
  }
  func.func @transform_4(%arg0: i32) -> (i32, i32, i32) {
    %c0_i32 = arith.constant 0 : i32
    %c0_i32_0 = arith.constant 0 : i32
    %c0_i32_1 = arith.constant 0 : i32
    return %arg0, %c0_i32, %c0_i32_0 : i32, i32, i32
  }
}

module attributes {stable_mosaic.version = 11 : i64} {
  func.func @_conv4x4_s2_kernel(%arg0: i32, %arg1: memref<2x9x9x64xbf16, #tpu.memory_space<vmem>>, %arg2: memref<1x9x9x64xf32, #tpu.memory_space<vmem>>, %arg3: memref<1x9x9x64xf32, #tpu.memory_space<vmem>>, %arg4: memref<4x64x32xbf16, #tpu.memory_space<vmem>>, %arg5: memref<128x32xbf16, #tpu.memory_space<vmem>>, %arg6: memref<1x1x32xf32, #tpu.memory_space<vmem>>, %arg7: memref<1x1x32xf32, #tpu.memory_space<vmem>>) attributes {dimension_semantics = [#tpu.dimension_semantics<parallel>], iteration_bounds = array<i64: 1>, scalar_prefetch = 0 : i64, scratch_operands = 0 : i64, tpu.core_type = #tpu.core_type<tc>, window_params = [{transform_indices = @transform_0, window_bounds = array<i64: 2, 9, 9, 64>}, {pipeline_mode = #tpu.pipeline_mode<synchronous>, transform_indices = @transform_1, window_bounds = array<i64: 1, 9, 9, 64>}, {pipeline_mode = #tpu.pipeline_mode<synchronous>, transform_indices = @transform_2, window_bounds = array<i64: 1, 9, 9, 64>}, {pipeline_mode = #tpu.pipeline_mode<synchronous>, transform_indices = @transform_3, window_bounds = array<i64: 4, 64, 32>}, {transform_indices = @transform_4, window_bounds = array<i64: 128, 32>}, {transform_indices = @transform_5, window_bounds = array<i64: 1, 1, 32>}, {transform_indices = @transform_6, window_bounds = array<i64: 1, 1, 32>}]} {
    %c0 = arith.constant 0 : index
    %c0_0 = arith.constant 0 : index
    %c0_1 = arith.constant 0 : index
    %c0_2 = arith.constant 0 : index
    %0 = vector.load %arg1[%c0, %c0_0, %c0_1, %c0_2] : memref<2x9x9x64xbf16, #tpu.memory_space<vmem>>, vector<2x9x9x64xbf16>
    %1 = arith.extf %0 : vector<2x9x9x64xbf16> to vector<2x9x9x64xf32>
    %c0_3 = arith.constant 0 : index
    %c0_4 = arith.constant 0 : index
    %c0_5 = arith.constant 0 : index
    %c0_6 = arith.constant 0 : index
    %2 = vector.load %arg2[%c0_3, %c0_4, %c0_5, %c0_6] : memref<1x9x9x64xf32, #tpu.memory_space<vmem>>, vector<1x9x9x64xf32>
    %3 = vector.broadcast %2 : vector<1x9x9x64xf32> to vector<2x9x9x64xf32>
    %4 = arith.mulf %1, %3 : vector<2x9x9x64xf32>
    %c0_7 = arith.constant 0 : index
    %c0_8 = arith.constant 0 : index
    %c0_9 = arith.constant 0 : index
    %c0_10 = arith.constant 0 : index
    %5 = vector.load %arg3[%c0_7, %c0_8, %c0_9, %c0_10] : memref<1x9x9x64xf32, #tpu.memory_space<vmem>>, vector<1x9x9x64xf32>
    %6 = vector.broadcast %5 : vector<1x9x9x64xf32> to vector<2x9x9x64xf32>
    %7 = arith.addf %4, %6 : vector<2x9x9x64xf32>
    %cst = arith.constant 2.000000e-01 : f32
    %8 = vector.broadcast %cst : f32 to vector<2x9x9x64xf32>
    %9 = arith.mulf %8, %7 : vector<2x9x9x64xf32>
    %10 = arith.maximumf %7, %9 : vector<2x9x9x64xf32>
    %11 = arith.truncf %10 : vector<2x9x9x64xf32> to vector<2x9x9x64xbf16>
    %12 = vector.extract_strided_slice %11 {offsets = [0, 0, 0, 0], sizes = [2, 8, 8, 64], strides = [1, 1, 1, 1]} : vector<2x9x9x64xbf16> to vector<2x8x8x64xbf16>
    %13 = vector.shape_cast %12 : vector<2x8x8x64xbf16> to vector<128x64xbf16>
    %c0_11 = arith.constant 0 : index
    %c0_12 = arith.constant 0 : index
    %c0_13 = arith.constant 0 : index
    %14 = vector.load %arg4[%c0_11, %c0_12, %c0_13] : memref<4x64x32xbf16, #tpu.memory_space<vmem>>, vector<1x64x32xbf16>
    %15 = vector.shape_cast %14 : vector<1x64x32xbf16> to vector<64x32xbf16>
    %cst_14 = arith.constant dense<0.000000e+00> : vector<128x32xf32>
    %16 = tpu.matmul %13, %15, %cst_14 {dimension_numbers = #tpu.dot_dimension_numbers<[1], [0], [0], [1], [0, 0, 1, 1], [], []>} : vector<128x64xbf16>, vector<64x32xbf16>, vector<128x32xf32> -> vector<128x32xf32>
    %17 = vector.extract_strided_slice %11 {offsets = [0, 0, 1, 0], sizes = [2, 8, 8, 64], strides = [1, 1, 1, 1]} : vector<2x9x9x64xbf16> to vector<2x8x8x64xbf16>
    %18 = vector.shape_cast %17 : vector<2x8x8x64xbf16> to vector<128x64xbf16>
    %c1 = arith.constant 1 : index
    %c0_15 = arith.constant 0 : index
    %c0_16 = arith.constant 0 : index
    %19 = vector.load %arg4[%c1, %c0_15, %c0_16] : memref<4x64x32xbf16, #tpu.memory_space<vmem>>, vector<1x64x32xbf16>
    %20 = vector.shape_cast %19 : vector<1x64x32xbf16> to vector<64x32xbf16>
    %cst_17 = arith.constant dense<0.000000e+00> : vector<128x32xf32>
    %21 = tpu.matmul %18, %20, %cst_17 {dimension_numbers = #tpu.dot_dimension_numbers<[1], [0], [0], [1], [0, 0, 1, 1], [], []>} : vector<128x64xbf16>, vector<64x32xbf16>, vector<128x32xf32> -> vector<128x32xf32>
    %22 = arith.addf %16, %21 : vector<128x32xf32>
    %23 = vector.extract_strided_slice %11 {offsets = [0, 1, 0, 0], sizes = [2, 8, 8, 64], strides = [1, 1, 1, 1]} : vector<2x9x9x64xbf16> to vector<2x8x8x64xbf16>
    %24 = vector.shape_cast %23 : vector<2x8x8x64xbf16> to vector<128x64xbf16>
    %c2 = arith.constant 2 : index
    %c0_18 = arith.constant 0 : index
    %c0_19 = arith.constant 0 : index
    %25 = vector.load %arg4[%c2, %c0_18, %c0_19] : memref<4x64x32xbf16, #tpu.memory_space<vmem>>, vector<1x64x32xbf16>
    %26 = vector.shape_cast %25 : vector<1x64x32xbf16> to vector<64x32xbf16>
    %cst_20 = arith.constant dense<0.000000e+00> : vector<128x32xf32>
    %27 = tpu.matmul %24, %26, %cst_20 {dimension_numbers = #tpu.dot_dimension_numbers<[1], [0], [0], [1], [0, 0, 1, 1], [], []>} : vector<128x64xbf16>, vector<64x32xbf16>, vector<128x32xf32> -> vector<128x32xf32>
    %28 = arith.addf %22, %27 : vector<128x32xf32>
    %29 = vector.extract_strided_slice %11 {offsets = [0, 1, 1, 0], sizes = [2, 8, 8, 64], strides = [1, 1, 1, 1]} : vector<2x9x9x64xbf16> to vector<2x8x8x64xbf16>
    %30 = vector.shape_cast %29 : vector<2x8x8x64xbf16> to vector<128x64xbf16>
    %c3 = arith.constant 3 : index
    %c0_21 = arith.constant 0 : index
    %c0_22 = arith.constant 0 : index
    %31 = vector.load %arg4[%c3, %c0_21, %c0_22] : memref<4x64x32xbf16, #tpu.memory_space<vmem>>, vector<1x64x32xbf16>
    %32 = vector.shape_cast %31 : vector<1x64x32xbf16> to vector<64x32xbf16>
    %cst_23 = arith.constant dense<0.000000e+00> : vector<128x32xf32>
    %33 = tpu.matmul %30, %32, %cst_23 {dimension_numbers = #tpu.dot_dimension_numbers<[1], [0], [0], [1], [0, 0, 1, 1], [], []>} : vector<128x64xbf16>, vector<64x32xbf16>, vector<128x32xf32> -> vector<128x32xf32>
    %34 = arith.addf %28, %33 : vector<128x32xf32>
    %cst_24 = arith.constant dense<0.000000e+00> : vector<32xf32>
    %35 = vector.multi_reduction <add>, %34, %cst_24 [0] : vector<128x32xf32> to vector<32xf32>
    %36 = vector.shape_cast %35 : vector<32xf32> to vector<1x32xf32>
    %37 = vector.shape_cast %36 : vector<1x32xf32> to vector<1x1x32xf32>
    %c0_25 = arith.constant 0 : index
    %c0_26 = arith.constant 0 : index
    %c0_27 = arith.constant 0 : index
    %38 = vector.load %arg6[%c0_25, %c0_26, %c0_27] : memref<1x1x32xf32, #tpu.memory_space<vmem>>, vector<1x1x32xf32>
    tpu.vector_store %arg6[%c0_25, %c0_26, %c0_27], %37 {strides = array<i32>} : memref<1x1x32xf32, #tpu.memory_space<vmem>>, vector<1x1x32xf32>,
    %39 = arith.mulf %34, %34 : vector<128x32xf32>
    %cst_28 = arith.constant dense<0.000000e+00> : vector<32xf32>
    %40 = vector.multi_reduction <add>, %39, %cst_28 [0] : vector<128x32xf32> to vector<32xf32>
    %41 = vector.shape_cast %40 : vector<32xf32> to vector<1x32xf32>
    %42 = vector.shape_cast %41 : vector<1x32xf32> to vector<1x1x32xf32>
    %c0_29 = arith.constant 0 : index
    %c0_30 = arith.constant 0 : index
    %c0_31 = arith.constant 0 : index
    %43 = vector.load %arg7[%c0_29, %c0_30, %c0_31] : memref<1x1x32xf32, #tpu.memory_space<vmem>>, vector<1x1x32xf32>
    tpu.vector_store %arg7[%c0_29, %c0_30, %c0_31], %42 {strides = array<i32>} : memref<1x1x32xf32, #tpu.memory_space<vmem>>, vector<1x1x32xf32>,
    %44 = arith.truncf %34 : vector<128x32xf32> to vector<128x32xbf16>
    %c0_32 = arith.constant 0 : index
    %c0_33 = arith.constant 0 : index
    %45 = vector.load %arg5[%c0_32, %c0_33] : memref<128x32xbf16, #tpu.memory_space<vmem>>, vector<128x32xbf16>
    tpu.vector_store %arg5[%c0_32, %c0_33], %44 {strides = array<i32>} : memref<128x32xbf16, #tpu.memory_space<vmem>>, vector<128x32xbf16>,
    return
  }
  func.func @transform_0(%arg0: i32) -> (i32, i32, i32, i32) {
    %c0_i32 = arith.constant 0 : i32
    %c0_i32_0 = arith.constant 0 : i32
    %c0_i32_1 = arith.constant 0 : i32
    %c0_i32_2 = arith.constant 0 : i32
    return %arg0, %c0_i32, %c0_i32_0, %c0_i32_1 : i32, i32, i32, i32
  }
  func.func @transform_1(%arg0: i32) -> (i32, i32, i32, i32) {
    %c0_i32 = arith.constant 0 : i32
    %c0_i32_0 = arith.constant 0 : i32
    %c0_i32_1 = arith.constant 0 : i32
    %c0_i32_2 = arith.constant 0 : i32
    %c0_i32_3 = arith.constant 0 : i32
    return %c0_i32, %c0_i32_0, %c0_i32_1, %c0_i32_2 : i32, i32, i32, i32
  }
  func.func @transform_2(%arg0: i32) -> (i32, i32, i32, i32) {
    %c0_i32 = arith.constant 0 : i32
    %c0_i32_0 = arith.constant 0 : i32
    %c0_i32_1 = arith.constant 0 : i32
    %c0_i32_2 = arith.constant 0 : i32
    %c0_i32_3 = arith.constant 0 : i32
    return %c0_i32, %c0_i32_0, %c0_i32_1, %c0_i32_2 : i32, i32, i32, i32
  }
  func.func @transform_3(%arg0: i32) -> (i32, i32, i32) {
    %c0_i32 = arith.constant 0 : i32
    %c0_i32_0 = arith.constant 0 : i32
    %c0_i32_1 = arith.constant 0 : i32
    %c0_i32_2 = arith.constant 0 : i32
    return %c0_i32, %c0_i32_0, %c0_i32_1 : i32, i32, i32
  }
  func.func @transform_4(%arg0: i32) -> (i32, i32) {
    %c0_i32 = arith.constant 0 : i32
    %c0_i32_0 = arith.constant 0 : i32
    return %arg0, %c0_i32 : i32, i32
  }
  func.func @transform_5(%arg0: i32) -> (i32, i32, i32) {
    %c0_i32 = arith.constant 0 : i32
    %c0_i32_0 = arith.constant 0 : i32
    %c0_i32_1 = arith.constant 0 : i32
    return %arg0, %c0_i32, %c0_i32_0 : i32, i32, i32
  }
  func.func @transform_6(%arg0: i32) -> (i32, i32, i32) {
    %c0_i32 = arith.constant 0 : i32
    %c0_i32_0 = arith.constant 0 : i32
    %c0_i32_1 = arith.constant 0 : i32
    return %arg0, %c0_i32, %c0_i32_0 : i32, i32, i32
  }
}

module attributes {stable_mosaic.version = 11 : i64} {
  func.func @_conv4x4_s2_kernel(%arg0: i32, %arg1: memref<2x5x5x128xbf16, #tpu.memory_space<vmem>>, %arg2: memref<1x5x5x128xf32, #tpu.memory_space<vmem>>, %arg3: memref<1x5x5x128xf32, #tpu.memory_space<vmem>>, %arg4: memref<4x128x64xbf16, #tpu.memory_space<vmem>>, %arg5: memref<32x64xbf16, #tpu.memory_space<vmem>>, %arg6: memref<1x1x64xf32, #tpu.memory_space<vmem>>, %arg7: memref<1x1x64xf32, #tpu.memory_space<vmem>>) attributes {dimension_semantics = [#tpu.dimension_semantics<parallel>], iteration_bounds = array<i64: 1>, scalar_prefetch = 0 : i64, scratch_operands = 0 : i64, tpu.core_type = #tpu.core_type<tc>, window_params = [{transform_indices = @transform_0, window_bounds = array<i64: 2, 5, 5, 128>}, {pipeline_mode = #tpu.pipeline_mode<synchronous>, transform_indices = @transform_1, window_bounds = array<i64: 1, 5, 5, 128>}, {pipeline_mode = #tpu.pipeline_mode<synchronous>, transform_indices = @transform_2, window_bounds = array<i64: 1, 5, 5, 128>}, {pipeline_mode = #tpu.pipeline_mode<synchronous>, transform_indices = @transform_3, window_bounds = array<i64: 4, 128, 64>}, {transform_indices = @transform_4, window_bounds = array<i64: 32, 64>}, {transform_indices = @transform_5, window_bounds = array<i64: 1, 1, 64>}, {transform_indices = @transform_6, window_bounds = array<i64: 1, 1, 64>}]} {
    %c0 = arith.constant 0 : index
    %c0_0 = arith.constant 0 : index
    %c0_1 = arith.constant 0 : index
    %c0_2 = arith.constant 0 : index
    %0 = vector.load %arg1[%c0, %c0_0, %c0_1, %c0_2] : memref<2x5x5x128xbf16, #tpu.memory_space<vmem>>, vector<2x5x5x128xbf16>
    %1 = arith.extf %0 : vector<2x5x5x128xbf16> to vector<2x5x5x128xf32>
    %c0_3 = arith.constant 0 : index
    %c0_4 = arith.constant 0 : index
    %c0_5 = arith.constant 0 : index
    %c0_6 = arith.constant 0 : index
    %2 = vector.load %arg2[%c0_3, %c0_4, %c0_5, %c0_6] : memref<1x5x5x128xf32, #tpu.memory_space<vmem>>, vector<1x5x5x128xf32>
    %3 = vector.broadcast %2 : vector<1x5x5x128xf32> to vector<2x5x5x128xf32>
    %4 = arith.mulf %1, %3 : vector<2x5x5x128xf32>
    %c0_7 = arith.constant 0 : index
    %c0_8 = arith.constant 0 : index
    %c0_9 = arith.constant 0 : index
    %c0_10 = arith.constant 0 : index
    %5 = vector.load %arg3[%c0_7, %c0_8, %c0_9, %c0_10] : memref<1x5x5x128xf32, #tpu.memory_space<vmem>>, vector<1x5x5x128xf32>
    %6 = vector.broadcast %5 : vector<1x5x5x128xf32> to vector<2x5x5x128xf32>
    %7 = arith.addf %4, %6 : vector<2x5x5x128xf32>
    %cst = arith.constant 2.000000e-01 : f32
    %8 = vector.broadcast %cst : f32 to vector<2x5x5x128xf32>
    %9 = arith.mulf %8, %7 : vector<2x5x5x128xf32>
    %10 = arith.maximumf %7, %9 : vector<2x5x5x128xf32>
    %11 = arith.truncf %10 : vector<2x5x5x128xf32> to vector<2x5x5x128xbf16>
    %12 = vector.extract_strided_slice %11 {offsets = [0, 0, 0, 0], sizes = [2, 4, 4, 128], strides = [1, 1, 1, 1]} : vector<2x5x5x128xbf16> to vector<2x4x4x128xbf16>
    %13 = vector.shape_cast %12 : vector<2x4x4x128xbf16> to vector<32x128xbf16>
    %c0_11 = arith.constant 0 : index
    %c0_12 = arith.constant 0 : index
    %c0_13 = arith.constant 0 : index
    %14 = vector.load %arg4[%c0_11, %c0_12, %c0_13] : memref<4x128x64xbf16, #tpu.memory_space<vmem>>, vector<1x128x64xbf16>
    %15 = vector.shape_cast %14 : vector<1x128x64xbf16> to vector<128x64xbf16>
    %cst_14 = arith.constant dense<0.000000e+00> : vector<32x64xf32>
    %16 = tpu.matmul %13, %15, %cst_14 {dimension_numbers = #tpu.dot_dimension_numbers<[1], [0], [0], [1], [0, 0, 1, 1], [], []>} : vector<32x128xbf16>, vector<128x64xbf16>, vector<32x64xf32> -> vector<32x64xf32>
    %17 = vector.extract_strided_slice %11 {offsets = [0, 0, 1, 0], sizes = [2, 4, 4, 128], strides = [1, 1, 1, 1]} : vector<2x5x5x128xbf16> to vector<2x4x4x128xbf16>
    %18 = vector.shape_cast %17 : vector<2x4x4x128xbf16> to vector<32x128xbf16>
    %c1 = arith.constant 1 : index
    %c0_15 = arith.constant 0 : index
    %c0_16 = arith.constant 0 : index
    %19 = vector.load %arg4[%c1, %c0_15, %c0_16] : memref<4x128x64xbf16, #tpu.memory_space<vmem>>, vector<1x128x64xbf16>
    %20 = vector.shape_cast %19 : vector<1x128x64xbf16> to vector<128x64xbf16>
    %cst_17 = arith.constant dense<0.000000e+00> : vector<32x64xf32>
    %21 = tpu.matmul %18, %20, %cst_17 {dimension_numbers = #tpu.dot_dimension_numbers<[1], [0], [0], [1], [0, 0, 1, 1], [], []>} : vector<32x128xbf16>, vector<128x64xbf16>, vector<32x64xf32> -> vector<32x64xf32>
    %22 = arith.addf %16, %21 : vector<32x64xf32>
    %23 = vector.extract_strided_slice %11 {offsets = [0, 1, 0, 0], sizes = [2, 4, 4, 128], strides = [1, 1, 1, 1]} : vector<2x5x5x128xbf16> to vector<2x4x4x128xbf16>
    %24 = vector.shape_cast %23 : vector<2x4x4x128xbf16> to vector<32x128xbf16>
    %c2 = arith.constant 2 : index
    %c0_18 = arith.constant 0 : index
    %c0_19 = arith.constant 0 : index
    %25 = vector.load %arg4[%c2, %c0_18, %c0_19] : memref<4x128x64xbf16, #tpu.memory_space<vmem>>, vector<1x128x64xbf16>
    %26 = vector.shape_cast %25 : vector<1x128x64xbf16> to vector<128x64xbf16>
    %cst_20 = arith.constant dense<0.000000e+00> : vector<32x64xf32>
    %27 = tpu.matmul %24, %26, %cst_20 {dimension_numbers = #tpu.dot_dimension_numbers<[1], [0], [0], [1], [0, 0, 1, 1], [], []>} : vector<32x128xbf16>, vector<128x64xbf16>, vector<32x64xf32> -> vector<32x64xf32>
    %28 = arith.addf %22, %27 : vector<32x64xf32>
    %29 = vector.extract_strided_slice %11 {offsets = [0, 1, 1, 0], sizes = [2, 4, 4, 128], strides = [1, 1, 1, 1]} : vector<2x5x5x128xbf16> to vector<2x4x4x128xbf16>
    %30 = vector.shape_cast %29 : vector<2x4x4x128xbf16> to vector<32x128xbf16>
    %c3 = arith.constant 3 : index
    %c0_21 = arith.constant 0 : index
    %c0_22 = arith.constant 0 : index
    %31 = vector.load %arg4[%c3, %c0_21, %c0_22] : memref<4x128x64xbf16, #tpu.memory_space<vmem>>, vector<1x128x64xbf16>
    %32 = vector.shape_cast %31 : vector<1x128x64xbf16> to vector<128x64xbf16>
    %cst_23 = arith.constant dense<0.000000e+00> : vector<32x64xf32>
    %33 = tpu.matmul %30, %32, %cst_23 {dimension_numbers = #tpu.dot_dimension_numbers<[1], [0], [0], [1], [0, 0, 1, 1], [], []>} : vector<32x128xbf16>, vector<128x64xbf16>, vector<32x64xf32> -> vector<32x64xf32>
    %34 = arith.addf %28, %33 : vector<32x64xf32>
    %cst_24 = arith.constant dense<0.000000e+00> : vector<64xf32>
    %35 = vector.multi_reduction <add>, %34, %cst_24 [0] : vector<32x64xf32> to vector<64xf32>
    %36 = vector.shape_cast %35 : vector<64xf32> to vector<1x64xf32>
    %37 = vector.shape_cast %36 : vector<1x64xf32> to vector<1x1x64xf32>
    %c0_25 = arith.constant 0 : index
    %c0_26 = arith.constant 0 : index
    %c0_27 = arith.constant 0 : index
    %38 = vector.load %arg6[%c0_25, %c0_26, %c0_27] : memref<1x1x64xf32, #tpu.memory_space<vmem>>, vector<1x1x64xf32>
    tpu.vector_store %arg6[%c0_25, %c0_26, %c0_27], %37 {strides = array<i32>} : memref<1x1x64xf32, #tpu.memory_space<vmem>>, vector<1x1x64xf32>,
    %39 = arith.mulf %34, %34 : vector<32x64xf32>
    %cst_28 = arith.constant dense<0.000000e+00> : vector<64xf32>
    %40 = vector.multi_reduction <add>, %39, %cst_28 [0] : vector<32x64xf32> to vector<64xf32>
    %41 = vector.shape_cast %40 : vector<64xf32> to vector<1x64xf32>
    %42 = vector.shape_cast %41 : vector<1x64xf32> to vector<1x1x64xf32>
    %c0_29 = arith.constant 0 : index
    %c0_30 = arith.constant 0 : index
    %c0_31 = arith.constant 0 : index
    %43 = vector.load %arg7[%c0_29, %c0_30, %c0_31] : memref<1x1x64xf32, #tpu.memory_space<vmem>>, vector<1x1x64xf32>
    tpu.vector_store %arg7[%c0_29, %c0_30, %c0_31], %42 {strides = array<i32>} : memref<1x1x64xf32, #tpu.memory_space<vmem>>, vector<1x1x64xf32>,
    %44 = arith.truncf %34 : vector<32x64xf32> to vector<32x64xbf16>
    %c0_32 = arith.constant 0 : index
    %c0_33 = arith.constant 0 : index
    %45 = vector.load %arg5[%c0_32, %c0_33] : memref<32x64xbf16, #tpu.memory_space<vmem>>, vector<32x64xbf16>
    tpu.vector_store %arg5[%c0_32, %c0_33], %44 {strides = array<i32>} : memref<32x64xbf16, #tpu.memory_space<vmem>>, vector<32x64xbf16>,
    return
  }
  func.func @transform_0(%arg0: i32) -> (i32, i32, i32, i32) {
    %c0_i32 = arith.constant 0 : i32
    %c0_i32_0 = arith.constant 0 : i32
    %c0_i32_1 = arith.constant 0 : i32
    %c0_i32_2 = arith.constant 0 : i32
    return %arg0, %c0_i32, %c0_i32_0, %c0_i32_1 : i32, i32, i32, i32
  }
  func.func @transform_1(%arg0: i32) -> (i32, i32, i32, i32) {
    %c0_i32 = arith.constant 0 : i32
    %c0_i32_0 = arith.constant 0 : i32
    %c0_i32_1 = arith.constant 0 : i32
    %c0_i32_2 = arith.constant 0 : i32
    %c0_i32_3 = arith.constant 0 : i32
    return %c0_i32, %c0_i32_0, %c0_i32_1, %c0_i32_2 : i32, i32, i32, i32
  }
  func.func @transform_2(%arg0: i32) -> (i32, i32, i32, i32) {
    %c0_i32 = arith.constant 0 : i32
    %c0_i32_0 = arith.constant 0 : i32
    %c0_i32_1 = arith.constant 0 : i32
    %c0_i32_2 = arith.constant 0 : i32
    %c0_i32_3 = arith.constant 0 : i32
    return %c0_i32, %c0_i32_0, %c0_i32_1, %c0_i32_2 : i32, i32, i32, i32
  }
  func.func @transform_3(%arg0: i32) -> (i32, i32, i32) {
    %c0_i32 = arith.constant 0 : i32
    %c0_i32_0 = arith.constant 0 : i32
    %c0_i32_1 = arith.constant 0 : i32
    %c0_i32_2 = arith.constant 0 : i32
    return %c0_i32, %c0_i32_0, %c0_i32_1 : i32, i32, i32
  }
  func.func @transform_4(%arg0: i32) -> (i32, i32) {
    %c0_i32 = arith.constant 0 : i32
    %c0_i32_0 = arith.constant 0 : i32
    return %arg0, %c0_i32 : i32, i32
  }
  func.func @transform_5(%arg0: i32) -> (i32, i32, i32) {
    %c0_i32 = arith.constant 0 : i32
    %c0_i32_0 = arith.constant 0 : i32
    %c0_i32_1 = arith.constant 0 : i32
    return %arg0, %c0_i32, %c0_i32_0 : i32, i32, i32
  }
  func.func @transform_6(%arg0: i32) -> (i32, i32, i32) {
    %c0_i32 = arith.constant 0 : i32
    %c0_i32_0 = arith.constant 0 : i32
    %c0_i32_1 = arith.constant 0 : i32
    return %arg0, %c0_i32, %c0_i32_0 : i32, i32, i32
  }
}

module attributes {stable_mosaic.version = 11 : i64} {
  func.func @_final_conv_kernel(%arg0: i32, %arg1: memref<2x1024xbf16, #tpu.memory_space<vmem>>, %arg2: memref<1x1024xf32, #tpu.memory_space<vmem>>, %arg3: memref<1x1024xf32, #tpu.memory_space<vmem>>, %arg4: memref<1024x128xbf16, #tpu.memory_space<vmem>>, %arg5: memref<2x128xf32, #tpu.memory_space<vmem>>) attributes {dimension_semantics = [#tpu.dimension_semantics<arbitrary>], iteration_bounds = array<i64: 1>, scalar_prefetch = 0 : i64, scratch_operands = 0 : i64, tpu.core_type = #tpu.core_type<tc>, window_params = [{pipeline_mode = #tpu.pipeline_mode<synchronous>, transform_indices = @transform_0, window_bounds = array<i64: 2, 1024>}, {pipeline_mode = #tpu.pipeline_mode<synchronous>, transform_indices = @transform_1, window_bounds = array<i64: 1, 1024>}, {pipeline_mode = #tpu.pipeline_mode<synchronous>, transform_indices = @transform_2, window_bounds = array<i64: 1, 1024>}, {pipeline_mode = #tpu.pipeline_mode<synchronous>, transform_indices = @transform_3, window_bounds = array<i64: 1024, 128>}, {pipeline_mode = #tpu.pipeline_mode<synchronous>, transform_indices = @transform_4, window_bounds = array<i64: 2, 128>}]} {
    %c0 = arith.constant 0 : index
    %c0_0 = arith.constant 0 : index
    %0 = vector.load %arg1[%c0, %c0_0] : memref<2x1024xbf16, #tpu.memory_space<vmem>>, vector<2x1024xbf16>
    %1 = arith.extf %0 : vector<2x1024xbf16> to vector<2x1024xf32>
    %c0_1 = arith.constant 0 : index
    %c0_2 = arith.constant 0 : index
    %2 = vector.load %arg2[%c0_1, %c0_2] : memref<1x1024xf32, #tpu.memory_space<vmem>>, vector<1x1024xf32>
    %3 = vector.broadcast %2 : vector<1x1024xf32> to vector<2x1024xf32>
    %4 = arith.mulf %1, %3 : vector<2x1024xf32>
    %c0_3 = arith.constant 0 : index
    %c0_4 = arith.constant 0 : index
    %5 = vector.load %arg3[%c0_3, %c0_4] : memref<1x1024xf32, #tpu.memory_space<vmem>>, vector<1x1024xf32>
    %6 = vector.broadcast %5 : vector<1x1024xf32> to vector<2x1024xf32>
    %7 = arith.addf %4, %6 : vector<2x1024xf32>
    %cst = arith.constant 2.000000e-01 : f32
    %8 = vector.broadcast %cst : f32 to vector<2x1024xf32>
    %9 = arith.mulf %8, %7 : vector<2x1024xf32>
    %10 = arith.maximumf %7, %9 : vector<2x1024xf32>
    %11 = arith.truncf %10 : vector<2x1024xf32> to vector<2x1024xbf16>
    %c0_5 = arith.constant 0 : index
    %c0_6 = arith.constant 0 : index
    %12 = vector.load %arg4[%c0_5, %c0_6] : memref<1024x128xbf16, #tpu.memory_space<vmem>>, vector<1024x128xbf16>
    %cst_7 = arith.constant dense<0.000000e+00> : vector<2x128xf32>
    %13 = tpu.matmul %11, %12, %cst_7 {dimension_numbers = #tpu.dot_dimension_numbers<[1], [0], [0], [1], [0, 0, 1, 1], [], []>} : vector<2x1024xbf16>, vector<1024x128xbf16>, vector<2x128xf32> -> vector<2x128xf32>
    %cst_8 = arith.constant 0.000000e+00 : f32
    %14 = vector.broadcast %cst_8 : f32 to vector<2x128xf32>
    %15 = arith.subf %14, %13 : vector<2x128xf32>
    %16 = math.exp %15 : vector<2x128xf32>
    %cst_9 = arith.constant 1.000000e+00 : f32
    %17 = vector.broadcast %cst_9 : f32 to vector<2x128xf32>
    %18 = arith.addf %17, %16 : vector<2x128xf32>
    %cst_10 = arith.constant 1.000000e+00 : f32
    %19 = vector.broadcast %cst_10 : f32 to vector<2x128xf32>
    %20 = arith.divf %19, %18 : vector<2x128xf32>
    %c0_11 = arith.constant 0 : index
    %c0_12 = arith.constant 0 : index
    %21 = vector.load %arg5[%c0_11, %c0_12] : memref<2x128xf32, #tpu.memory_space<vmem>>, vector<2x128xf32>
    tpu.vector_store %arg5[%c0_11, %c0_12], %20 {strides = array<i32>} : memref<2x128xf32, #tpu.memory_space<vmem>>, vector<2x128xf32>,
    return
  }
  func.func @transform_0(%arg0: i32) -> (i32, i32) {
    %c0_i32 = arith.constant 0 : i32
    %c0_i32_0 = arith.constant 0 : i32
    %c0_i32_1 = arith.constant 0 : i32
    return %c0_i32, %c0_i32_0 : i32, i32
  }
  func.func @transform_1(%arg0: i32) -> (i32, i32) {
    %c0_i32 = arith.constant 0 : i32
    %c0_i32_0 = arith.constant 0 : i32
    %c0_i32_1 = arith.constant 0 : i32
    return %c0_i32, %c0_i32_0 : i32, i32
  }
  func.func @transform_2(%arg0: i32) -> (i32, i32) {
    %c0_i32 = arith.constant 0 : i32
    %c0_i32_0 = arith.constant 0 : i32
    %c0_i32_1 = arith.constant 0 : i32
    return %c0_i32, %c0_i32_0 : i32, i32
  }
  func.func @transform_3(%arg0: i32) -> (i32, i32) {
    %c0_i32 = arith.constant 0 : i32
    %c0_i32_0 = arith.constant 0 : i32
    %c0_i32_1 = arith.constant 0 : i32
    return %c0_i32, %c0_i32_0 : i32, i32
  }
  func.func @transform_4(%arg0: i32) -> (i32, i32) {
    %c0_i32 = arith.constant 0 : i32
    %c0_i32_0 = arith.constant 0 : i32
    %c0_i32_1 = arith.constant 0 : i32
    return %c0_i32, %c0_i32_0 : i32, i32
  }
}

</mosaic_0001>

<bundles_post_ra>
// kernel: discriminator_forward.5
= control target key start
LH: loop header
LB: loop body
LE: loop exit
PB: predicated region body
PF: predicated region fallthrough
CT: control target
= control target key end

     0   :  { %s7672_s9 = smov 0   ;;  %s9733_s0 = inlined_call_operand.vmem [shape: bf16[2,33,33,12], index: 0, kind: input, shape index: {}]   ;;  %s9734_s1 = inlined_call_operand.vmem [shape: bf16[4,12,8], index: 1, kind: input, shape index: {}]   ;;  %s9735_s2 = inlined_call_operand.vmem [shape: bf16[2048,8], index: 2, kind: output, shape index: {}]  }
   0x1 LB: > { %s7678_s10 = sadd.s32 4294967295, %s7655_s9   ;;  %p6128_p0 = scmp.ge.s32.totalorder %s7655_s9, 1  ;;  %s7655_s9 = sphi %s7672_s9, %s12_s9  }
   0x2   : > { %p112_p1 = scmp.lt.s32.totalorder %s7655_s9, 3 }
   0x4   : > { %p113_p2 = pnand %p6128_p0, %p112_p1 }
   0x6   : > { %116 = sbr.rel (%p113_p2) target bundleno = 771 (0x303), region = 28 }
   0xb   : > { %vm2117_vm0 = vcmask 1045504   ;;  %p134_p3 = scmp.lt.s32.totalorder %s7678_s10, 1  ;;  %v7581_v0 = vld [vmem:[%s9734_s1] sm:$0x3f]   ;;  %v7582_v1 = vld [vmem:[%s9734_s1 + $0x8] sm:$0x3f]  }
   0xc   : > { %7569 = vmatprep.subr.msk.bf16.mxu1 %vm2117_vm0, %v7581_v0  ;;  %v3184_v2 = vsel %vm2117_vm0, %v7581_v0, 0  ;;  %7568 = vmatprep.subr.msk.bf16.mxu0 %vm2117_vm0, %v7582_v1  ;;  %v2119_v3 = vsel %vm2117_vm0, %v7582_v1, 0  ;;  %v7585_v4 = vld [vmem:[%s9734_s1 + $0x10] sm:$0x3f]   ;;  %v7586_v5 = vld [vmem:[%s9734_s1 + $0x18] sm:$0x3f]  }
   0xd   : > { %s135_s15 = scalar_select %p134_p3, %s7678_s10, 1  ;;  %7179 = vmatpush3.bf16.msra.mxu1 %v3184_v2  ;;  %7049 = vmatpush3.bf16.msra.mxu0 %v2119_v3  ;;  %vm1924_vm1 = vcmask 97280   ;;  %vm313_vm2 = vsmask.f32 3328  ;;  %vm314_vm3 = vsmask.f32 7440 }
   0xe   : > { %7570 = vmatprep.subr.msk.bf16.mxu0 %vm2117_vm0, %v7585_v4  ;;  %v7707_v6 = vsel %vm2117_vm0, %v7585_v4, 0  ;;  %7571 = vmatprep.subr.msk.bf16.mxu1 %vm2117_vm0, %v7586_v5  ;;  %v4496_v32 = vsel %vm2117_vm0, %v7586_v5, 0  ;;  %vm7722_vm4 = vmor %vm313_vm2, %vm314_vm3  ;;  %s6130_s24 = sshll.u32 %s7678_s10, 7  ;;  %vm5939_vm5 = vcmask 60416  }
   0xf   : > { %s7572_s16 = smul.u32 660, %s135_s15  ;;  %p140_p4 = scmp.lt.s32.totalorder %s6130_s24, 255 }
  0x11   : > { %s7703_s23 = scalar_lea.vmem %s9733_s0, %s7572_s16  ;;  %s10242_s24 = smov (!%p140_p4, %s6130_s24), 255 }
  0x12   : > { %v146_v7 = vld [vmem:[%s7703_s23] sm:$0xf]  ;;  %v147_v8 = vld [vmem:[%s7703_s23 + $0x4] sm:$0xf]  ;;  %v148_v9 = vld [vmem:[%s7703_s23 + $0x8] sm:$0xf] }
  0x13   : > { %v317_v10 = vshrl.u32 %v146_v7, 16  ;;  %v320_v11 = vshll.u32 %v146_v7, 16  ;;  %v326_v12 = vshll.u32 %v147_v8, 16  ;;  %v330_v13 = vshrl.u32 %v147_v8, 16  ;;  %v149_v14 = vld [vmem:[%s7703_s23 + $0xc] sm:$0xf] }
  0x14   : > { %v6263_v15 = vcombine.low %v146_v7, %v147_v8  ;;  %v346_v16 = vshll.u32 %v149_v14, 16  ;;  %v350_v17 = vshrl.u32 %v149_v14, 16  ;;  %v6264_v18 = vcombine.low %v148_v9, %v149_v14  ;;  %v150_v19 = vld [vmem:[%s7703_s23 + $0x10] sm:$0x1]  ;;  %v151_v24 = vld [vmem:[%s7703_s23 + $0x14] sm:$0xf] }
  0x15   : > { %v319_v20 = vrot.slane %v317_v10, 4  ;;  %v322_v21 = vrot.slane %v320_v11, 5  ;;  %v328_v22 = vrot.slane %v326_v12, 5  ;;  %v332_v23 = vrot.slane %v330_v13, 4  ;;  %v152_v33 = vld [vmem:[%s7703_s23 + $0x18] sm:$0xf] }
  0x16   : > { %7180 = vmatprep.mubr.msk.bf16.mxu1 %vm1924_vm1, %v6263_v15  ;;  %v348_v25 = vrot.slane %v346_v16, 5  ;;  %v352_v26 = vrot.slane %v350_v17, 4  ;;  %v336_v27 = vshll.u32 %v148_v9, 16  ;;  %v340_v28 = vshrl.u32 %v148_v9, 16  ;;  %v153_v47 = vld [vmem:[%s7703_s23 + $0x1c] sm:$0xf] }
  0x17   : > { %7181 = vmatmul.mubr.msk.bf16.vlgmr.msra.gmra.mxu1 %vm1924_vm1, %v6264_v18  ;;  %v323_v29 = vor.u32 %v322_v21, %v319_v20  ;;  %v333_v30 = vor.u32 %v332_v23, %v328_v22  ;;  %v356_v31 = vshll.u32 %v150_v19, 16  ;;  %v361_v38 = vshrl.u32 %v151_v24, 16  ;;  %v154_v52 = vld [vmem:[%s7703_s23 + $0x20] sm:$0xf]  ;;  %v155_v61 = vld [vmem:[%s7703_s23 + $0x24] sm:$0x1] }
  0x18   : > { %v338_v35 = vrot.slane %v336_v27, 5  ;;  %v342_v36 = vrot.slane %v340_v28, 4  ;;  %v353_v37 = vor.u32 %v352_v26, %v348_v25  ;;  %7439 = vmatpush3.bf16.msra.mxu1 %v4496_v32  ;;  %v364_v42 = vshll.u32 %v151_v24, 16  ;;  %v156_v2 = vld [vmem:[%s7703_s23 + $0x28] sm:$0xf]  ;;  %s6131_s25 = sshll.u32 %s10242_s24, 2 }
  0x19   : > { %v324_v39 = vrot.slane %v323_v29, 4  ;;  %v334_v40 = vrot.slane %v333_v30, 4  ;;  %v358_v41 = vrot.slane %v356_v31, 5  ;;  %v363_v45 = vrot.slane %v361_v38, 4  ;;  %v157_v8 = vld [vmem:[%s7703_s23 + $0x2c] sm:$0xf]  ;;  %s9212_s28 = scalar_lea.vmem %s9735_s2, %s6131_s25 }
  0x1a   : > { %v343_v43 = vor.u32 %v342_v36, %v338_v35  ;;  %v354_v44 = vrot.slane %v353_v37, 4  ;;  %v370_v46 = vshll.u32 %v152_v33, 16  ;;  %v366_v50 = vrot.slane %v364_v42, 5  ;;  %v158_v21 = vld [vmem:[%s7703_s23 + $0x30] sm:$0xf] }
  0x1b   : > { %v329_v48 = vsel %vm7722_vm4, %v324_v39, %v328_v22  ;;  %v339_v49 = vsel %vm7722_vm4, %v334_v40, %v338_v35  ;;  %v374_v51 = vshrl.u32 %v152_v33, 16  ;;  %v7734_v58 = vcombine.low %v151_v24, %v152_v33  ;;  %v159_v26 = vld [vmem:[%s7703_s23 + $0x34] sm:$0xf]  ;;  %v160_v35 = vld [vmem:[%s7703_s23 + $0x38] sm:$0x1] }
  0x1c   : > { %v344_v53 = vrot.slane %v343_v43, 4  ;;  %v6134_v54 = vcombine.low %v329_v48, %v339_v49  ;;  %v359_v55 = vsel %vm7722_vm4, %v354_v44, %v358_v41  ;;  %v372_v56 = vrot.slane %v370_v46, 5  ;;  %v161_v40 = vld [vmem:[%s7703_s23 + $0x3c] sm:$0xf] }
  0x1d   : > { %v376_v57 = vrot.slane %v374_v51, 4  ;;  %v380_v59 = vshll.u32 %v153_v47, 16  ;;  %v384_v60 = vshrl.u32 %v153_v47, 16  ;;  %v390_v63 = vshll.u32 %v154_v52, 16  ;;  %7184 = vmatprep.mubr.msk.bf16.mxu1 %vm1924_vm1, %v7734_v58 }
  0x1e   : > { %7050 = vmatprep.mubr.msk.bf16.mxu0 %vm1924_vm1, %v6134_v54  ;;  %v349_v62 = vsel %vm7722_vm4, %v344_v53, %v348_v25  ;;  %v394_v0 = vshrl.u32 %v154_v52, 16  ;;  %v7740_v1 = vcombine.low %v153_v47, %v154_v52  ;;  %v367_v7 = vor.u32 %v366_v50, %v363_v45  ;;  %v162_v45 = vld [vmem:[%s7703_s23 + $0x40] sm:$0xf] }
  0x1f   : > { %v6135_v3 = vcombine.low %v349_v62, %v359_v55  ;;  %v382_v4 = vrot.slane %v380_v59, 5  ;;  %v386_v5 = vrot.slane %v384_v60, 4  ;;  %v392_v9 = vrot.slane %v390_v63, 5  ;;  %v163_v59 = vld [vmem:[%s7703_s23 + $0x44] sm:$0xf] }
  0x20   : > { %v396_v10 = vrot.slane %v394_v0, 4  ;;  %7185 = vmatmul.mubr.msk.bf16.gmra.mxu1 %vm1924_vm1, %v7740_v1  ;;  %v377_v11 = vor.u32 %v376_v57, %v372_v56  ;;  %v400_v12 = vshll.u32 %v155_v61, 16  ;;  %v368_v13 = vrot.slane %v367_v7, 4  ;;  %v164_v0 = vld [vmem:[%s7703_s23 + $0x48] sm:$0xf] }
  0x21   : > { %7051 = vmatmul.mubr.msk.bf16.vlgmr.msra.gmra.mxu0 %vm1924_vm1, %v6135_v3  ;;  %v387_v14 = vor.u32 %v386_v5, %v382_v4  ;;  %v405_v15 = vshrl.u32 %v156_v2, 16  ;;  %v408_v16 = vshll.u32 %v156_v2, 16  ;;  %v414_v20 = vshll.u32 %v157_v8, 16 }
  0x22   : > { %7309 = vmatpush3.bf16.msra.mxu0 %v7707_v6  ;;  %v378_v17 = vrot.slane %v377_v11, 4  ;;  %v397_v18 = vor.u32 %v396_v10, %v392_v9  ;;  %v402_v19 = vrot.slane %v400_v12, 5  ;;  %v373_v22 = vsel %vm7722_vm4, %v368_v13, %v372_v56 }
  0x23   : > { %v388_v23 = vrot.slane %v387_v14, 4  ;;  %v407_v24 = vrot.slane %v405_v15, 4  ;;  %v410_v25 = vrot.slane %v408_v16, 5  ;;  %v416_v29 = vrot.slane %v414_v20, 5  ;;  %v165_v15 = vld [vmem:[%s7703_s23 + $0x4c] sm:$0x1] }
  0x24   : > { %v383_v27 = vsel %vm7722_vm4, %v378_v17, %v382_v4  ;;  %v398_v28 = vrot.slane %v397_v18, 4  ;;  %v418_v6 = vshrl.u32 %v157_v8, 16  ;;  %v7760_v32 = vcombine.low %v156_v2, %v157_v8  ;;  %v166_v20 = vld [vmem:[%s7703_s23 + $0x50] sm:$0xf] }
  0x25   : > { %v7756_v30 = vcombine.low %v373_v22, %v383_v27  ;;  %v393_v31 = vsel %vm7722_vm4, %v388_v23, %v392_v9  ;;  %v424_v33 = vshll.u32 %v158_v21, 16  ;;  %v428_v38 = vshrl.u32 %v158_v21, 16 }
  0x26   : > { %v403_v36 = vsel %vm7722_vm4, %v398_v28, %v402_v19  ;;  %v420_v37 = vrot.slane %v418_v6, 4  ;;  %v434_v39 = vshll.u32 %v159_v26, 16  ;;  %7188 = vmatprep.mubr.msk.bf16.mxu1 %vm1924_vm1, %v7760_v32  ;;  %v438_v43 = vshrl.u32 %v159_v26, 16 }
  0x27   : > { %7054 = vmatprep.mubr.msk.bf16.mxu0 %vm1924_vm1, %v7756_v30  ;;  %v7768_v41 = vcombine.low %v393_v31, %v403_v36  ;;  %v426_v42 = vrot.slane %v424_v33, 5  ;;  %v7772_v44 = vcombine.low %v158_v21, %v159_v26  ;;  %v430_v46 = vrot.slane %v428_v38, 4  ;;  %v167_v21 = vld [vmem:[%s7703_s23 + $0x54] sm:$0xf] }
  0x28   : > { %v436_v47 = vrot.slane %v434_v39, 5  ;;  %v411_v48 = vor.u32 %v410_v25, %v407_v24  ;;  %v421_v49 = vor.u32 %v420_v37, %v416_v29  ;;  %v440_v50 = vrot.slane %v438_v43, 4 }
  0x29   : > { %7055 = vmatmul.mubr.msk.bf16.gmra.mxu0 %vm1924_vm1, %v7768_v41  ;;  %7189 = vmatmul.mubr.msk.bf16.gmra.mxu1 %vm1924_vm1, %v7772_v44  ;;  %v444_v51 = vshll.u32 %v160_v35, 16  ;;  %v449_v52 = vshrl.u32 %v161_v40, 16  ;;  %v452_v53 = vshll.u32 %v161_v40, 16  ;;  %v431_v56 = vor.u32 %v430_v46, %v426_v42 }
  0x2a   : > { %v412_v54 = vrot.slane %v411_v48, 4  ;;  %v422_v55 = vrot.slane %v421_v49, 4  ;;  %v458_v57 = vshll.u32 %v162_v45, 16  ;;  %v441_v60 = vor.u32 %v440_v50, %v436_v47 }
  0x2b   : > { %v446_v61 = vrot.slane %v444_v51, 5  ;;  %v451_v62 = vrot.slane %v449_v52, 4  ;;  %v454_v63 = vrot.slane %v452_v53, 5  ;;  %v432_v4 = vrot.slane %v431_v56, 4  ;;  %v170_v56 = vld [vmem:[%s7703_s23 + $0x60] sm:$0x1] }
  0x2c   : > { %v417_v2 = vsel %vm7722_vm4, %v412_v54, %v416_v29  ;;  %v427_v3 = vsel %vm7722_vm4, %v422_v55, %v426_v42  ;;  %v460_v5 = vrot.slane %v458_v57, 5  ;;  %v442_v8 = vrot.slane %v441_v60, 4 }
  0x2d   : > { %v7785_v7 = vcombine.low %v417_v2, %v427_v3  ;;  %v462_v9 = vshrl.u32 %v162_v45, 16  ;;  %v7787_v10 = vcombine.low %v161_v40, %v162_v45  ;;  %v437_v11 = vsel %vm7722_vm4, %v432_v4, %v436_v47  ;;  %v168_v40 = vld [vmem:[%s7703_s23 + $0x58] sm:$0xf]  ;;  %v169_v47 = vld [vmem:[%s7703_s23 + $0x5c] sm:$0xf] }
  0x2e   : > { %v468_v12 = vshll.u32 %v163_v59, 16  ;;  %v472_v13 = vshrl.u32 %v163_v59, 16  ;;  %v478_v14 = vshll.u32 %v164_v0, 16  ;;  %v447_v16 = vsel %vm7722_vm4, %v442_v8, %v446_v61  ;;  %v172_v4 = vld [vmem:[%s7703_s23 + $0x68] sm:$0xf] }
  0x2f   : > { %7058 = vmatprep.mubr.msk.bf16.mxu0 %vm1924_vm1, %v7785_v7  ;;  %v464_v17 = vrot.slane %v462_v9, 4  ;;  %7192 = vmatprep.mubr.msk.bf16.mxu1 %vm1924_vm1, %v7787_v10  ;;  %v482_v18 = vshrl.u32 %v164_v0, 16  ;;  %v7798_v19 = vcombine.low %v163_v59, %v164_v0  ;;  %v7802_v22 = vcombine.low %v437_v11, %v447_v16 }
  0x30   : > { %v470_v23 = vrot.slane %v468_v12, 5  ;;  %v474_v24 = vrot.slane %v472_v13, 4  ;;  %v480_v25 = vrot.slane %v478_v14, 5  ;;  %v455_v27 = vor.u32 %v454_v63, %v451_v62  ;;  %v171_v62 = vld [vmem:[%s7703_s23 + $0x64] sm:$0xf] }
  0x31   : > { %v484_v26 = vrot.slane %v482_v18, 4  ;;  %7193 = vmatmul.mubr.msk.bf16.gmra.mxu1 %vm1924_vm1, %v7798_v19  ;;  %v465_v28 = vor.u32 %v464_v17, %v460_v5  ;;  %v488_v29 = vshll.u32 %v165_v15, 16  ;;  %7059 = vmatmul.mubr.msk.bf16.gmra.mxu0 %vm1924_vm1, %v7802_v22  ;;  %v493_v31 = vshrl.u32 %v166_v20, 16 }
  0x32   : > { %v475_v6 = vor.u32 %v474_v24, %v470_v23  ;;  %v496_v33 = vshll.u32 %v166_v20, 16  ;;  %v502_v35 = vshll.u32 %v167_v21, 16  ;;  %v456_v36 = vrot.slane %v455_v27, 4  ;;  %v174_v27 = vld [vmem:[%s7703_s23 + $0x70] sm:$0xf] }
  0x33   : > { %v466_v37 = vrot.slane %v465_v28, 4  ;;  %v485_v38 = vor.u32 %v484_v26, %v480_v25  ;;  %v490_v39 = vrot.slane %v488_v29, 5  ;;  %v495_v43 = vrot.slane %v493_v31, 4 }
  0x34   : > { %v476_v42 = vrot.slane %v475_v6, 4  ;;  %v498_v45 = vrot.slane %v496_v33, 5  ;;  %v504_v46 = vrot.slane %v502_v35, 5  ;;  %v461_v48 = vsel %vm7722_vm4, %v456_v36, %v460_v5 }
  0x35   : > { %v471_v49 = vsel %vm7722_vm4, %v466_v37, %v470_v23  ;;  %v486_v50 = vrot.slane %v485_v38, 4  ;;  %v506_v51 = vshrl.u32 %v167_v21, 16  ;;  %v7818_v54 = vcombine.low %v166_v20, %v167_v21  ;;  %v173_v21 = vld [vmem:[%s7703_s23 + $0x6c] sm:$0xf] }
  0x36   : > { %v7814_v52 = vcombine.low %v461_v48, %v471_v49  ;;  %v481_v53 = vsel %vm7722_vm4, %v476_v42, %v480_v25  ;;  %v512_v55 = vshll.u32 %v168_v40, 16  ;;  %v516_v60 = vshrl.u32 %v168_v40, 16  ;;  %v176_v49 = vld [vmem:[%s7703_s23 + $0x78] sm:$0xf] }
  0x37   : > { %v491_v57 = vsel %vm7722_vm4, %v486_v50, %v490_v39  ;;  %v508_v59 = vrot.slane %v506_v51, 4  ;;  %v522_v61 = vshll.u32 %v169_v47, 16  ;;  %7196 = vmatprep.mubr.msk.bf16.mxu1 %vm1924_vm1, %v7818_v54  ;;  %v526_v2 = vshrl.u32 %v169_v47, 16  ;;  %v177_v50 = vld [vmem:[%s7703_s23 + $0x7c] sm:$0xf] }
  0x38   : > { %7062 = vmatprep.mubr.msk.bf16.mxu0 %vm1924_vm1, %v7814_v52  ;;  %v7826_v63 = vcombine.low %v481_v53, %v491_v57  ;;  %v514_v0 = vrot.slane %v512_v55, 5  ;;  %v7830_v3 = vcombine.low %v168_v40, %v169_v47  ;;  %v518_v5 = vrot.slane %v516_v60, 4 }
  0x39   : > { %v524_v8 = vrot.slane %v522_v61, 5  ;;  %v499_v9 = vor.u32 %v498_v45, %v495_v43  ;;  %v509_v11 = vor.u32 %v508_v59, %v504_v46  ;;  %v528_v12 = vrot.slane %v526_v2, 4  ;;  %v175_v43 = vld [vmem:[%s7703_s23 + $0x74] sm:$0x1] }
  0x3a   : > { %7063 = vmatmul.mubr.msk.bf16.gmra.mxu0 %vm1924_vm1, %v7826_v63  ;;  %7197 = vmatmul.mubr.msk.bf16.gmra.mxu1 %vm1924_vm1, %v7830_v3  ;;  %v532_v13 = vshll.u32 %v170_v56, 16  ;;  %v537_v14 = vshrl.u32 %v171_v62, 16  ;;  %v540_v15 = vshll.u32 %v171_v62, 16  ;;  %v519_v18 = vor.u32 %v518_v5, %v514_v0 }
  0x3b   : > { %v500_v16 = vrot.slane %v499_v9, 4  ;;  %v510_v17 = vrot.slane %v509_v11, 4  ;;  %v546_v20 = vshll.u32 %v172_v4, 16  ;;  %v529_v23 = vor.u32 %v528_v12, %v524_v8  ;;  %v178_v12 = vld [vmem:[%s7703_s23 + $0x80] sm:$0xf] }
  0x3c   : > { %v534_v24 = vrot.slane %v532_v13, 5  ;;  %v539_v25 = vrot.slane %v537_v14, 4  ;;  %v542_v26 = vrot.slane %v540_v15, 5  ;;  %v520_v6 = vrot.slane %v519_v18, 4 }
  0x3d   : > { %v505_v28 = vsel %vm7722_vm4, %v500_v16, %v504_v46  ;;  %v515_v29 = vsel %vm7722_vm4, %v510_v17, %v514_v0  ;;  %v548_v31 = vrot.slane %v546_v20, 5  ;;  %v530_v35 = vrot.slane %v529_v23, 4  ;;  %v179_v17 = vld [vmem:[%s7703_s23 + $0x84] sm:$0xf] }
  0x3e   : > { %v7843_v33 = vcombine.low %v505_v28, %v515_v29  ;;  %v550_v36 = vshrl.u32 %v172_v4, 16  ;;  %v7845_v37 = vcombine.low %v171_v62, %v172_v4  ;;  %v525_v38 = vsel %vm7722_vm4, %v520_v6, %v524_v8  ;;  %v180_v28 = vld [vmem:[%s7703_s23 + $0x88] sm:$0x1] }
  0x3f   : > { %v556_v39 = vshll.u32 %v173_v21, 16  ;;  %v560_v40 = vshrl.u32 %v173_v21, 16  ;;  %v566_v42 = vshll.u32 %v174_v27, 16  ;;  %v535_v45 = vsel %vm7722_vm4, %v530_v35, %v534_v24 }
  0x40   : > { %7066 = vmatprep.mubr.msk.bf16.mxu0 %vm1924_vm1, %v7843_v33  ;;  %v552_v46 = vrot.slane %v550_v36, 4  ;;  %7200 = vmatprep.mubr.msk.bf16.mxu1 %vm1924_vm1, %v7845_v37  ;;  %v570_v47 = vshrl.u32 %v174_v27, 16  ;;  %v7856_v48 = vcombine.low %v173_v21, %v174_v27  ;;  %v7860_v51 = vcombine.low %v525_v38, %v535_v45  ;;  %v181_v36 = vld [vmem:[%s7703_s23 + $0x8c] sm:$0xf] }
  0x41   : > { %v558_v53 = vrot.slane %v556_v39, 5  ;;  %v562_v55 = vrot.slane %v560_v40, 4  ;;  %v568_v56 = vrot.slane %v566_v42, 5  ;;  %v543_v59 = vor.u32 %v542_v26, %v539_v25 }
  0x42   : > { %v572_v57 = vrot.slane %v570_v47, 4  ;;  %7201 = vmatmul.mubr.msk.bf16.gmra.mxu1 %vm1924_vm1, %v7856_v48  ;;  %v553_v60 = vor.u32 %v552_v46, %v548_v31  ;;  %v576_v61 = vshll.u32 %v175_v43, 16  ;;  %7067 = vmatmul.mubr.msk.bf16.gmra.mxu0 %vm1924_vm1, %v7860_v51  ;;  %v581_v0 = vshrl.u32 %v176_v49, 16  ;;  %v182_v43 = vld [vmem:[%s7703_s23 + $0x90] sm:$0xf] }
  0x43   : > { %v563_v62 = vor.u32 %v562_v55, %v558_v53  ;;  %v584_v2 = vshll.u32 %v176_v49, 16  ;;  %v590_v4 = vshll.u32 %v177_v50, 16  ;;  %v544_v5 = vrot.slane %v543_v59, 4 }
  0x44   : > { %v554_v8 = vrot.slane %v553_v60, 4  ;;  %v573_v9 = vor.u32 %v572_v57, %v568_v56  ;;  %v578_v11 = vrot.slane %v576_v61, 5  ;;  %v583_v14 = vrot.slane %v581_v0, 4 }
  0x45   : > { %v564_v13 = vrot.slane %v563_v62, 4  ;;  %v586_v15 = vrot.slane %v584_v2, 5  ;;  %v592_v16 = vrot.slane %v590_v4, 5  ;;  %v549_v18 = vsel %vm7722_vm4, %v544_v5, %v548_v31  ;;  %v183_v62 = vld [vmem:[%s7703_s23 + $0x94] sm:$0xf] }
  0x46   : > { %v559_v20 = vsel %vm7722_vm4, %v554_v8, %v558_v53  ;;  %v574_v21 = vrot.slane %v573_v9, 4  ;;  %v594_v23 = vshrl.u32 %v177_v50, 16  ;;  %v7876_v26 = vcombine.low %v176_v49, %v177_v50  ;;  %v184_v8 = vld [vmem:[%s7703_s23 + $0x98] sm:$0xf] }
  0x47   : > { %v7872_v24 = vcombine.low %v549_v18, %v559_v20  ;;  %v569_v25 = vsel %vm7722_vm4, %v564_v13, %v568_v56  ;;  %v600_v27 = vshll.u32 %v178_v12, 16  ;;  %v604_v31 = vshrl.u32 %v178_v12, 16 }
  0x48   : > { %9833 = vst [vmem:[#allocation2_spill] sm:$0xff] %v7876_v26  ;;  %v579_v29 = vsel %vm7722_vm4, %v574_v21, %v578_v11  ;;  %v596_v6 = vrot.slane %v594_v23, 4  ;;  %v610_v35 = vshll.u32 %v179_v17, 16  ;;  %7204 = vmatprep.mubr.msk.bf16.mxu1 %vm1924_vm1, %v7876_v26  ;;  %v614_v40 = vshrl.u32 %v179_v17, 16 }
  0x49   : > { %7070 = vmatprep.mubr.msk.bf16.mxu0 %vm1924_vm1, %v7872_v24  ;;  %v7884_v38 = vcombine.low %v569_v25, %v579_v29  ;;  %v602_v39 = vrot.slane %v600_v27, 5  ;;  %v7888_v42 = vcombine.low %v178_v12, %v179_v17  ;;  %v606_v45 = vrot.slane %v604_v31, 4  ;;  %v186_v31 = vld [vmem:[%s7703_s23 + $0xa0] sm:$0xf] }
  0x4a   : > { %v612_v46 = vrot.slane %v610_v35, 5  ;;  %v587_v47 = vor.u32 %v586_v15, %v583_v14  ;;  %v597_v49 = vor.u32 %v596_v6, %v592_v16  ;;  %v616_v50 = vrot.slane %v614_v40, 4  ;;  %v187_v35 = vld [vmem:[%s7703_s23 + $0xa4] sm:$0xf] }
  0x4b   : > { %9834 = vst [vmem:[#allocation3_spill] sm:$0xff] %v7888_v42  ;;  %7071 = vmatmul.mubr.msk.bf16.gmra.mxu0 %vm1924_vm1, %v7884_v38  ;;  %7205 = vmatmul.mubr.msk.bf16.gmra.mxu1 %vm1924_vm1, %v7888_v42  ;;  %v620_v53 = vshll.u32 %v180_v28, 16  ;;  %v625_v55 = vshrl.u32 %v181_v36, 16  ;;  %v628_v56 = vshll.u32 %v181_v36, 16  ;;  %v607_v60 = vor.u32 %v606_v45, %v602_v39 }
  0x4c   : > { %v588_v57 = vrot.slane %v587_v47, 4  ;;  %v598_v59 = vrot.slane %v597_v49, 4  ;;  %v634_v61 = vshll.u32 %v182_v43, 16  ;;  %v617_v0 = vor.u32 %v616_v50, %v612_v46 }
  0x4d   : > { %v622_v2 = vrot.slane %v620_v53, 5  ;;  %v627_v4 = vrot.slane %v625_v55, 4  ;;  %v630_v5 = vrot.slane %v628_v56, 5  ;;  %v608_v12 = vrot.slane %v607_v60, 4 }
  0x4e   : > { %v593_v9 = vsel %vm7722_vm4, %v588_v57, %v592_v16  ;;  %v603_v11 = vsel %vm7722_vm4, %v598_v59, %v602_v39  ;;  %v636_v13 = vrot.slane %v634_v61, 5  ;;  %v618_v15 = vrot.slane %v617_v0, 4  ;;  %v185_v16 = vld [vmem:[%s7703_s23 + $0x9c] sm:$0x1] }
  0x4f   : > { %v7901_v14 = vcombine.low %v593_v9, %v603_v11  ;;  %v638_v17 = vshrl.u32 %v182_v43, 16  ;;  %v7903_v18 = vcombine.low %v181_v36, %v182_v43  ;;  %v613_v20 = vsel %vm7722_vm4, %v608_v12, %v612_v46 }
  0x50   : > { %v644_v21 = vshll.u32 %v183_v62, 16  ;;  %v648_v23 = vshrl.u32 %v183_v62, 16  ;;  %v654_v25 = vshll.u32 %v184_v8, 16  ;;  %v623_v27 = vsel %vm7722_vm4, %v618_v15, %v622_v2 }
  0x51   : > { %9835 = vst [vmem:[#allocation4_spill] sm:$0xff] %v7903_v18  ;;  %7074 = vmatprep.mubr.msk.bf16.mxu0 %vm1924_vm1, %v7901_v14  ;;  %v640_v28 = vrot.slane %v638_v17, 4  ;;  %7208 = vmatprep.mubr.msk.bf16.mxu1 %vm1924_vm1, %v7903_v18  ;;  %v658_v29 = vshrl.u32 %v184_v8, 16  ;;  %v7914_v6 = vcombine.low %v183_v62, %v184_v8  ;;  %v7918_v36 = vcombine.low %v613_v20, %v623_v27  ;;  %v188_v62 = vld [vmem:[%s7703_s23 + $0xa8] sm:$0xf] }
  0x52   : > { %v646_v39 = vrot.slane %v644_v21, 5  ;;  %v650_v40 = vrot.slane %v648_v23, 4  ;;  %v656_v43 = vrot.slane %v654_v25, 5  ;;  %v631_v46 = vor.u32 %v630_v5, %v627_v4  ;;  %v189_v5 = vld [vmem:[%s7703_s23 + $0xac] sm:$0xf] }
  0x53   : > { %9836 = vst [vmem:[#allocation5_spill] sm:$0xff] %v7914_v6  ;;  %v660_v45 = vrot.slane %v658_v29, 4  ;;  %7209 = vmatmul.mubr.msk.bf16.gmra.mxu1 %vm1924_vm1, %v7914_v6  ;;  %v641_v47 = vor.u32 %v640_v28, %v636_v13  ;;  %v664_v49 = vshll.u32 %v185_v16, 16  ;;  %7075 = vmatmul.mubr.msk.bf16.gmra.mxu0 %vm1924_vm1, %v7918_v36  ;;  %v669_v53 = vshrl.u32 %v186_v31, 16  ;;  %v190_v25 = vld [vmem:[%s7703_s23 + $0xb0] sm:$0x1] }
  0x54   : > { %v651_v50 = vor.u32 %v650_v40, %v646_v39  ;;  %v672_v55 = vshll.u32 %v186_v31, 16  ;;  %v678_v56 = vshll.u32 %v187_v35, 16  ;;  %v632_v57 = vrot.slane %v631_v46, 4  ;;  %v191_v29 = vld [vmem:[%s7703_s23 + $0xb4] sm:$0xf] }
  0x55   : > { %v642_v59 = vrot.slane %v641_v47, 4  ;;  %v661_v60 = vor.u32 %v660_v45, %v656_v43  ;;  %v666_v61 = vrot.slane %v664_v49, 5  ;;  %v671_v2 = vrot.slane %v669_v53, 4 }
  0x56   : > { %v652_v0 = vrot.slane %v651_v50, 4  ;;  %v674_v8 = vrot.slane %v672_v55, 5  ;;  %v680_v4 = vrot.slane %v678_v56, 5  ;;  %v637_v9 = vsel %vm7722_vm4, %v632_v57, %v636_v13 }
  0x57   : > { %v647_v11 = vsel %vm7722_vm4, %v642_v59, %v646_v39  ;;  %v662_v12 = vrot.slane %v661_v60, 4  ;;  %v682_v15 = vshrl.u32 %v187_v35, 16  ;;  %v7934_v21 = vcombine.low %v186_v31, %v187_v35 }
  0x58   : > { %v7930_v17 = vcombine.low %v637_v9, %v647_v11  ;;  %v657_v20 = vsel %vm7722_vm4, %v652_v0, %v656_v43  ;;  %v688_v23 = vshll.u32 %v188_v62, 16  ;;  %v692_v13 = vshrl.u32 %v188_v62, 16  ;;  %v192_v43 = vld [vmem:[%s7703_s23 + $0xb8] sm:$0xf]  ;;  %v194_v9 = vld [vmem:[%s7703_s23 + $0xc0] sm:$0xf] }
  0x59   : > { %9837 = vst [vmem:[#allocation6_spill] sm:$0xff] %v7934_v21  ;;  %v667_v16 = vsel %vm7722_vm4, %v662_v12, %v666_v61  ;;  %v684_v27 = vrot.slane %v682_v15, 4  ;;  %v698_v28 = vshll.u32 %v189_v5, 16  ;;  %7212 = vmatprep.mubr.msk.bf16.mxu1 %vm1924_vm1, %v7934_v21  ;;  %v702_v31 = vshrl.u32 %v189_v5, 16  ;;  %v272_v21 = vld [vmem:[%s7703_s23 + $0x1f8] sm:$0xf] }
  0x5a   : > { %7078 = vmatprep.mubr.msk.bf16.mxu0 %vm1924_vm1, %v7930_v17  ;;  %v7942_v39 = vcombine.low %v657_v20, %v667_v16  ;;  %v690_v40 = vrot.slane %v688_v23, 5  ;;  %v7946_v35 = vcombine.low %v188_v62, %v189_v5  ;;  %v694_v45 = vrot.slane %v692_v13, 4  ;;  %v193_v62 = vld [vmem:[%s7703_s23 + $0xbc] sm:$0xf] }
  0x5b   : > { %v700_v46 = vrot.slane %v698_v28, 5  ;;  %v675_v47 = vor.u32 %v674_v8, %v671_v2  ;;  %v685_v49 = vor.u32 %v684_v27, %v680_v4  ;;  %v704_v50 = vrot.slane %v702_v31, 4 }
  0x5c   : > { %9838 = vst [vmem:[#allocation7_spill] sm:$0xff] %v7942_v39  ;;  %9839 = vst [vmem:[#allocation8_spill] sm:$0xff] %v7946_v35  ;;  %7079 = vmatmul.mubr.msk.bf16.gmra.mxu0 %vm1924_vm1, %v7942_v39  ;;  %7213 = vmatmul.mubr.msk.bf16.gmra.mxu1 %vm1924_vm1, %v7946_v35  ;;  %v708_v53 = vshll.u32 %v190_v25, 16  ;;  %v713_v55 = vshrl.u32 %v191_v29, 16  ;;  %v716_v56 = vshll.u32 %v191_v29, 16  ;;  %v695_v60 = vor.u32 %v694_v45, %v690_v40 }
  0x5d   : > { %v676_v57 = vrot.slane %v675_v47, 4  ;;  %v686_v59 = vrot.slane %v685_v49, 4  ;;  %v722_v61 = vshll.u32 %v192_v43, 16  ;;  %v705_v0 = vor.u32 %v704_v50, %v700_v46  ;;  %v197_v50 = vld [vmem:[%s7703_s23 + $0xcc] sm:$0xf] }
  0x5e   : > { %v710_v5 = vrot.slane %v708_v53, 5  ;;  %v715_v2 = vrot.slane %v713_v55, 4  ;;  %v718_v8 = vrot.slane %v716_v56, 5  ;;  %v696_v15 = vrot.slane %v695_v60, 4 }
  0x5f   : > { %v681_v11 = vsel %vm7722_vm4, %v676_v57, %v680_v4  ;;  %v691_v12 = vsel %vm7722_vm4, %v686_v59, %v690_v40  ;;  %v724_v20 = vrot.slane %v722_v61, 5  ;;  %v706_v25 = vrot.slane %v705_v0, 4  ;;  %v195_v4 = vld [vmem:[%s7703_s23 + $0xc4] sm:$0x1] }
  0x60   : > { %v7959_v23 = vcombine.low %v681_v11, %v691_v12  ;;  %v726_v16 = vshrl.u32 %v192_v43, 16  ;;  %v7961_v27 = vcombine.low %v191_v29, %v192_v43  ;;  %v701_v13 = vsel %vm7722_vm4, %v696_v15, %v700_v46  ;;  %v196_v43 = vld [vmem:[%s7703_s23 + $0xc8] sm:$0xf] }
  0x61   : > { %v732_v28 = vshll.u32 %v193_v62, 16  ;;  %v736_v31 = vshrl.u32 %v193_v62, 16  ;;  %v742_v45 = vshll.u32 %v194_v9, 16  ;;  %v711_v40 = vsel %vm7722_vm4, %v706_v25, %v710_v5 }
  0x62   : > { %9840 = vst [vmem:[#allocation9_spill] sm:$0xff] %v7959_v23  ;;  %9841 = vst [vmem:[#allocation10_spill] sm:$0xff] %v7961_v27  ;;  %7082 = vmatprep.mubr.msk.bf16.mxu0 %vm1924_vm1, %v7959_v23  ;;  %v728_v47 = vrot.slane %v726_v16, 4  ;;  %7216 = vmatprep.mubr.msk.bf16.mxu1 %vm1924_vm1, %v7961_v27  ;;  %v746_v49 = vshrl.u32 %v194_v9, 16  ;;  %v7972_v29 = vcombine.low %v193_v62, %v194_v9  ;;  %v752_v61 = vshll.u32 %v195_v4, 16 }
  0x63   : > { %v7976_v46 = vcombine.low %v701_v13, %v711_v40  ;;  %v734_v53 = vrot.slane %v732_v28, 5  ;;  %v738_v55 = vrot.slane %v736_v31, 4  ;;  %v744_v56 = vrot.slane %v742_v45, 5  ;;  %v198_v16 = vld [vmem:[%s7703_s23 + $0xd0] sm:$0xf] }
  0x64   : > { %9842 = vst [vmem:[#allocation11_spill] sm:$0xff] %v7972_v29  ;;  %v748_v57 = vrot.slane %v746_v49, 4  ;;  %7217 = vmatmul.mubr.msk.bf16.gmra.mxu1 %vm1924_vm1, %v7972_v29  ;;  %v719_v59 = vor.u32 %v718_v8, %v715_v2  ;;  %v729_v60 = vor.u32 %v728_v47, %v724_v20  ;;  %v757_v0 = vshrl.u32 %v196_v43, 16  ;;  %v199_v8 = vld [vmem:[%s7703_s23 + $0xd4] sm:$0xf] }
  0x65   : > { %9843 = vst [vmem:[#allocation12_spill] sm:$0xff] %v7976_v46  ;;  %7083 = vmatmul.mubr.msk.bf16.gmra.mxu0 %vm1924_vm1, %v7976_v46  ;;  %v739_v62 = vor.u32 %v738_v55, %v734_v53  ;;  %v760_v5 = vshll.u32 %v196_v43, 16  ;;  %v766_v9 = vshll.u32 %v197_v50, 16  ;;  %v754_v25 = vrot.slane %v752_v61, 5  ;;  %v268_v27 = vld [vmem:[%s7703_s23 + $0x1e8] sm:$0xf] }
  0x66   : > { %v720_v11 = vrot.slane %v719_v59, 4  ;;  %v730_v12 = vrot.slane %v729_v60, 4  ;;  %v749_v15 = vor.u32 %v748_v57, %v744_v56  ;;  %v759_v28 = vrot.slane %v757_v0, 4  ;;  %v200_v60 = vld [vmem:[%s7703_s23 + $0xd8] sm:$0x1] }
  0x67   : > { %v740_v13 = vrot.slane %v739_v62, 4  ;;  %v762_v31 = vrot.slane %v760_v5, 5  ;;  %v768_v2 = vrot.slane %v766_v9, 5  ;;  %v770_v47 = vshrl.u32 %v197_v50, 16  ;;  %v201_v5 = vld [vmem:[%s7703_s23 + $0xdc] sm:$0xf] }
  0x68   : > { %v725_v45 = vsel %vm7722_vm4, %v720_v11, %v724_v20  ;;  %v735_v4 = vsel %vm7722_vm4, %v730_v12, %v734_v53  ;;  %v750_v40 = vrot.slane %v749_v15, 4  ;;  %v7992_v57 = vcombine.low %v196_v43, %v197_v50  ;;  %v202_v9 = vld [vmem:[%s7703_s23 + $0xe0] sm:$0xf] }
  0x69   : > { %v7988_v49 = vcombine.low %v725_v45, %v735_v4  ;;  %v745_v55 = vsel %vm7722_vm4, %v740_v13, %v744_v56  ;;  %v776_v59 = vshll.u32 %v198_v16, 16  ;;  %v772_v62 = vrot.slane %v770_v47, 4 }
  0x6a   : > { %9845 = vst [vmem:[#allocation14_spill] sm:$0xff] %v7992_v57  ;;  %v755_v61 = vsel %vm7722_vm4, %v750_v40, %v754_v25  ;;  %v780_v20 = vshrl.u32 %v198_v16, 16  ;;  %v786_v0 = vshll.u32 %v199_v8, 16  ;;  %7220 = vmatprep.mubr.msk.bf16.mxu1 %vm1924_vm1, %v7992_v57  ;;  %v790_v43 = vshrl.u32 %v199_v8, 16 }
  0x6b   : > { %9844 = vst [vmem:[#allocation13_spill] sm:$0xff] %v7988_v49  ;;  %7086 = vmatprep.mubr.msk.bf16.mxu0 %vm1924_vm1, %v7988_v49  ;;  %v8000_v53 = vcombine.low %v745_v55, %v755_v61  ;;  %v778_v56 = vrot.slane %v776_v59, 5  ;;  %v8004_v50 = vcombine.low %v198_v16, %v199_v8  ;;  %v763_v15 = vor.u32 %v762_v31, %v759_v28  ;;  %v203_v59 = vld [vmem:[%s7703_s23 + $0xe4] sm:$0xf] }
  0x6c   : > { %v782_v11 = vrot.slane %v780_v20, 4  ;;  %v788_v12 = vrot.slane %v786_v0, 5  ;;  %v773_v25 = vor.u32 %v772_v62, %v768_v2  ;;  %v792_v13 = vrot.slane %v790_v43, 4  ;;  %v204_v62 = vld [vmem:[%s7703_s23 + $0xe8] sm:$0xf] }
  0x6d   : > { %9846 = vst [vmem:[#allocation15_spill] sm:$0xff] %v8000_v53  ;;  %9847 = vst [vmem:[#allocation16_spill] sm:$0xff] %v8004_v50  ;;  %7087 = vmatmul.mubr.msk.bf16.gmra.mxu0 %vm1924_vm1, %v8000_v53  ;;  %7221 = vmatmul.mubr.msk.bf16.gmra.mxu1 %vm1924_vm1, %v8004_v50  ;;  %v796_v45 = vshll.u32 %v200_v60, 16  ;;  %v801_v4 = vshrl.u32 %v201_v5, 16  ;;  %v804_v40 = vshll.u32 %v201_v5, 16  ;;  %v764_v47 = vrot.slane %v763_v15, 4 }
  0x6e   : > { %v774_v16 = vrot.slane %v773_v25, 4  ;;  %v783_v8 = vor.u32 %v782_v11, %v778_v56  ;;  %v810_v55 = vshll.u32 %v202_v9, 16  ;;  %v793_v61 = vor.u32 %v792_v13, %v788_v12 }
  0x6f   : > { %v798_v20 = vrot.slane %v796_v45, 5  ;;  %v803_v28 = vrot.slane %v801_v4, 4  ;;  %v806_v31 = vrot.slane %v804_v40, 5  ;;  %v769_v0 = vsel %vm7722_vm4, %v764_v47, %v768_v2  ;;  %v205_v2 = vld [vmem:[%s7703_s23 + $0xec] sm:$0x1] }
  0x70   : > { %v779_v43 = vsel %vm7722_vm4, %v774_v16, %v778_v56  ;;  %v784_v60 = vrot.slane %v783_v8, 4  ;;  %v812_v50 = vrot.slane %v810_v55, 5  ;;  %v794_v11 = vrot.slane %v793_v61, 4  ;;  %v207_v8 = vld [vmem:[%s7703_s23 + $0xf4] sm:$0xf] }
  0x71   : > { %v8017_v15 = vcombine.low %v769_v0, %v779_v43  ;;  %v814_v25 = vshrl.u32 %v202_v9, 16  ;;  %v8019_v13 = vcombine.low %v201_v5, %v202_v9  ;;  %v820_v4 = vshll.u32 %v203_v59, 16  ;;  %v206_v9 = vld [vmem:[%s7703_s23 + $0xf0] sm:$0xf] }
  0x72   : > { %v789_v45 = vsel %vm7722_vm4, %v784_v60, %v788_v12  ;;  %v824_v40 = vshrl.u32 %v203_v59, 16  ;;  %v830_v57 = vshll.u32 %v204_v62, 16  ;;  %v799_v56 = vsel %vm7722_vm4, %v794_v11, %v798_v20 }
  0x73   : > { %9848 = vst [vmem:[#allocation17_spill] sm:$0xff] %v8017_v15  ;;  %9849 = vst [vmem:[#allocation18_spill] sm:$0xff] %v8019_v13  ;;  %7090 = vmatprep.mubr.msk.bf16.mxu0 %vm1924_vm1, %v8017_v15  ;;  %v816_v47 = vrot.slane %v814_v25, 4  ;;  %7224 = vmatprep.mubr.msk.bf16.mxu1 %vm1924_vm1, %v8019_v13  ;;  %v834_v16 = vshrl.u32 %v204_v62, 16  ;;  %v8030_v5 = vcombine.low %v203_v59, %v204_v62  ;;  %v822_v55 = vrot.slane %v820_v4, 5 }
  0x74   : > { %v8034_v12 = vcombine.low %v789_v45, %v799_v56  ;;  %v826_v61 = vrot.slane %v824_v40, 4  ;;  %v832_v0 = vrot.slane %v830_v57, 5  ;;  %v807_v20 = vor.u32 %v806_v31, %v803_v28  ;;  %v209_v31 = vld [vmem:[%s7703_s23 + $0xfc] sm:$0xf] }
  0x75   : > { %9850 = vst [vmem:[#allocation19_spill] sm:$0xff] %v8030_v5  ;;  %v836_v43 = vrot.slane %v834_v16, 4  ;;  %7225 = vmatmul.mubr.msk.bf16.gmra.mxu1 %vm1924_vm1, %v8030_v5  ;;  %v817_v60 = vor.u32 %v816_v47, %v812_v50  ;;  %v840_v11 = vshll.u32 %v205_v2, 16  ;;  %v845_v62 = vshrl.u32 %v206_v9, 16  ;;  %v208_v16 = vld [vmem:[%s7703_s23 + $0xf8] sm:$0xf] }
  0x76   : > { %9851 = vst [vmem:[#allocation20_spill] sm:$0xff] %v8034_v12  ;;  %7091 = vmatmul.mubr.msk.bf16.gmra.mxu0 %vm1924_vm1, %v8034_v12  ;;  %v827_v59 = vor.u32 %v826_v61, %v822_v55  ;;  %v848_v25 = vshll.u32 %v206_v9, 16  ;;  %v854_v45 = vshll.u32 %v207_v8, 16  ;;  %v808_v56 = vrot.slane %v807_v20, 4 }
  0x77   : > { %v818_v4 = vrot.slane %v817_v60, 4  ;;  %v837_v40 = vor.u32 %v836_v43, %v832_v0  ;;  %v842_v57 = vrot.slane %v840_v11, 5  ;;  %v847_v29 = vrot.slane %v845_v62, 4 }
  0x78   : > { %v828_v13 = vrot.slane %v827_v59, 4  ;;  %v850_v5 = vrot.slane %v848_v25, 5  ;;  %v856_v28 = vrot.slane %v854_v45, 5  ;;  %v813_v2 = vsel %vm7722_vm4, %v808_v56, %v812_v50  ;;  %v210_v59 = vld [vmem:[%s7703_s23 + $0x100] sm:$0x1] }
  0x79   : > { %v823_v47 = vsel %vm7722_vm4, %v818_v4, %v822_v55  ;;  %v838_v61 = vrot.slane %v837_v40, 4  ;;  %v858_v12 = vshrl.u32 %v207_v8, 16  ;;  %v8050_v60 = vcombine.low %v206_v9, %v207_v8  ;;  %v211_v56 = vld [vmem:[%s7703_s23 + $0x104] sm:$0xf] }
  0x7a   : > { %v8046_v20 = vcombine.low %v813_v2, %v823_v47  ;;  %v833_v43 = vsel %vm7722_vm4, %v828_v13, %v832_v0  ;;  %v864_v11 = vshll.u32 %v208_v16, 16  ;;  %v868_v50 = vshrl.u32 %v208_v16, 16  ;;  %v212_v0 = vld [vmem:[%s7703_s23 + $0x108] sm:$0xf] }
  0x7b   : > { %9853 = vst [vmem:[#allocation22_spill] sm:$0xff] %v8050_v60  ;;  %v843_v62 = vsel %vm7722_vm4, %v838_v61, %v842_v57  ;;  %v860_v25 = vrot.slane %v858_v12, 4  ;;  %v874_v45 = vshll.u32 %v209_v31, 16  ;;  %7228 = vmatprep.mubr.msk.bf16.mxu1 %vm1924_vm1, %v8050_v60  ;;  %v878_v9 = vshrl.u32 %v209_v31, 16  ;;  %v213_v60 = vld [vmem:[%s7703_s23 + $0x10c] sm:$0xf] }
  0x7c   : > { %9852 = vst [vmem:[#allocation21_spill] sm:$0xff] %v8046_v20  ;;  %7094 = vmatprep.mubr.msk.bf16.mxu0 %vm1924_vm1, %v8046_v20  ;;  %v8058_v55 = vcombine.low %v833_v43, %v843_v62  ;;  %v866_v13 = vrot.slane %v864_v11, 5  ;;  %v8062_v8 = vcombine.low %v208_v16, %v209_v31  ;;  %v870_v4 = vrot.slane %v868_v50, 4 }
  0x7d   : > { %v876_v40 = vrot.slane %v874_v45, 5  ;;  %v851_v12 = vor.u32 %v850_v5, %v847_v29  ;;  %v861_v57 = vor.u32 %v860_v25, %v856_v28  ;;  %v880_v2 = vrot.slane %v878_v9, 4  ;;  %v214_v25 = vld [vmem:[%s7703_s23 + $0x110] sm:$0xf] }
  0x7e   : > { %9854 = vst [vmem:[#allocation23_spill] sm:$0xff] %v8058_v55  ;;  %9855 = vst [vmem:[#allocation24_spill] sm:$0xff] %v8062_v8  ;;  %7095 = vmatmul.mubr.msk.bf16.gmra.mxu0 %vm1924_vm1, %v8058_v55  ;;  %7229 = vmatmul.mubr.msk.bf16.gmra.mxu1 %vm1924_vm1, %v8062_v8  ;;  %v884_v47 = vshll.u32 %v210_v59, 16  ;;  %v889_v61 = vshrl.u32 %v211_v56, 16  ;;  %v892_v43 = vshll.u32 %v211_v56, 16  ;;  %v871_v31 = vor.u32 %v870_v4, %v866_v13 }
  0x7f   : > { %v852_v11 = vrot.slane %v851_v12, 4  ;;  %v862_v16 = vrot.slane %v861_v57, 4  ;;  %v898_v62 = vshll.u32 %v212_v0, 16  ;;  %v881_v50 = vor.u32 %v880_v2, %v876_v40 }
  0x80   : > { %v886_v45 = vrot.slane %v884_v47, 5  ;;  %v891_v29 = vrot.slane %v889_v61, 4  ;;  %v894_v5 = vrot.slane %v892_v43, 5  ;;  %v872_v59 = vrot.slane %v871_v31, 4 }
  0x81   : > { %v857_v9 = vsel %vm7722_vm4, %v852_v11, %v856_v28  ;;  %v867_v8 = vsel %vm7722_vm4, %v862_v16, %v866_v13  ;;  %v900_v55 = vrot.slane %v898_v62, 5  ;;  %v882_v4 = vrot.slane %v881_v50, 4  ;;  %v215_v28 = vld [vmem:[%s7703_s23 + $0x114] sm:$0x1]  ;;  %v217_v16 = vld [vmem:[%s7703_s23 + $0x11c] sm:$0xf] }
  0x82   : > { %v8075_v12 = vcombine.low %v857_v9, %v867_v8  ;;  %v902_v57 = vshrl.u32 %v212_v0, 16  ;;  %v8077_v2 = vcombine.low %v211_v56, %v212_v0  ;;  %v877_v47 = vsel %vm7722_vm4, %v872_v59, %v876_v40  ;;  %v216_v0 = vld [vmem:[%s7703_s23 + $0x118] sm:$0xf] }
  0x83   : > { %v908_v61 = vshll.u32 %v213_v60, 16  ;;  %v912_v43 = vshrl.u32 %v213_v60, 16  ;;  %v918_v20 = vshll.u32 %v214_v25, 16  ;;  %v887_v13 = vsel %vm7722_vm4, %v882_v4, %v886_v45 }
  0x84   : > { %9856 = vst [vmem:[#allocation25_spill] sm:$0xff] %v8075_v12  ;;  %9857 = vst [vmem:[#allocation26_spill] sm:$0xff] %v8077_v2  ;;  %7098 = vmatprep.mubr.msk.bf16.mxu0 %vm1924_vm1, %v8075_v12  ;;  %v904_v8 = vrot.slane %v902_v57, 4  ;;  %7232 = vmatprep.mubr.msk.bf16.mxu1 %vm1924_vm1, %v8077_v2  ;;  %v922_v11 = vshrl.u32 %v214_v25, 16  ;;  %v8088_v56 = vcombine.low %v213_v60, %v214_v25  ;;  %v928_v4 = vshll.u32 %v215_v28, 16 }
  0x85   : > { %v8092_v40 = vcombine.low %v877_v47, %v887_v13  ;;  %v910_v31 = vrot.slane %v908_v61, 5  ;;  %v914_v62 = vrot.slane %v912_v43, 4  ;;  %v920_v50 = vrot.slane %v918_v20, 5 }
  0x86   : > { %9858 = vst [vmem:[#allocation27_spill] sm:$0xff] %v8088_v56  ;;  %v924_v9 = vrot.slane %v922_v11, 4  ;;  %7233 = vmatmul.mubr.msk.bf16.gmra.mxu1 %vm1924_vm1, %v8088_v56  ;;  %v895_v45 = vor.u32 %v894_v5, %v891_v29  ;;  %v905_v59 = vor.u32 %v904_v8, %v900_v55  ;;  %v933_v25 = vshrl.u32 %v216_v0, 16  ;;  %v218_v11 = vld [vmem:[%s7703_s23 + $0x120] sm:$0xf] }
  0x87   : > { %9859 = vst [vmem:[#allocation28_spill] sm:$0xff] %v8092_v40  ;;  %7099 = vmatmul.mubr.msk.bf16.gmra.mxu0 %vm1924_vm1, %v8092_v40  ;;  %v915_v60 = vor.u32 %v914_v62, %v910_v31  ;;  %v936_v57 = vshll.u32 %v216_v0, 16  ;;  %v942_v47 = vshll.u32 %v217_v16, 16  ;;  %v930_v20 = vrot.slane %v928_v4, 5  ;;  %v219_v5 = vld [vmem:[%s7703_s23 + $0x124] sm:$0xf] }
  0x88   : > { %v896_v13 = vrot.slane %v895_v45, 4  ;;  %v906_v61 = vrot.slane %v905_v59, 4  ;;  %v925_v43 = vor.u32 %v924_v9, %v920_v50  ;;  %v935_v12 = vrot.slane %v933_v25, 4 }
  0x89   : > { %v916_v2 = vrot.slane %v915_v60, 4  ;;  %v938_v56 = vrot.slane %v936_v57, 5  ;;  %v944_v29 = vrot.slane %v942_v47, 5  ;;  %v946_v40 = vshrl.u32 %v217_v16, 16  ;;  %v220_v60 = vld [vmem:[%s7703_s23 + $0x128] sm:$0x1] }
  0x8a   : > { %v901_v28 = vsel %vm7722_vm4, %v896_v13, %v900_v55  ;;  %v911_v8 = vsel %vm7722_vm4, %v906_v61, %v910_v31  ;;  %v926_v62 = vrot.slane %v925_v43, 4  ;;  %v8108_v59 = vcombine.low %v216_v0, %v217_v16  ;;  %v221_v13 = vld [vmem:[%s7703_s23 + $0x12c] sm:$0xf] }
  0x8b   : > { %v8104_v45 = vcombine.low %v901_v28, %v911_v8  ;;  %v921_v9 = vsel %vm7722_vm4, %v916_v2, %v920_v50  ;;  %v952_v4 = vshll.u32 %v218_v11, 16  ;;  %v948_v57 = vrot.slane %v946_v40, 4  ;;  %v222_v50 = vld [vmem:[%s7703_s23 + $0x130] sm:$0xf] }
  0x8c   : > { %9861 = vst [vmem:[#allocation30_spill] sm:$0xff] %v8108_v59  ;;  %v931_v25 = vsel %vm7722_vm4, %v926_v62, %v930_v20  ;;  %v956_v55 = vshrl.u32 %v218_v11, 16  ;;  %v962_v47 = vshll.u32 %v219_v5, 16  ;;  %7236 = vmatprep.mubr.msk.bf16.mxu1 %vm1924_vm1, %v8108_v59  ;;  %v966_v0 = vshrl.u32 %v219_v5, 16  ;;  %v223_v59 = vld [vmem:[%s7703_s23 + $0x134] sm:$0xf] }
  0x8d   : > { %9860 = vst [vmem:[#allocation29_spill] sm:$0xff] %v8104_v45  ;;  %7102 = vmatprep.mubr.msk.bf16.mxu0 %vm1924_vm1, %v8104_v45  ;;  %v8116_v31 = vcombine.low %v921_v9, %v931_v25  ;;  %v954_v2 = vrot.slane %v952_v4, 5  ;;  %v8120_v16 = vcombine.low %v218_v11, %v219_v5  ;;  %v939_v40 = vor.u32 %v938_v56, %v935_v12 }
  0x8e   : > { %v958_v61 = vrot.slane %v956_v55, 4  ;;  %v964_v43 = vrot.slane %v962_v47, 5  ;;  %v949_v20 = vor.u32 %v948_v57, %v944_v29  ;;  %v968_v28 = vrot.slane %v966_v0, 4  ;;  %v224_v57 = vld [vmem:[%s7703_s23 + $0x138] sm:$0xf] }
  0x8f   : > { %9862 = vst [vmem:[#allocation31_spill] sm:$0xff] %v8116_v31  ;;  %9863 = vst [vmem:[#allocation32_spill] sm:$0xff] %v8120_v16  ;;  %7103 = vmatmul.mubr.msk.bf16.gmra.mxu0 %vm1924_vm1, %v8116_v31  ;;  %7237 = vmatmul.mubr.msk.bf16.gmra.mxu1 %vm1924_vm1, %v8120_v16  ;;  %v972_v8 = vshll.u32 %v220_v60, 16  ;;  %v977_v62 = vshrl.u32 %v221_v13, 16  ;;  %v980_v9 = vshll.u32 %v221_v13, 16  ;;  %v940_v4 = vrot.slane %v939_v40, 4 }
  0x90   : > { %v950_v11 = vrot.slane %v949_v20, 4  ;;  %v959_v5 = vor.u32 %v958_v61, %v954_v2  ;;  %v986_v25 = vshll.u32 %v222_v50, 16  ;;  %v969_v55 = vor.u32 %v968_v28, %v964_v43 }
  0x91   : > { %v974_v47 = vrot.slane %v972_v8, 5  ;;  %v979_v12 = vrot.slane %v977_v62, 4  ;;  %v982_v56 = vrot.slane %v980_v9, 5  ;;  %v945_v0 = vsel %vm7722_vm4, %v940_v4, %v944_v29  ;;  %v225_v29 = vld [vmem:[%s7703_s23 + $0x13c] sm:$0x1] }
  0x92   : > { %v955_v16 = vsel %vm7722_vm4, %v950_v11, %v954_v2  ;;  %v960_v60 = vrot.slane %v959_v5, 4  ;;  %v988_v31 = vrot.slane %v986_v25, 5  ;;  %v970_v61 = vrot.slane %v969_v55, 4  ;;  %v227_v11 = vld [vmem:[%s7703_s23 + $0x144] sm:$0xf] }
  0x93   : > { %v8133_v40 = vcombine.low %v945_v0, %v955_v16  ;;  %v990_v20 = vshrl.u32 %v222_v50, 16  ;;  %v8135_v28 = vcombine.low %v221_v13, %v222_v50  ;;  %v996_v62 = vshll.u32 %v223_v59, 16  ;;  %v226_v50 = vld [vmem:[%s7703_s23 + $0x140] sm:$0xf] }
  0x94   : > { %v965_v8 = vsel %vm7722_vm4, %v960_v60, %v964_v43  ;;  %v1000_v9 = vshrl.u32 %v223_v59, 16  ;;  %v1006_v45 = vshll.u32 %v224_v57, 16  ;;  %v975_v2 = vsel %vm7722_vm4, %v970_v61, %v974_v47 }
  0x95   : > { %9864 = vst [vmem:[#allocation33_spill] sm:$0xff] %v8133_v40  ;;  %9865 = vst [vmem:[#allocation34_spill] sm:$0xff] %v8135_v28  ;;  %7106 = vmatprep.mubr.msk.bf16.mxu0 %vm1924_vm1, %v8133_v40  ;;  %v992_v16 = vrot.slane %v990_v20, 4  ;;  %7240 = vmatprep.mubr.msk.bf16.mxu1 %vm1924_vm1, %v8135_v28  ;;  %v1010_v4 = vshrl.u32 %v224_v57, 16  ;;  %v8146_v13 = vcombine.low %v223_v59, %v224_v57  ;;  %v998_v5 = vrot.slane %v996_v62, 5 }
  0x96   : > { %v8150_v43 = vcombine.low %v965_v8, %v975_v2  ;;  %v1002_v25 = vrot.slane %v1000_v9, 4  ;;  %v1008_v55 = vrot.slane %v1006_v45, 5  ;;  %v983_v47 = vor.u32 %v982_v56, %v979_v12  ;;  %v229_v56 = vld [vmem:[%s7703_s23 + $0x14c] sm:$0xf] }
  0x97   : > { %9866 = vst [vmem:[#allocation35_spill] sm:$0xff] %v8146_v13  ;;  %v1012_v0 = vrot.slane %v1010_v4, 4  ;;  %7241 = vmatmul.mubr.msk.bf16.gmra.mxu1 %vm1924_vm1, %v8146_v13  ;;  %v993_v60 = vor.u32 %v992_v16, %v988_v31  ;;  %v1016_v61 = vshll.u32 %v225_v29, 16  ;;  %v1021_v57 = vshrl.u32 %v226_v50, 16  ;;  %v228_v4 = vld [vmem:[%s7703_s23 + $0x148] sm:$0xf] }
  0x98   : > { %9867 = vst [vmem:[#allocation36_spill] sm:$0xff] %v8150_v43  ;;  %7107 = vmatmul.mubr.msk.bf16.gmra.mxu0 %vm1924_vm1, %v8150_v43  ;;  %v1003_v59 = vor.u32 %v1002_v25, %v998_v5  ;;  %v1024_v20 = vshll.u32 %v226_v50, 16  ;;  %v1030_v8 = vshll.u32 %v227_v11, 16  ;;  %v984_v2 = vrot.slane %v983_v47, 4 }
  0x99   : > { %v994_v62 = vrot.slane %v993_v60, 4  ;;  %v1013_v9 = vor.u32 %v1012_v0, %v1008_v55  ;;  %v1018_v45 = vrot.slane %v1016_v61, 5  ;;  %v1023_v40 = vrot.slane %v1021_v57, 4 }
  0x9a   : > { %v1004_v28 = vrot.slane %v1003_v59, 4  ;;  %v1026_v13 = vrot.slane %v1024_v20, 5  ;;  %v1032_v12 = vrot.slane %v1030_v8, 5  ;;  %v989_v29 = vsel %vm7722_vm4, %v984_v2, %v988_v31  ;;  %v230_v59 = vld [vmem:[%s7703_s23 + $0x150] sm:$0x1] }
  0x9b   : > { %v999_v16 = vsel %vm7722_vm4, %v994_v62, %v998_v5  ;;  %v1014_v25 = vrot.slane %v1013_v9, 4  ;;  %v1034_v43 = vshrl.u32 %v227_v11, 16  ;;  %v8166_v60 = vcombine.low %v226_v50, %v227_v11  ;;  %v231_v2 = vld [vmem:[%s7703_s23 + $0x154] sm:$0xf] }
  0x9c   : > { %v8162_v47 = vcombine.low %v989_v29, %v999_v16  ;;  %v1009_v0 = vsel %vm7722_vm4, %v1004_v28, %v1008_v55  ;;  %v1040_v61 = vshll.u32 %v228_v4, 16  ;;  %v1044_v31 = vshrl.u32 %v228_v4, 16  ;;  %v232_v55 = vld [vmem:[%s7703_s23 + $0x158] sm:$0xf] }
  0x9d   : > { %9869 = vst [vmem:[#allocation38_spill] sm:$0xff] %v8166_v60  ;;  %v1019_v57 = vsel %vm7722_vm4, %v1014_v25, %v1018_v45  ;;  %v1036_v20 = vrot.slane %v1034_v43, 4  ;;  %v1050_v8 = vshll.u32 %v229_v56, 16  ;;  %7244 = vmatprep.mubr.msk.bf16.mxu1 %vm1924_vm1, %v8166_v60  ;;  %v1054_v50 = vshrl.u32 %v229_v56, 16  ;;  %v233_v60 = vld [vmem:[%s7703_s23 + $0x15c] sm:$0xf] }
  0x9e   : > { %9868 = vst [vmem:[#allocation37_spill] sm:$0xff] %v8162_v47  ;;  %7110 = vmatprep.mubr.msk.bf16.mxu0 %vm1924_vm1, %v8162_v47  ;;  %v8174_v5 = vcombine.low %v1009_v0, %v1019_v57  ;;  %v1042_v28 = vrot.slane %v1040_v61, 5  ;;  %v8178_v11 = vcombine.low %v228_v4, %v229_v56  ;;  %v1046_v62 = vrot.slane %v1044_v31, 4 }
  0x9f   : > { %v1052_v9 = vrot.slane %v1050_v8, 5  ;;  %v1027_v43 = vor.u32 %v1026_v13, %v1023_v40  ;;  %v1037_v45 = vor.u32 %v1036_v20, %v1032_v12  ;;  %v1056_v29 = vrot.slane %v1054_v50, 4  ;;  %v234_v20 = vld [vmem:[%s7703_s23 + $0x160] sm:$0xf] }
  0xa0   : > { %9870 = vst [vmem:[#allocation39_spill] sm:$0xff] %v8174_v5  ;;  %9871 = vst [vmem:[#allocation40_spill] sm:$0xff] %v8178_v11  ;;  %7111 = vmatmul.mubr.msk.bf16.gmra.mxu0 %vm1924_vm1, %v8174_v5  ;;  %7245 = vmatmul.mubr.msk.bf16.gmra.mxu1 %vm1924_vm1, %v8178_v11  ;;  %v1060_v16 = vshll.u32 %v230_v59, 16  ;;  %v1065_v25 = vshrl.u32 %v231_v2, 16  ;;  %v1068_v0 = vshll.u32 %v231_v2, 16  ;;  %v1047_v56 = vor.u32 %v1046_v62, %v1042_v28 }
  0xa1   : > { %v1028_v61 = vrot.slane %v1027_v43, 4  ;;  %v1038_v4 = vrot.slane %v1037_v45, 4  ;;  %v1074_v57 = vshll.u32 %v232_v55, 16  ;;  %v1057_v31 = vor.u32 %v1056_v29, %v1052_v9 }
  0xa2   : > { %v1062_v8 = vrot.slane %v1060_v16, 5  ;;  %v1067_v40 = vrot.slane %v1065_v25, 4  ;;  %v1070_v13 = vrot.slane %v1068_v0, 5  ;;  %v1048_v59 = vrot.slane %v1047_v56, 4 }
  0xa3   : > { %v1033_v50 = vsel %vm7722_vm4, %v1028_v61, %v1032_v12  ;;  %v1043_v11 = vsel %vm7722_vm4, %v1038_v4, %v1042_v28  ;;  %v1076_v5 = vrot.slane %v1074_v57, 5  ;;  %v1058_v62 = vrot.slane %v1057_v31, 4  ;;  %v235_v12 = vld [vmem:[%s7703_s23 + $0x164] sm:$0x1]  ;;  %v237_v4 = vld [vmem:[%s7703_s23 + $0x16c] sm:$0xf] }
  0xa4   : > { %v8191_v43 = vcombine.low %v1033_v50, %v1043_v11  ;;  %v1078_v45 = vshrl.u32 %v232_v55, 16  ;;  %v8193_v29 = vcombine.low %v231_v2, %v232_v55  ;;  %v1053_v16 = vsel %vm7722_vm4, %v1048_v59, %v1052_v9  ;;  %v236_v55 = vld [vmem:[%s7703_s23 + $0x168] sm:$0xf] }
  0xa5   : > { %v1084_v25 = vshll.u32 %v233_v60, 16  ;;  %v1088_v0 = vshrl.u32 %v233_v60, 16  ;;  %v1094_v47 = vshll.u32 %v234_v20, 16  ;;  %v1063_v28 = vsel %vm7722_vm4, %v1058_v62, %v1062_v8 }
  0xa6   : > { %9872 = vst [vmem:[#allocation41_spill] sm:$0xff] %v8191_v43  ;;  %9873 = vst [vmem:[#allocation42_spill] sm:$0xff] %v8193_v29  ;;  %7114 = vmatprep.mubr.msk.bf16.mxu0 %vm1924_vm1, %v8191_v43  ;;  %v1080_v11 = vrot.slane %v1078_v45, 4  ;;  %7248 = vmatprep.mubr.msk.bf16.mxu1 %vm1924_vm1, %v8193_v29  ;;  %v1098_v61 = vshrl.u32 %v234_v20, 16  ;;  %v8204_v2 = vcombine.low %v233_v60, %v234_v20  ;;  %v1104_v62 = vshll.u32 %v235_v12, 16 }
  0xa7   : > { %v8208_v9 = vcombine.low %v1053_v16, %v1063_v28  ;;  %v1086_v56 = vrot.slane %v1084_v25, 5  ;;  %v1090_v57 = vrot.slane %v1088_v0, 4  ;;  %v1096_v31 = vrot.slane %v1094_v47, 5 }
  0xa8   : > { %9874 = vst [vmem:[#allocation43_spill] sm:$0xff] %v8204_v2  ;;  %v1100_v50 = vrot.slane %v1098_v61, 4  ;;  %7249 = vmatmul.mubr.msk.bf16.gmra.mxu1 %vm1924_vm1, %v8204_v2  ;;  %v1071_v8 = vor.u32 %v1070_v13, %v1067_v40  ;;  %v1081_v59 = vor.u32 %v1080_v11, %v1076_v5  ;;  %v1109_v20 = vshrl.u32 %v236_v55, 16  ;;  %v238_v61 = vld [vmem:[%s7703_s23 + $0x170] sm:$0xf] }
  0xa9   : > { %9875 = vst [vmem:[#allocation44_spill] sm:$0xff] %v8208_v9  ;;  %7115 = vmatmul.mubr.msk.bf16.gmra.mxu0 %vm1924_vm1, %v8208_v9  ;;  %v1091_v60 = vor.u32 %v1090_v57, %v1086_v56  ;;  %v1112_v45 = vshll.u32 %v236_v55, 16  ;;  %v1118_v16 = vshll.u32 %v237_v4, 16  ;;  %v1106_v47 = vrot.slane %v1104_v62, 5  ;;  %v239_v13 = vld [vmem:[%s7703_s23 + $0x174] sm:$0xf] }
  0xaa   : > { %v1072_v28 = vrot.slane %v1071_v8, 4  ;;  %v1082_v25 = vrot.slane %v1081_v59, 4  ;;  %v1101_v0 = vor.u32 %v1100_v50, %v1096_v31  ;;  %v1111_v43 = vrot.slane %v1109_v20, 4 }
  0xab   : > { %v1092_v29 = vrot.slane %v1091_v60, 4  ;;  %v1114_v2 = vrot.slane %v1112_v45, 5  ;;  %v1120_v40 = vrot.slane %v1118_v16, 5  ;;  %v1122_v9 = vshrl.u32 %v237_v4, 16  ;;  %v240_v60 = vld [vmem:[%s7703_s23 + $0x178] sm:$0x1] }
  0xac   : > { %v1077_v12 = vsel %vm7722_vm4, %v1072_v28, %v1076_v5  ;;  %v1087_v11 = vsel %vm7722_vm4, %v1082_v25, %v1086_v56  ;;  %v1102_v57 = vrot.slane %v1101_v0, 4  ;;  %v8224_v59 = vcombine.low %v236_v55, %v237_v4  ;;  %v241_v28 = vld [vmem:[%s7703_s23 + $0x17c] sm:$0xf] }
  0xad   : > { %v8220_v8 = vcombine.low %v1077_v12, %v1087_v11  ;;  %v1097_v50 = vsel %vm7722_vm4, %v1092_v29, %v1096_v31  ;;  %v1128_v62 = vshll.u32 %v238_v61, 16  ;;  %v1124_v45 = vrot.slane %v1122_v9, 4  ;;  %v242_v31 = vld [vmem:[%s7703_s23 + $0x180] sm:$0xf] }
  0xae   : > { %9877 = vst [vmem:[#allocation46_spill] sm:$0xff] %v8224_v59  ;;  %v1107_v20 = vsel %vm7722_vm4, %v1102_v57, %v1106_v47  ;;  %v1132_v5 = vshrl.u32 %v238_v61, 16  ;;  %v1138_v16 = vshll.u32 %v239_v13, 16  ;;  %7252 = vmatprep.mubr.msk.bf16.mxu1 %vm1924_vm1, %v8224_v59  ;;  %v1142_v55 = vshrl.u32 %v239_v13, 16  ;;  %v243_v59 = vld [vmem:[%s7703_s23 + $0x184] sm:$0xf] }
  0xaf   : > { %9876 = vst [vmem:[#allocation45_spill] sm:$0xff] %v8220_v8  ;;  %7118 = vmatprep.mubr.msk.bf16.mxu0 %vm1924_vm1, %v8220_v8  ;;  %v8232_v56 = vcombine.low %v1097_v50, %v1107_v20  ;;  %v1130_v29 = vrot.slane %v1128_v62, 5  ;;  %v8236_v4 = vcombine.low %v238_v61, %v239_v13  ;;  %v1115_v9 = vor.u32 %v1114_v2, %v1111_v43 }
  0xb0   : > { %v1134_v25 = vrot.slane %v1132_v5, 4  ;;  %v1140_v0 = vrot.slane %v1138_v16, 5  ;;  %v1125_v47 = vor.u32 %v1124_v45, %v1120_v40  ;;  %v1144_v12 = vrot.slane %v1142_v55, 4  ;;  %v244_v45 = vld [vmem:[%s7703_s23 + $0x188] sm:$0xf] }
  0xb1   : > { %9878 = vst [vmem:[#allocation47_spill] sm:$0xff] %v8232_v56  ;;  %9879 = vst [vmem:[#allocation48_spill] sm:$0xff] %v8236_v4  ;;  %7119 = vmatmul.mubr.msk.bf16.gmra.mxu0 %vm1924_vm1, %v8232_v56  ;;  %7253 = vmatmul.mubr.msk.bf16.gmra.mxu1 %vm1924_vm1, %v8236_v4  ;;  %v1148_v11 = vshll.u32 %v240_v60, 16  ;;  %v1153_v57 = vshrl.u32 %v241_v28, 16  ;;  %v1156_v50 = vshll.u32 %v241_v28, 16  ;;  %v1116_v62 = vrot.slane %v1115_v9, 4 }
  0xb2   : > { %v1126_v61 = vrot.slane %v1125_v47, 4  ;;  %v1135_v13 = vor.u32 %v1134_v25, %v1130_v29  ;;  %v1162_v20 = vshll.u32 %v242_v31, 16  ;;  %v1145_v5 = vor.u32 %v1144_v12, %v1140_v0 }
  0xb3   : > { %v1150_v16 = vrot.slane %v1148_v11, 5  ;;  %v1155_v43 = vrot.slane %v1153_v57, 4  ;;  %v1158_v2 = vrot.slane %v1156_v50, 5  ;;  %v1121_v55 = vsel %vm7722_vm4, %v1116_v62, %v1120_v40  ;;  %v245_v40 = vld [vmem:[%s7703_s23 + $0x18c] sm:$0x1] }
  0xb4   : > { %v1131_v4 = vsel %vm7722_vm4, %v1126_v61, %v1130_v29  ;;  %v1136_v60 = vrot.slane %v1135_v13, 4  ;;  %v1164_v56 = vrot.slane %v1162_v20, 5  ;;  %v1146_v25 = vrot.slane %v1145_v5, 4  ;;  %v247_v61 = vld [vmem:[%s7703_s23 + $0x194] sm:$0xf] }
  0xb5   : > { %v8249_v9 = vcombine.low %v1121_v55, %v1131_v4  ;;  %v1166_v47 = vshrl.u32 %v242_v31, 16  ;;  %v8251_v12 = vcombine.low %v241_v28, %v242_v31  ;;  %v1172_v57 = vshll.u32 %v243_v59, 16  ;;  %v246_v31 = vld [vmem:[%s7703_s23 + $0x190] sm:$0xf] }
  0xb6   : > { %v1141_v11 = vsel %vm7722_vm4, %v1136_v60, %v1140_v0  ;;  %v1176_v50 = vshrl.u32 %v243_v59, 16  ;;  %v1182_v8 = vshll.u32 %v244_v45, 16  ;;  %v1151_v29 = vsel %vm7722_vm4, %v1146_v25, %v1150_v16 }
  0xb7   : > { %9880 = vst [vmem:[#allocation49_spill] sm:$0xff] %v8249_v9  ;;  %9881 = vst [vmem:[#allocation50_spill] sm:$0xff] %v8251_v12  ;;  %7122 = vmatprep.mubr.msk.bf16.mxu0 %vm1924_vm1, %v8249_v9  ;;  %v1168_v4 = vrot.slane %v1166_v47, 4  ;;  %7256 = vmatprep.mubr.msk.bf16.mxu1 %vm1924_vm1, %v8251_v12  ;;  %v1186_v62 = vshrl.u32 %v244_v45, 16  ;;  %v8262_v28 = vcombine.low %v243_v59, %v244_v45  ;;  %v1174_v13 = vrot.slane %v1172_v57, 5 }
  0xb8   : > { %v8266_v0 = vcombine.low %v1141_v11, %v1151_v29  ;;  %v1178_v20 = vrot.slane %v1176_v50, 4  ;;  %v1184_v5 = vrot.slane %v1182_v8, 5  ;;  %v1159_v16 = vor.u32 %v1158_v2, %v1155_v43  ;;  %v249_v2 = vld [vmem:[%s7703_s23 + $0x19c] sm:$0xf] }
  0xb9   : > { %9882 = vst [vmem:[#allocation51_spill] sm:$0xff] %v8262_v28  ;;  %v1188_v55 = vrot.slane %v1186_v62, 4  ;;  %7257 = vmatmul.mubr.msk.bf16.gmra.mxu1 %vm1924_vm1, %v8262_v28  ;;  %v1169_v60 = vor.u32 %v1168_v4, %v1164_v56  ;;  %v1192_v25 = vshll.u32 %v245_v40, 16  ;;  %v1197_v45 = vshrl.u32 %v246_v31, 16  ;;  %v248_v62 = vld [vmem:[%s7703_s23 + $0x198] sm:$0xf] }
  0xba   : > { %9883 = vst [vmem:[#allocation52_spill] sm:$0xff] %v8266_v0  ;;  %7123 = vmatmul.mubr.msk.bf16.gmra.mxu0 %vm1924_vm1, %v8266_v0  ;;  %v1179_v59 = vor.u32 %v1178_v20, %v1174_v13  ;;  %v1200_v47 = vshll.u32 %v246_v31, 16  ;;  %v1206_v11 = vshll.u32 %v247_v61, 16  ;;  %v1160_v29 = vrot.slane %v1159_v16, 4 }
  0xbb   : > { %v1170_v57 = vrot.slane %v1169_v60, 4  ;;  %v1189_v50 = vor.u32 %v1188_v55, %v1184_v5  ;;  %v1194_v8 = vrot.slane %v1192_v25, 5  ;;  %v1199_v9 = vrot.slane %v1197_v45, 4 }
  0xbc   : > { %v1180_v12 = vrot.slane %v1179_v59, 4  ;;  %v1202_v28 = vrot.slane %v1200_v47, 5  ;;  %v1208_v43 = vrot.slane %v1206_v11, 5  ;;  %v1165_v40 = vsel %vm7722_vm4, %v1160_v29, %v1164_v56  ;;  %v250_v59 = vld [vmem:[%s7703_s23 + $0x1a0] sm:$0x1] }
  0xbd   : > { %v1175_v4 = vsel %vm7722_vm4, %v1170_v57, %v1174_v13  ;;  %v1190_v20 = vrot.slane %v1189_v50, 4  ;;  %v1210_v0 = vshrl.u32 %v247_v61, 16  ;;  %v8282_v60 = vcombine.low %v246_v31, %v247_v61  ;;  %v251_v29 = vld [vmem:[%s7703_s23 + $0x1a4] sm:$0xf] }
  0xbe   : > { %v8278_v16 = vcombine.low %v1165_v40, %v1175_v4  ;;  %v1185_v55 = vsel %vm7722_vm4, %v1180_v12, %v1184_v5  ;;  %v1216_v25 = vshll.u32 %v248_v62, 16  ;;  %v1220_v56 = vshrl.u32 %v248_v62, 16  ;;  %v252_v5 = vld [vmem:[%s7703_s23 + $0x1a8] sm:$0xf] }
  0xbf   : > { %9885 = vst [vmem:[#allocation54_spill] sm:$0xff] %v8282_v60  ;;  %v1195_v45 = vsel %vm7722_vm4, %v1190_v20, %v1194_v8  ;;  %v1212_v47 = vrot.slane %v1210_v0, 4  ;;  %v1226_v11 = vshll.u32 %v249_v2, 16  ;;  %7260 = vmatprep.mubr.msk.bf16.mxu1 %vm1924_vm1, %v8282_v60  ;;  %v1230_v31 = vshrl.u32 %v249_v2, 16  ;;  %v253_v60 = vld [vmem:[%s7703_s23 + $0x1ac] sm:$0xf] }
  0xc0   : > { %9884 = vst [vmem:[#allocation53_spill] sm:$0xff] %v8278_v16  ;;  %7126 = vmatprep.mubr.msk.bf16.mxu0 %vm1924_vm1, %v8278_v16  ;;  %v8290_v13 = vcombine.low %v1185_v55, %v1195_v45  ;;  %v1218_v12 = vrot.slane %v1216_v25, 5  ;;  %v8294_v61 = vcombine.low %v248_v62, %v249_v2  ;;  %v1222_v57 = vrot.slane %v1220_v56, 4 }
  0xc1   : > { %v1228_v50 = vrot.slane %v1226_v11, 5  ;;  %v1203_v0 = vor.u32 %v1202_v28, %v1199_v9  ;;  %v1213_v8 = vor.u32 %v1212_v47, %v1208_v43  ;;  %v1232_v40 = vrot.slane %v1230_v31, 4  ;;  %v254_v47 = vld [vmem:[%s7703_s23 + $0x1b0] sm:$0xf] }
  0xc2   : > { %9886 = vst [vmem:[#allocation55_spill] sm:$0xff] %v8290_v13  ;;  %9887 = vst [vmem:[#allocation56_spill] sm:$0xff] %v8294_v61  ;;  %7127 = vmatmul.mubr.msk.bf16.gmra.mxu0 %vm1924_vm1, %v8290_v13  ;;  %7261 = vmatmul.mubr.msk.bf16.gmra.mxu1 %vm1924_vm1, %v8294_v61  ;;  %v1236_v4 = vshll.u32 %v250_v59, 16  ;;  %v1241_v20 = vshrl.u32 %v251_v29, 16  ;;  %v1244_v55 = vshll.u32 %v251_v29, 16  ;;  %v1223_v2 = vor.u32 %v1222_v57, %v1218_v12 }
  0xc3   : > { %v1204_v25 = vrot.slane %v1203_v0, 4  ;;  %v1214_v62 = vrot.slane %v1213_v8, 4  ;;  %v1250_v45 = vshll.u32 %v252_v5, 16  ;;  %v1233_v56 = vor.u32 %v1232_v40, %v1228_v50 }
  0xc4   : > { %v1238_v11 = vrot.slane %v1236_v4, 5  ;;  %v1243_v9 = vrot.slane %v1241_v20, 4  ;;  %v1246_v28 = vrot.slane %v1244_v55, 5  ;;  %v1224_v59 = vrot.slane %v1223_v2, 4 }
  0xc5   : > { %v1209_v31 = vsel %vm7722_vm4, %v1204_v25, %v1208_v43  ;;  %v1219_v61 = vsel %vm7722_vm4, %v1214_v62, %v1218_v12  ;;  %v1252_v13 = vrot.slane %v1250_v45, 5  ;;  %v1234_v57 = vrot.slane %v1233_v56, 4  ;;  %v255_v43 = vld [vmem:[%s7703_s23 + $0x1b4] sm:$0x1]  ;;  %v257_v62 = vld [vmem:[%s7703_s23 + $0x1bc] sm:$0xf] }
  0xc6   : > { %v8307_v0 = vcombine.low %v1209_v31, %v1219_v61  ;;  %v1254_v8 = vshrl.u32 %v252_v5, 16  ;;  %v8309_v40 = vcombine.low %v251_v29, %v252_v5  ;;  %v1229_v4 = vsel %vm7722_vm4, %v1224_v59, %v1228_v50  ;;  %v256_v5 = vld [vmem:[%s7703_s23 + $0x1b8] sm:$0xf] }
  0xc7   : > { %v1260_v20 = vshll.u32 %v253_v60, 16  ;;  %v1264_v55 = vshrl.u32 %v253_v60, 16  ;;  %v1270_v16 = vshll.u32 %v254_v47, 16  ;;  %v1239_v12 = vsel %vm7722_vm4, %v1234_v57, %v1238_v11 }
  0xc8   : > { %9888 = vst [vmem:[#allocation57_spill] sm:$0xff] %v8307_v0  ;;  %9889 = vst [vmem:[#allocation58_spill] sm:$0xff] %v8309_v40  ;;  %7130 = vmatprep.mubr.msk.bf16.mxu0 %vm1924_vm1, %v8307_v0  ;;  %v1256_v61 = vrot.slane %v1254_v8, 4  ;;  %7264 = vmatprep.mubr.msk.bf16.mxu1 %vm1924_vm1, %v8309_v40  ;;  %v1274_v25 = vshrl.u32 %v254_v47, 16  ;;  %v8320_v29 = vcombine.low %v253_v60, %v254_v47  ;;  %v1280_v57 = vshll.u32 %v255_v43, 16 }
  0xc9   : > { %v8324_v50 = vcombine.low %v1229_v4, %v1239_v12  ;;  %v1262_v2 = vrot.slane %v1260_v20, 5  ;;  %v1266_v45 = vrot.slane %v1264_v55, 4  ;;  %v1272_v56 = vrot.slane %v1270_v16, 5 }
  0xca   : > { %9890 = vst [vmem:[#allocation59_spill] sm:$0xff] %v8320_v29  ;;  %v1276_v31 = vrot.slane %v1274_v25, 4  ;;  %7265 = vmatmul.mubr.msk.bf16.gmra.mxu1 %vm1924_vm1, %v8320_v29  ;;  %v1247_v11 = vor.u32 %v1246_v28, %v1243_v9  ;;  %v1257_v59 = vor.u32 %v1256_v61, %v1252_v13  ;;  %v1285_v47 = vshrl.u32 %v256_v5, 16  ;;  %v258_v25 = vld [vmem:[%s7703_s23 + $0x1c0] sm:$0xf] }
  0xcb   : > { %9891 = vst [vmem:[#allocation60_spill] sm:$0xff] %v8324_v50  ;;  %7131 = vmatmul.mubr.msk.bf16.gmra.mxu0 %vm1924_vm1, %v8324_v50  ;;  %v1267_v60 = vor.u32 %v1266_v45, %v1262_v2  ;;  %v1288_v8 = vshll.u32 %v256_v5, 16  ;;  %v1294_v4 = vshll.u32 %v257_v62, 16  ;;  %v1282_v16 = vrot.slane %v1280_v57, 5  ;;  %v259_v28 = vld [vmem:[%s7703_s23 + $0x1c4] sm:$0xf] }
  0xcc   : > { %v1248_v12 = vrot.slane %v1247_v11, 4  ;;  %v1258_v20 = vrot.slane %v1257_v59, 4  ;;  %v1277_v55 = vor.u32 %v1276_v31, %v1272_v56  ;;  %v1287_v0 = vrot.slane %v1285_v47, 4 }
  0xcd   : > { %v1268_v40 = vrot.slane %v1267_v60, 4  ;;  %v1290_v29 = vrot.slane %v1288_v8, 5  ;;  %v1296_v9 = vrot.slane %v1294_v4, 5  ;;  %v1298_v50 = vshrl.u32 %v257_v62, 16  ;;  %v260_v60 = vld [vmem:[%s7703_s23 + $0x1c8] sm:$0x1] }
  0xce   : > { %v1253_v43 = vsel %vm7722_vm4, %v1248_v12, %v1252_v13  ;;  %v1263_v61 = vsel %vm7722_vm4, %v1258_v20, %v1262_v2  ;;  %v1278_v45 = vrot.slane %v1277_v55, 4  ;;  %v8340_v59 = vcombine.low %v256_v5, %v257_v62  ;;  %v261_v12 = vld [vmem:[%s7703_s23 + $0x1cc] sm:$0xf] }
  0xcf   : > { %v8336_v11 = vcombine.low %v1253_v43, %v1263_v61  ;;  %v1273_v31 = vsel %vm7722_vm4, %v1268_v40, %v1272_v56  ;;  %v1304_v57 = vshll.u32 %v258_v25, 16  ;;  %v1300_v8 = vrot.slane %v1298_v50, 4  ;;  %v262_v56 = vld [vmem:[%s7703_s23 + $0x1d0] sm:$0xf] }
  0xd0   : > { %9893 = vst [vmem:[#allocation62_spill] sm:$0xff] %v8340_v59  ;;  %v1283_v47 = vsel %vm7722_vm4, %v1278_v45, %v1282_v16  ;;  %v1308_v13 = vshrl.u32 %v258_v25, 16  ;;  %v1314_v4 = vshll.u32 %v259_v28, 16  ;;  %7268 = vmatprep.mubr.msk.bf16.mxu1 %vm1924_vm1, %v8340_v59  ;;  %v1318_v5 = vshrl.u32 %v259_v28, 16  ;;  %v263_v59 = vld [vmem:[%s7703_s23 + $0x1d4] sm:$0xf] }
  0xd1   : > { %9892 = vst [vmem:[#allocation61_spill] sm:$0xff] %v8336_v11  ;;  %7134 = vmatprep.mubr.msk.bf16.mxu0 %vm1924_vm1, %v8336_v11  ;;  %v8348_v2 = vcombine.low %v1273_v31, %v1283_v47  ;;  %v1306_v40 = vrot.slane %v1304_v57, 5  ;;  %v8352_v62 = vcombine.low %v258_v25, %v259_v28  ;;  %v1291_v50 = vor.u32 %v1290_v29, %v1287_v0 }
  0xd2   : > { %v1310_v20 = vrot.slane %v1308_v13, 4  ;;  %v1316_v55 = vrot.slane %v1314_v4, 5  ;;  %v1301_v16 = vor.u32 %v1300_v8, %v1296_v9  ;;  %v1320_v43 = vrot.slane %v1318_v5, 4  ;;  %v264_v8 = vld [vmem:[%s7703_s23 + $0x1d8] sm:$0xf] }
  0xd3   : > { %9894 = vst [vmem:[#allocation63_spill] sm:$0xff] %v8348_v2  ;;  %9895 = vst [vmem:[#allocation64_spill] sm:$0xff] %v8352_v62  ;;  %7135 = vmatmul.mubr.msk.bf16.gmra.mxu0 %vm1924_vm1, %v8348_v2  ;;  %7269 = vmatmul.mubr.msk.bf16.gmra.mxu1 %vm1924_vm1, %v8352_v62  ;;  %v1324_v61 = vshll.u32 %v260_v60, 16  ;;  %v1329_v45 = vshrl.u32 %v261_v12, 16  ;;  %v1332_v31 = vshll.u32 %v261_v12, 16  ;;  %v1292_v57 = vrot.slane %v1291_v50, 4 }
  0xd4   : > { %v1302_v25 = vrot.slane %v1301_v16, 4  ;;  %v1311_v28 = vor.u32 %v1310_v20, %v1306_v40  ;;  %v1338_v47 = vshll.u32 %v262_v56, 16  ;;  %v1321_v13 = vor.u32 %v1320_v43, %v1316_v55 }
  0xd5   : > { %v1326_v4 = vrot.slane %v1324_v61, 5  ;;  %v1331_v0 = vrot.slane %v1329_v45, 4  ;;  %v1334_v29 = vrot.slane %v1332_v31, 5  ;;  %v1297_v5 = vsel %vm7722_vm4, %v1292_v57, %v1296_v9  ;;  %v265_v57 = vld [vmem:[%s7703_s23 + $0x1dc] sm:$0x1] }
  0xd6   : > { %v1307_v62 = vsel %vm7722_vm4, %v1302_v25, %v1306_v40  ;;  %v1312_v60 = vrot.slane %v1311_v28, 4  ;;  %v1340_v2 = vrot.slane %v1338_v47, 5  ;;  %v1322_v20 = vrot.slane %v1321_v13, 4  ;;  %v266_v25 = vld [vmem:[%s7703_s23 + $0x1e0] sm:$0xf] }
  0xd7   : > { %v8365_v11 = vcombine.low %v1297_v5, %v1307_v62  ;;  %v1342_v50 = vshrl.u32 %v262_v56, 16  ;;  %v8367_v16 = vcombine.low %v261_v12, %v262_v56  ;;  %v8369_v43 = vpop.f32.mrf.mxu1  ;;  %v1348_v45 = vshll.u32 %v263_v59, 16  ;;  %v267_v28 = vld [vmem:[%s7703_s23 + $0x1e4] sm:$0xf] }
  0xd8   : > { %v1317_v61 = vsel %vm7722_vm4, %v1312_v60, %v1316_v55  ;;  %v1352_v9 = vshrl.u32 %v263_v59, 16  ;;  %v1358_v31 = vshll.u32 %v264_v8, 16  ;;  %v1327_v40 = vsel %vm7722_vm4, %v1322_v20, %v1326_v4 }
  0xd9   : > { %9896 = vst [vmem:[#allocation65_spill] sm:$0xff] %v8365_v11  ;;  %9897 = vst [vmem:[#allocation66_spill] sm:$0xff] %v8367_v16  ;;  %7138 = vmatprep.mubr.msk.bf16.mxu0 %vm1924_vm1, %v8365_v11  ;;  %v1344_v62 = vrot.slane %v1342_v50, 4  ;;  %7272 = vmatprep.mubr.msk.bf16.mxu1 %vm1924_vm1, %v8367_v16  ;;  %v1362_v12 = vshrl.u32 %v264_v8, 16  ;;  %v8380_v56 = vcombine.low %v263_v59, %v264_v8  ;;  %v3220_v55 = vpop.f32.mrf.mxu1  ;;  %v1350_v13 = vrot.slane %v1348_v45, 5 }
  0xda   : > { %v8384_v47 = vcombine.low %v1317_v61, %v1327_v40  ;;  %v1354_v5 = vrot.slane %v1352_v9, 4  ;;  %v1360_v60 = vrot.slane %v1358_v31, 5  ;;  %v1335_v4 = vor.u32 %v1334_v29, %v1331_v0 }
  0xdb   : > { %9898 = vst [vmem:[#allocation67_spill] sm:$0xff] %v8380_v56  ;;  %v1364_v11 = vrot.slane %v1362_v12, 4  ;;  %7273 = vmatmul.mubr.msk.bf16.gmra.mxu1 %vm1924_vm1, %v8380_v56  ;;  %v1345_v20 = vor.u32 %v1344_v62, %v1340_v2  ;;  %v1368_v50 = vshll.u32 %v265_v57, 16  ;;  %v8388_v16 = vpop.f32.mrf.mxu1  ;;  %v1373_v8 = vshrl.u32 %v266_v25, 16  ;;  %v269_v56 = vld [vmem:[%s7703_s23 + $0x1ec] sm:$0xf] }
  0xdc   : > { %9899 = vst [vmem:[#allocation68_spill] sm:$0xff] %v8384_v47  ;;  %7139 = vmatmul.mubr.msk.bf16.gmra.mxu0 %vm1924_vm1, %v8384_v47  ;;  %v1355_v59 = vor.u32 %v1354_v5, %v1350_v13  ;;  %v1376_v61 = vshll.u32 %v266_v25, 16  ;;  %v1382_v45 = vshll.u32 %v267_v28, 16  ;;  %v1336_v9 = vrot.slane %v1335_v4, 4 }
  0xdd   : > { %v1346_v31 = vrot.slane %v1345_v20, 4  ;;  %v1365_v40 = vor.u32 %v1364_v11, %v1360_v60  ;;  %v1370_v12 = vrot.slane %v1368_v50, 5  ;;  %v8393_v35 = vpop.f32.mrf.mxu1  ;;  %v1375_v29 = vrot.slane %v1373_v8, 4 }
  0xde   : > { %v1356_v0 = vrot.slane %v1355_v59, 4  ;;  %v1378_v57 = vrot.slane %v1376_v61, 5  ;;  %v1384_v62 = vrot.slane %v1382_v45, 5  ;;  %v1341_v47 = vsel %vm7722_vm4, %v1336_v9, %v1340_v2 }
  0xdf   : > { %v1351_v5 = vsel %vm7722_vm4, %v1346_v31, %v1350_v13  ;;  %v1366_v15 = vrot.slane %v1365_v40, 4  ;;  %v1386_v4 = vshrl.u32 %v267_v28, 16  ;;  %v8404_v50 = vcombine.low %v266_v25, %v267_v28  ;;  %v270_v31 = vld [vmem:[%s7703_s23 + $0x1f0] sm:$0x1]  ;;  %v271_v40 = vld [vmem:[%s7703_s23 + $0x1f4] sm:$0xf] }
  0xe0   : > { %v8400_v20 = vcombine.low %v1341_v47, %v1351_v5  ;;  %v1361_v11 = vsel %vm7722_vm4, %v1356_v0, %v1360_v60  ;;  %v1392_v59 = vshll.u32 %v268_v27, 16  ;;  %v8406_v8 = vpop.f32.mrf.mxu1  ;;  %v1396_v45 = vshrl.u32 %v268_v27, 16 }
  0xe1   : > { %9901 = vst [vmem:[#allocation70_spill] sm:$0xff] %v8404_v50  ;;  %v1371_v61 = vsel %vm7722_vm4, %v1366_v15, %v1370_v12  ;;  %v1388_v2 = vrot.slane %v1386_v4, 4  ;;  %v1402_v9 = vshll.u32 %v269_v56, 16  ;;  %v7052_v13 = vpop.f32.mrf.mxu0  ;;  %7276 = vmatprep.mubr.msk.bf16.mxu1 %vm1924_vm1, %v8404_v50  ;;  %v1406_v28 = vshrl.u32 %v269_v56, 16 }
  0xe2   : > { %9900 = vst [vmem:[#allocation69_spill] sm:$0xff] %v8400_v20  ;;  %7142 = vmatprep.mubr.msk.bf16.mxu0 %vm1924_vm1, %v8400_v20  ;;  %v8413_v47 = vcombine.low %v1361_v11, %v1371_v61  ;;  %v1394_v25 = vrot.slane %v1392_v59, 5  ;;  %v8417_v60 = vcombine.low %v268_v27, %v269_v56  ;;  %v8420_v15 = vpop.f32.mrf.mxu1  ;;  %v1398_v12 = vrot.slane %v1396_v45, 4 }
  0xe3   : > { %v1404_v0 = vrot.slane %v1402_v9, 5  ;;  %v1379_v5 = vor.u32 %v1378_v57, %v1375_v29  ;;  %v1389_v4 = vor.u32 %v1388_v2, %v1384_v62  ;;  %v2155_v53 = vpop.f32.mrf.mxu0  ;;  %v1408_v11 = vrot.slane %v1406_v28, 4 }
  0xe4   : > { %9902 = vst [vmem:[#allocation71_spill] sm:$0xff] %v8413_v47  ;;  %9903 = vst [vmem:[#allocation72_spill] sm:$0xff] %v8417_v60  ;;  %7143 = vmatmul.mubr.msk.bf16.gmra.mxu0 %vm1924_vm1, %v8413_v47  ;;  %7277 = vmatmul.mubr.msk.bf16.gmra.mxu1 %vm1924_vm1, %v8417_v60  ;;  %v8428_v59 = vadd.f32 %v8369_v43, %v7052_v13  ;;  %v1412_v27 = vshll.u32 %v270_v31, 16  ;;  %v8430_v56 = vadd.f32 %v3220_v55, %v2155_v53  ;;  %v8432_v61 = vpop.f32.mrf.mxu1  ;;  %v273_v31 = vld [vmem:[%s7703_s23 + $0x1fc] sm:$0xf] }
  0xe5   : > { %v1380_v29 = vrot.slane %v1379_v5, 4  ;;  %v1390_v57 = vrot.slane %v1389_v4, 4  ;;  %v1399_v2 = vor.u32 %v1398_v12, %v1394_v25  ;;  %v1417_v45 = vshrl.u32 %v271_v40, 16  ;;  %v7053_v9 = vpop.f32.mrf.mxu0  ;;  %v274_v5 = vld [vmem:[%s7703_s23 + $0x200] sm:$0xf] }
  0xe6   : > { %9904 = vst [vmem:[#allocation73_spill] sm:$0xff] %v8428_v59  ;;  %9905 = vst [vmem:[#allocation74_spill] sm:$0xff] %v8430_v56  ;;  %v1409_v50 = vor.u32 %v1408_v11, %v1404_v0  ;;  %v1414_v28 = vrot.slane %v1412_v27, 5  ;;  %v1420_v47 = vshll.u32 %v271_v40, 16  ;;  %v1426_v20 = vshll.u32 %v272_v21, 16  ;;  %v8434_v60 = vpop.f32.mrf.mxu1 }
  0xe7   : > { %v1385_v43 = vsel %vm7722_vm4, %v1380_v29, %v1384_v62  ;;  %v1395_v53 = vsel %vm7722_vm4, %v1390_v57, %v1394_v25  ;;  %v1400_v55 = vrot.slane %v1399_v2, 4  ;;  %v1419_v13 = vrot.slane %v1417_v45, 4  ;;  %v2158_v4 = vpop.f32.mrf.mxu0  ;;  %v275_v2 = vld [vmem:[%s7703_s23 + $0x204] sm:$0x1] }
  0xe8   : > { %v8442_v12 = vcombine.low %v1385_v43, %v1395_v53  ;;  %v1410_v56 = vrot.slane %v1409_v50, 4  ;;  %v1422_v11 = vrot.slane %v1420_v47, 5  ;;  %v1428_v27 = vrot.slane %v1426_v20, 5 }
  0xe9   : > { %v1405_v59 = vsel %vm7722_vm4, %v1400_v55, %v1404_v0  ;;  %v1430_v6 = vshrl.u32 %v272_v21, 16  ;;  %v8446_v49 = vcombine.low %v271_v40, %v272_v21  ;;  %v8449_v62 = vadd.f32 %v8388_v16, %v7053_v9  ;;  %v7056_v25 = vpop.f32.mrf.mxu0  ;;  %v8451_v29 = vpop.f32.mrf.mxu1  ;;  %v276_v9 = vld [vmem:[%s7703_s23 + $0x208] sm:$0xf] }
  0xea   : > { %9906 = vst [vmem:[#allocation75_spill] sm:$0xff] %v8442_v12  ;;  %7146 = vmatprep.mubr.msk.bf16.mxu0 %vm1924_vm1, %v8442_v12  ;;  %v1415_v20 = vsel %vm7722_vm4, %v1410_v56, %v1414_v28  ;;  %v1436_v50 = vshll.u32 %v273_v31, 16  ;;  %v1440_v47 = vshrl.u32 %v273_v31, 16  ;;  %v1446_v0 = vshll.u32 %v274_v5, 16 }
  0xeb   : > { %9907 = vst [vmem:[#allocation76_spill] sm:$0xff] %v8446_v49  ;;  %9908 = vst [vmem:[#allocation77_spill] sm:$0xff] %v8449_v62  ;;  %v8457_v57 = vcombine.low %v1405_v59, %v1415_v20  ;;  %v1432_v21 = vrot.slane %v1430_v6, 4  ;;  %7280 = vmatprep.mubr.msk.bf16.mxu1 %vm1924_vm1, %v8446_v49  ;;  %v1450_v16 = vshrl.u32 %v274_v5, 16  ;;  %v8461_v40 = vcombine.low %v273_v31, %v274_v5  ;;  %v2171_v45 = vpop.f32.mrf.mxu0  ;;  %v8465_v43 = vpop.f32.mrf.mxu1  ;;  %v277_v20 = vld [vmem:[%s7703_s23 + $0x20c] sm:$0xf] }
  0xec   : > { %v1438_v53 = vrot.slane %v1436_v50, 5  ;;  %v1442_v56 = vrot.slane %v1440_v47, 4  ;;  %v1448_v28 = vrot.slane %v1446_v0, 5  ;;  %v8468_v55 = vadd.f32 %v8393_v35, %v2158_v4 }
  0xed   : > { %9909 = vst [vmem:[#allocation78_spill] sm:$0xff] %v8457_v57  ;;  %9910 = vst [vmem:[#allocation79_spill] sm:$0xff] %v8461_v40  ;;  %7147 = vmatmul.mubr.msk.bf16.gmra.mxu0 %vm1924_vm1, %v8457_v57  ;;  %v1452_v6 = vrot.slane %v1450_v16, 4  ;;  %7281 = vmatmul.mubr.msk.bf16.gmra.mxu1 %vm1924_vm1, %v8461_v40  ;;  %v1423_v59 = vor.u32 %v1422_v11, %v1419_v13  ;;  %v1433_v31 = vor.u32 %v1432_v21, %v1428_v27  ;;  %v7057_v62 = vpop.f32.mrf.mxu0  ;;  %v8478_v50 = vpop.f32.mrf.mxu1  ;;  %v278_v57 = vld [vmem:[%s7703_s23 + $0x210] sm:$0xf] }
  0xee   : > { %9911 = vst [vmem:[#allocation80_spill] sm:$0xff] %v8468_v55  ;;  %v8475_v5 = vadd.f32 %v8406_v8, %v7056_v25  ;;  %v1443_v47 = vor.u32 %v1442_v56, %v1438_v53  ;;  %v1456_v35 = vshll.u32 %v275_v2, 16  ;;  %v8481_v4 = vadd.f32 %v8420_v15, %v2171_v45 }
  0xef   : > { %v1461_v0 = vshrl.u32 %v276_v9, 16  ;;  %v1424_v16 = vrot.slane %v1423_v59, 4  ;;  %v1434_v55 = vrot.slane %v1433_v31, 4  ;;  %v1453_v40 = vor.u32 %v1452_v6, %v1448_v28  ;;  %v2174_v11 = vpop.f32.mrf.mxu0  ;;  %v8483_v21 = vpop.f32.mrf.mxu1  ;;  %v279_v59 = vld [vmem:[%s7703_s23 + $0x214] sm:$0xf] }
  0xf0   : > { %9912 = vst [vmem:[#allocation81_spill] sm:$0xff] %v8475_v5  ;;  %9913 = vst [vmem:[#allocation82_spill] sm:$0xff] %v8481_v4  ;;  %v1464_v13 = vshll.u32 %v276_v9, 16  ;;  %v1444_v8 = vrot.slane %v1443_v47, 4  ;;  %v1458_v25 = vrot.slane %v1456_v35, 5  ;;  %v1470_v49 = vshll.u32 %v277_v20, 16 }
  0xf1   : > { %v1463_v5 = vrot.slane %v1461_v0, 4  ;;  %v1429_v2 = vsel %vm7722_vm4, %v1424_v16, %v1428_v27  ;;  %v1439_v15 = vsel %vm7722_vm4, %v1434_v55, %v1438_v53  ;;  %v1454_v45 = vrot.slane %v1453_v40, 4  ;;  %v8491_v31 = vpop.f32.mrf.mxu1  ;;  %v7060_v4 = vpop.f32.mrf.mxu0 }
  0xf2   : > { %v1466_v56 = vrot.slane %v1464_v13, 5  ;;  %v8493_v6 = vcombine.low %v1429_v2, %v1439_v15  ;;  %v1449_v47 = vsel %vm7722_vm4, %v1444_v8, %v1448_v28  ;;  %v1472_v35 = vrot.slane %v1470_v49, 5  ;;  %v280_v2 = vld [vmem:[%s7703_s23 + $0x218] sm:$0x1]  ;;  %v281_v15 = vld [vmem:[%s7703_s23 + $0x21c] sm:$0xf] }
  0xf3   : > { %v1474_v0 = vshrl.u32 %v277_v20, 16  ;;  %v1459_v27 = vsel %vm7722_vm4, %v1454_v45, %v1458_v25  ;;  %v8499_v16 = vcombine.low %v276_v9, %v277_v20  ;;  %v8502_v40 = vadd.f32 %v8432_v61, %v7057_v62  ;;  %v8504_v55 = vpop.f32.mrf.mxu1  ;;  %v2187_v25 = vpop.f32.mrf.mxu0 }
  0xf4   : > { %9914 = vst [vmem:[#allocation83_spill] sm:$0xff] %v8493_v6  ;;  %v1480_v53 = vshll.u32 %v278_v57, 16  ;;  %7150 = vmatprep.mubr.msk.bf16.mxu0 %vm1924_vm1, %v8493_v6  ;;  %v8508_v13 = vcombine.low %v1449_v47, %v1459_v27  ;;  %v1484_v28 = vshrl.u32 %v278_v57, 16  ;;  %v1490_v8 = vshll.u32 %v279_v59, 16  ;;  %v282_v6 = vld [vmem:[%s7703_s23 + $0x220] sm:$0xf] }
  0xf5   : > { %9915 = vst [vmem:[#allocation84_spill] sm:$0xff] %v8499_v16  ;;  %9916 = vst [vmem:[#allocation85_spill] sm:$0xff] %v8502_v40  ;;  %v1476_v49 = vrot.slane %v1474_v0, 4  ;;  %7284 = vmatprep.mubr.msk.bf16.mxu1 %vm1924_vm1, %v8499_v16  ;;  %v1494_v61 = vshrl.u32 %v279_v59, 16  ;;  %v8513_v62 = vcombine.low %v278_v57, %v279_v59  ;;  %v8516_v20 = vadd.f32 %v8434_v60, %v2174_v11  ;;  %v8519_v45 = vpop.f32.mrf.mxu1  ;;  %v7061_v12 = vpop.f32.mrf.mxu0 }
  0xf6   : > { %9917 = vst [vmem:[#allocation86_spill] sm:$0xff] %v8508_v13  ;;  %v1482_v9 = vrot.slane %v1480_v53, 5  ;;  %7151 = vmatmul.mubr.msk.bf16.gmra.mxu0 %vm1924_vm1, %v8508_v13  ;;  %v1486_v47 = vrot.slane %v1484_v28, 4  ;;  %v1492_v0 = vrot.slane %v1490_v8, 5  ;;  %v1467_v27 = vor.u32 %v1466_v56, %v1463_v5 }
  0xf7   : > { %9918 = vst [vmem:[#allocation87_spill] sm:$0xff] %v8513_v62  ;;  %9919 = vst [vmem:[#allocation88_spill] sm:$0xff] %v8516_v20  ;;  %v1477_v40 = vor.u32 %v1476_v49, %v1472_v35  ;;  %v1496_v16 = vrot.slane %v1494_v61, 4  ;;  %7285 = vmatmul.mubr.msk.bf16.gmra.mxu1 %vm1924_vm1, %v8513_v62  ;;  %v8527_v57 = vadd.f32 %v8451_v29, %v7060_v4  ;;  %v1500_v60 = vshll.u32 %v280_v2, 16  ;;  %v8532_v59 = vpop.f32.mrf.mxu1  ;;  %v2190_v28 = vpop.f32.mrf.mxu0 }
  0xf8   : > { %v8530_v11 = vadd.f32 %v8465_v43, %v2187_v25  ;;  %v1468_v53 = vrot.slane %v1467_v27, 4  ;;  %v1487_v56 = vor.u32 %v1486_v47, %v1482_v9  ;;  %v1505_v49 = vshrl.u32 %v281_v15, 16  ;;  %v283_v25 = vld [vmem:[%s7703_s23 + $0x224] sm:$0xf] }
  0xf9   : > { %9920 = vst [vmem:[#allocation89_spill] sm:$0xff] %v8527_v57  ;;  %v1478_v5 = vrot.slane %v1477_v40, 4  ;;  %v1497_v8 = vor.u32 %v1496_v16, %v1492_v0  ;;  %v1502_v61 = vrot.slane %v1500_v60, 5  ;;  %v1508_v20 = vshll.u32 %v281_v15, 16 }
  0xfa   : > { %9921 = vst [vmem:[#allocation90_spill] sm:$0xff] %v8530_v11  ;;  %v1514_v62 = vshll.u32 %v282_v6, 16  ;;  %v1473_v29 = vsel %vm7722_vm4, %v1468_v53, %v1472_v35  ;;  %v1488_v43 = vrot.slane %v1487_v56, 4  ;;  %v1507_v2 = vrot.slane %v1505_v49, 4  ;;  %v284_v11 = vld [vmem:[%s7703_s23 + $0x228] sm:$0xf]  ;;  %v7064_v57 = vpop.f32.mrf.mxu0  ;;  %v8540_v27 = vpop.f32.mrf.mxu1 }
  0xfb   : > { %v1483_v4 = vsel %vm7722_vm4, %v1478_v5, %v1482_v9  ;;  %v1498_v47 = vrot.slane %v1497_v8, 4  ;;  %v1510_v16 = vrot.slane %v1508_v20, 5  ;;  %v1518_v35 = vshrl.u32 %v282_v6, 16 }
  0xfc   : > { %v8542_v40 = vcombine.low %v1473_v29, %v1483_v4  ;;  %v1516_v60 = vrot.slane %v1514_v62, 5  ;;  %v1493_v13 = vsel %vm7722_vm4, %v1488_v43, %v1492_v0  ;;  %v8546_v53 = vcombine.low %v281_v15, %v282_v6  ;;  %v2203_v5 = vpop.f32.mrf.mxu0  ;;  %v8551_v56 = vpop.f32.mrf.mxu1  ;;  %v285_v6 = vld [vmem:[%s7703_s23 + $0x22c] sm:$0x1]  ;;  %v286_v15 = vld [vmem:[%s7703_s23 + $0x230] sm:$0xf] }
  0xfd   : > { %v8549_v9 = vadd.f32 %v8478_v50, %v7061_v12  ;;  %v1503_v62 = vsel %vm7722_vm4, %v1498_v47, %v1502_v61  ;;  %v1524_v20 = vshll.u32 %v283_v25, 16  ;;  %v1528_v49 = vshrl.u32 %v283_v25, 16 }
  0xfe   : > { %9922 = vst [vmem:[#allocation91_spill] sm:$0xff] %v8542_v40  ;;  %9923 = vst [vmem:[#allocation92_spill] sm:$0xff] %v8546_v53  ;;  %7154 = vmatprep.mubr.msk.bf16.mxu0 %vm1924_vm1, %v8542_v40  ;;  %v1534_v0 = vshll.u32 %v284_v11, 16  ;;  %v8557_v8 = vcombine.low %v1493_v13, %v1503_v62  ;;  %v1520_v29 = vrot.slane %v1518_v35, 4  ;;  %7288 = vmatprep.mubr.msk.bf16.mxu1 %vm1924_vm1, %v8546_v53  ;;  %v1538_v12 = vshrl.u32 %v284_v11, 16  ;;  %v7065_v4 = vpop.f32.mrf.mxu0  ;;  %v8565_v43 = vpop.f32.mrf.mxu1 }
  0xff   : > { %9924 = vst [vmem:[#allocation93_spill] sm:$0xff] %v8549_v9  ;;  %v8561_v50 = vcombine.low %v283_v25, %v284_v11  ;;  %v1526_v9 = vrot.slane %v1524_v20, 5  ;;  %v1530_v61 = vrot.slane %v1528_v49, 4  ;;  %v8568_v40 = vadd.f32 %v8483_v21, %v2190_v28  ;;  %v287_v62 = vld [vmem:[%s7703_s23 + $0x234] sm:$0xf] }
 0x100   : > { %9925 = vst [vmem:[#allocation94_spill] sm:$0xff] %v8557_v8  ;;  %v1536_v47 = vrot.slane %v1534_v0, 5  ;;  %7155 = vmatmul.mubr.msk.bf16.gmra.mxu0 %vm1924_vm1, %v8557_v8  ;;  %v1540_v13 = vrot.slane %v1538_v12, 4  ;;  %v1511_v11 = vor.u32 %v1510_v16, %v1507_v2  ;;  %v1521_v25 = vor.u32 %v1520_v29, %v1516_v60  ;;  %v2206_v20 = vpop.f32.mrf.mxu0  ;;  %v8578_v49 = vpop.f32.mrf.mxu1  ;;  %v288_v8 = vld [vmem:[%s7703_s23 + $0x238] sm:$0xf] }
 0x101   : > { %9926 = vst [vmem:[#allocation95_spill] sm:$0xff] %v8561_v50  ;;  %9927 = vst [vmem:[#allocation96_spill] sm:$0xff] %v8568_v40  ;;  %7289 = vmatmul.mubr.msk.bf16.gmra.mxu1 %vm1924_vm1, %v8561_v50  ;;  %v8575_v35 = vadd.f32 %v8491_v31, %v7064_v57  ;;  %v1531_v0 = vor.u32 %v1530_v61, %v1526_v9  ;;  %v1544_v21 = vshll.u32 %v285_v6, 16  ;;  %v1549_v40 = vshrl.u32 %v286_v15, 16 }
 0x102   : > { %v8581_v28 = vadd.f32 %v8504_v55, %v2203_v5  ;;  %v1512_v12 = vrot.slane %v1511_v11, 4  ;;  %v1522_v53 = vrot.slane %v1521_v25, 4  ;;  %v1541_v50 = vor.u32 %v1540_v13, %v1536_v47  ;;  %v8583_v16 = vpop.f32.mrf.mxu1  ;;  %v7068_v46 = vpop.f32.mrf.mxu0  ;;  %v289_v11 = vld [vmem:[%s7703_s23 + $0x23c] sm:$0xf] }
 0x103   : > { %9928 = vst [vmem:[#allocation97_spill] sm:$0xff] %v8575_v35  ;;  %v1552_v2 = vshll.u32 %v286_v15, 16  ;;  %v1532_v31 = vrot.slane %v1531_v0, 4  ;;  %v1546_v57 = vrot.slane %v1544_v21, 5  ;;  %v1551_v29 = vrot.slane %v1549_v40, 4 }
 0x104   : > { %9929 = vst [vmem:[#allocation98_spill] sm:$0xff] %v8581_v28  ;;  %v1558_v35 = vshll.u32 %v287_v62, 16  ;;  %v1517_v6 = vsel %vm7722_vm4, %v1512_v12, %v1516_v60  ;;  %v1527_v55 = vsel %vm7722_vm4, %v1522_v53, %v1526_v9  ;;  %v1542_v5 = vrot.slane %v1541_v50, 4  ;;  %v8591_v25 = vpop.f32.mrf.mxu1  ;;  %v2219_v28 = vpop.f32.mrf.mxu0 }
 0x105   : > { %v1554_v61 = vrot.slane %v1552_v2, 5  ;;  %v8593_v13 = vcombine.low %v1517_v6, %v1527_v55  ;;  %v1537_v40 = vsel %vm7722_vm4, %v1532_v31, %v1536_v47  ;;  %v1562_v21 = vshrl.u32 %v287_v62, 16  ;;  %v290_v6 = vld [vmem:[%s7703_s23 + $0x240] sm:$0x1] }
 0x106   : > { %v1560_v0 = vrot.slane %v1558_v35, 5  ;;  %v1547_v60 = vsel %vm7722_vm4, %v1542_v5, %v1546_v57  ;;  %v8599_v12 = vcombine.low %v286_v15, %v287_v62  ;;  %v8602_v53 = vadd.f32 %v8519_v45, %v7065_v4  ;;  %v8604_v50 = vpop.f32.mrf.mxu1  ;;  %v7069_v55 = vpop.f32.mrf.mxu0  ;;  %v291_v57 = vld [vmem:[%s7703_s23 + $0x244] sm:$0xf] }
 0x107   : > { %9930 = vst [vmem:[#allocation99_spill] sm:$0xff] %v8593_v13  ;;  %v1572_v9 = vshrl.u32 %v288_v8, 16  ;;  %7158 = vmatprep.mubr.msk.bf16.mxu0 %vm1924_vm1, %v8593_v13  ;;  %v8608_v2 = vcombine.low %v1537_v40, %v1547_v60  ;;  %v1564_v47 = vrot.slane %v1562_v21, 4  ;;  %v1578_v35 = vshll.u32 %v289_v11, 16 }
 0x108   : > { %9931 = vst [vmem:[#allocation100_spill] sm:$0xff] %v8599_v12  ;;  %9932 = vst [vmem:[#allocation101_spill] sm:$0xff] %v8602_v53  ;;  %v1582_v31 = vshrl.u32 %v289_v11, 16  ;;  %7292 = vmatprep.mubr.msk.bf16.mxu1 %vm1924_vm1, %v8599_v12  ;;  %v8613_v15 = vcombine.low %v288_v8, %v289_v11  ;;  %v8616_v45 = vadd.f32 %v8532_v59, %v2206_v20  ;;  %v1568_v62 = vshll.u32 %v288_v8, 16  ;;  %v8619_v5 = vpop.f32.mrf.mxu1  ;;  %v2222_v13 = vpop.f32.mrf.mxu0 }
 0x109   : > { %9933 = vst [vmem:[#allocation102_spill] sm:$0xff] %v8608_v2  ;;  %v1555_v4 = vor.u32 %v1554_v61, %v1551_v29  ;;  %7159 = vmatmul.mubr.msk.bf16.gmra.mxu0 %vm1924_vm1, %v8608_v2  ;;  %v1580_v40 = vrot.slane %v1578_v35, 5  ;;  %v1565_v60 = vor.u32 %v1564_v47, %v1560_v0  ;;  %v1574_v53 = vrot.slane %v1572_v9, 4  ;;  %v292_v61 = vld [vmem:[%s7703_s23 + $0x248] sm:$0xf] }
 0x10a   : > { %9934 = vst [vmem:[#allocation103_spill] sm:$0xff] %v8613_v15  ;;  %9935 = vst [vmem:[#allocation104_spill] sm:$0xff] %v8616_v45  ;;  %v1584_v21 = vrot.slane %v1582_v31, 4  ;;  %7293 = vmatmul.mubr.msk.bf16.gmra.mxu1 %vm1924_vm1, %v8613_v15  ;;  %v1570_v20 = vrot.slane %v1568_v62, 5  ;;  %v8626_v29 = vadd.f32 %v8540_v27, %v7068_v46  ;;  %v1588_v8 = vshll.u32 %v290_v6, 16 }
 0x10b   : > { %v1556_v59 = vrot.slane %v1555_v4, 4  ;;  %v1566_v11 = vrot.slane %v1565_v60, 4  ;;  %v8630_v35 = vadd.f32 %v8551_v56, %v2219_v28  ;;  %v1593_v47 = vshrl.u32 %v291_v57, 16  ;;  %v7072_v9 = vpop.f32.mrf.mxu0  ;;  %v8632_v31 = vpop.f32.mrf.mxu1  ;;  %v293_v46 = vld [vmem:[%s7703_s23 + $0x24c] sm:$0xf] }
 0x10c   : > { %9936 = vst [vmem:[#allocation105_spill] sm:$0xff] %v8626_v29  ;;  %v1585_v45 = vor.u32 %v1584_v21, %v1580_v40  ;;  %v1575_v4 = vor.u32 %v1574_v53, %v1570_v20  ;;  %v1590_v62 = vrot.slane %v1588_v8, 5  ;;  %v1596_v12 = vshll.u32 %v291_v57, 16  ;;  %v294_v29 = vld [vmem:[%s7703_s23 + $0x250] sm:$0xf] }
 0x10d   : > { %9937 = vst [vmem:[#allocation106_spill] sm:$0xff] %v8630_v35  ;;  %v1561_v15 = vsel %vm7722_vm4, %v1556_v59, %v1560_v0  ;;  %v1571_v27 = vsel %vm7722_vm4, %v1566_v11, %v1570_v20  ;;  %v1595_v60 = vrot.slane %v1593_v47, 4  ;;  %v1602_v21 = vshll.u32 %v292_v61, 16  ;;  %v2235_v56 = vpop.f32.mrf.mxu0  ;;  %v8640_v28 = vpop.f32.mrf.mxu1 }
 0x10e   : > { %v1586_v6 = vrot.slane %v1585_v45, 4  ;;  %v1576_v35 = vrot.slane %v1575_v4, 4  ;;  %v8642_v2 = vcombine.low %v1561_v15, %v1571_v27  ;;  %v1598_v18 = vrot.slane %v1596_v12, 5 }
 0x10f   : > { %v1606_v0 = vshrl.u32 %v292_v61, 16  ;;  %v1604_v59 = vrot.slane %v1602_v21, 5  ;;  %v8646_v8 = vcombine.low %v291_v57, %v292_v61  ;;  %v8649_v45 = vadd.f32 %v8565_v43, %v7069_v55  ;;  %v7073_v20 = vpop.f32.mrf.mxu0  ;;  %v8651_v11 = vpop.f32.mrf.mxu1 }
 0x110   : > { %9938 = vst [vmem:[#allocation107_spill] sm:$0xff] %v8642_v2  ;;  %v1591_v53 = vsel %vm7722_vm4, %v1586_v6, %v1590_v62  ;;  %7162 = vmatprep.mubr.msk.bf16.mxu0 %vm1924_vm1, %v8642_v2  ;;  %v1581_v15 = vsel %vm7722_vm4, %v1576_v35, %v1580_v40  ;;  %v1616_v47 = vshrl.u32 %v293_v46, 16  ;;  %v1622_v4 = vshll.u32 %v294_v29, 16  ;;  %v295_v62 = vld [vmem:[%s7703_s23 + $0x254] sm:$0x1] }
 0x111   : > { %9939 = vst [vmem:[#allocation108_spill] sm:$0xff] %v8646_v8  ;;  %9940 = vst [vmem:[#allocation109_spill] sm:$0xff] %v8649_v45  ;;  %v1608_v12 = vrot.slane %v1606_v0, 4  ;;  %v8658_v27 = vcombine.low %v1581_v15, %v1591_v53  ;;  %7296 = vmatprep.mubr.msk.bf16.mxu1 %vm1924_vm1, %v8646_v8  ;;  %v1626_v43 = vshrl.u32 %v294_v29, 16  ;;  %v8662_v55 = vcombine.low %v293_v46, %v294_v29  ;;  %v2238_v61 = vpop.f32.mrf.mxu0  ;;  %v8667_v6 = vpop.f32.mrf.mxu1  ;;  %v296_v45 = vld [vmem:[%s7703_s23 + $0x258] sm:$0xf] }
 0x112   : > { %v8665_v57 = vadd.f32 %v8578_v49, %v2222_v13  ;;  %v1624_v40 = vrot.slane %v1622_v4, 5  ;;  %v1599_v35 = vor.u32 %v1598_v18, %v1595_v60  ;;  %v1612_v0 = vshll.u32 %v293_v46, 16  ;;  %v297_v13 = vld [vmem:[%s7703_s23 + $0x25c] sm:$0xf] }
 0x113   : > { %9941 = vst [vmem:[#allocation110_spill] sm:$0xff] %v8658_v27  ;;  %9942 = vst [vmem:[#allocation111_spill] sm:$0xff] %v8662_v55  ;;  %v1609_v21 = vor.u32 %v1608_v12, %v1604_v59  ;;  %7163 = vmatmul.mubr.msk.bf16.gmra.mxu0 %vm1924_vm1, %v8658_v27  ;;  %v1628_v53 = vrot.slane %v1626_v43, 4  ;;  %7297 = vmatmul.mubr.msk.bf16.gmra.mxu1 %vm1924_vm1, %v8662_v55  ;;  %v1618_v29 = vrot.slane %v1616_v47, 4  ;;  %v1632_v49 = vshll.u32 %v295_v62, 16  ;;  %v7076_v4 = vpop.f32.mrf.mxu0 }
 0x114   : > { %9943 = vst [vmem:[#allocation112_spill] sm:$0xff] %v8665_v57  ;;  %v8675_v15 = vadd.f32 %v8583_v16, %v7072_v9  ;;  %v8678_v57 = vpop.f32.mrf.mxu1  ;;  %v1600_v18 = vrot.slane %v1599_v35, 4  ;;  %v1614_v60 = vrot.slane %v1612_v0, 5  ;;  %v8681_v12 = vadd.f32 %v8591_v25, %v2235_v56  ;;  %v299_v0 = vld [vmem:[%s7703_s23 + $0x264] sm:$0xf] }
 0x115   : > { %v1610_v46 = vrot.slane %v1609_v21, 4  ;;  %v1629_v43 = vor.u32 %v1628_v53, %v1624_v40  ;;  %v1634_v8 = vrot.slane %v1632_v49, 5  ;;  %v1637_v55 = vshrl.u32 %v296_v45, 16  ;;  %v298_v21 = vld [vmem:[%s7703_s23 + $0x260] sm:$0xf] }
 0x116   : > { %9944 = vst [vmem:[#allocation113_spill] sm:$0xff] %v8675_v15  ;;  %9945 = vst [vmem:[#allocation114_spill] sm:$0xff] %v8681_v12  ;;  %v1640_v47 = vshll.u32 %v296_v45, 16  ;;  %v8683_v27 = vpop.f32.mrf.mxu1  ;;  %v1605_v16 = vsel %vm7722_vm4, %v1600_v18, %v1604_v59  ;;  %v1619_v62 = vor.u32 %v1618_v29, %v1614_v60  ;;  %v1646_v35 = vshll.u32 %v297_v13, 16  ;;  %v2251_v15 = vpop.f32.mrf.mxu0 }
 0x117   : > { %v1615_v9 = vsel %vm7722_vm4, %v1610_v46, %v1614_v60  ;;  %v1630_v56 = vrot.slane %v1629_v43, 4  ;;  %v1639_v53 = vrot.slane %v1637_v55, 4  ;;  %v1650_v23 = vshrl.u32 %v297_v13, 16 }
 0x118   : > { %v8691_v25 = vcombine.low %v1605_v16, %v1615_v9  ;;  %v1642_v49 = vrot.slane %v1640_v47, 5  ;;  %v8693_v12 = vpop.f32.mrf.mxu1  ;;  %v1620_v2 = vrot.slane %v1619_v62, 4  ;;  %v1648_v42 = vrot.slane %v1646_v35, 5  ;;  %v7077_v18 = vpop.f32.mrf.mxu0 }
 0x119   : > { %v8695_v59 = vcombine.low %v296_v45, %v297_v13  ;;  %v1635_v29 = vsel %vm7722_vm4, %v1630_v56, %v1634_v8  ;;  %v8702_v46 = vadd.f32 %v8604_v50, %v7073_v20  ;;  %v1660_v55 = vshrl.u32 %v298_v21, 16  ;;  %v300_v8 = vld [vmem:[%s7703_s23 + $0x268] sm:$0x1]  ;;  %v301_v56 = vld [vmem:[%s7703_s23 + $0x26c] sm:$0xf] }
 0x11a   : > { %9946 = vst [vmem:[#allocation115_spill] sm:$0xff] %v8691_v25  ;;  %7166 = vmatprep.mubr.msk.bf16.mxu0 %vm1924_vm1, %v8691_v25  ;;  %v1666_v60 = vshll.u32 %v299_v0, 16  ;;  %v8704_v43 = vpop.f32.mrf.mxu1  ;;  %v1625_v47 = vsel %vm7722_vm4, %v1620_v2, %v1624_v40  ;;  %v1652_v45 = vrot.slane %v1650_v23, 4  ;;  %v1670_v13 = vshrl.u32 %v299_v0, 16  ;;  %v2254_v9 = vpop.f32.mrf.mxu0 }
 0x11b   : > { %9947 = vst [vmem:[#allocation116_spill] sm:$0xff] %v8695_v59  ;;  %9948 = vst [vmem:[#allocation117_spill] sm:$0xff] %v8702_v46  ;;  %7300 = vmatprep.mubr.msk.bf16.mxu1 %vm1924_vm1, %v8695_v59  ;;  %v8710_v16 = vcombine.low %v298_v21, %v299_v0  ;;  %v8713_v62 = vcombine.low %v1625_v47, %v1635_v29  ;;  %v8716_v20 = vadd.f32 %v8619_v5, %v2238_v61  ;;  %v302_v59 = vld [vmem:[%s7703_s23 + $0x270] sm:$0xf] }
 0x11c   : > { %v1668_v50 = vrot.slane %v1666_v60, 5  ;;  %v1643_v35 = vor.u32 %v1642_v49, %v1639_v53  ;;  %v1672_v46 = vrot.slane %v1670_v13, 4  ;;  %v1653_v23 = vor.u32 %v1652_v45, %v1648_v42  ;;  %v7080_v0 = vpop.f32.mrf.mxu0  ;;  %v8722_v25 = vpop.f32.mrf.mxu1 }
 0x11d   : > { %9949 = vst [vmem:[#allocation118_spill] sm:$0xff] %v8710_v16  ;;  %9950 = vst [vmem:[#allocation119_spill] sm:$0xff] %v8713_v62  ;;  %7301 = vmatmul.mubr.msk.bf16.gmra.mxu1 %vm1924_vm1, %v8710_v16  ;;  %v1656_v2 = vshll.u32 %v298_v21, 16  ;;  %v1662_v40 = vrot.slane %v1660_v55, 4  ;;  %7167 = vmatmul.mubr.msk.bf16.gmra.mxu0 %vm1924_vm1, %v8713_v62  ;;  %v8727_v5 = vadd.f32 %v8632_v31, %v7076_v4  ;;  %v1676_v61 = vshll.u32 %v300_v8, 16 }
 0x11e   : > { %9951 = vst [vmem:[#allocation120_spill] sm:$0xff] %v8716_v20  ;;  %v1644_v29 = vrot.slane %v1643_v35, 4  ;;  %v8730_v53 = vadd.f32 %v8640_v28, %v2251_v15  ;;  %v1654_v49 = vrot.slane %v1653_v23, 4  ;;  %v1673_v55 = vor.u32 %v1672_v46, %v1668_v50  ;;  %v2267_v47 = vpop.f32.mrf.mxu0  ;;  %v3348_v45 = vpop.f32.mrf.mxu1  ;;  %v303_v15 = vld [vmem:[%s7703_s23 + $0x274] sm:$0xf] }
 0x11f   : > { %9952 = vst [vmem:[#allocation121_spill] sm:$0xff] %v8727_v5  ;;  %v1658_v21 = vrot.slane %v1656_v2, 5  ;;  %v1681_v60 = vshrl.u32 %v301_v56, 16  ;;  %v1678_v20 = vrot.slane %v1676_v61, 5  ;;  %v1684_v35 = vshll.u32 %v301_v56, 16 }
 0x120   : > { %9953 = vst [vmem:[#allocation122_spill] sm:$0xff] %v8730_v53  ;;  %v1649_v13 = vsel %vm7722_vm4, %v1644_v29, %v1648_v42  ;;  %v1690_v16 = vshll.u32 %v302_v59, 16  ;;  %v1674_v8 = vrot.slane %v1673_v55, 4  ;;  %v304_v53 = vld [vmem:[%s7703_s23 + $0x278] sm:$0xf]  ;;  %v7081_v23 = vpop.f32.mrf.mxu0  ;;  %v7215_v2 = vpop.f32.mrf.mxu1  ;;  %v1694_v39 = vshrl.u32 %v302_v59, 16 }
 0x121   : > { %v1659_v31 = vsel %vm7722_vm4, %v1654_v49, %v1658_v21  ;;  %v1663_v4 = vor.u32 %v1662_v40, %v1658_v21  ;;  %v1683_v28 = vrot.slane %v1681_v60, 4  ;;  %v1686_v5 = vrot.slane %v1684_v35, 5 }
 0x122   : > { %v8738_v46 = vcombine.low %v1649_v13, %v1659_v31  ;;  %v1692_v62 = vrot.slane %v1690_v16, 5  ;;  %v1679_v42 = vsel %vm7722_vm4, %v1674_v8, %v1678_v20  ;;  %v8742_v29 = vcombine.low %v301_v56, %v302_v59  ;;  %v2270_v61 = vpop.f32.mrf.mxu0  ;;  %v3351_v49 = vpop.f32.mrf.mxu1  ;;  %v305_v20 = vld [vmem:[%s7703_s23 + $0x27c] sm:$0x1] }
 0x123   : > { %v1664_v26 = vrot.slane %v1663_v4, 4  ;;  %v8745_v40 = vadd.f32 %v8651_v11, %v7077_v18  ;;  %v1696_v21 = vrot.slane %v1694_v39, 4  ;;  %v1704_v55 = vshrl.u32 %v303_v15, 16 }
 0x124   : > { %7170 = vmatprep.mubr.msk.bf16.mxu0 %vm1924_vm1, %v8738_v46  ;;  %v1710_v60 = vshll.u32 %v304_v53, 16  ;;  %v1714_v16 = vshrl.u32 %v304_v53, 16  ;;  %7304 = vmatprep.mubr.msk.bf16.mxu1 %vm1924_vm1, %v8742_v29  ;;  %v8753_v59 = vcombine.low %v303_v15, %v304_v53  ;;  %v8756_v11 = vadd.f32 %v8667_v6, %v2254_v9  ;;  %v7218_v56 = vpop.f32.mrf.mxu1 }
 0x125   : > { %9954 = vst [vmem:[#allocation123_spill] sm:$0xff] %v8745_v40  ;;  %v1669_v13 = vsel %vm7722_vm4, %v1664_v26, %v1668_v50  ;;  %v1687_v18 = vor.u32 %v1686_v5, %v1683_v28  ;;  %v1697_v4 = vor.u32 %v1696_v21, %v1692_v62  ;;  %v7084_v8 = vpop.f32.mrf.mxu0  ;;  %v1700_v50 = vshll.u32 %v303_v15, 16 }
 0x126   : > { %v8759_v35 = vcombine.low %v1669_v13, %v1679_v42  ;;  %v1712_v39 = vrot.slane %v1710_v60, 5  ;;  %v1716_v31 = vrot.slane %v1714_v16, 4  ;;  %7305 = vmatmul.mubr.msk.bf16.gmra.mxu1 %vm1924_vm1, %v8753_v59  ;;  %v1706_v40 = vrot.slane %v1704_v55, 4  ;;  %v3364_v6 = vpop.f32.mrf.mxu1 }
 0x127   : > { %v1688_v26 = vrot.slane %v1687_v18, 4  ;;  %v8764_v53 = vadd.f32 %v8678_v57, %v7080_v0  ;;  %v1698_v9 = vrot.slane %v1697_v4, 4  ;;  %v1720_v28 = vshll.u32 %v305_v20, 16  ;;  %7440 = vmatprep.mubr.msk.bf16.mxu1 %vm1924_vm1, %v7756_v30  ;;  %v2283_v21 = vpop.f32.mrf.mxu0 }
 0x128   : > { %7171 = vmatmul.mubr.msk.bf16.gmra.mxu0 %vm1924_vm1, %v8759_v35  ;;  %v1717_v5 = vor.u32 %v1716_v31, %v1712_v39  ;;  %v8769_v42 = vadd.f32 %v8683_v27, %v2267_v47  ;;  %v1702_v55 = vrot.slane %v1700_v50, 5  ;;  %v8776_v57 = vadd.f32 %v8693_v12, %v7081_v23  ;;  %v7219_v60 = vpop.f32.mrf.mxu1 }
 0x129   : > { %v1693_v15 = vsel %vm7722_vm4, %v1688_v26, %v1692_v62  ;;  %v8779_v0 = vadd.f32 %v8704_v43, %v2270_v61  ;;  %v1722_v13 = vrot.slane %v1720_v28, 5  ;;  %v8782_v27 = vadd.f32 %v8722_v25, %v7084_v8  ;;  %v7085_v30 = vpop.f32.mrf.mxu0 }
 0x12a   : > { %v1718_v16 = vrot.slane %v1717_v5, 4  ;;  %v8784_v47 = vadd.f32 %v3348_v45, %v2283_v21  ;;  %v1703_v18 = vsel %vm7722_vm4, %v1698_v9, %v1702_v55  ;;  %v1707_v62 = vor.u32 %v1706_v40, %v1702_v55  ;;  %v3367_v12 = vpop.f32.mrf.mxu1 }
 0x12b   : > { %v8788_v20 = vadd.f32 %v7215_v2, %v7085_v30  ;;  %v8790_v23 = vcombine.low %v1693_v15, %v1703_v18  ;;  %v2286_v43 = vpop.f32.mrf.mxu0 }
 0x12c   : > { %v1708_v61 = vrot.slane %v1707_v62, 4  ;;  %v1723_v31 = vsel %vm7722_vm4, %v1718_v16, %v1722_v13  ;;  %v8794_v4 = vadd.f32 %v3351_v49, %v2286_v43 }
 0x12d   : > { %7174 = vmatprep.mubr.msk.bf16.mxu0 %vm1924_vm1, %v8790_v23  ;;  %v7088_v25 = vpop.f32.mrf.mxu0  ;;  %v7222_v45 = vpop.f32.mrf.mxu1 }
 0x12e   : > { %v1713_v40 = vsel %vm7722_vm4, %v1708_v61, %v1712_v39  ;;  %7441 = vmatmul.mubr.msk.bf16.vlgmr.msra.gmra.mxu1 %vm1924_vm1, %v7768_v41  ;;  %v8802_v2 = vadd.f32 %v7218_v56, %v7088_v25 }
 0x12f   : > { %v8804_v8 = vcombine.low %v1713_v40, %v1723_v31  ;;  %7444 = vmatprep.mubr.msk.bf16.mxu1 %vm1924_vm1, %v7785_v7  ;;  %v2299_v49 = vpop.f32.mrf.mxu0  ;;  %v3380_v26 = vpop.f32.mrf.mxu1 }
 0x130   : > { %v8808_v50 = vadd.f32 %v3364_v6, %v2299_v49 }
 0x131   : > { %7175 = vmatmul.mubr.msk.bf16.gmra.mxu0 %vm1924_vm1, %v8804_v8  ;;  %v7089_v9 = vpop.f32.mrf.mxu0  ;;  %v7223_v5 = vpop.f32.mrf.mxu1 }
 0x132   : > { %7310 = vmatprep.mubr.msk.bf16.mxu0 %vm1924_vm1, %v7734_v58  ;;  %v8814_v41 = vadd.f32 %v7219_v60, %v7089_v9 }
 0x133   : > { %v2302_v56 = vpop.f32.mrf.mxu0  ;;  %v3383_v39 = vpop.f32.mrf.mxu1 }
 0x134   : > { %v8816_v28 = vadd.f32 %v3367_v12, %v2302_v56 }
 0x135   : > { %v7226_v21 = vpop.f32.mrf.mxu1 }
 0x136   : > { %7445 = vmatmul.mubr.msk.bf16.gmra.mxu1 %vm1924_vm1, %v7802_v22  ;;  %v7092_v7 = vpop.f32.mrf.mxu0 }
 0x137   : > { %7448 = vmatprep.mubr.msk.bf16.mxu1 %vm1924_vm1, %v7814_v52  ;;  %v8822_v6 = vadd.f32 %v7222_v45, %v7092_v7  ;;  %v3396_v15 = vpop.f32.mrf.mxu1 }
 0x138   : > { %v2315_v55 = vpop.f32.mrf.mxu0 }
 0x139   : > { %7311 = vmatmul.mubr.msk.bf16.vlgmr.msra.gmra.mxu0 %vm1924_vm1, %v7740_v1  ;;  %v8826_v58 = vadd.f32 %v3380_v26, %v2315_v55  ;;  %v7227_v60 = vpop.f32.mrf.mxu1 }
 0x13a   : > { %7314 = vmatprep.mubr.msk.bf16.mxu0 %vm1924_vm1, %v7760_v32  ;;  %v7093_v16 = vpop.f32.mrf.mxu0 }
 0x13b   : > { %v8830_v13 = vadd.f32 %v7223_v5, %v7093_v16  ;;  %v3399_v22 = vpop.f32.mrf.mxu1 }
 0x13c   : > { %v2318_v30 = vpop.f32.mrf.mxu0 }
 0x13d   : > { %v8832_v18 = vadd.f32 %v3383_v39, %v2318_v30 }
 0x13e   : > { %7449 = vmatmul.mubr.msk.bf16.gmra.mxu1 %vm1924_vm1, %v7826_v63  ;;  %v7096_v52 = vpop.f32.mrf.mxu0  ;;  %v7230_v62 = vpop.f32.mrf.mxu1 }
 0x13f   : > { %7452 = vmatprep.mubr.msk.bf16.mxu1 %vm1924_vm1, %v7843_v33  ;;  %v8838_v1 = vadd.f32 %v7226_v21, %v7096_v52 }
 0x140   : > { %v2331_v12 = vpop.f32.mrf.mxu0  ;;  %v3412_v43 = vpop.f32.mrf.mxu1 }
 0x141   : > { %7315 = vmatmul.mubr.msk.bf16.gmra.mxu0 %vm1924_vm1, %v7772_v44  ;;  %v8842_v32 = vadd.f32 %v3396_v15, %v2331_v12 }
 0x142   : > { %7318 = vmatprep.mubr.msk.bf16.mxu0 %vm1924_vm1, %v7787_v10  ;;  %v7097_v61 = vpop.f32.mrf.mxu0  ;;  %v7231_v31 = vpop.f32.mrf.mxu1 }
 0x143   : > { %v8846_v63 = vadd.f32 %v7227_v60, %v7097_v61 }
 0x144   : > { %v2334_v25 = vpop.f32.mrf.mxu0  ;;  %v3415_v45 = vpop.f32.mrf.mxu1 }
 0x145   : > { %9955 = vst [vmem:[#allocation124_spill] sm:$0xff] %v8846_v63  ;;  %v8848_v40 = vadd.f32 %v3399_v22, %v2334_v25 }
 0x146   : > { %7453 = vmatmul.mubr.msk.bf16.gmra.mxu1 %vm1924_vm1, %v7860_v51  ;;  %v7234_v33 = vpop.f32.mrf.mxu1 }
 0x147   : > { %9956 = vst [vmem:[#allocation125_spill] sm:$0xff] %v8848_v40  ;;  %7456 = vmatprep.mubr.msk.bf16.mxu1 %vm1924_vm1, %v7872_v24  ;;  %v7100_v44 = vpop.f32.mrf.mxu0 }
 0x148   : > { %v8854_v49 = vadd.f32 %v7230_v62, %v7100_v44  ;;  %v3428_v26 = vpop.f32.mrf.mxu1 }
 0x149   : > { %7319 = vmatmul.mubr.msk.bf16.gmra.mxu0 %vm1924_vm1, %v7798_v19  ;;  %v2347_v10 = vpop.f32.mrf.mxu0 }
 0x14a   : > { %9957 = vst [vmem:[#allocation126_spill] sm:$0xff] %v8854_v49  ;;  %7322 = vmatprep.mubr.msk.bf16.mxu0 %vm1924_vm1, %v7818_v54  ;;  %v8860_v9 = vadd.f32 %v3412_v43, %v2347_v10  ;;  %v7235_v5 = vpop.f32.mrf.mxu1  ;;  %v9966_v43 = vld [vmem:[#allocation2_spill] sm:$0xff] }
 0x14b   : > { %v7101_v56 = vpop.f32.mrf.mxu0 }
 0x14c   : > { %9958 = vst [vmem:[#allocation127_spill] sm:$0xff] %v8860_v9  ;;  %v8862_v51 = vadd.f32 %v7231_v31, %v7101_v56  ;;  %v3431_v39 = vpop.f32.mrf.mxu1  ;;  %v9972_v56 = vld [vmem:[#allocation3_spill] sm:$0xff] }
 0x14d   : > { %v2350_v21 = vpop.f32.mrf.mxu0 }
 0x14e   : > { %9959 = vst [vmem:[#allocation128_spill] sm:$0xff] %v8862_v51  ;;  %7457 = vmatmul.mubr.msk.bf16.gmra.mxu1 %vm1924_vm1, %v7884_v38  ;;  %v8866_v24 = vadd.f32 %v3415_v45, %v2350_v21  ;;  %v9974_v21 = vld [vmem:[#allocation4_spill] sm:$0xff] }
 0x14f   : > { %7460 = vmatprep.mubr.msk.bf16.mxu1 %vm1924_vm1, %v7901_v14  ;;  %v7104_v19 = vpop.f32.mrf.mxu0  ;;  %v7238_v7 = vpop.f32.mrf.mxu1 }
 0x150   : > { %9960 = vst [vmem:[#allocation129_spill] sm:$0xff] %v8866_v24  ;;  %v8870_v15 = vadd.f32 %v7234_v33, %v7104_v19 }
 0x151   : > { %7323 = vmatmul.mubr.msk.bf16.gmra.mxu0 %vm1924_vm1, %v7830_v3  ;;  %v2363_v54 = vpop.f32.mrf.mxu0  ;;  %v3444_v55 = vpop.f32.mrf.mxu1 }
 0x152   : > { %9961 = vst [vmem:[#allocation130_spill] sm:$0xff] %v8870_v15  ;;  %7326 = vmatprep.mubr.msk.bf16.mxu0 %vm1924_vm1, %v7845_v37  ;;  %v8876_v60 = vadd.f32 %v3428_v26, %v2363_v54  ;;  %v9970_v26 = vld [vmem:[#allocation9_spill] sm:$0xff] }
 0x153   : > { %v7105_v38 = vpop.f32.mrf.mxu0  ;;  %v7239_v16 = vpop.f32.mrf.mxu1 }
 0x154   : > { %9962 = vst [vmem:[#allocation131_spill] sm:$0xff] %v8876_v60  ;;  %v8878_v22 = vadd.f32 %v7235_v5, %v7105_v38  ;;  %v10132_v60 = vld [vmem:[#allocation95_spill] sm:$0xff] }
 0x155   : > { %v2366_v30 = vpop.f32.mrf.mxu0  ;;  %v3447_v14 = vpop.f32.mrf.mxu1 }
 0x156   : > { %9963 = vst [vmem:[#allocation132_spill] sm:$0xff] %v8878_v22  ;;  %7461 = vmatmul.mubr.msk.bf16.gmra.mxu1 %vm1924_vm1, %v7918_v36  ;;  %v8882_v52 = vadd.f32 %v3431_v39, %v2366_v30  ;;  %v9977_v30 = vld [vmem:[#allocation12_spill] sm:$0xff] }
 0x157   : > { %7464 = vmatprep.mubr.msk.bf16.mxu1 %vm1924_vm1, %v7930_v17  ;;  %v7242_v3 = vpop.f32.mrf.mxu1  ;;  %v9969_v17 = vld [vmem:[#allocation7_spill] sm:$0xff] }
 0x158   : > { %9964 = vst [vmem:[#allocation133_spill] sm:$0xff] %v8882_v52  ;;  %v7108_v62 = vpop.f32.mrf.mxu0 }
 0x159   : > { %7327 = vmatmul.mubr.msk.bf16.gmra.mxu0 %vm1924_vm1, %v7856_v48  ;;  %v8888_v37 = vadd.f32 %v7238_v7, %v7108_v62  ;;  %v3460_v12 = vpop.f32.mrf.mxu1 }
 0x15a   : > { %7330 = vmatprep.mubr.msk.bf16.mxu0 %vm1924_vm1, %v9966_v43  ;;  %v2379_v61 = vpop.f32.mrf.mxu0  ;;  %v9978_v43 = vld [vmem:[#allocation13_spill] sm:$0xff] }
 0x15b   : > { %9965 = vst [vmem:[#allocation134_spill] sm:$0xff] %v8888_v37  ;;  %v8892_v31 = vadd.f32 %v3444_v55, %v2379_v61  ;;  %v7243_v36 = vpop.f32.mrf.mxu1 }
 0x15c   : > { %v7109_v25 = vpop.f32.mrf.mxu0 }
 0x15d   : > { %9967 = vst [vmem:[#allocation2_spill] sm:$0xff] %v8892_v31  ;;  %v8894_v45 = vadd.f32 %v7239_v16, %v7109_v25  ;;  %v3463_v33 = vpop.f32.mrf.mxu1  ;;  %v9980_v25 = vld [vmem:[#allocation5_spill] sm:$0xff] }
 0x15e   : > { %7465 = vmatmul.mubr.msk.bf16.gmra.mxu1 %vm1924_vm1, %v9969_v17  ;;  %v2382_v44 = vpop.f32.mrf.mxu0  ;;  %v9981_v17 = vld [vmem:[#allocation6_spill] sm:$0xff] }
 0x15f   : > { %9968 = vst [vmem:[#allocation135_spill] sm:$0xff] %v8894_v45  ;;  %7468 = vmatprep.mubr.msk.bf16.mxu1 %vm1924_vm1, %v9970_v26  ;;  %v8900_v48 = vadd.f32 %v3447_v14, %v2382_v44 }
 0x160   : > { %v7112_v10 = vpop.f32.mrf.mxu0  ;;  %v7246_v5 = vpop.f32.mrf.mxu1 }
 0x161   : > { %9971 = vst [vmem:[#allocation7_spill] sm:$0xff] %v8900_v48  ;;  %7331 = vmatmul.mubr.msk.bf16.gmra.mxu0 %vm1924_vm1, %v9972_v56  ;;  %v8904_v39 = vadd.f32 %v7242_v3, %v7112_v10 }
 0x162   : > { %7334 = vmatprep.mubr.msk.bf16.mxu0 %vm1924_vm1, %v9974_v21  ;;  %v2395_v19 = vpop.f32.mrf.mxu0  ;;  %v3476_v7 = vpop.f32.mrf.mxu1 }
 0x163   : > { %9973 = vst [vmem:[#allocation9_spill] sm:$0xff] %v8904_v39  ;;  %v8908_v54 = vadd.f32 %v3460_v12, %v2395_v19  ;;  %v9984_v19 = vld [vmem:[#allocation15_spill] sm:$0xff] }
 0x164   : > { %v7113_v55 = vpop.f32.mrf.mxu0  ;;  %v7247_v38 = vpop.f32.mrf.mxu1 }
 0x165   : > { %9975 = vst [vmem:[#allocation3_spill] sm:$0xff] %v8908_v54  ;;  %v8910_v16 = vadd.f32 %v7243_v36, %v7113_v55  ;;  %v10121_v54 = vld [vmem:[#allocation102_spill] sm:$0xff] }
 0x166   : > { %7469 = vmatmul.mubr.msk.bf16.gmra.mxu1 %vm1924_vm1, %v9977_v30  ;;  %v2398_v14 = vpop.f32.mrf.mxu0  ;;  %v3479_v62 = vpop.f32.mrf.mxu1  ;;  %v9986_v30 = vld [vmem:[#allocation17_spill] sm:$0xff] }
 0x167   : > { %9976 = vst [vmem:[#allocation4_spill] sm:$0xff] %v8910_v16  ;;  %7472 = vmatprep.mubr.msk.bf16.mxu1 %vm1924_vm1, %v9978_v43  ;;  %v8916_v3 = vadd.f32 %v3463_v33, %v2398_v14 }
 0x168   : > { %v7250_v61 = vpop.f32.mrf.mxu1 }
 0x169   : > { %9979 = vst [vmem:[#allocation12_spill] sm:$0xff] %v8916_v3  ;;  %7335 = vmatmul.mubr.msk.bf16.gmra.mxu0 %vm1924_vm1, %v9980_v25  ;;  %v7116_v12 = vpop.f32.mrf.mxu0 }
 0x16a   : > { %7338 = vmatprep.mubr.msk.bf16.mxu0 %vm1924_vm1, %v9981_v17  ;;  %v8922_v36 = vadd.f32 %v7246_v5, %v7116_v12  ;;  %v3492_v44 = vpop.f32.mrf.mxu1  ;;  %v9988_v5 = vld [vmem:[#allocation8_spill] sm:$0xff]  ;;  %v9989_v12 = vld [vmem:[#allocation10_spill] sm:$0xff] }
 0x16b   : > { %v2411_v26 = vpop.f32.mrf.mxu0 }
 0x16c   : > { %9982 = vst [vmem:[#allocation13_spill] sm:$0xff] %v8922_v36  ;;  %v8924_v10 = vadd.f32 %v3476_v7, %v2411_v26  ;;  %v7251_v56 = vpop.f32.mrf.mxu1 }
 0x16d   : > { %v7117_v21 = vpop.f32.mrf.mxu0 }
 0x16e   : > { %9983 = vst [vmem:[#allocation5_spill] sm:$0xff] %v8924_v10  ;;  %7473 = vmatmul.mubr.msk.bf16.gmra.mxu1 %vm1924_vm1, %v9984_v19  ;;  %v8928_v33 = vadd.f32 %v7247_v38, %v7117_v21  ;;  %v3495_v55 = vpop.f32.mrf.mxu1 }
 0x16f   : > { %7476 = vmatprep.mubr.msk.bf16.mxu1 %vm1924_vm1, %v9986_v30  ;;  %v2414_v14 = vpop.f32.mrf.mxu0  ;;  %v9992_v30 = vld [vmem:[#allocation20_spill] sm:$0xff] }
 0x170   : > { %9985 = vst [vmem:[#allocation6_spill] sm:$0xff] %v8928_v33  ;;  %v8932_v43 = vadd.f32 %v3479_v62, %v2414_v14  ;;  %v9994_v14 = vld [vmem:[#allocation21_spill] sm:$0xff] }
 0x171   : > { %7339 = vmatmul.mubr.msk.bf16.gmra.mxu0 %vm1924_vm1, %v9988_v5  ;;  %v7120_v25 = vpop.f32.mrf.mxu0  ;;  %v7254_v7 = vpop.f32.mrf.mxu1 }
 0x172   : > { %9987 = vst [vmem:[#allocation15_spill] sm:$0xff] %v8932_v43  ;;  %7342 = vmatprep.mubr.msk.bf16.mxu0 %vm1924_vm1, %v9989_v12  ;;  %v8938_v17 = vadd.f32 %v7250_v61, %v7120_v25  ;;  %v9996_v61 = vld [vmem:[#allocation11_spill] sm:$0xff] }
 0x173   : > { %v2427_v26 = vpop.f32.mrf.mxu0  ;;  %v3508_v38 = vpop.f32.mrf.mxu1 }
 0x174   : > { %9990 = vst [vmem:[#allocation17_spill] sm:$0xff] %v8938_v17  ;;  %v8940_v21 = vadd.f32 %v3492_v44, %v2427_v26  ;;  %v9997_v44 = vld [vmem:[#allocation14_spill] sm:$0xff] }
 0x175   : > { %v7121_v19 = vpop.f32.mrf.mxu0  ;;  %v7255_v33 = vpop.f32.mrf.mxu1 }
 0x176   : > { %9991 = vst [vmem:[#allocation8_spill] sm:$0xff] %v8940_v21  ;;  %7477 = vmatmul.mubr.msk.bf16.gmra.mxu1 %vm1924_vm1, %v9992_v30  ;;  %v8944_v62 = vadd.f32 %v7251_v56, %v7121_v19 }
 0x177   : > { %7480 = vmatprep.mubr.msk.bf16.mxu1 %vm1924_vm1, %v9994_v14  ;;  %v2430_v5 = vpop.f32.mrf.mxu0  ;;  %v3511_v43 = vpop.f32.mrf.mxu1  ;;  %v10000_v14 = vld [vmem:[#allocation23_spill] sm:$0xff] }
 0x178   : > { %9993 = vst [vmem:[#allocation10_spill] sm:$0xff] %v8944_v62  ;;  %v8948_v10 = vadd.f32 %v3495_v55, %v2430_v5  ;;  %v10001_v5 = vld [vmem:[#allocation25_spill] sm:$0xff] }
 0x179   : > { %7343 = vmatmul.mubr.msk.bf16.gmra.mxu0 %vm1924_vm1, %v9996_v61  ;;  %v7258_v25 = vpop.f32.mrf.mxu1 }
 0x17a   : > { %9995 = vst [vmem:[#allocation20_spill] sm:$0xff] %v8948_v10  ;;  %7346 = vmatprep.mubr.msk.bf16.mxu0 %vm1924_vm1, %v9997_v44  ;;  %v7124_v12 = vpop.f32.mrf.mxu0  ;;  %v10003_v44 = vld [vmem:[#allocation16_spill] sm:$0xff] }
 0x17b   : > { %v8954_v26 = vadd.f32 %v7254_v7, %v7124_v12  ;;  %v3524_v30 = vpop.f32.mrf.mxu1  ;;  %v10005_v12 = vld [vmem:[#allocation18_spill] sm:$0xff] }
 0x17c   : > { %v2443_v56 = vpop.f32.mrf.mxu0 }
 0x17d   : > { %9998 = vst [vmem:[#allocation21_spill] sm:$0xff] %v8954_v26  ;;  %v8956_v19 = vadd.f32 %v3508_v38, %v2443_v56  ;;  %v7259_v62 = vpop.f32.mrf.mxu1 }
 0x17e   : > { %7481 = vmatmul.mubr.msk.bf16.gmra.mxu1 %vm1924_vm1, %v10000_v14  ;;  %v7125_v55 = vpop.f32.mrf.mxu0 }
 0x17f   : > { %9999 = vst [vmem:[#allocation11_spill] sm:$0xff] %v8956_v19  ;;  %7484 = vmatprep.mubr.msk.bf16.mxu1 %vm1924_vm1, %v10001_v5  ;;  %v8962_v61 = vadd.f32 %v7255_v33, %v7125_v55  ;;  %v3527_v10 = vpop.f32.mrf.mxu1  ;;  %v10008_v33 = vld [vmem:[#allocation28_spill] sm:$0xff] }
 0x180   : > { %v2446_v21 = vpop.f32.mrf.mxu0 }
 0x181   : > { %10002 = vst [vmem:[#allocation14_spill] sm:$0xff] %v8962_v61  ;;  %7347 = vmatmul.mubr.msk.bf16.gmra.mxu0 %vm1924_vm1, %v10003_v44  ;;  %v8966_v7 = vadd.f32 %v3511_v43, %v2446_v21  ;;  %v10009_v61 = vld [vmem:[#allocation29_spill] sm:$0xff] }
 0x182   : > { %7350 = vmatprep.mubr.msk.bf16.mxu0 %vm1924_vm1, %v10005_v12  ;;  %v7128_v38 = vpop.f32.mrf.mxu0  ;;  %v7262_v56 = vpop.f32.mrf.mxu1  ;;  %v10011_v12 = vld [vmem:[#allocation19_spill] sm:$0xff] }
 0x183   : > { %10004 = vst [vmem:[#allocation23_spill] sm:$0xff] %v8966_v7  ;;  %v8970_v19 = vadd.f32 %v7258_v25, %v7128_v38  ;;  %v10013_v38 = vld [vmem:[#allocation22_spill] sm:$0xff]  ;;  %v10015_v7 = vld [vmem:[#allocation31_spill] sm:$0xff] }
 0x184   : > { %v2459_v14 = vpop.f32.mrf.mxu0  ;;  %v3540_v26 = vpop.f32.mrf.mxu1 }
 0x185   : > { %10006 = vst [vmem:[#allocation25_spill] sm:$0xff] %v8970_v19  ;;  %v8972_v17 = vadd.f32 %v3524_v30, %v2459_v14 }
 0x186   : > { %7485 = vmatmul.mubr.msk.bf16.gmra.mxu1 %vm1924_vm1, %v10008_v33  ;;  %v7129_v55 = vpop.f32.mrf.mxu0  ;;  %v7263_v5 = vpop.f32.mrf.mxu1 }
 0x187   : > { %10007 = vst [vmem:[#allocation16_spill] sm:$0xff] %v8972_v17  ;;  %7488 = vmatprep.mubr.msk.bf16.mxu1 %vm1924_vm1, %v10009_v61  ;;  %v8978_v43 = vadd.f32 %v7259_v62, %v7129_v55  ;;  %v10017_v55 = vld [vmem:[#allocation33_spill] sm:$0xff] }
 0x188   : > { %v2462_v21 = vpop.f32.mrf.mxu0  ;;  %v3543_v44 = vpop.f32.mrf.mxu1 }
 0x189   : > { %10010 = vst [vmem:[#allocation18_spill] sm:$0xff] %v8978_v43  ;;  %7351 = vmatmul.mubr.msk.bf16.gmra.mxu0 %vm1924_vm1, %v10011_v12  ;;  %v8982_v25 = vadd.f32 %v3527_v10, %v2462_v21 }
 0x18a   : > { %7354 = vmatprep.mubr.msk.bf16.mxu0 %vm1924_vm1, %v10013_v38  ;;  %v7266_v30 = vpop.f32.mrf.mxu1  ;;  %v10019_v38 = vld [vmem:[#allocation24_spill] sm:$0xff] }
 0x18b   : > { %10012 = vst [vmem:[#allocation28_spill] sm:$0xff] %v8982_v25  ;;  %v7132_v14 = vpop.f32.mrf.mxu0 }
 0x18c   : > { %v8986_v33 = vadd.f32 %v7262_v56, %v7132_v14  ;;  %v3556_v17 = vpop.f32.mrf.mxu1  ;;  %v10020_v14 = vld [vmem:[#allocation26_spill] sm:$0xff] }
 0x18d   : > { %v2475_v19 = vpop.f32.mrf.mxu0 }
 0x18e   : > { %10014 = vst [vmem:[#allocation29_spill] sm:$0xff] %v8986_v33  ;;  %7489 = vmatmul.mubr.msk.bf16.gmra.mxu1 %vm1924_vm1, %v10015_v7  ;;  %v8990_v62 = vadd.f32 %v3540_v26, %v2475_v19  ;;  %v7267_v61 = vpop.f32.mrf.mxu1 }
 0x18f   : > { %7492 = vmatprep.mubr.msk.bf16.mxu1 %vm1924_vm1, %v10017_v55  ;;  %v7133_v10 = vpop.f32.mrf.mxu0  ;;  %v10023_v55 = vld [vmem:[#allocation36_spill] sm:$0xff] }
 0x190   : > { %10016 = vst [vmem:[#allocation19_spill] sm:$0xff] %v8990_v62  ;;  %v8994_v21 = vadd.f32 %v7263_v5, %v7133_v10  ;;  %v3559_v12 = vpop.f32.mrf.mxu1  ;;  %v10025_v10 = vld [vmem:[#allocation37_spill] sm:$0xff] }
 0x191   : > { %7355 = vmatmul.mubr.msk.bf16.gmra.mxu0 %vm1924_vm1, %v10019_v38  ;;  %v2478_v56 = vpop.f32.mrf.mxu0 }
 0x192   : > { %10018 = vst [vmem:[#allocation22_spill] sm:$0xff] %v8994_v21  ;;  %7358 = vmatprep.mubr.msk.bf16.mxu0 %vm1924_vm1, %v10020_v14  ;;  %v9000_v33 = vadd.f32 %v3543_v44, %v2478_v56  ;;  %v10027_v44 = vld [vmem:[#allocation27_spill] sm:$0xff]  ;;  %v10028_v14 = vld [vmem:[#allocation30_spill] sm:$0xff] }
 0x193   : > { %v7136_v7 = vpop.f32.mrf.mxu0  ;;  %v7270_v26 = vpop.f32.mrf.mxu1 }
 0x194   : > { %10021 = vst [vmem:[#allocation31_spill] sm:$0xff] %v9000_v33  ;;  %v9002_v19 = vadd.f32 %v7266_v30, %v7136_v7  ;;  %v10034_v33 = vld [vmem:[#allocation32_spill] sm:$0xff] }
 0x195   : > { %v2491_v62 = vpop.f32.mrf.mxu0  ;;  %v3572_v25 = vpop.f32.mrf.mxu1 }
 0x196   : > { %10022 = vst [vmem:[#allocation33_spill] sm:$0xff] %v9002_v19  ;;  %7493 = vmatmul.mubr.msk.bf16.gmra.mxu1 %vm1924_vm1, %v10023_v55  ;;  %v9006_v5 = vadd.f32 %v3556_v17, %v2491_v62 }
 0x197   : > { %7496 = vmatprep.mubr.msk.bf16.mxu1 %vm1924_vm1, %v10025_v10  ;;  %v7137_v38 = vpop.f32.mrf.mxu0  ;;  %v7271_v21 = vpop.f32.mrf.mxu1  ;;  %v10031_v10 = vld [vmem:[#allocation39_spill] sm:$0xff] }
 0x198   : > { %10024 = vst [vmem:[#allocation24_spill] sm:$0xff] %v9006_v5  ;;  %v9010_v43 = vadd.f32 %v7267_v61, %v7137_v38 }
 0x199   : > { %7359 = vmatmul.mubr.msk.bf16.gmra.mxu0 %vm1924_vm1, %v10027_v44  ;;  %v2494_v56 = vpop.f32.mrf.mxu0  ;;  %v3575_v30 = vpop.f32.mrf.mxu1 }
 0x19a   : > { %10026 = vst [vmem:[#allocation26_spill] sm:$0xff] %v9010_v43  ;;  %7362 = vmatprep.mubr.msk.bf16.mxu0 %vm1924_vm1, %v10028_v14  ;;  %v9016_v7 = vadd.f32 %v3559_v12, %v2494_v56  ;;  %v10033_v43 = vld [vmem:[#allocation41_spill] sm:$0xff] }
 0x19b   : > { %v7274_v55 = vpop.f32.mrf.mxu1 }
 0x19c   : > { %10029 = vst [vmem:[#allocation36_spill] sm:$0xff] %v9016_v7  ;;  %v7140_v17 = vpop.f32.mrf.mxu0 }
 0x19d   : > { %v9018_v62 = vadd.f32 %v7270_v26, %v7140_v17  ;;  %v3588_v5 = vpop.f32.mrf.mxu1  ;;  %v10036_v26 = vld [vmem:[#allocation34_spill] sm:$0xff] }
 0x19e   : > { %7497 = vmatmul.mubr.msk.bf16.gmra.mxu1 %vm1924_vm1, %v10031_v10  ;;  %v2507_v61 = vpop.f32.mrf.mxu0 }
 0x19f   : > { %10030 = vst [vmem:[#allocation37_spill] sm:$0xff] %v9018_v62  ;;  %v9022_v38 = vadd.f32 %v3572_v25, %v2507_v61  ;;  %7500 = vmatprep.mubr.msk.bf16.mxu1 %vm1924_vm1, %v10033_v43  ;;  %v7275_v44 = vpop.f32.mrf.mxu1 }
 0x1a0   : > { %v7141_v19 = vpop.f32.mrf.mxu0 }
 0x1a1   : > { %10032 = vst [vmem:[#allocation27_spill] sm:$0xff] %v9022_v38  ;;  %7363 = vmatmul.mubr.msk.bf16.gmra.mxu0 %vm1924_vm1, %v10034_v33  ;;  %v9028_v12 = vadd.f32 %v7271_v21, %v7141_v19  ;;  %v3591_v56 = vpop.f32.mrf.mxu1  ;;  %v10039_v38 = vld [vmem:[#allocation44_spill] sm:$0xff]  ;;  %v10041_v33 = vld [vmem:[#allocation45_spill] sm:$0xff] }
 0x1a2   : > { %7366 = vmatprep.mubr.msk.bf16.mxu0 %vm1924_vm1, %v10036_v26  ;;  %v2510_v14 = vpop.f32.mrf.mxu0  ;;  %v10042_v26 = vld [vmem:[#allocation35_spill] sm:$0xff] }
 0x1a3   : > { %10035 = vst [vmem:[#allocation30_spill] sm:$0xff] %v9028_v12  ;;  %v9032_v17 = vadd.f32 %v3575_v30, %v2510_v14  ;;  %v10044_v14 = vld [vmem:[#allocation38_spill] sm:$0xff] }
 0x1a4   : > { %v7144_v10 = vpop.f32.mrf.mxu0  ;;  %v7278_v25 = vpop.f32.mrf.mxu1 }
 0x1a5   : > { %10037 = vst [vmem:[#allocation39_spill] sm:$0xff] %v9032_v17  ;;  %v9034_v61 = vadd.f32 %v7274_v55, %v7144_v10  ;;  %v10048_v17 = vld [vmem:[#allocation49_spill] sm:$0xff] }
 0x1a6   : > { %7501 = vmatmul.mubr.msk.bf16.gmra.mxu1 %vm1924_vm1, %v10039_v38  ;;  %v2523_v43 = vpop.f32.mrf.mxu0  ;;  %v3604_v62 = vpop.f32.mrf.mxu1 }
 0x1a7   : > { %10038 = vst [vmem:[#allocation41_spill] sm:$0xff] %v9034_v61  ;;  %v9038_v7 = vadd.f32 %v3588_v5, %v2523_v43  ;;  %7504 = vmatprep.mubr.msk.bf16.mxu1 %vm1924_vm1, %v10041_v33  ;;  %v10046_v43 = vld [vmem:[#allocation47_spill] sm:$0xff] }
 0x1a8   : > { %v7145_v21 = vpop.f32.mrf.mxu0  ;;  %v7279_v19 = vpop.f32.mrf.mxu1 }
 0x1a9   : > { %10040 = vst [vmem:[#allocation32_spill] sm:$0xff] %v9038_v7  ;;  %7367 = vmatmul.mubr.msk.bf16.gmra.mxu0 %vm1924_vm1, %v10042_v26  ;;  %v9044_v30 = vadd.f32 %v7275_v44, %v7145_v21  ;;  %v10050_v26 = vld [vmem:[#allocation40_spill] sm:$0xff] }
 0x1aa   : > { %7370 = vmatprep.mubr.msk.bf16.mxu0 %vm1924_vm1, %v10044_v14  ;;  %v2526_v55 = vpop.f32.mrf.mxu0  ;;  %v3607_v10 = vpop.f32.mrf.mxu1 }
 0x1ab   : > { %10043 = vst [vmem:[#allocation34_spill] sm:$0xff] %v9044_v30  ;;  %v9048_v38 = vadd.f32 %v3591_v56, %v2526_v55  ;;  %v10051_v55 = vld [vmem:[#allocation42_spill] sm:$0xff]  ;;  %v10057_v30 = vld [vmem:[#allocation43_spill] sm:$0xff] }
 0x1ad   : > { %10045 = vst [vmem:[#allocation44_spill] sm:$0xff] %v9048_v38  ;;  %v7148_v61 = vpop.f32.mrf.mxu0  ;;  %v7282_v5 = vpop.f32.mrf.mxu1 }
 0x1ae   : > { %7505 = vmatmul.mubr.msk.bf16.gmra.mxu1 %vm1924_vm1, %v10046_v43  ;;  %v9052_v33 = vadd.f32 %v7278_v25, %v7148_v61 }
 0x1af   : > { %v2539_v7 = vpop.f32.mrf.mxu0  ;;  %7508 = vmatprep.mubr.msk.bf16.mxu1 %vm1924_vm1, %v10048_v17  ;;  %v3620_v44 = vpop.f32.mrf.mxu1 }
 0x1b0   : > { %10047 = vst [vmem:[#allocation45_spill] sm:$0xff] %v9052_v33  ;;  %v9056_v21 = vadd.f32 %v3604_v62, %v2539_v7  ;;  %v10054_v33 = vld [vmem:[#allocation52_spill] sm:$0xff]  ;;  %v10056_v62 = vld [vmem:[#allocation53_spill] sm:$0xff] }
 0x1b1   : > { %7371 = vmatmul.mubr.msk.bf16.gmra.mxu0 %vm1924_vm1, %v10050_v26  ;;  %v7149_v14 = vpop.f32.mrf.mxu0  ;;  %v7283_v56 = vpop.f32.mrf.mxu1 }
 0x1b2   : > { %10049 = vst [vmem:[#allocation35_spill] sm:$0xff] %v9056_v21  ;;  %7374 = vmatprep.mubr.msk.bf16.mxu0 %vm1924_vm1, %v10051_v55  ;;  %v9062_v38 = vadd.f32 %v7279_v19, %v7149_v14  ;;  %v10059_v55 = vld [vmem:[#allocation46_spill] sm:$0xff] }
 0x1b3   : > { %v2542_v43 = vpop.f32.mrf.mxu0  ;;  %v3623_v25 = vpop.f32.mrf.mxu1 }
 0x1b4   : > { %10052 = vst [vmem:[#allocation38_spill] sm:$0xff] %v9062_v38  ;;  %v9064_v61 = vadd.f32 %v3607_v10, %v2542_v43 }
 0x1b6   : > { %10053 = vst [vmem:[#allocation47_spill] sm:$0xff] %v9064_v61  ;;  %7509 = vmatmul.mubr.msk.bf16.gmra.mxu1 %vm1924_vm1, %v10054_v33  ;;  %v7152_v17 = vpop.f32.mrf.mxu0  ;;  %v10063_v61 = vld [vmem:[#allocation57_spill] sm:$0xff] }
 0x1b7   : > { %v9068_v7 = vadd.f32 %v7282_v5, %v7152_v17  ;;  %7512 = vmatprep.mubr.msk.bf16.mxu1 %vm1924_vm1, %v10056_v62  ;;  %v7286_v26 = vpop.f32.mrf.mxu1  ;;  %v10062_v62 = vld [vmem:[#allocation55_spill] sm:$0xff] }
 0x1b8   : > { %v2555_v21 = vpop.f32.mrf.mxu0 }
 0x1b9   : > { %10055 = vst [vmem:[#allocation49_spill] sm:$0xff] %v9068_v7  ;;  %7375 = vmatmul.mubr.msk.bf16.gmra.mxu0 %vm1924_vm1, %v10057_v30  ;;  %v9074_v19 = vadd.f32 %v3620_v44, %v2555_v21  ;;  %v3636_v14 = vpop.f32.mrf.mxu1  ;;  %v10064_v21 = vld [vmem:[#allocation48_spill] sm:$0xff] }
 0x1ba   : > { %7378 = vmatprep.mubr.msk.bf16.mxu0 %vm1924_vm1, %v10059_v55  ;;  %v7153_v10 = vpop.f32.mrf.mxu0 }
 0x1bb   : > { %10058 = vst [vmem:[#allocation40_spill] sm:$0xff] %v9074_v19  ;;  %v9078_v43 = vadd.f32 %v7283_v56, %v7153_v10  ;;  %v7287_v33 = vpop.f32.mrf.mxu1  ;;  %v10066_v56 = vld [vmem:[#allocation50_spill] sm:$0xff]  ;;  %v10069_v19 = vld [vmem:[#allocation60_spill] sm:$0xff] }
 0x1bc   : > { %v2558_v5 = vpop.f32.mrf.mxu0 }
 0x1bd   : > { %10060 = vst [vmem:[#allocation42_spill] sm:$0xff] %v9078_v43  ;;  %v9080_v17 = vadd.f32 %v3623_v25, %v2558_v5  ;;  %v3639_v7 = vpop.f32.mrf.mxu1 }
 0x1be   : > { %7513 = vmatmul.mubr.msk.bf16.gmra.mxu1 %vm1924_vm1, %v10062_v62 }
 0x1bf   : > { %10061 = vst [vmem:[#allocation52_spill] sm:$0xff] %v9080_v17  ;;  %7516 = vmatprep.mubr.msk.bf16.mxu1 %vm1924_vm1, %v10063_v61 }
 0x1c0   : > { %v7156_v30 = vpop.f32.mrf.mxu0 }
 0x1c1   : > { %v7290_v44 = vpop.f32.mrf.mxu1  ;;  %7379 = vmatmul.mubr.msk.bf16.gmra.mxu0 %vm1924_vm1, %v10064_v21  ;;  %v9088_v55 = vadd.f32 %v7286_v26, %v7156_v30  ;;  %v10071_v26 = vld [vmem:[#allocation61_spill] sm:$0xff]  ;;  %v10072_v30 = vld [vmem:[#allocation51_spill] sm:$0xff] }
 0x1c2   : > { %7382 = vmatprep.mubr.msk.bf16.mxu0 %vm1924_vm1, %v10066_v56  ;;  %v2571_v10 = vpop.f32.mrf.mxu0 }
 0x1c3   : > { %10065 = vst [vmem:[#allocation53_spill] sm:$0xff] %v9088_v55  ;;  %v3652_v25 = vpop.f32.mrf.mxu1  ;;  %v9092_v5 = vadd.f32 %v3636_v14, %v2571_v10  ;;  %v10073_v14 = vld [vmem:[#allocation54_spill] sm:$0xff]  ;;  %v10116_v55 = vld [vmem:[#allocation79_spill] sm:$0xff] }
 0x1c4   : > { %v7157_v17 = vpop.f32.mrf.mxu0 }
 0x1c5   : > { %10067 = vst [vmem:[#allocation43_spill] sm:$0xff] %v9092_v5  ;;  %v7291_v43 = vpop.f32.mrf.mxu1  ;;  %v9094_v62 = vadd.f32 %v7287_v33, %v7157_v17 }
 0x1c6   : > { %7517 = vmatmul.mubr.msk.bf16.gmra.mxu1 %vm1924_vm1, %v10069_v19  ;;  %v2574_v61 = vpop.f32.mrf.mxu0 }
 0x1c7   : > { %10068 = vst [vmem:[#allocation46_spill] sm:$0xff] %v9094_v62  ;;  %v3655_v38 = vpop.f32.mrf.mxu1  ;;  %v9098_v12 = vadd.f32 %v3639_v7, %v2574_v61  ;;  %7520 = vmatprep.mubr.msk.bf16.mxu1 %vm1924_vm1, %v10071_v26  ;;  %v10077_v61 = vld [vmem:[#allocation63_spill] sm:$0xff] }
 0x1c9   : > { %10070 = vst [vmem:[#allocation55_spill] sm:$0xff] %v9098_v12  ;;  %7383 = vmatmul.mubr.msk.bf16.gmra.mxu0 %vm1924_vm1, %v10072_v30  ;;  %v7160_v21 = vpop.f32.mrf.mxu0  ;;  %v10078_v30 = vld [vmem:[#allocation65_spill] sm:$0xff] }
 0x1ca   : > { %7386 = vmatprep.mubr.msk.bf16.mxu0 %vm1924_vm1, %v10073_v14  ;;  %v9106_v56 = vadd.f32 %v7290_v44, %v7160_v21  ;;  %v7294_v33 = vpop.f32.mrf.mxu1  ;;  %v10080_v21 = vld [vmem:[#allocation56_spill] sm:$0xff] }
 0x1cb   : > { %v2587_v17 = vpop.f32.mrf.mxu0 }
 0x1cc   : > { %10074 = vst [vmem:[#allocation57_spill] sm:$0xff] %v9106_v56  ;;  %v9108_v10 = vadd.f32 %v3652_v25, %v2587_v17  ;;  %v3668_v19 = vpop.f32.mrf.mxu1  ;;  %v10081_v25 = vld [vmem:[#allocation58_spill] sm:$0xff] }
 0x1cd   : > { %v7161_v62 = vpop.f32.mrf.mxu0  ;;  %v10098_v56 = vld [vmem:[#allocation78_spill] sm:$0xff] }
 0x1ce   : > { %10075 = vst [vmem:[#allocation48_spill] sm:$0xff] %v9108_v10  ;;  %v9110_v7 = vadd.f32 %v7291_v43, %v7161_v62  ;;  %7521 = vmatmul.mubr.msk.bf16.gmra.mxu1 %vm1924_vm1, %v10077_v61  ;;  %v7295_v26 = vpop.f32.mrf.mxu1  ;;  %v10084_v10 = vld [vmem:[#allocation68_spill] sm:$0xff] }
 0x1cf   : > { %v2590_v12 = vpop.f32.mrf.mxu0  ;;  %7524 = vmatprep.mubr.msk.bf16.mxu1 %vm1924_vm1, %v10078_v30  ;;  %v10085_v30 = vld [vmem:[#allocation69_spill] sm:$0xff] }
 0x1d0   : > { %10076 = vst [vmem:[#allocation50_spill] sm:$0xff] %v9110_v7  ;;  %v9116_v5 = vadd.f32 %v3655_v38, %v2590_v12  ;;  %v3671_v44 = vpop.f32.mrf.mxu1 }
 0x1d1   : > { %7387 = vmatmul.mubr.msk.bf16.gmra.mxu0 %vm1924_vm1, %v10080_v21 }
 0x1d2   : > { %10079 = vst [vmem:[#allocation60_spill] sm:$0xff] %v9116_v5  ;;  %7390 = vmatprep.mubr.msk.bf16.mxu0 %vm1924_vm1, %v10081_v25  ;;  %v10087_v5 = vld [vmem:[#allocation59_spill] sm:$0xff] }
 0x1d3   : > { %v7164_v14 = vpop.f32.mrf.mxu0  ;;  %v7298_v43 = vpop.f32.mrf.mxu1 }
 0x1d4   : > { %v9122_v62 = vadd.f32 %v7294_v33, %v7164_v14 }
 0x1d5   : > { %v2603_v17 = vpop.f32.mrf.mxu0  ;;  %v3684_v61 = vpop.f32.mrf.mxu1 }
 0x1d6   : > { %10082 = vst [vmem:[#allocation61_spill] sm:$0xff] %v9122_v62  ;;  %v9124_v7 = vadd.f32 %v3668_v19, %v2603_v17  ;;  %7525 = vmatmul.mubr.msk.bf16.gmra.mxu1 %vm1924_vm1, %v10084_v10  ;;  %v10089_v62 = vld [vmem:[#allocation62_spill] sm:$0xff] }
 0x1d7   : > { %v7165_v12 = vpop.f32.mrf.mxu0  ;;  %v7299_v38 = vpop.f32.mrf.mxu1  ;;  %7528 = vmatprep.mubr.msk.bf16.mxu1 %vm1924_vm1, %v10085_v30 }
 0x1d8   : > { %10083 = vst [vmem:[#allocation51_spill] sm:$0xff] %v9124_v7  ;;  %v9130_v21 = vadd.f32 %v7295_v26, %v7165_v12  ;;  %v10091_v7 = vld [vmem:[#allocation71_spill] sm:$0xff] }
 0x1d9   : > { %7391 = vmatmul.mubr.msk.bf16.gmra.mxu0 %vm1924_vm1, %v10087_v5  ;;  %v2606_v25 = vpop.f32.mrf.mxu0  ;;  %v3687_v33 = vpop.f32.mrf.mxu1  ;;  %v10092_v12 = vld [vmem:[#allocation75_spill] sm:$0xff] }
 0x1da   : > { %10086 = vst [vmem:[#allocation54_spill] sm:$0xff] %v9130_v21  ;;  %v9134_v14 = vadd.f32 %v3671_v44, %v2606_v25  ;;  %7394 = vmatprep.mubr.msk.bf16.mxu0 %vm1924_vm1, %v10089_v62  ;;  %v10094_v44 = vld [vmem:[#allocation64_spill] sm:$0xff] }
 0x1dc   : > { %10088 = vst [vmem:[#allocation63_spill] sm:$0xff] %v9134_v14  ;;  %v10096_v14 = vld [vmem:[#allocation66_spill] sm:$0xff] }
 0x1dd   : > { %v7302_v19 = vpop.f32.mrf.mxu1  ;;  %v7168_v17 = vpop.f32.mrf.mxu0 }
 0x1de   : > { %v9138_v10 = vadd.f32 %v7298_v43, %v7168_v17  ;;  %7529 = vmatmul.mubr.msk.bf16.gmra.mxu1 %vm1924_vm1, %v10091_v7 }
 0x1df   : > { %v3700_v30 = vpop.f32.mrf.mxu1  ;;  %v2619_v26 = vpop.f32.mrf.mxu0  ;;  %7532 = vmatprep.mubr.msk.bf16.mxu1 %vm1924_vm1, %v10092_v12 }
 0x1e0   : > { %10090 = vst [vmem:[#allocation65_spill] sm:$0xff] %v9138_v10  ;;  %v9144_v5 = vadd.f32 %v3684_v61, %v2619_v26  ;;  %v10099_v26 = vld [vmem:[#allocation83_spill] sm:$0xff] }
 0x1e1   : > { %v7303_v21 = vpop.f32.mrf.mxu1  ;;  %7395 = vmatmul.mubr.msk.bf16.gmra.mxu0 %vm1924_vm1, %v10094_v44  ;;  %v7169_v25 = vpop.f32.mrf.mxu0 }
 0x1e2   : > { %10093 = vst [vmem:[#allocation56_spill] sm:$0xff] %v9144_v5  ;;  %v9148_v62 = vadd.f32 %v7299_v38, %v7169_v25  ;;  %7398 = vmatprep.mubr.msk.bf16.mxu0 %vm1924_vm1, %v10096_v14  ;;  %v10101_v38 = vld [vmem:[#allocation67_spill] sm:$0xff] }
 0x1e3   : > { %v3703_v43 = vpop.f32.mrf.mxu1  ;;  %v2622_v17 = vpop.f32.mrf.mxu0 }
 0x1e4   : > { %10095 = vst [vmem:[#allocation58_spill] sm:$0xff] %v9148_v62  ;;  %v9152_v7 = vadd.f32 %v3687_v33, %v2622_v17  ;;  %v10103_v62 = vld [vmem:[#allocation70_spill] sm:$0xff] }
 0x1e6   : > { %10097 = vst [vmem:[#allocation68_spill] sm:$0xff] %v9152_v7  ;;  %v7306_v10 = vpop.f32.mrf.mxu1  ;;  %7533 = vmatmul.mubr.msk.bf16.gmra.mxu1 %vm1924_vm1, %v10098_v56 }
 0x1e7   : > { %7536 = vmatprep.mubr.msk.bf16.mxu1 %vm1924_vm1, %v10099_v26 }
 0x1e8   : > { %v7172_v61 = vpop.f32.mrf.mxu0  ;;  %v3716_v44 = vpop.f32.mrf.mxu1 }
 0x1e9   : > { %v9158_v12 = vadd.f32 %v7302_v19, %v7172_v61  ;;  %7399 = vmatmul.mubr.msk.bf16.gmra.mxu0 %vm1924_vm1, %v10101_v38  ;;  %v10106_v61 = vld [vmem:[#allocation86_spill] sm:$0xff]  ;;  %v10107_v38 = vld [vmem:[#allocation91_spill] sm:$0xff] }
 0x1ea   : > { %v2635_v25 = vpop.f32.mrf.mxu0  ;;  %7402 = vmatprep.mubr.msk.bf16.mxu0 %vm1924_vm1, %v10103_v62  ;;  %v7307_v33 = vpop.f32.mrf.mxu1 }
 0x1eb   : > { %10100 = vst [vmem:[#allocation69_spill] sm:$0xff] %v9158_v12  ;;  %v9162_v14 = vadd.f32 %v3700_v30, %v2635_v25  ;;  %v10113_v12 = vld [vmem:[#allocation94_spill] sm:$0xff] }
 0x1ec   : > { %v7173_v17 = vpop.f32.mrf.mxu0  ;;  %v3719_v7 = vpop.f32.mrf.mxu1 }
 0x1ed   : > { %10102 = vst [vmem:[#allocation59_spill] sm:$0xff] %v9162_v14  ;;  %v9166_v56 = vadd.f32 %v7303_v21, %v7173_v17  ;;  %v10108_v14 = vld [vmem:[#allocation72_spill] sm:$0xff] }
 0x1ee   : > { %v2638_v5 = vpop.f32.mrf.mxu0  ;;  %v7442_v19 = vpop.f32.mrf.mxu1  ;;  %7537 = vmatmul.mubr.msk.bf16.gmra.mxu1 %vm1924_vm1, %v10106_v61  ;;  %v10110_v21 = vld [vmem:[#allocation76_spill] sm:$0xff] }
 0x1ef   : > { %10104 = vst [vmem:[#allocation62_spill] sm:$0xff] %v9166_v56  ;;  %v9168_v26 = vadd.f32 %v3703_v43, %v2638_v5  ;;  %7540 = vmatprep.mubr.msk.bf16.mxu1 %vm1924_vm1, %v10107_v38 }
 0x1f0   : > { %v4532_v30 = vpop.f32.mrf.mxu1 }
 0x1f1   : > { %10105 = vst [vmem:[#allocation71_spill] sm:$0xff] %v9168_v26  ;;  %v7176_v25 = vpop.f32.mrf.mxu0  ;;  %7403 = vmatmul.mubr.msk.bf16.gmra.mxu0 %vm1924_vm1, %v10108_v14 }
 0x1f2   : > { %v9176_v62 = vadd.f32 %v7306_v10, %v7176_v25  ;;  %7406 = vmatprep.mubr.msk.bf16.mxu0 %vm1924_vm1, %v10110_v21  ;;  %v7443_v17 = vpop.f32.mrf.mxu1  ;;  %v10114_v10 = vld [vmem:[#allocation99_spill] sm:$0xff] }
 0x1f3   : > { %v2651_v5 = vpop.f32.mrf.mxu0 }
 0x1f4   : > { %10109 = vst [vmem:[#allocation75_spill] sm:$0xff] %v9176_v62  ;;  %v9181_v43 = vadd.f32 %v3716_v44, %v2651_v5  ;;  %v4535_v26 = vpop.f32.mrf.mxu1  ;;  %v10117_v44 = vld [vmem:[#allocation73_spill] sm:$0xff]  ;;  %v10118_v5 = vld [vmem:[#allocation84_spill] sm:$0xff] }
 0x1f5   : > { %v7177_v61 = vpop.f32.mrf.mxu0 }
 0x1f6   : > { %10111 = vst [vmem:[#allocation64_spill] sm:$0xff] %v9181_v43  ;;  %v9183_v56 = vadd.f32 %v7307_v33, %v7177_v61  ;;  %v7446_v38 = vpop.f32.mrf.mxu1  ;;  %7541 = vmatmul.mubr.msk.bf16.gmra.mxu1 %vm1924_vm1, %v10113_v12  ;;  %v10119_v43 = vld [vmem:[#allocation74_spill] sm:$0xff] }
 0x1f7   : > { %v2654_v14 = vpop.f32.mrf.mxu0  ;;  %7544 = vmatprep.mubr.msk.bf16.mxu1 %vm1924_vm1, %v10114_v10 }
 0x1f8   : > { %10112 = vst [vmem:[#allocation66_spill] sm:$0xff] %v9183_v56  ;;  %v9189_v25 = vadd.f32 %v3719_v7, %v2654_v14  ;;  %v4548_v21 = vpop.f32.mrf.mxu1 }
 0x1f9   : > { %v7312_v62 = vpop.f32.mrf.mxu0  ;;  %7407 = vmatmul.mubr.msk.bf16.gmra.mxu0 %vm1924_vm1, %v10116_v55 }
 0x1fa   : > { %10115 = vst [vmem:[#allocation78_spill] sm:$0xff] %v9189_v25  ;;  %v4305_v33 = vadd.f32 %v7312_v62, %v10117_v44  ;;  %7410 = vmatprep.mubr.msk.bf16.mxu0 %vm1924_vm1, %v10118_v5  ;;  %v7447_v61 = vpop.f32.mrf.mxu1  ;;  %v10120_v25 = vld [vmem:[#allocation77_spill] sm:$0xff]  ;;  %v10122_v44 = vld [vmem:[#allocation107_spill] sm:$0xff] }
 0x1fb   : > { %v3792_v56 = vpop.f32.mrf.mxu0 }
 0x1fc   : > { %v5045_v12 = vadd.f32 %v7442_v19, %v4305_v33  ;;  %v4303_v36 = vadd.f32 %v3792_v56, %v10119_v43  ;;  %v9197_v3 = vpop.f32.mrf.mxu1  ;;  %v10123_v33 = vld [vmem:[#allocation80_spill] sm:$0xff] }
 0x1fd   : > { %v7313_v7 = vpop.f32.mrf.mxu0 }
 0x1fe   : > { %v5173_v14 = vmul.f32 0.2, %v5045_v12  ;;  %v5043_v10 = vadd.f32 %v4532_v30, %v4303_v36  ;;  %v4306_v16 = vadd.f32 %v7313_v7, %v10120_v25  ;;  %v9200_v55 = vpop.f32.mrf.mxu1  ;;  %7545 = vmatmul.mubr.msk.bf16.gmra.mxu1 %vm1924_vm1, %v10121_v54  ;;  %v10124_v36 = vld [vmem:[#allocation87_spill] sm:$0xff] }
 0x1ff   : > { %v3795_v62 = vpop.f32.mrf.mxu0  ;;  %7548 = vmatprep.mubr.msk.bf16.mxu1 %vm1924_vm1, %v10122_v44 }
 0x200   : > { %v5301_v19 = vmax.f32 %v5045_v12, %v5173_v14  ;;  %v5171_v56 = vmul.f32 0.2, %v5043_v10  ;;  %v5046_v43 = vadd.f32 %v7443_v17, %v4306_v16  ;;  %v4304_v5 = vadd.f32 %v3795_v62, %v10123_v33  ;;  %v9207_v39 = vpop.f32.mrf.mxu1  ;;  %v10125_v17 = vld [vmem:[#allocation92_spill] sm:$0xff]  ;;  %v9221_v14 = vld [vmem:[%s7703_s23 + $0x280] sm:$0xf]  ;;  %v10126_v62 = vld [vmem:[#allocation81_spill] sm:$0xff] }
 0x201   : > { %v7316_v54 = vpop.f32.mrf.mxu0  ;;  %7411 = vmatmul.mubr.msk.bf16.gmra.mxu0 %vm1924_vm1, %v10124_v36  ;;  %v4432_v31 = vshrl.u32 %v9221_v14, 16 }
 0x202   : > { %v6662_v30 = vpack.c.bf16 %v5301_v19, %v5301_v19  ;;  %v5299_v25 = vmax.f32 %v5043_v10, %v5171_v56  ;;  %v5174_v12 = vmul.f32 0.2, %v5046_v43  ;;  %v5044_v16 = vadd.f32 %v4535_v26, %v4304_v5  ;;  %7414 = vmatprep.mubr.msk.bf16.mxu0 %vm1924_vm1, %v10125_v17  ;;  %v9218_v7 = vpop.f32.mrf.mxu1  ;;  %v10127_v10 = vld [vmem:[#allocation82_spill] sm:$0xff] }
 0x203   : > { %v4309_v44 = vadd.f32 %v7316_v54, %v10126_v62  ;;  %v3808_v33 = vpop.f32.mrf.mxu0  ;;  %v9230_v5 = vld [vmem:[%s7703_s23 + $0x284] sm:$0xf] }
 0x204   : > { %5942 = vst.msk [vmem:[%s9212_s28 + $0x8] sm:$0xf] %vm5939_vm5, %v6662_v30  ;;  %v6660_v48 = vpack.c.bf16 %v5299_v25, %v5299_v25  ;;  %v5302_v36 = vmax.f32 %v5046_v43, %v5174_v12  ;;  %v5172_v19 = vmul.f32 0.2, %v5044_v16  ;;  %v4307_v56 = vadd.f32 %v3808_v33, %v10127_v10  ;;  %v9227_v26 = vpop.f32.mrf.mxu1  ;;  %v10128_v25 = vld [vmem:[#allocation85_spill] sm:$0xff]  ;;  %v10129_v12 = vld [vmem:[#allocation110_spill] sm:$0xff] }
 0x205   : > { %v5049_v17 = vadd.f32 %v7446_v38, %v4309_v44  ;;  %v7317_v45 = vpop.f32.mrf.mxu0  ;;  %v9241_v33 = vld [vmem:[%s7703_s23 + $0x288] sm:$0xf] }
 0x206   : > { %5940 = vst.msk [vmem:[%s9212_s28] sm:$0xf] %vm5939_vm5, %v6660_v48  ;;  %v6663_v54 = vpack.c.bf16 %v5302_v36, %v5302_v36  ;;  %v5300_v62 = vmax.f32 %v5044_v16, %v5172_v19  ;;  %v5047_v30 = vadd.f32 %v4548_v21, %v4307_v56  ;;  %v4310_v37 = vadd.f32 %v7317_v45, %v10128_v25  ;;  %v9236_v43 = vpop.f32.mrf.mxu1  ;;  %v10130_v44 = vld [vmem:[#allocation115_spill] sm:$0xff]  ;;  %v10131_v56 = vld [vmem:[#allocation88_spill] sm:$0xff] }
 0x207   : > { %7549 = vmatmul.mubr.msk.bf16.gmra.mxu1 %vm1924_vm1, %v10129_v12  ;;  %v5177_v10 = vmul.f32 0.2, %v5049_v17  ;;  %v3811_v38 = vpop.f32.mrf.mxu0  ;;  %v4435_v48 = vshll.u32 %v9221_v14, 16  ;;  %v4441_v16 = vshll.u32 %v9230_v5, 16  ;;  %v4445_v21 = vshrl.u32 %v9230_v5, 16 }
 0x208   : > { %7552 = vmatprep.mubr.msk.bf16.mxu1 %vm1924_vm1, %v10130_v44  ;;  %5943 = vst.msk [vmem:[%s9212_s28 + $0xc] sm:$0xf] %vm5939_vm5, %v6663_v54  ;;  %v6661_v45 = vpack.c.bf16 %v5300_v62, %v5300_v62  ;;  %v5175_v36 = vmul.f32 0.2, %v5047_v30  ;;  %v5050_v19 = vadd.f32 %v7447_v61, %v4310_v37  ;;  %v4308_v25 = vadd.f32 %v3811_v38, %v10131_v56  ;;  %v9251_v12 = vpop.f32.mrf.mxu1  ;;  %v10133_v37 = vld [vmem:[#allocation89_spill] sm:$0xff]  ;;  %v10134_v38 = vld [vmem:[#allocation100_spill] sm:$0xff] }
 0x209   : > { %v5305_v52 = vmax.f32 %v5049_v17, %v5177_v10  ;;  %v7320_v22 = vpop.f32.mrf.mxu0  ;;  %7415 = vmatmul.mubr.msk.bf16.gmra.mxu0 %vm1924_vm1, %v10132_v60  ;;  %v4434_v44 = vrot.slane %v4432_v31, 4  ;;  %v4451_v15 = vshll.u32 %v9241_v33, 16  ;;  %v9265_v10 = vld [vmem:[%s7703_s23 + $0x28c] sm:$0xf]  ;;  %v4437_v56 = vrot.slane %v4435_v48, 5 }
 0x20a   : > { %5941 = vst.msk [vmem:[%s9212_s28 + $0x4] sm:$0xf] %vm5939_vm5, %v6661_v45  ;;  %v5303_v24 = vmax.f32 %v5047_v30, %v5175_v36  ;;  %v5178_v54 = vmul.f32 0.2, %v5050_v19  ;;  %v5048_v62 = vadd.f32 %v9197_v3, %v4308_v25  ;;  %v4313_v61 = vadd.f32 %v7320_v22, %v10133_v37  ;;  %7418 = vmatprep.mubr.msk.bf16.mxu0 %vm1924_vm1, %v10134_v38  ;;  %v9262_v17 = vpop.f32.mrf.mxu1  ;;  %v10135_v25 = vld [vmem:[#allocation90_spill] sm:$0xff] }
 0x20b   : > { %v6666_v60 = vpack.c.bf16 %v5305_v52, %v5305_v52  ;;  %v3824_v31 = vpop.f32.mrf.mxu0  ;;  %v9267_v51 = vrot.slane %v4441_v16, 5  ;;  %v4447_v30 = vrot.slane %v4445_v21, 4  ;;  %v4455_v52 = vshrl.u32 %v9241_v33, 16 }
 0x20c   : > { %v6664_v45 = vpack.c.bf16 %v5303_v24, %v5303_v24  ;;  %v5306_v36 = vmax.f32 %v5050_v19, %v5178_v54  ;;  %v5176_v9 = vmul.f32 0.2, %v5048_v62  ;;  %v5053_v3 = vadd.f32 %v9200_v55, %v4313_v61  ;;  %v9270_v22 = vpop.f32.mrf.mxu1  ;;  %v10136_v55 = vld [vmem:[#allocation93_spill] sm:$0xff] }
 0x20d   : > { %5946 = vst.msk [vmem:[%s9212_s28 + $0x18] sm:$0xf] %vm5939_vm5, %v6666_v60  ;;  %v4311_v37 = vadd.f32 %v3824_v31, %v10135_v25  ;;  %v7321_v38 = vpop.f32.mrf.mxu0  ;;  %v4461_v48 = vshll.u32 %v9265_v10, 16  ;;  %v4465_v16 = vshrl.u32 %v9265_v10, 16  ;;  %v10137_v60 = vld [vmem:[#allocation119_spill] sm:$0xff]  ;;  %v4438_v49 = vor.u32 %v4437_v56, %v4434_v44 }
 0x20e   : > { %5944 = vst.msk [vmem:[%s9212_s28 + $0x10] sm:$0xf] %vm5939_vm5, %v6664_v45  ;;  %v6667_v24 = vpack.c.bf16 %v5306_v36, %v5306_v36  ;;  %v5304_v21 = vmax.f32 %v5048_v62, %v5176_v9  ;;  %v5181_v19 = vmul.f32 0.2, %v5053_v3  ;;  %v4314_v54 = vadd.f32 %v7321_v38, %v10136_v55  ;;  %v9281_v61 = vpop.f32.mrf.mxu1  ;;  %v10138_v55 = vld [vmem:[#allocation96_spill] sm:$0xff] }
 0x20f   : > { %7553 = vmatmul.mubr.msk.bf16.gmra.mxu1 %vm1924_vm1, %v10137_v60  ;;  %v5051_v31 = vadd.f32 %v9207_v39, %v4311_v37  ;;  %v3827_v25 = vpop.f32.mrf.mxu0  ;;  %v4448_v45 = vor.u32 %v4447_v30, %v9267_v51  ;;  %v9289_v36 = vrot.slane %v4451_v15, 5  ;;  %v4457_v44 = vrot.slane %v4455_v52, 4 }
 0x210   : > { %7556 = vmatprep.mubr.msk.bf16.mxu1 %vm1924_vm1, %v8738_v46  ;;  %5947 = vst.msk [vmem:[%s9212_s28 + $0x1c] sm:$0xf] %vm5939_vm5, %v6667_v24  ;;  %v6665_v9 = vpack.c.bf16 %v5304_v21, %v5304_v21  ;;  %v5309_v62 = vmax.f32 %v5053_v3, %v5181_v19  ;;  %v5054_v38 = vadd.f32 %v9218_v7, %v4314_v54  ;;  %v9295_v39 = vpop.f32.mrf.mxu1  ;;  %v10139_v46 = vld [vmem:[#allocation103_spill] sm:$0xff]  ;;  %v9299_v15 = vrot.slane %v4461_v48, 5  ;;  %v10140_v24 = vld [vmem:[#allocation97_spill] sm:$0xff]  ;;  %v10141_v19 = vld [vmem:[#allocation108_spill] sm:$0xff] }
 0x211   : > { %v4312_v60 = vadd.f32 %v3827_v25, %v10138_v55  ;;  %v5179_v37 = vmul.f32 0.2, %v5051_v31  ;;  %v7324_v40 = vpop.f32.mrf.mxu0  ;;  %7419 = vmatmul.mubr.msk.bf16.gmra.mxu0 %vm1924_vm1, %v10139_v46  ;;  %v4467_v56 = vrot.slane %v4465_v16, 4  ;;  %v310_v25 = vld [vmem:[%s7703_s23 + $0x290] sm:$0x1]  ;;  %v4439_v52 = vrot.slane %v4438_v49, 4 }
 0x212   : > { %5945 = vst.msk [vmem:[%s9212_s28 + $0x14] sm:$0xf] %vm5939_vm5, %v6665_v9  ;;  %v6670_v30 = vpack.c.bf16 %v5309_v62, %v5309_v62  ;;  %v5182_v3 = vmul.f32 0.2, %v5054_v38  ;;  %v4317_v21 = vadd.f32 %v7324_v40, %v10140_v24  ;;  %7422 = vmatprep.mubr.msk.bf16.mxu0 %vm1924_vm1, %v10141_v19  ;;  %v9307_v54 = vpop.f32.mrf.mxu1  ;;  %v4449_v48 = vrot.slane %v4448_v45, 4 }
 0x213   : > { %v5052_v7 = vadd.f32 %v9227_v26, %v4312_v60  ;;  %v5307_v55 = vmax.f32 %v5051_v31, %v5179_v37  ;;  %v3840_v46 = vpop.f32.mrf.mxu0  ;;  %v10142_v26 = vld [vmem:[#allocation98_spill] sm:$0xff]  ;;  %v4458_v63 = vor.u32 %v4457_v44, %v9289_v36  ;;  %v4468_v31 = vor.u32 %v4467_v56, %v9299_v15 }
 0x214   : > { %5950 = vst.msk [vmem:[%s9212_s28 + $0x28] sm:$0xf] %vm5939_vm5, %v6670_v30  ;;  %v5310_v16 = vmax.f32 %v5054_v38, %v5182_v3  ;;  %v5057_v62 = vadd.f32 %v9236_v43, %v4317_v21  ;;  %v4315_v60 = vadd.f32 %v3840_v46, %v10142_v26  ;;  %v9314_v40 = vpop.f32.mrf.mxu1  ;;  %v4471_v49 = vshll.u32 %v310_v25, 16  ;;  %v10143_v43 = vld [vmem:[#allocation101_spill] sm:$0xff]  ;;  %v10144_v25 = vld [vmem:[#allocation104_spill] sm:$0xff]  ;;  %v10145_v26 = vld [vmem:[#allocation111_spill] sm:$0xff] }
 0x215   : > { %v5180_v9 = vmul.f32 0.2, %v5052_v7  ;;  %v6668_v24 = vpack.c.bf16 %v5307_v55, %v5307_v55  ;;  %v7325_v19 = vpop.f32.mrf.mxu0  ;;  %v4444_v44 = vsel %vm7722_vm4, %v4439_v52, %v9267_v51  ;;  %v4459_v51 = vrot.slane %v4458_v63, 4 }
 0x216   : > { %v6671_v45 = vpack.c.bf16 %v5310_v16, %v5310_v16  ;;  %v5185_v30 = vmul.f32 0.2, %v5057_v62  ;;  %v5055_v38 = vadd.f32 %v9251_v12, %v4315_v60  ;;  %v9319_v3 = vpop.f32.mrf.mxu1  ;;  %v4318_v21 = vadd.f32 %v7325_v19, %v10143_v43 }
 0x217   : > { %v5308_v37 = vmax.f32 %v5052_v7, %v5180_v9  ;;  %7557 = vmatmul.mubr.msk.bf16.gmra.mxu1 %vm1924_vm1, %v8759_v35  ;;  %5948 = vst.msk [vmem:[%s9212_s28 + $0x20] sm:$0xf] %vm5939_vm5, %v6668_v24  ;;  %v3843_v55 = vpop.f32.mrf.mxu0  ;;  %v4454_v12 = vsel %vm7722_vm4, %v4449_v48, %v9289_v36  ;;  %v4469_v52 = vrot.slane %v4468_v31, 4  ;;  %v4473_v60 = vrot.slane %v4471_v49, 5  ;;  %v10146_v24 = vld [vmem:[#allocation105_spill] sm:$0xff] }
 0x218   : > { %7560 = vmatprep.mubr.msk.bf16.mxu1 %vm1924_vm1, %v8790_v23  ;;  %5951 = vst.msk [vmem:[%s9212_s28 + $0x2c] sm:$0xf] %vm5939_vm5, %v6671_v45  ;;  %v5313_v56 = vmax.f32 %v5057_v62, %v5185_v30  ;;  %v5183_v7 = vmul.f32 0.2, %v5055_v38  ;;  %v4316_v46 = vadd.f32 %v3843_v55, %v10144_v25  ;;  %v9337_v16 = vpop.f32.mrf.mxu1  ;;  %v5058_v9 = vadd.f32 %v9262_v17, %v4318_v21  ;;  %v10147_v45 = vld [vmem:[#allocation116_spill] sm:$0xff]  ;;  %v10149_v25 = vld [vmem:[#allocation109_spill] sm:$0xff] }
 0x219   : > { %v6669_v35 = vpack.c.bf16 %v5308_v37, %v5308_v37  ;;  %v7328_v23 = vpop.f32.mrf.mxu0  ;;  %7423 = vmatmul.mubr.msk.bf16.gmra.mxu0 %vm1924_vm1, %v10145_v26  ;;  %v6463_v43 = vcombine.low %v4444_v44, %v4454_v12 }
 0x21a   : > { %v6674_v36 = vpack.c.bf16 %v5313_v56, %v5313_v56  ;;  %v5311_v48 = vmax.f32 %v5055_v38, %v5183_v7  ;;  %v5056_v62 = vadd.f32 %v9270_v22, %v4316_v46  ;;  %v4321_v19 = vadd.f32 %v7328_v23, %v10146_v24  ;;  %7426 = vmatprep.mubr.msk.bf16.mxu0 %vm1924_vm1, %v10147_v45  ;;  %v9348_v17 = vpop.f32.mrf.mxu1  ;;  %v10148_v38 = vld [vmem:[#allocation106_spill] sm:$0xff] }
 0x21b   : > { %5949 = vst.msk [vmem:[%s9212_s28 + $0x24] sm:$0xf] %vm5939_vm5, %v6669_v35  ;;  %v5186_v37 = vmul.f32 0.2, %v5058_v9  ;;  %v3856_v30 = vpop.f32.mrf.mxu0  ;;  %v4464_v56 = vsel %vm7722_vm4, %v4459_v51, %v9299_v15  ;;  %v4474_v7 = vsel %vm7722_vm4, %v4469_v52, %v4473_v60 }
 0x21c   : > { %5954 = vst.msk [vmem:[%s9212_s28 + $0x38] sm:$0xf] %vm5939_vm5, %v6674_v36  ;;  %v6672_v63 = vpack.c.bf16 %v5311_v48, %v5311_v48  ;;  %v5184_v31 = vmul.f32 0.2, %v5056_v62  ;;  %v5061_v49 = vadd.f32 %v9281_v61, %v4321_v19  ;;  %v4319_v21 = vadd.f32 %v3856_v30, %v10148_v38  ;;  %v9354_v22 = vpop.f32.mrf.mxu1 }
 0x21d   : > { %v5314_v55 = vmax.f32 %v5058_v9, %v5186_v37  ;;  %v7329_v35 = vpop.f32.mrf.mxu0  ;;  %v10152_v37 = vld [vmem:[#allocation113_spill] sm:$0xff] }
 0x21e   : > { %5952 = vst.msk [vmem:[%s9212_s28 + $0x30] sm:$0xf] %vm5939_vm5, %v6672_v63  ;;  %v5312_v44 = vmax.f32 %v5056_v62, %v5184_v31  ;;  %v5189_v12 = vmul.f32 0.2, %v5061_v49  ;;  %v5059_v61 = vadd.f32 %v9295_v39, %v4319_v21  ;;  %v4322_v46 = vadd.f32 %v7329_v35, %v10149_v25  ;;  %v9365_v23 = vpop.f32.mrf.mxu1  ;;  %v10150_v39 = vld [vmem:[#allocation112_spill] sm:$0xff]  ;;  %v10151_v62 = vld [vmem:[#allocation118_spill] sm:$0xff] }
 0x21f   : > { %7561 = vmatmul.mubr.msk.bf16.gmra.mxu1 %vm1924_vm1, %v8804_v8  ;;  %v6675_v9 = vpack.c.bf16 %v5314_v55, %v5314_v55  ;;  %v3859_v15 = vpop.f32.mrf.mxu0  ;;  %v6464_v8 = vcombine.low %v4464_v56, %v4474_v7  ;;  %v10153_v21 = vld [vmem:[#allocation114_spill] sm:$0xff] }
 0x220   : > { %7564 = vmatprep.mubr.msk.bf16.mxu1 %vm1924_vm1, %v6463_v43  ;;  %v6673_v34 = vpack.c.bf16 %v5312_v44, %v5312_v44  ;;  %v5317_v26 = vmax.f32 %v5061_v49, %v5189_v12  ;;  %v5187_v51 = vmul.f32 0.2, %v5059_v61  ;;  %v5062_v52 = vadd.f32 %v9307_v54, %v4322_v46  ;;  %v9371_v60 = vpop.f32.mrf.mxu1 }
 0x221   : > { %5955 = vst.msk [vmem:[%s9212_s28 + $0x3c] sm:$0xf] %vm5939_vm5, %v6675_v9  ;;  %v4320_v36 = vadd.f32 %v3859_v15, %v10150_v39  ;;  %v7332_v48 = vpop.f32.mrf.mxu0  ;;  %7427 = vmatmul.mubr.msk.bf16.gmra.mxu0 %vm1924_vm1, %v10151_v62  ;;  %v6394_v44 = vcombine.low %v9221_v14, %v9230_v5  ;;  %v10155_v5 = vld [vmem:[#allocation120_spill] sm:$0xff] }
 0x222   : > { %5953 = vst.msk [vmem:[%s9212_s28 + $0x34] sm:$0xf] %vm5939_vm5, %v6673_v34  ;;  %v6678_v24 = vpack.c.bf16 %v5317_v26, %v5317_v26  ;;  %v5315_v19 = vmax.f32 %v5059_v61, %v5187_v51  ;;  %v5190_v45 = vmul.f32 0.2, %v5062_v52  ;;  %v4325_v54 = vadd.f32 %v7332_v48, %v10152_v37  ;;  %7430 = vmatprep.mubr.msk.bf16.mxu0 %vm1924_vm1, %v8742_v29  ;;  %v7467_v30 = vpop.f32.mrf.mxu1  ;;  %v10154_v61 = vld [vmem:[#allocation117_spill] sm:$0xff] }
 0x223   : > { %v5060_v43 = vadd.f32 %v9314_v40, %v4320_v36  ;;  %v3872_v63 = vpop.f32.mrf.mxu0 }
 0x224   : > { %5958 = vst.msk [vmem:[%s9212_s28 + $0x48] sm:$0xf] %vm5939_vm5, %v6678_v24  ;;  %v6676_v31 = vpack.c.bf16 %v5315_v19, %v5315_v19  ;;  %v5318_v49 = vmax.f32 %v5062_v52, %v5190_v45  ;;  %v5065_v38 = vadd.f32 %v9319_v3, %v4325_v54  ;;  %v4323_v55 = vadd.f32 %v3872_v63, %v10153_v21  ;;  %v4631_v35 = vpop.f32.mrf.mxu1  ;;  %v10157_v54 = vld [vmem:[#allocation122_spill] sm:$0xff] }
 0x225   : > { %v5188_v56 = vmul.f32 0.2, %v5060_v43  ;;  %v7333_v7 = vpop.f32.mrf.mxu0 }
 0x226   : > { %5956 = vst.msk [vmem:[%s9212_s28 + $0x40] sm:$0xf] %vm5939_vm5, %v6676_v31  ;;  %v6679_v29 = vpack.c.bf16 %v5318_v49, %v5318_v49  ;;  %v5193_v40 = vmul.f32 0.2, %v5065_v38  ;;  %v5063_v12 = vadd.f32 %v9337_v16, %v4323_v55  ;;  %v4326_v25 = vadd.f32 %v7333_v7, %v10154_v61  ;;  %v7470_v46 = vpop.f32.mrf.mxu1 }
 0x227   : > { %7565 = vmatmul.mubr.msk.bf16.gmra.mxu1 %vm1924_vm1, %v6464_v8  ;;  %v5316_v3 = vmax.f32 %v5060_v43, %v5188_v56  ;;  %v3875_v9 = vpop.f32.mrf.mxu0  ;;  %v6395_v49 = vcombine.low %v9241_v33, %v9265_v10  ;;  %v10158_v56 = vld [vmem:[#allocation123_spill] sm:$0xff] }
 0x228   : > { %5959 = vst.msk [vmem:[%s9212_s28 + $0x4c] sm:$0xf] %vm5939_vm5, %v6679_v29  ;;  %v5321_v15 = vmax.f32 %v5065_v38, %v5193_v40  ;;  %v5191_v34 = vmul.f32 0.2, %v5063_v12  ;;  %v5066_v14 = vadd.f32 %v9348_v17, %v4326_v25  ;;  %v4324_v26 = vadd.f32 %v3875_v9, %v10155_v5  ;;  %v4644_v51 = vpop.f32.mrf.mxu1  ;;  %v10156_v17 = vld [vmem:[#allocation121_spill] sm:$0xff] }
 0x229   : > { %v6677_v52 = vpack.c.bf16 %v5316_v3, %v5316_v3  ;;  %v7336_v16 = vpop.f32.mrf.mxu0  ;;  %7431 = vmatmul.mubr.msk.bf16.gmra.mxu0 %vm1924_vm1, %v8753_v59 }
 0x22a   : > { %v6682_v39 = vpack.c.bf16 %v5321_v15, %v5321_v15  ;;  %v5319_v36 = vmax.f32 %v5063_v12, %v5191_v34  ;;  %v5194_v48 = vmul.f32 0.2, %v5066_v14  ;;  %v5064_v62 = vadd.f32 %v9354_v22, %v4324_v26  ;;  %7434 = vmatprep.mubr.msk.bf16.mxu0 %vm1924_vm1, %v6394_v44  ;;  %v7471_v8 = vpop.f32.mrf.mxu1 }
 0x22b   : > { %5957 = vst.msk [vmem:[%s9212_s28 + $0x44] sm:$0xf] %vm5939_vm5, %v6677_v52  ;;  %v4329_v24 = vadd.f32 %v7336_v16, %v10156_v17  ;;  %v3888_v19 = vpop.f32.mrf.mxu0 }
 0x22c   : > { %5962 = vst.msk [vmem:[%s9212_s28 + $0x58] sm:$0xf] %vm5939_vm5, %v6682_v39  ;;  %v6680_v45 = vpack.c.bf16 %v5319_v36, %v5319_v36  ;;  %v5322_v37 = vmax.f32 %v5066_v14, %v5194_v48  ;;  %v5192_v59 = vmul.f32 0.2, %v5064_v62  ;;  %v4327_v43 = vadd.f32 %v3888_v19, %v10157_v54  ;;  %v4647_v63 = vpop.f32.mrf.mxu1 }
 0x22d   : > { %v5069_v31 = vadd.f32 %v9365_v23, %v4329_v24  ;;  %v7337_v22 = vpop.f32.mrf.mxu0 }
 0x22e   : > { %5960 = vst.msk [vmem:[%s9212_s28 + $0x50] sm:$0xf] %vm5939_vm5, %v6680_v45  ;;  %v6683_v38 = vpack.c.bf16 %v5322_v37, %v5322_v37  ;;  %v5320_v21 = vmax.f32 %v5064_v62, %v5192_v59  ;;  %v5067_v55 = vadd.f32 %v9371_v60, %v4327_v43  ;;  %v4330_v7 = vadd.f32 %v7337_v22, %v10158_v56  ;;  %v7474_v44 = vpop.f32.mrf.mxu1 }
 0x22f   : > { %v5197_v29 = vmul.f32 0.2, %v5069_v31  ;;  %v3891_v40 = vpop.f32.mrf.mxu0 }
 0x230   : > { %5963 = vst.msk [vmem:[%s9212_s28 + $0x5c] sm:$0xf] %vm5939_vm5, %v6683_v38  ;;  %v6681_v12 = vpack.c.bf16 %v5320_v21, %v5320_v21  ;;  %v5195_v23 = vmul.f32 0.2, %v5067_v55  ;;  %v5070_v61 = vadd.f32 %v7467_v30, %v4330_v7  ;;  %v4328_v25 = vadd.f32 %v3891_v40, %v8756_v11  ;;  %v4660_v33 = vpop.f32.mrf.mxu1 }
 0x231   : > { %v5325_v10 = vmax.f32 %v5069_v31, %v5197_v29  ;;  %v7340_v3 = vpop.f32.mrf.mxu0  ;;  %7435 = vmatmul.mubr.msk.bf16.gmra.mxu0 %vm1924_vm1, %v6395_v49 }
 0x232   : > { %5961 = vst.msk [vmem:[%s9212_s28 + $0x54] sm:$0xf] %vm5939_vm5, %v6681_v12  ;;  %v5323_v60 = vmax.f32 %v5067_v55, %v5195_v23  ;;  %v5198_v9 = vmul.f32 0.2, %v5070_v61  ;;  %v5068_v15 = vadd.f32 %v4631_v35, %v4328_v25  ;;  %v4333_v34 = vadd.f32 %v7340_v3, %v8764_v53  ;;  %v7475_v14 = vpop.f32.mrf.mxu1 }
 0x233   : > { %v6686_v5 = vpack.c.bf16 %v5325_v10, %v5325_v10  ;;  %v3904_v26 = vpop.f32.mrf.mxu0 }
 0x234   : > { %v6684_v30 = vpack.c.bf16 %v5323_v60, %v5323_v60  ;;  %v5326_v11 = vmax.f32 %v5070_v61, %v5198_v9  ;;  %v5196_v52 = vmul.f32 0.2, %v5068_v15  ;;  %v5073_v16 = vadd.f32 %v7470_v46, %v4333_v34  ;;  %v4663_v39 = vpop.f32.mrf.mxu1 }
 0x235   : > { %5966 = vst.msk [vmem:[%s9212_s28 + $0x68] sm:$0xf] %vm5939_vm5, %v6686_v5  ;;  %v4331_v36 = vadd.f32 %v3904_v26, %v8769_v42  ;;  %v7341_v48 = vpop.f32.mrf.mxu0 }
 0x236   : > { %5964 = vst.msk [vmem:[%s9212_s28 + $0x60] sm:$0xf] %vm5939_vm5, %v6684_v30  ;;  %v6687_v35 = vpack.c.bf16 %v5326_v11, %v5326_v11  ;;  %v5324_v62 = vmax.f32 %v5068_v15, %v5196_v52  ;;  %v5201_v53 = vmul.f32 0.2, %v5073_v16  ;;  %v4334_v17 = vadd.f32 %v7341_v48, %v8776_v57  ;;  %v7478_v24 = vpop.f32.mrf.mxu1 }
 0x237   : > { %v5071_v19 = vadd.f32 %v4644_v51, %v4331_v36  ;;  %v3907_v45 = vpop.f32.mrf.mxu0 }
 0x238   : > { %5967 = vst.msk [vmem:[%s9212_s28 + $0x6c] sm:$0xf] %vm5939_vm5, %v6687_v35  ;;  %v6685_v46 = vpack.c.bf16 %v5324_v62, %v5324_v62  ;;  %v5329_v37 = vmax.f32 %v5073_v16, %v5201_v53  ;;  %v5074_v59 = vadd.f32 %v7471_v8, %v4334_v17  ;;  %v4332_v42 = vadd.f32 %v3907_v45, %v8779_v0  ;;  %v4676_v54 = vpop.f32.mrf.mxu1 }
 0x239   : > { %v5199_v43 = vmul.f32 0.2, %v5071_v19  ;;  %v7344_v31 = vpop.f32.mrf.mxu0 }
 0x23a   : > { %5965 = vst.msk [vmem:[%s9212_s28 + $0x64] sm:$0xf] %vm5939_vm5, %v6685_v46  ;;  %v6690_v22 = vpack.c.bf16 %v5329_v37, %v5329_v37  ;;  %v5202_v49 = vmul.f32 0.2, %v5074_v59  ;;  %v5072_v38 = vadd.f32 %v4647_v63, %v4332_v42  ;;  %v4337_v57 = vadd.f32 %v7344_v31, %v8782_v27  ;;  %v7479_v51 = vpop.f32.mrf.mxu1 }
 0x23b   : > { %v5327_v21 = vmax.f32 %v5071_v19, %v5199_v43  ;;  %v3920_v55 = vpop.f32.mrf.mxu0 }
 0x23c   : > { %5970 = vst.msk [vmem:[%s9212_s28 + $0x78] sm:$0xf] %vm5939_vm5, %v6690_v22  ;;  %v5330_v8 = vmax.f32 %v5074_v59, %v5202_v49  ;;  %v5200_v56 = vmul.f32 0.2, %v5072_v38  ;;  %v5077_v0 = vadd.f32 %v7474_v44, %v4337_v57  ;;  %v4335_v7 = vadd.f32 %v3920_v55, %v8784_v47  ;;  %v4679_v29 = vpop.f32.mrf.mxu1 }
 0x23d   : > { %v6688_v40 = vpack.c.bf16 %v5327_v21, %v5327_v21  ;;  %v7345_v12 = vpop.f32.mrf.mxu0 }
 0x23e   : > { %v6691_v23 = vpack.c.bf16 %v5330_v8, %v5330_v8  ;;  %v5328_v63 = vmax.f32 %v5072_v38, %v5200_v56  ;;  %v5205_v61 = vmul.f32 0.2, %v5077_v0  ;;  %v5075_v27 = vadd.f32 %v4660_v33, %v4335_v7  ;;  %v7482_v25 = vpop.f32.mrf.mxu1 }
 0x23f   : > { %5968 = vst.msk [vmem:[%s9212_s28 + $0x70] sm:$0xf] %vm5939_vm5, %v6688_v40  ;;  %v4338_v10 = vadd.f32 %v7345_v12, %v8788_v20  ;;  %v3923_v3 = vpop.f32.mrf.mxu0 }
 0x240   : > { %5971 = vst.msk [vmem:[%s9212_s28 + $0x7c] sm:$0xf] %vm5939_vm5, %v6691_v23  ;;  %v6689_v44 = vpack.c.bf16 %v5328_v63, %v5328_v63  ;;  %v5333_v60 = vmax.f32 %v5077_v0, %v5205_v61  ;;  %v5203_v47 = vmul.f32 0.2, %v5075_v27  ;;  %v4336_v9 = vadd.f32 %v3923_v3, %v8794_v4  ;;  %v4692_v15 = vpop.f32.mrf.mxu1 }
 0x241   : > { %v5078_v34 = vadd.f32 %v7475_v14, %v4338_v10  ;;  %v7348_v5 = vpop.f32.mrf.mxu0 }
 0x242   : > { %5969 = vst.msk [vmem:[%s9212_s28 + $0x74] sm:$0xf] %vm5939_vm5, %v6689_v44  ;;  %v6694_v33 = vpack.c.bf16 %v5333_v60, %v5333_v60  ;;  %v5331_v26 = vmax.f32 %v5075_v27, %v5203_v47  ;;  %v5076_v30 = vadd.f32 %v4663_v39, %v4336_v9  ;;  %v4341_v20 = vadd.f32 %v7348_v5, %v8802_v2  ;;  %v7483_v11 = vpop.f32.mrf.mxu1 }
 0x243   : > { %v5206_v52 = vmul.f32 0.2, %v5078_v34  ;;  %v3936_v16 = vpop.f32.mrf.mxu0 }
 0x244   : > { %5974 = vst.msk [vmem:[%s9212_s28 + $0x88] sm:$0xf] %vm5939_vm5, %v6694_v33  ;;  %v6692_v36 = vpack.c.bf16 %v5331_v26, %v5331_v26  ;;  %v5204_v48 = vmul.f32 0.2, %v5076_v30  ;;  %v5081_v35 = vadd.f32 %v7478_v24, %v4341_v20  ;;  %v4339_v4 = vadd.f32 %v3936_v16, %v8808_v50  ;;  %v4695_v14 = vpop.f32.mrf.mxu1 }
 0x245   : > { %v5334_v62 = vmax.f32 %v5078_v34, %v5206_v52  ;;  %v7349_v53 = vpop.f32.mrf.mxu0 }
 0x246   : > { %5972 = vst.msk [vmem:[%s9212_s28 + $0x80] sm:$0xf] %vm5939_vm5, %v6692_v36  ;;  %v5332_v39 = vmax.f32 %v5076_v30, %v5204_v48  ;;  %v5209_v17 = vmul.f32 0.2, %v5081_v35  ;;  %v5079_v2 = vadd.f32 %v4676_v54, %v4339_v4  ;;  %v4342_v19 = vadd.f32 %v7349_v53, %v8814_v41  ;;  %v7486_v45 = vpop.f32.mrf.mxu1 }
 0x247   : > { %v6695_v46 = vpack.c.bf16 %v5334_v62, %v5334_v62  ;;  %v3939_v37 = vpop.f32.mrf.mxu0 }
 0x248   : > { %v6693_v59 = vpack.c.bf16 %v5332_v39, %v5332_v39  ;;  %v5337_v24 = vmax.f32 %v5081_v35, %v5209_v17  ;;  %v5207_v42 = vmul.f32 0.2, %v5079_v2  ;;  %v5082_v50 = vadd.f32 %v7479_v51, %v4342_v19  ;;  %v4708_v43 = vpop.f32.mrf.mxu1 }
 0x249   : > { %5975 = vst.msk [vmem:[%s9212_s28 + $0x8c] sm:$0xf] %vm5939_vm5, %v6695_v46  ;;  %v4340_v31 = vadd.f32 %v3939_v37, %v8816_v28  ;;  %v7352_v22 = vpop.f32.mrf.mxu0 }
 0x24a   : > { %5973 = vst.msk [vmem:[%s9212_s28 + $0x84] sm:$0xf] %vm5939_vm5, %v6693_v59  ;;  %v6698_v54 = vpack.c.bf16 %v5337_v24, %v5337_v24  ;;  %v5335_v49 = vmax.f32 %v5079_v2, %v5207_v42  ;;  %v5210_v41 = vmul.f32 0.2, %v5082_v50  ;;  %v4345_v38 = vadd.f32 %v7352_v22, %v8822_v6  ;;  %v7487_v57 = vpop.f32.mrf.mxu1 }
 0x24b   : > { %v5080_v21 = vadd.f32 %v4679_v29, %v4340_v31  ;;  %v3952_v55 = vpop.f32.mrf.mxu0 }
 0x24c   : > { %5978 = vst.msk [vmem:[%s9212_s28 + $0x98] sm:$0xf] %vm5939_vm5, %v6698_v54  ;;  %v6696_v51 = vpack.c.bf16 %v5335_v49, %v5335_v49  ;;  %v5338_v8 = vmax.f32 %v5082_v50, %v5210_v41  ;;  %v5085_v56 = vadd.f32 %v7482_v25, %v4345_v38  ;;  %v4343_v28 = vadd.f32 %v3952_v55, %v8826_v58  ;;  %v4711_v0 = vpop.f32.mrf.mxu1 }
 0x24d   : > { %v5208_v7 = vmul.f32 0.2, %v5080_v21  ;;  %v7353_v40 = vpop.f32.mrf.mxu0 }
 0x24e   : > { %5976 = vst.msk [vmem:[%s9212_s28 + $0x90] sm:$0xf] %vm5939_vm5, %v6696_v51  ;;  %v6699_v12 = vpack.c.bf16 %v5338_v8, %v5338_v8  ;;  %v5213_v23 = vmul.f32 0.2, %v5085_v56  ;;  %v5083_v63 = vadd.f32 %v4692_v15, %v4343_v28  ;;  %v4346_v6 = vadd.f32 %v7353_v40, %v8830_v13  ;;  %v7490_v29 = vpop.f32.mrf.mxu1  ;;  %v10162_v51 = vld [vmem:[#allocation127_spill] sm:$0xff]  ;;  %v10163_v40 = vld [vmem:[#allocation128_spill] sm:$0xff] }
 0x24f   : > { %v5336_v61 = vmax.f32 %v5080_v21, %v5208_v7  ;;  %v3955_v27 = vpop.f32.mrf.mxu0 }
 0x250   : > { %5979 = vst.msk [vmem:[%s9212_s28 + $0x9c] sm:$0xf] %vm5939_vm5, %v6699_v12  ;;  %v5341_v25 = vmax.f32 %v5085_v56, %v5213_v23  ;;  %v5211_v10 = vmul.f32 0.2, %v5083_v63  ;;  %v5086_v58 = vadd.f32 %v7483_v11, %v4346_v6  ;;  %v4344_v3 = vadd.f32 %v3955_v27, %v8832_v18  ;;  %v4724_v44 = vpop.f32.mrf.mxu1 }
 0x251   : > { %v6697_v60 = vpack.c.bf16 %v5336_v61, %v5336_v61  ;;  %v7356_v47 = vpop.f32.mrf.mxu0 }
 0x252   : > { %v6702_v9 = vpack.c.bf16 %v5341_v25, %v5341_v25  ;;  %v5339_v15 = vmax.f32 %v5083_v63, %v5211_v10  ;;  %v5214_v34 = vmul.f32 0.2, %v5086_v58  ;;  %v5084_v13 = vadd.f32 %v4695_v14, %v4344_v3  ;;  %v7491_v5 = vpop.f32.mrf.mxu1  ;;  %v10159_v14 = vld [vmem:[#allocation124_spill] sm:$0xff]  ;;  %v10164_v25 = vld [vmem:[#allocation129_spill] sm:$0xff] }
 0x253   : > { %5977 = vst.msk [vmem:[%s9212_s28 + $0x94] sm:$0xf] %vm5939_vm5, %v6697_v60  ;;  %v4349_v33 = vadd.f32 %v7356_v47, %v8838_v1  ;;  %v3968_v26 = vpop.f32.mrf.mxu0 }
 0x254   : > { %5982 = vst.msk [vmem:[%s9212_s28 + $0xa8] sm:$0xf] %vm5939_vm5, %v6702_v9  ;;  %v6700_v30 = vpack.c.bf16 %v5339_v15, %v5339_v15  ;;  %v5342_v20 = vmax.f32 %v5086_v58, %v5214_v34  ;;  %v5212_v18 = vmul.f32 0.2, %v5084_v13  ;;  %v4347_v11 = vadd.f32 %v3968_v26, %v8842_v32  ;;  %v4727_v52 = vpop.f32.mrf.mxu1  ;;  %v10160_v32 = vld [vmem:[#allocation125_spill] sm:$0xff]  ;;  %v10165_v34 = vld [vmem:[#allocation130_spill] sm:$0xff] }
 0x255   : > { %v5089_v16 = vadd.f32 %v7486_v45, %v4349_v33  ;;  %v7357_v36 = vpop.f32.mrf.mxu0 }
 0x256   : > { %5980 = vst.msk [vmem:[%s9212_s28 + $0xa0] sm:$0xf] %vm5939_vm5, %v6700_v30  ;;  %v6703_v48 = vpack.c.bf16 %v5342_v20, %v5342_v20  ;;  %v5340_v35 = vmax.f32 %v5084_v13, %v5212_v18  ;;  %v5087_v4 = vadd.f32 %v4708_v43, %v4347_v11  ;;  %v4350_v1 = vadd.f32 %v7357_v36, %v10159_v14  ;;  %v7494_v62 = vpop.f32.mrf.mxu1  ;;  %v10161_v43 = vld [vmem:[#allocation126_spill] sm:$0xff]  ;;  %v10166_v18 = vld [vmem:[#allocation131_spill] sm:$0xff] }
 0x257   : > { %v5217_v53 = vmul.f32 0.2, %v5089_v16  ;;  %v3971_v39 = vpop.f32.mrf.mxu0 }
 0x258   : > { %5983 = vst.msk [vmem:[%s9212_s28 + $0xac] sm:$0xf] %vm5939_vm5, %v6703_v48  ;;  %v6701_v17 = vpack.c.bf16 %v5340_v35, %v5340_v35  ;;  %v5215_v2 = vmul.f32 0.2, %v5087_v4  ;;  %v5090_v19 = vadd.f32 %v7487_v57, %v4350_v1  ;;  %v4348_v46 = vadd.f32 %v3971_v39, %v10160_v32  ;;  %v4740_v45 = vpop.f32.mrf.mxu1  ;;  %v10168_v32 = vld [vmem:[#allocation133_spill] sm:$0xff] }
 0x259   : > { %v5345_v37 = vmax.f32 %v5089_v16, %v5217_v53  ;;  %v7360_v59 = vpop.f32.mrf.mxu0  ;;  %v10167_v53 = vld [vmem:[#allocation132_spill] sm:$0xff] }
 0x25a   : > { %5981 = vst.msk [vmem:[%s9212_s28 + $0xa4] sm:$0xf] %vm5939_vm5, %v6701_v17  ;;  %v5343_v24 = vmax.f32 %v5087_v4, %v5215_v2  ;;  %v5218_v42 = vmul.f32 0.2, %v5090_v19  ;;  %v5088_v50 = vadd.f32 %v4711_v0, %v4348_v46  ;;  %v4353_v31 = vadd.f32 %v7360_v59, %v10161_v43  ;;  %v7495_v22 = vpop.f32.mrf.mxu1  ;;  %v10169_v43 = vld [vmem:[#allocation134_spill] sm:$0xff] }
 0x25b   : > { %v6706_v54 = vpack.c.bf16 %v5345_v37, %v5345_v37  ;;  %v3984_v49 = vpop.f32.mrf.mxu0 }
 0x25c   : > { %v6704_v41 = vpack.c.bf16 %v5343_v24, %v5343_v24  ;;  %v5346_v38 = vmax.f32 %v5090_v19, %v5218_v42  ;;  %v5216_v57 = vmul.f32 0.2, %v5088_v50  ;;  %v5093_v21 = vadd.f32 %v7490_v29, %v4353_v31  ;;  %v4743_v55 = vpop.f32.mrf.mxu1 }
 0x25d   : > { %5986 = vst.msk [vmem:[%s9212_s28 + $0xb8] sm:$0xf] %vm5939_vm5, %v6706_v54  ;;  %v4351_v8 = vadd.f32 %v3984_v49, %v10162_v51  ;;  %v7361_v56 = vpop.f32.mrf.mxu0  ;;  %v10170_v51 = vld [vmem:[#allocation2_spill] sm:$0xff] }
 0x25e   : > { %5984 = vst.msk [vmem:[%s9212_s28 + $0xb0] sm:$0xf] %vm5939_vm5, %v6704_v41  ;;  %v6707_v28 = vpack.c.bf16 %v5346_v38, %v5346_v38  ;;  %v5344_v0 = vmax.f32 %v5088_v50, %v5216_v57  ;;  %v5221_v7 = vmul.f32 0.2, %v5093_v21  ;;  %v4354_v12 = vadd.f32 %v7361_v56, %v10163_v40  ;;  %v7498_v23 = vpop.f32.mrf.mxu1  ;;  %v10171_v40 = vld [vmem:[#allocation135_spill] sm:$0xff] }
 0x25f   : > { %v5091_v63 = vadd.f32 %v4724_v44, %v4351_v8  ;;  %v3987_v6 = vpop.f32.mrf.mxu0 }
 0x260   : > { %5987 = vst.msk [vmem:[%s9212_s28 + $0xbc] sm:$0xf] %vm5939_vm5, %v6707_v28  ;;  %v6705_v29 = vpack.c.bf16 %v5344_v0, %v5344_v0  ;;  %v5349_v61 = vmax.f32 %v5093_v21, %v5221_v7  ;;  %v5094_v27 = vadd.f32 %v7491_v5, %v4354_v12  ;;  %v4352_v10 = vadd.f32 %v3987_v6, %v10164_v25  ;;  %v4756_v58 = vpop.f32.mrf.mxu1 }
 0x261   : > { %v5219_v3 = vmul.f32 0.2, %v5091_v63  ;;  %v7364_v60 = vpop.f32.mrf.mxu0 }
 0x262   : > { %5985 = vst.msk [vmem:[%s9212_s28 + $0xb4] sm:$0xf] %vm5939_vm5, %v6705_v29  ;;  %v6710_v47 = vpack.c.bf16 %v5349_v61, %v5349_v61  ;;  %v5222_v9 = vmul.f32 0.2, %v5094_v27  ;;  %v5092_v15 = vadd.f32 %v4727_v52, %v4352_v10  ;;  %v4357_v13 = vadd.f32 %v7364_v60, %v10165_v34  ;;  %v7499_v44 = vpop.f32.mrf.mxu1  ;;  %v10173_v34 = vld [vmem:[#allocation9_spill] sm:$0xff] }
 0x263   : > { %v5347_v33 = vmax.f32 %v5091_v63, %v5219_v3  ;;  %v4000_v26 = vpop.f32.mrf.mxu0  ;;  %v10172_v3 = vld [vmem:[#allocation7_spill] sm:$0xff] }
 0x264   : > { %5990 = vst.msk [vmem:[%s9212_s28 + $0xc8] sm:$0xf] %vm5939_vm5, %v6710_v47  ;;  %v5350_v5 = vmax.f32 %v5094_v27, %v5222_v9  ;;  %v5220_v30 = vmul.f32 0.2, %v5092_v15  ;;  %v5097_v20 = vadd.f32 %v7494_v62, %v4357_v13  ;;  %v4355_v11 = vadd.f32 %v4000_v26, %v10166_v18  ;;  %v4759_v16 = vpop.f32.mrf.mxu1  ;;  %v10174_v18 = vld [vmem:[#allocation3_spill] sm:$0xff] }
 0x265   : > { %v6708_v36 = vpack.c.bf16 %v5347_v33, %v5347_v33  ;;  %v7365_v48 = vpop.f32.mrf.mxu0 }
 0x266   : > { %v6711_v35 = vpack.c.bf16 %v5350_v5, %v5350_v5  ;;  %v5348_v52 = vmax.f32 %v5092_v15, %v5220_v30  ;;  %v5225_v4 = vmul.f32 0.2, %v5097_v20  ;;  %v5095_v14 = vadd.f32 %v4740_v45, %v4355_v11  ;;  %v7502_v1 = vpop.f32.mrf.mxu1 }
 0x267   : > { %5988 = vst.msk [vmem:[%s9212_s28 + $0xc0] sm:$0xf] %vm5939_vm5, %v6708_v36  ;;  %v4358_v39 = vadd.f32 %v7365_v48, %v10167_v53  ;;  %v4003_v17 = vpop.f32.mrf.mxu0  ;;  %v10175_v53 = vld [vmem:[#allocation4_spill] sm:$0xff] }
 0x268   : > { %5991 = vst.msk [vmem:[%s9212_s28 + $0xcc] sm:$0xf] %vm5939_vm5, %v6711_v35  ;;  %v6709_v62 = vpack.c.bf16 %v5348_v52, %v5348_v52  ;;  %v5353_v2 = vmax.f32 %v5097_v20, %v5225_v4  ;;  %v5223_v19 = vmul.f32 0.2, %v5095_v14  ;;  %v4356_v46 = vadd.f32 %v4003_v17, %v10168_v32  ;;  %v4772_v37 = vpop.f32.mrf.mxu1  ;;  %v10176_v32 = vld [vmem:[#allocation12_spill] sm:$0xff] }
 0x269   : > { %v5098_v59 = vadd.f32 %v7495_v22, %v4358_v39  ;;  %v7368_v24 = vpop.f32.mrf.mxu0 }
 0x26a   : > { %5989 = vst.msk [vmem:[%s9212_s28 + $0xc4] sm:$0xf] %vm5939_vm5, %v6709_v62  ;;  %v6714_v45 = vpack.c.bf16 %v5353_v2, %v5353_v2  ;;  %v5351_v42 = vmax.f32 %v5095_v14, %v5223_v19  ;;  %v5096_v50 = vadd.f32 %v4743_v55, %v4356_v46  ;;  %v4361_v31 = vadd.f32 %v7368_v24, %v10169_v43  ;;  %v7503_v54 = vpop.f32.mrf.mxu1 }
 0x26b   : > { %v5226_v49 = vmul.f32 0.2, %v5098_v59  ;;  %v4016_v41 = vpop.f32.mrf.mxu0 }
 0x26c   : > { %5994 = vst.msk [vmem:[%s9212_s28 + $0xd8] sm:$0xf] %vm5939_vm5, %v6714_v45  ;;  %v6712_v38 = vpack.c.bf16 %v5351_v42, %v5351_v42  ;;  %v5224_v57 = vmul.f32 0.2, %v5096_v50  ;;  %v5101_v21 = vadd.f32 %v7498_v23, %v4361_v31  ;;  %v4359_v8 = vadd.f32 %v4016_v41, %v10170_v51  ;;  %v4775_v22 = vpop.f32.mrf.mxu1  ;;  %v10178_v51 = vld [vmem:[#allocation5_spill] sm:$0xff] }
 0x26d   : > { %v5354_v56 = vmax.f32 %v5098_v59, %v5226_v49  ;;  %v7369_v28 = vpop.f32.mrf.mxu0  ;;  %v10177_v49 = vld [vmem:[#allocation13_spill] sm:$0xff] }
 0x26e   : > { %5992 = vst.msk [vmem:[%s9212_s28 + $0xd0] sm:$0xf] %vm5939_vm5, %v6712_v38  ;;  %v5352_v55 = vmax.f32 %v5096_v50, %v5224_v57  ;;  %v5229_v0 = vmul.f32 0.2, %v5101_v21  ;;  %v5099_v7 = vadd.f32 %v4756_v58, %v4359_v8  ;;  %v4362_v12 = vadd.f32 %v7369_v28, %v10171_v40  ;;  %v7506_v63 = vpop.f32.mrf.mxu1  ;;  %v10179_v40 = vld [vmem:[#allocation6_spill] sm:$0xff] }
 0x26f   : > { %v6715_v6 = vpack.c.bf16 %v5354_v56, %v5354_v56  ;;  %v4019_v29 = vpop.f32.mrf.mxu0 }
 0x270   : > { %v6713_v61 = vpack.c.bf16 %v5352_v55, %v5352_v55  ;;  %v5357_v23 = vmax.f32 %v5101_v21, %v5229_v0  ;;  %v5227_v27 = vmul.f32 0.2, %v5099_v7  ;;  %v5102_v25 = vadd.f32 %v7499_v44, %v4362_v12  ;;  %v4788_v10 = vpop.f32.mrf.mxu1 }
 0x271   : > { %5995 = vst.msk [vmem:[%s9212_s28 + $0xdc] sm:$0xf] %vm5939_vm5, %v6715_v6  ;;  %v4360_v60 = vadd.f32 %v4019_v29, %v10172_v3  ;;  %v7372_v47 = vpop.f32.mrf.mxu0  ;;  %v10180_v3 = vld [vmem:[#allocation15_spill] sm:$0xff] }
 0x272   : > { %5993 = vst.msk [vmem:[%s9212_s28 + $0xd4] sm:$0xf] %vm5939_vm5, %v6713_v61  ;;  %v6718_v58 = vpack.c.bf16 %v5357_v23, %v5357_v23  ;;  %v5355_v9 = vmax.f32 %v5099_v7, %v5227_v27  ;;  %v5230_v15 = vmul.f32 0.2, %v5102_v25  ;;  %v4365_v13 = vadd.f32 %v7372_v47, %v10173_v34  ;;  %v7507_v33 = vpop.f32.mrf.mxu1  ;;  %v10181_v34 = vld [vmem:[#allocation17_spill] sm:$0xff] }
 0x273   : > { %v5100_v26 = vadd.f32 %v4759_v16, %v4360_v60  ;;  %v4032_v5 = vpop.f32.mrf.mxu0 }
 0x274   : > { %5998 = vst.msk [vmem:[%s9212_s28 + $0xe8] sm:$0xf] %vm5939_vm5, %v6718_v58  ;;  %v6716_v44 = vpack.c.bf16 %v5355_v9, %v5355_v9  ;;  %v5358_v30 = vmax.f32 %v5102_v25, %v5230_v15  ;;  %v5105_v20 = vadd.f32 %v7502_v1, %v4365_v13  ;;  %v4363_v11 = vadd.f32 %v4032_v5, %v10174_v18  ;;  %v4791_v36 = vpop.f32.mrf.mxu1 }
 0x275   : > { %v5228_v48 = vmul.f32 0.2, %v5100_v26  ;;  %v7373_v35 = vpop.f32.mrf.mxu0 }
 0x276   : > { %5996 = vst.msk [vmem:[%s9212_s28 + $0xe0] sm:$0xf] %vm5939_vm5, %v6716_v44  ;;  %v6719_v52 = vpack.c.bf16 %v5358_v30, %v5358_v30  ;;  %v5233_v4 = vmul.f32 0.2, %v5105_v20  ;;  %v5103_v14 = vadd.f32 %v4772_v37, %v4363_v11  ;;  %v4366_v39 = vadd.f32 %v7373_v35, %v10175_v53  ;;  %v7510_v16 = vpop.f32.mrf.mxu1  ;;  %v10183_v53 = vld [vmem:[#allocation10_spill] sm:$0xff] }
 0x277   : > { %v5356_v17 = vmax.f32 %v5100_v26, %v5228_v48  ;;  %v4035_v62 = vpop.f32.mrf.mxu0  ;;  %v10182_v48 = vld [vmem:[#allocation8_spill] sm:$0xff] }
 0x278   : > { %5999 = vst.msk [vmem:[%s9212_s28 + $0xec] sm:$0xf] %vm5939_vm5, %v6719_v52  ;;  %v5361_v1 = vmax.f32 %v5105_v20, %v5233_v4  ;;  %v5231_v2 = vmul.f32 0.2, %v5103_v14  ;;  %v5106_v19 = vadd.f32 %v7503_v54, %v4366_v39  ;;  %v4364_v46 = vadd.f32 %v4035_v62, %v10176_v32  ;;  %v4804_v59 = vpop.f32.mrf.mxu1  ;;  %v10184_v32 = vld [vmem:[#allocation20_spill] sm:$0xff] }
 0x279   : > { %v6717_v24 = vpack.c.bf16 %v5356_v17, %v5356_v17  ;;  %v7376_v45 = vpop.f32.mrf.mxu0 }
 0x27a   : > { %v6722_v42 = vpack.c.bf16 %v5361_v1, %v5361_v1  ;;  %v5359_v37 = vmax.f32 %v5103_v14, %v5231_v2  ;;  %v5234_v50 = vmul.f32 0.2, %v5106_v19  ;;  %v5104_v43 = vadd.f32 %v4775_v22, %v4364_v46  ;;  %v7511_v31 = vpop.f32.mrf.mxu1 }
 0x27b   : > { %5997 = vst.msk [vmem:[%s9212_s28 + $0xe4] sm:$0xf] %vm5939_vm5, %v6717_v24  ;;  %v4369_v41 = vadd.f32 %v7376_v45, %v10177_v49  ;;  %v4048_v38 = vpop.f32.mrf.mxu0  ;;  %v10185_v49 = vld [vmem:[#allocation21_spill] sm:$0xff] }
 0x27c   : > { %6002 = vst.msk [vmem:[%s9212_s28 + $0xf8] sm:$0xf] %vm5939_vm5, %v6722_v42  ;;  %v6720_v54 = vpack.c.bf16 %v5359_v37, %v5359_v37  ;;  %v5362_v57 = vmax.f32 %v5106_v19, %v5234_v50  ;;  %v5232_v21 = vmul.f32 0.2, %v5104_v43  ;;  %v4367_v8 = vadd.f32 %v4048_v38, %v10178_v51  ;;  %v4807_v56 = vpop.f32.mrf.mxu1  ;;  %v10186_v51 = vld [vmem:[#allocation11_spill] sm:$0xff] }
 0x27d   : > { %v5109_v28 = vadd.f32 %v7506_v63, %v4369_v41  ;;  %v7377_v55 = vpop.f32.mrf.mxu0 }
 0x27e   : > { %6000 = vst.msk [vmem:[%s9212_s28 + $0xf0] sm:$0xf] %vm5939_vm5, %v6720_v54  ;;  %v6723_v22 = vpack.c.bf16 %v5362_v57, %v5362_v57  ;;  %v5360_v0 = vmax.f32 %v5104_v43, %v5232_v21  ;;  %v5107_v7 = vadd.f32 %v4788_v10, %v4367_v8  ;;  %v4370_v12 = vadd.f32 %v7377_v55, %v10179_v40  ;;  %v7514_v6 = vpop.f32.mrf.mxu1 }
 0x27f   : > { %v5237_v29 = vmul.f32 0.2, %v5109_v28  ;;  %v4051_v61 = vpop.f32.mrf.mxu0 }
 0x280   : > { %6003 = vst.msk [vmem:[%s9212_s28 + $0xfc] sm:$0xf] %vm5939_vm5, %v6723_v22  ;;  %v6721_v23 = vpack.c.bf16 %v5360_v0, %v5360_v0  ;;  %v5235_v27 = vmul.f32 0.2, %v5107_v7  ;;  %v5110_v25 = vadd.f32 %v7507_v33, %v4370_v12  ;;  %v4368_v60 = vadd.f32 %v4051_v61, %v10180_v3  ;;  %v4820_v63 = vpop.f32.mrf.mxu1  ;;  %v10188_v3 = vld [vmem:[#allocation23_spill] sm:$0xff] }
 0x281   : > { %v5365_v47 = vmax.f32 %v5109_v28, %v5237_v29  ;;  %v7380_v58 = vpop.f32.mrf.mxu0  ;;  %v10187_v29 = vld [vmem:[#allocation14_spill] sm:$0xff] }
 0x282   : > { %6001 = vst.msk [vmem:[%s9212_s28 + $0xf4] sm:$0xf] %vm5939_vm5, %v6721_v23  ;;  %v5363_v10 = vmax.f32 %v5107_v7, %v5235_v27  ;;  %v5238_v9 = vmul.f32 0.2, %v5110_v25  ;;  %v5108_v15 = vadd.f32 %v4791_v36, %v4368_v60  ;;  %v4373_v13 = vadd.f32 %v7380_v58, %v10181_v34  ;;  %v7515_v26 = vpop.f32.mrf.mxu1  ;;  %v10189_v34 = vld [vmem:[#allocation25_spill] sm:$0xff] }
 0x283   : > { %v6726_v5 = vpack.c.bf16 %v5365_v47, %v5365_v47  ;;  %v4064_v44 = vpop.f32.mrf.mxu0 }
 0x284   : > { %v6724_v30 = vpack.c.bf16 %v5363_v10, %v5363_v10  ;;  %v5366_v33 = vmax.f32 %v5110_v25, %v5238_v9  ;;  %v5236_v20 = vmul.f32 0.2, %v5108_v15  ;;  %v5113_v18 = vadd.f32 %v7510_v16, %v4373_v13  ;;  %v4823_v11 = vpop.f32.mrf.mxu1 }
 0x285   : > { %6006 = vst.msk [vmem:[%s9212_s28 + $0x108] sm:$0xf] %vm5939_vm5, %v6726_v5  ;;  %v4371_v35 = vadd.f32 %v4064_v44, %v10182_v48  ;;  %v7381_v52 = vpop.f32.mrf.mxu0  ;;  %v10190_v48 = vld [vmem:[#allocation16_spill] sm:$0xff] }
 0x286   : > { %6004 = vst.msk [vmem:[%s9212_s28 + $0x100] sm:$0xf] %vm5939_vm5, %v6724_v30  ;;  %v6727_v36 = vpack.c.bf16 %v5366_v33, %v5366_v33  ;;  %v5364_v4 = vmax.f32 %v5108_v15, %v5236_v20  ;;  %v5241_v14 = vmul.f32 0.2, %v5113_v18  ;;  %v4374_v39 = vadd.f32 %v7381_v52, %v10183_v53  ;;  %v7518_v17 = vpop.f32.mrf.mxu1  ;;  %v10191_v53 = vld [vmem:[#allocation18_spill] sm:$0xff] }
 0x287   : > { %v5111_v62 = vadd.f32 %v4804_v59, %v4371_v35  ;;  %v4067_v1 = vpop.f32.mrf.mxu0 }
 0x288   : > { %6007 = vst.msk [vmem:[%s9212_s28 + $0x10c] sm:$0xf] %vm5939_vm5, %v6727_v36  ;;  %v6725_v16 = vpack.c.bf16 %v5364_v4, %v5364_v4  ;;  %v5369_v2 = vmax.f32 %v5113_v18, %v5241_v14  ;;  %v5114_v19 = vadd.f32 %v7511_v31, %v4374_v39  ;;  %v4372_v46 = vadd.f32 %v4067_v1, %v10184_v32  ;;  %v4836_v24 = vpop.f32.mrf.mxu1 }
 0x289   : > { %v5239_v45 = vmul.f32 0.2, %v5111_v62  ;;  %v7384_v42 = vpop.f32.mrf.mxu0 }
 0x28a   : > { %6005 = vst.msk [vmem:[%s9212_s28 + $0x104] sm:$0xf] %vm5939_vm5, %v6725_v16  ;;  %v6730_v37 = vpack.c.bf16 %v5369_v2, %v5369_v2  ;;  %v5242_v50 = vmul.f32 0.2, %v5114_v19  ;;  %v5112_v43 = vadd.f32 %v4807_v56, %v4372_v46  ;;  %v4377_v41 = vadd.f32 %v7384_v42, %v10185_v49  ;;  %v7519_v59 = vpop.f32.mrf.mxu1  ;;  %v10193_v49 = vld [vmem:[#allocation29_spill] sm:$0xff] }
 0x28b   : > { %v5367_v38 = vmax.f32 %v5111_v62, %v5239_v45  ;;  %v4080_v54 = vpop.f32.mrf.mxu0  ;;  %v10192_v45 = vld [vmem:[#allocation28_spill] sm:$0xff] }
 0x28c   : > { %6010 = vst.msk [vmem:[%s9212_s28 + $0x118] sm:$0xf] %vm5939_vm5, %v6730_v37  ;;  %v5370_v31 = vmax.f32 %v5114_v19, %v5242_v50  ;;  %v5240_v57 = vmul.f32 0.2, %v5112_v43  ;;  %v5117_v21 = vadd.f32 %v7514_v6, %v4377_v41  ;;  %v4375_v8 = vadd.f32 %v4080_v54, %v10186_v51  ;;  %v4839_v28 = vpop.f32.mrf.mxu1  ;;  %v10194_v51 = vld [vmem:[#allocation19_spill] sm:$0xff] }
 0x28d   : > { %v6728_v55 = vpack.c.bf16 %v5367_v38, %v5367_v38  ;;  %v7385_v22 = vpop.f32.mrf.mxu0 }
 0x28e   : > { %v6731_v0 = vpack.c.bf16 %v5370_v31, %v5370_v31  ;;  %v5368_v56 = vmax.f32 %v5112_v43, %v5240_v57  ;;  %v5245_v7 = vmul.f32 0.2, %v5117_v21  ;;  %v5115_v40 = vadd.f32 %v4820_v63, %v4375_v8  ;;  %v7522_v12 = vpop.f32.mrf.mxu1 }
 0x28f   : > { %6008 = vst.msk [vmem:[%s9212_s28 + $0x110] sm:$0xf] %vm5939_vm5, %v6728_v55  ;;  %v4378_v61 = vadd.f32 %v7385_v22, %v10187_v29  ;;  %v4083_v23 = vpop.f32.mrf.mxu0  ;;  %v10195_v29 = vld [vmem:[#allocation22_spill] sm:$0xff] }
 0x290   : > { %6011 = vst.msk [vmem:[%s9212_s28 + $0x11c] sm:$0xf] %vm5939_vm5, %v6731_v0  ;;  %v6729_v6 = vpack.c.bf16 %v5368_v56, %v5368_v56  ;;  %v5373_v27 = vmax.f32 %v5117_v21, %v5245_v7  ;;  %v5243_v25 = vmul.f32 0.2, %v5115_v40  ;;  %v4376_v60 = vadd.f32 %v4083_v23, %v10188_v3  ;;  %v4852_v47 = vpop.f32.mrf.mxu1  ;;  %v10196_v3 = vld [vmem:[#allocation31_spill] sm:$0xff] }
 0x291   : > { %v5118_v58 = vadd.f32 %v7515_v26, %v4378_v61  ;;  %v7388_v10 = vpop.f32.mrf.mxu0 }
 0x292   : > { %6009 = vst.msk [vmem:[%s9212_s28 + $0x114] sm:$0xf] %vm5939_vm5, %v6729_v6  ;;  %v6734_v63 = vpack.c.bf16 %v5373_v27, %v5373_v27  ;;  %v5371_v9 = vmax.f32 %v5115_v40, %v5243_v25  ;;  %v5116_v15 = vadd.f32 %v4823_v11, %v4376_v60  ;;  %v4381_v13 = vadd.f32 %v7388_v10, %v10189_v34  ;;  %v7523_v5 = vpop.f32.mrf.mxu1 }
 0x293   : > { %v5246_v44 = vmul.f32 0.2, %v5118_v58  ;;  %v4096_v30 = vpop.f32.mrf.mxu0 }
 0x294   : > { %6014 = vst.msk [vmem:[%s9212_s28 + $0x128] sm:$0xf] %vm5939_vm5, %v6734_v63  ;;  %v6732_v33 = vpack.c.bf16 %v5371_v9, %v5371_v9  ;;  %v5244_v20 = vmul.f32 0.2, %v5116_v15  ;;  %v5121_v18 = vadd.f32 %v7518_v17, %v4381_v13  ;;  %v4379_v35 = vadd.f32 %v4096_v30, %v10190_v48  ;;  %v4855_v26 = vpop.f32.mrf.mxu1  ;;  %v10198_v48 = vld [vmem:[#allocation24_spill] sm:$0xff] }
 0x295   : > { %v5374_v52 = vmax.f32 %v5118_v58, %v5246_v44  ;;  %v7389_v36 = vpop.f32.mrf.mxu0  ;;  %v10197_v44 = vld [vmem:[#allocation33_spill] sm:$0xff] }
 0x296   : > { %6012 = vst.msk [vmem:[%s9212_s28 + $0x120] sm:$0xf] %vm5939_vm5, %v6732_v33  ;;  %v5372_v11 = vmax.f32 %v5116_v15, %v5244_v20  ;;  %v5249_v4 = vmul.f32 0.2, %v5121_v18  ;;  %v5119_v14 = vadd.f32 %v4836_v24, %v4379_v35  ;;  %v4382_v39 = vadd.f32 %v7389_v36, %v10191_v53  ;;  %v7526_v62 = vpop.f32.mrf.mxu1  ;;  %v10199_v53 = vld [vmem:[#allocation26_spill] sm:$0xff] }
 0x297   : > { %v6735_v1 = vpack.c.bf16 %v5374_v52, %v5374_v52  ;;  %v4099_v16 = vpop.f32.mrf.mxu0 }
 0x298   : > { %v6733_v2 = vpack.c.bf16 %v5372_v11, %v5372_v11  ;;  %v5377_v17 = vmax.f32 %v5121_v18, %v5249_v4  ;;  %v5247_v19 = vmul.f32 0.2, %v5119_v14  ;;  %v5122_v32 = vadd.f32 %v7519_v59, %v4382_v39  ;;  %v4868_v46 = vpop.f32.mrf.mxu1 }
 0x299   : > { %6015 = vst.msk [vmem:[%s9212_s28 + $0x12c] sm:$0xf] %vm5939_vm5, %v6735_v1  ;;  %v4380_v42 = vadd.f32 %v4099_v16, %v10192_v45  ;;  %v7392_v37 = vpop.f32.mrf.mxu0  ;;  %v10200_v45 = vld [vmem:[#allocation36_spill] sm:$0xff] }
 0x29a   : > { %6013 = vst.msk [vmem:[%s9212_s28 + $0x124] sm:$0xf] %vm5939_vm5, %v6733_v2  ;;  %v6738_v24 = vpack.c.bf16 %v5377_v17, %v5377_v17  ;;  %v5375_v50 = vmax.f32 %v5119_v14, %v5247_v19  ;;  %v5250_v43 = vmul.f32 0.2, %v5122_v32  ;;  %v4385_v41 = vadd.f32 %v7392_v37, %v10193_v49  ;;  %v7527_v38 = vpop.f32.mrf.mxu1  ;;  %v10201_v49 = vld [vmem:[#allocation37_spill] sm:$0xff] }
 0x29b   : > { %v5120_v54 = vadd.f32 %v4839_v28, %v4380_v42  ;;  %v4112_v31 = vpop.f32.mrf.mxu0 }
 0x29c   : > { %6018 = vst.msk [vmem:[%s9212_s28 + $0x138] sm:$0xf] %vm5939_vm5, %v6738_v24  ;;  %v6736_v59 = vpack.c.bf16 %v5375_v50, %v5375_v50  ;;  %v5378_v57 = vmax.f32 %v5122_v32, %v5250_v43  ;;  %v5125_v21 = vadd.f32 %v7522_v12, %v4385_v41  ;;  %v4383_v8 = vadd.f32 %v4112_v31, %v10194_v51  ;;  %v4871_v55 = vpop.f32.mrf.mxu1 }
 0x29d   : > { %v5248_v22 = vmul.f32 0.2, %v5120_v54  ;;  %v7393_v0 = vpop.f32.mrf.mxu0 }
 0x29e   : > { %6016 = vst.msk [vmem:[%s9212_s28 + $0x130] sm:$0xf] %vm5939_vm5, %v6736_v59  ;;  %v6739_v56 = vpack.c.bf16 %v5378_v57, %v5378_v57  ;;  %v5253_v7 = vmul.f32 0.2, %v5125_v21  ;;  %v5123_v40 = vadd.f32 %v4852_v47, %v4383_v8  ;;  %v4386_v61 = vadd.f32 %v7393_v0, %v10195_v29  ;;  %v7530_v28 = vpop.f32.mrf.mxu1  ;;  %v10203_v29 = vld [vmem:[#allocation30_spill] sm:$0xff] }
 0x29f   : > { %v5376_v23 = vmax.f32 %v5120_v54, %v5248_v22  ;;  %v4115_v6 = vpop.f32.mrf.mxu0  ;;  %v10202_v22 = vld [vmem:[#allocation27_spill] sm:$0xff] }
 0x2a0   : > { %6019 = vst.msk [vmem:[%s9212_s28 + $0x13c] sm:$0xf] %vm5939_vm5, %v6739_v56  ;;  %v5381_v12 = vmax.f32 %v5125_v21, %v5253_v7  ;;  %v5251_v27 = vmul.f32 0.2, %v5123_v40  ;;  %v5126_v25 = vadd.f32 %v7523_v5, %v4386_v61  ;;  %v4384_v60 = vadd.f32 %v4115_v6, %v10196_v3  ;;  %v4884_v58 = vpop.f32.mrf.mxu1  ;;  %v10204_v3 = vld [vmem:[#allocation39_spill] sm:$0xff] }
 0x2a1   : > { %v6737_v10 = vpack.c.bf16 %v5376_v23, %v5376_v23  ;;  %v7396_v63 = vpop.f32.mrf.mxu0 }
 0x2a2   : > { %v6742_v9 = vpack.c.bf16 %v5381_v12, %v5381_v12  ;;  %v5379_v47 = vmax.f32 %v5123_v40, %v5251_v27  ;;  %v5254_v15 = vmul.f32 0.2, %v5126_v25  ;;  %v5124_v34 = vadd.f32 %v4855_v26, %v4384_v60  ;;  %v7531_v13 = vpop.f32.mrf.mxu1 }
 0x2a3   : > { %6017 = vst.msk [vmem:[%s9212_s28 + $0x134] sm:$0xf] %vm5939_vm5, %v6737_v10  ;;  %v4389_v30 = vadd.f32 %v7396_v63, %v10197_v44  ;;  %v4128_v33 = vpop.f32.mrf.mxu0  ;;  %v10205_v44 = vld [vmem:[#allocation41_spill] sm:$0xff] }
 0x2a4   : > { %6022 = vst.msk [vmem:[%s9212_s28 + $0x148] sm:$0xf] %vm5939_vm5, %v6742_v9  ;;  %v6740_v5 = vpack.c.bf16 %v5379_v47, %v5379_v47  ;;  %v5382_v20 = vmax.f32 %v5126_v25, %v5254_v15  ;;  %v5252_v18 = vmul.f32 0.2, %v5124_v34  ;;  %v4387_v35 = vadd.f32 %v4128_v33, %v10198_v48  ;;  %v4887_v52 = vpop.f32.mrf.mxu1  ;;  %v10206_v48 = vld [vmem:[#allocation32_spill] sm:$0xff] }
 0x2a5   : > { %v5129_v36 = vadd.f32 %v7526_v62, %v4389_v30  ;;  %v7397_v11 = vpop.f32.mrf.mxu0 }
 0x2a6   : > { %6020 = vst.msk [vmem:[%s9212_s28 + $0x140] sm:$0xf] %vm5939_vm5, %v6740_v5  ;;  %v6743_v26 = vpack.c.bf16 %v5382_v20, %v5382_v20  ;;  %v5380_v4 = vmax.f32 %v5124_v34, %v5252_v18  ;;  %v5127_v14 = vadd.f32 %v4868_v46, %v4387_v35  ;;  %v4390_v39 = vadd.f32 %v7397_v11, %v10199_v53  ;;  %v7534_v1 = vpop.f32.mrf.mxu1 }
 0x2a7   : > { %v5257_v16 = vmul.f32 0.2, %v5129_v36  ;;  %v4131_v2 = vpop.f32.mrf.mxu0 }
 0x2a8   : > { %6023 = vst.msk [vmem:[%s9212_s28 + $0x14c] sm:$0xf] %vm5939_vm5, %v6743_v26  ;;  %v6741_v17 = vpack.c.bf16 %v5380_v4, %v5380_v4  ;;  %v5255_v19 = vmul.f32 0.2, %v5127_v14  ;;  %v5130_v32 = vadd.f32 %v7527_v38, %v4390_v39  ;;  %v4388_v42 = vadd.f32 %v4131_v2, %v10200_v45  ;;  %v4900_v62 = vpop.f32.mrf.mxu1  ;;  %v10208_v45 = vld [vmem:[#allocation44_spill] sm:$0xff] }
 0x2a9   : > { %v5385_v37 = vmax.f32 %v5129_v36, %v5257_v16  ;;  %v7400_v24 = vpop.f32.mrf.mxu0  ;;  %v10207_v16 = vld [vmem:[#allocation34_spill] sm:$0xff] }
 0x2aa   : > { %6021 = vst.msk [vmem:[%s9212_s28 + $0x144] sm:$0xf] %vm5939_vm5, %v6741_v17  ;;  %v5383_v46 = vmax.f32 %v5127_v14, %v5255_v19  ;;  %v5258_v50 = vmul.f32 0.2, %v5130_v32  ;;  %v5128_v43 = vadd.f32 %v4871_v55, %v4388_v42  ;;  %v4393_v41 = vadd.f32 %v7400_v24, %v10201_v49  ;;  %v7535_v54 = vpop.f32.mrf.mxu1  ;;  %v10209_v49 = vld [vmem:[#allocation45_spill] sm:$0xff] }
 0x2ab   : > { %v6746_v31 = vpack.c.bf16 %v5385_v37, %v5385_v37  ;;  %v4144_v59 = vpop.f32.mrf.mxu0 }
 0x2ac   : > { %v6744_v57 = vpack.c.bf16 %v5383_v46, %v5383_v46  ;;  %v5386_v38 = vmax.f32 %v5130_v32, %v5258_v50  ;;  %v5256_v21 = vmul.f32 0.2, %v5128_v43  ;;  %v5133_v51 = vadd.f32 %v7530_v28, %v4393_v41  ;;  %v4903_v8 = vpop.f32.mrf.mxu1 }
 0x2ad   : > { %6026 = vst.msk [vmem:[%s9212_s28 + $0x158] sm:$0xf] %vm5939_vm5, %v6746_v31  ;;  %v4391_v0 = vadd.f32 %v4144_v59, %v10202_v22  ;;  %v7401_v56 = vpop.f32.mrf.mxu0  ;;  %v10210_v22 = vld [vmem:[#allocation35_spill] sm:$0xff] }
 0x2ae   : > { %6024 = vst.msk [vmem:[%s9212_s28 + $0x150] sm:$0xf] %vm5939_vm5, %v6744_v57  ;;  %v6747_v55 = vpack.c.bf16 %v5386_v38, %v5386_v38  ;;  %v5384_v7 = vmax.f32 %v5128_v43, %v5256_v21  ;;  %v5261_v40 = vmul.f32 0.2, %v5133_v51  ;;  %v4394_v61 = vadd.f32 %v7401_v56, %v10203_v29  ;;  %v7538_v23 = vpop.f32.mrf.mxu1  ;;  %v10211_v29 = vld [vmem:[#allocation38_spill] sm:$0xff] }
 0x2af   : > { %v5131_v6 = vadd.f32 %v4884_v58, %v4391_v0  ;;  %v4147_v12 = vpop.f32.mrf.mxu0 }
 0x2b0   : > { %6027 = vst.msk [vmem:[%s9212_s28 + $0x15c] sm:$0xf] %vm5939_vm5, %v6747_v55  ;;  %v6745_v28 = vpack.c.bf16 %v5384_v7, %v5384_v7  ;;  %v5389_v27 = vmax.f32 %v5133_v51, %v5261_v40  ;;  %v5134_v25 = vadd.f32 %v7531_v13, %v4394_v61  ;;  %v4392_v60 = vadd.f32 %v4147_v12, %v10204_v3  ;;  %v4916_v10 = vpop.f32.mrf.mxu1 }
 0x2b1   : > { %v5259_v63 = vmul.f32 0.2, %v5131_v6  ;;  %v7404_v9 = vpop.f32.mrf.mxu0 }
 0x2b2   : > { %6025 = vst.msk [vmem:[%s9212_s28 + $0x154] sm:$0xf] %vm5939_vm5, %v6745_v28  ;;  %v6750_v47 = vpack.c.bf16 %v5389_v27, %v5389_v27  ;;  %v5262_v15 = vmul.f32 0.2, %v5134_v25  ;;  %v5132_v34 = vadd.f32 %v4887_v52, %v4392_v60  ;;  %v4397_v30 = vadd.f32 %v7404_v9, %v10205_v44  ;;  %v7539_v58 = vpop.f32.mrf.mxu1  ;;  %v10213_v44 = vld [vmem:[#allocation49_spill] sm:$0xff] }
 0x2b3   : > { %v5387_v33 = vmax.f32 %v5131_v6, %v5259_v63  ;;  %v4160_v5 = vpop.f32.mrf.mxu0  ;;  %v10212_v63 = vld [vmem:[#allocation47_spill] sm:$0xff] }
 0x2b4   : > { %6030 = vst.msk [vmem:[%s9212_s28 + $0x168] sm:$0xf] %vm5939_vm5, %v6750_v47  ;;  %v5390_v13 = vmax.f32 %v5134_v25, %v5262_v15  ;;  %v5260_v20 = vmul.f32 0.2, %v5132_v34  ;;  %v5137_v18 = vadd.f32 %v7534_v1, %v4397_v30  ;;  %v4395_v35 = vadd.f32 %v4160_v5, %v10206_v48  ;;  %v4919_v36 = vpop.f32.mrf.mxu1  ;;  %v10214_v48 = vld [vmem:[#allocation40_spill] sm:$0xff] }
 0x2b5   : > { %v6748_v11 = vpack.c.bf16 %v5387_v33, %v5387_v33  ;;  %v7405_v26 = vpop.f32.mrf.mxu0 }
 0x2b6   : > { %v6751_v4 = vpack.c.bf16 %v5390_v13, %v5390_v13  ;;  %v5388_v52 = vmax.f32 %v5132_v34, %v5260_v20  ;;  %v5265_v14 = vmul.f32 0.2, %v5137_v18  ;;  %v5135_v53 = vadd.f32 %v4900_v62, %v4395_v35  ;;  %v7542_v39 = vpop.f32.mrf.mxu1 }
 0x2b7   : > { %6028 = vst.msk [vmem:[%s9212_s28 + $0x160] sm:$0xf] %vm5939_vm5, %v6748_v11  ;;  %v4398_v2 = vadd.f32 %v7405_v26, %v10207_v16  ;;  %v4163_v17 = vpop.f32.mrf.mxu0  ;;  %v10215_v16 = vld [vmem:[#allocation42_spill] sm:$0xff] }
 0x2b8   : > { %6031 = vst.msk [vmem:[%s9212_s28 + $0x16c] sm:$0xf] %vm5939_vm5, %v6751_v4  ;;  %v6749_v1 = vpack.c.bf16 %v5388_v52, %v5388_v52  ;;  %v5393_v19 = vmax.f32 %v5137_v18, %v5265_v14  ;;  %v5263_v32 = vmul.f32 0.2, %v5135_v53  ;;  %v4396_v42 = vadd.f32 %v4163_v17, %v10208_v45  ;;  %v4932_v37 = vpop.f32.mrf.mxu1  ;;  %v10216_v45 = vld [vmem:[#allocation52_spill] sm:$0xff] }
 0x2b9   : > { %v5138_v24 = vadd.f32 %v7535_v54, %v4398_v2  ;;  %v7408_v46 = vpop.f32.mrf.mxu0 }
 0x2ba   : > { %6029 = vst.msk [vmem:[%s9212_s28 + $0x164] sm:$0xf] %vm5939_vm5, %v6749_v1  ;;  %v6754_v62 = vpack.c.bf16 %v5393_v19, %v5393_v19  ;;  %v5391_v50 = vmax.f32 %v5135_v53, %v5263_v32  ;;  %v5136_v43 = vadd.f32 %v4903_v8, %v4396_v42  ;;  %v4401_v41 = vadd.f32 %v7408_v46, %v10209_v49  ;;  %v7543_v31 = vpop.f32.mrf.mxu1 }
 0x2bb   : > { %v5266_v59 = vmul.f32 0.2, %v5138_v24  ;;  %v4176_v57 = vpop.f32.mrf.mxu0 }
 0x2bc   : > { %6034 = vst.msk [vmem:[%s9212_s28 + $0x178] sm:$0xf] %vm5939_vm5, %v6754_v62  ;;  %v6752_v38 = vpack.c.bf16 %v5391_v50, %v5391_v50  ;;  %v5264_v21 = vmul.f32 0.2, %v5136_v43  ;;  %v5141_v51 = vadd.f32 %v7538_v23, %v4401_v41  ;;  %v4399_v0 = vadd.f32 %v4176_v57, %v10210_v22  ;;  %v4935_v54 = vpop.f32.mrf.mxu1  ;;  %v10218_v22 = vld [vmem:[#allocation43_spill] sm:$0xff] }
 0x2bd   : > { %v5394_v56 = vmax.f32 %v5138_v24, %v5266_v59  ;;  %v7409_v55 = vpop.f32.mrf.mxu0  ;;  %v10217_v59 = vld [vmem:[#allocation53_spill] sm:$0xff] }
 0x2be   : > { %6032 = vst.msk [vmem:[%s9212_s28 + $0x170] sm:$0xf] %vm5939_vm5, %v6752_v38  ;;  %v5392_v8 = vmax.f32 %v5136_v43, %v5264_v21  ;;  %v5269_v7 = vmul.f32 0.2, %v5141_v51  ;;  %v5139_v40 = vadd.f32 %v4916_v10, %v4399_v0  ;;  %v4402_v61 = vadd.f32 %v7409_v55, %v10211_v29  ;;  %v7546_v6 = vpop.f32.mrf.mxu1  ;;  %v10219_v29 = vld [vmem:[#allocation46_spill] sm:$0xff] }
 0x2bf   : > { %v6755_v12 = vpack.c.bf16 %v5394_v56, %v5394_v56  ;;  %v4179_v28 = vpop.f32.mrf.mxu0 }
 0x2c0   : > { %v6753_v27 = vpack.c.bf16 %v5392_v8, %v5392_v8  ;;  %v5397_v23 = vmax.f32 %v5141_v51, %v5269_v7  ;;  %v5267_v25 = vmul.f32 0.2, %v5139_v40  ;;  %v5142_v3 = vadd.f32 %v7539_v58, %v4402_v61  ;;  %v4948_v60 = vpop.f32.mrf.mxu1 }
 0x2c1   : > { %6035 = vst.msk [vmem:[%s9212_s28 + $0x17c] sm:$0xf] %vm5939_vm5, %v6755_v12  ;;  %v4400_v9 = vadd.f32 %v4179_v28, %v10212_v63  ;;  %v7412_v47 = vpop.f32.mrf.mxu0  ;;  %v10220_v63 = vld [vmem:[#allocation55_spill] sm:$0xff] }
 0x2c2   : > { %6033 = vst.msk [vmem:[%s9212_s28 + $0x174] sm:$0xf] %vm5939_vm5, %v6753_v27  ;;  %v6758_v10 = vpack.c.bf16 %v5397_v23, %v5397_v23  ;;  %v5395_v15 = vmax.f32 %v5139_v40, %v5267_v25  ;;  %v5270_v34 = vmul.f32 0.2, %v5142_v3  ;;  %v4405_v30 = vadd.f32 %v7412_v47, %v10213_v44  ;;  %v7547_v33 = vpop.f32.mrf.mxu1  ;;  %v10221_v44 = vld [vmem:[#allocation57_spill] sm:$0xff] }
 0x2c3   : > { %v5140_v5 = vadd.f32 %v4919_v36, %v4400_v9  ;;  %v4192_v13 = vpop.f32.mrf.mxu0 }
 0x2c4   : > { %6038 = vst.msk [vmem:[%s9212_s28 + $0x188] sm:$0xf] %vm5939_vm5, %v6758_v10  ;;  %v6756_v58 = vpack.c.bf16 %v5395_v15, %v5395_v15  ;;  %v5398_v20 = vmax.f32 %v5142_v3, %v5270_v34  ;;  %v5145_v18 = vadd.f32 %v7542_v39, %v4405_v30  ;;  %v4403_v35 = vadd.f32 %v4192_v13, %v10214_v48  ;;  %v4951_v11 = vpop.f32.mrf.mxu1 }
 0x2c5   : > { %v5268_v26 = vmul.f32 0.2, %v5140_v5  ;;  %v7413_v4 = vpop.f32.mrf.mxu0 }
 0x2c6   : > { %6036 = vst.msk [vmem:[%s9212_s28 + $0x180] sm:$0xf] %vm5939_vm5, %v6756_v58  ;;  %v6759_v52 = vpack.c.bf16 %v5398_v20, %v5398_v20  ;;  %v5273_v14 = vmul.f32 0.2, %v5145_v18  ;;  %v5143_v53 = vadd.f32 %v4932_v37, %v4403_v35  ;;  %v4406_v2 = vadd.f32 %v7413_v4, %v10215_v16  ;;  %v10223_v16 = vld [vmem:[#allocation50_spill] sm:$0xff] }
 0x2c7   : > { %v7550_v36 = vpop.f32.mrf.mxu1  ;;  %v5396_v17 = vmax.f32 %v5140_v5, %v5268_v26  ;;  %v4195_v1 = vpop.f32.mrf.mxu0  ;;  %v10222_v26 = vld [vmem:[#allocation48_spill] sm:$0xff] }
 0x2c8   : > { %6039 = vst.msk [vmem:[%s9212_s28 + $0x18c] sm:$0xf] %vm5939_vm5, %v6759_v52  ;;  %v5401_v39 = vmax.f32 %v5145_v18, %v5273_v14  ;;  %v5271_v19 = vmul.f32 0.2, %v5143_v53  ;;  %v5146_v32 = vadd.f32 %v7543_v31, %v4406_v2  ;;  %v4404_v42 = vadd.f32 %v4195_v1, %v10216_v45  ;;  %v10224_v45 = vld [vmem:[#allocation60_spill] sm:$0xff] }
 0x2c9   : > { %v4964_v24 = vpop.f32.mrf.mxu1  ;;  %v6757_v46 = vpack.c.bf16 %v5396_v17, %v5396_v17  ;;  %v7416_v62 = vpop.f32.mrf.mxu0 }
 0x2ca   : > { %v6762_v50 = vpack.c.bf16 %v5401_v39, %v5401_v39  ;;  %v5399_v37 = vmax.f32 %v5143_v53, %v5271_v19  ;;  %v5274_v43 = vmul.f32 0.2, %v5146_v32  ;;  %v5144_v49 = vadd.f32 %v4935_v54, %v4404_v42 }
 0x2cb   : > { %v7551_v41 = vpop.f32.mrf.mxu1  ;;  %6037 = vst.msk [vmem:[%s9212_s28 + $0x184] sm:$0xf] %vm5939_vm5, %v6757_v46  ;;  %v4409_v57 = vadd.f32 %v7416_v62, %v10217_v59  ;;  %v4208_v38 = vpop.f32.mrf.mxu0  ;;  %v10225_v59 = vld [vmem:[#allocation61_spill] sm:$0xff] }
 0x2cc   : > { %6042 = vst.msk [vmem:[%s9212_s28 + $0x198] sm:$0xf] %vm5939_vm5, %v6762_v50  ;;  %v6760_v31 = vpack.c.bf16 %v5399_v37, %v5399_v37  ;;  %v5402_v21 = vmax.f32 %v5146_v32, %v5274_v43  ;;  %v5272_v51 = vmul.f32 0.2, %v5144_v49  ;;  %v4407_v0 = vadd.f32 %v4208_v38, %v10218_v22  ;;  %v10226_v22 = vld [vmem:[#allocation51_spill] sm:$0xff] }
 0x2cd   : > { %v4967_v56 = vpop.f32.mrf.mxu1  ;;  %v5149_v55 = vadd.f32 %v7546_v6, %v4409_v57  ;;  %v7417_v8 = vpop.f32.mrf.mxu0 }
 0x2ce   : > { %6040 = vst.msk [vmem:[%s9212_s28 + $0x190] sm:$0xf] %vm5939_vm5, %v6760_v31  ;;  %v6763_v54 = vpack.c.bf16 %v5402_v21, %v5402_v21  ;;  %v5400_v7 = vmax.f32 %v5144_v49, %v5272_v51  ;;  %v5147_v40 = vadd.f32 %v4948_v60, %v4407_v0  ;;  %v4410_v61 = vadd.f32 %v7417_v8, %v10219_v29 }
 0x2cf   : > { %v7554_v12 = vpop.f32.mrf.mxu1  ;;  %v5277_v28 = vmul.f32 0.2, %v5149_v55  ;;  %v4211_v27 = vpop.f32.mrf.mxu0 }
 0x2d0   : > { %6043 = vst.msk [vmem:[%s9212_s28 + $0x19c] sm:$0xf] %vm5939_vm5, %v6763_v54  ;;  %v6761_v23 = vpack.c.bf16 %v5400_v7, %v5400_v7  ;;  %v5275_v25 = vmul.f32 0.2, %v5147_v40  ;;  %v5150_v3 = vadd.f32 %v7547_v33, %v4410_v61  ;;  %v4408_v9 = vadd.f32 %v4211_v27, %v10220_v63  ;;  %v10228_v63 = vld [vmem:[#allocation63_spill] sm:$0xff] }
 0x2d1   : > { %v4980_v6 = vpop.f32.mrf.mxu1  ;;  %v5405_v47 = vmax.f32 %v5149_v55, %v5277_v28  ;;  %v7420_v10 = vpop.f32.mrf.mxu0  ;;  %v10227_v28 = vld [vmem:[#allocation54_spill] sm:$0xff] }
 0x2d2   : > { %6041 = vst.msk [vmem:[%s9212_s28 + $0x194] sm:$0xf] %vm5939_vm5, %v6761_v23  ;;  %v5403_v60 = vmax.f32 %v5147_v40, %v5275_v25  ;;  %v5278_v15 = vmul.f32 0.2, %v5150_v3  ;;  %v5148_v34 = vadd.f32 %v4951_v11, %v4408_v9  ;;  %v4413_v30 = vadd.f32 %v7420_v10, %v10221_v44  ;;  %v10229_v44 = vld [vmem:[#allocation65_spill] sm:$0xff] }
 0x2d3   : > { %v7555_v5 = vpop.f32.mrf.mxu1  ;;  %v6766_v13 = vpack.c.bf16 %v5405_v47, %v5405_v47  ;;  %v4224_v58 = vpop.f32.mrf.mxu0 }
 0x2d4   : > { %v6764_v20 = vpack.c.bf16 %v5403_v60, %v5403_v60  ;;  %v5406_v33 = vmax.f32 %v5150_v3, %v5278_v15  ;;  %v5276_v18 = vmul.f32 0.2, %v5148_v34  ;;  %v5153_v48 = vadd.f32 %v7550_v36, %v4413_v30 }
 0x2d5   : > { %v4983_v35 = vpop.f32.mrf.mxu1  ;;  %6046 = vst.msk [vmem:[%s9212_s28 + $0x1a8] sm:$0xf] %vm5939_vm5, %v6766_v13  ;;  %v4411_v4 = vadd.f32 %v4224_v58, %v10222_v26  ;;  %v7421_v52 = vpop.f32.mrf.mxu0 }
 0x2d6   : > { %6044 = vst.msk [vmem:[%s9212_s28 + $0x1a0] sm:$0xf] %vm5939_vm5, %v6764_v20  ;;  %v6767_v11 = vpack.c.bf16 %v5406_v33, %v5406_v33  ;;  %v5404_v14 = vmax.f32 %v5148_v34, %v5276_v18  ;;  %v5281_v53 = vmul.f32 0.2, %v5153_v48  ;;  %v4414_v2 = vadd.f32 %v7421_v52, %v10223_v16 }
 0x2d7   : > { %v7558_v17 = vpop.f32.mrf.mxu1  ;;  %v5151_v1 = vadd.f32 %v4964_v24, %v4411_v4  ;;  %v4227_v39 = vpop.f32.mrf.mxu0 }
 0x2d8   : > { %6047 = vst.msk [vmem:[%s9212_s28 + $0x1ac] sm:$0xf] %vm5939_vm5, %v6767_v11  ;;  %v6765_v36 = vpack.c.bf16 %v5404_v14, %v5404_v14  ;;  %v5409_v19 = vmax.f32 %v5153_v48, %v5281_v53  ;;  %v5154_v32 = vadd.f32 %v7551_v41, %v4414_v2  ;;  %v4412_v42 = vadd.f32 %v4227_v39, %v10224_v45  ;;  %v10230_v48 = vld [vmem:[#allocation56_spill] sm:$0xff]  ;;  %v10231_v53 = vld [vmem:[#allocation58_spill] sm:$0xff] }
 0x2d9   : > { %v4996_v46 = vpop.f32.mrf.mxu1  ;;  %v5279_v62 = vmul.f32 0.2, %v5151_v1  ;;  %v7424_v50 = vpop.f32.mrf.mxu0 }
 0x2da   : > { %6045 = vst.msk [vmem:[%s9212_s28 + $0x1a4] sm:$0xf] %vm5939_vm5, %v6765_v36  ;;  %v6770_v37 = vpack.c.bf16 %v5409_v19, %v5409_v19  ;;  %v5282_v43 = vmul.f32 0.2, %v5154_v32  ;;  %v5152_v49 = vadd.f32 %v4967_v56, %v4412_v42  ;;  %v4417_v57 = vadd.f32 %v7424_v50, %v10225_v59 }
 0x2db   : > { %v7559_v24 = vpop.f32.mrf.mxu1  ;;  %v5407_v38 = vmax.f32 %v5151_v1, %v5279_v62  ;;  %v4240_v31 = vpop.f32.mrf.mxu0 }
 0x2dc   : > { %6050 = vst.msk [vmem:[%s9212_s28 + $0x1b8] sm:$0xf] %vm5939_vm5, %v6770_v37  ;;  %v5410_v41 = vmax.f32 %v5154_v32, %v5282_v43  ;;  %v5280_v21 = vmul.f32 0.2, %v5152_v49  ;;  %v5157_v51 = vadd.f32 %v7554_v12, %v4417_v57  ;;  %v4415_v0 = vadd.f32 %v4240_v31, %v10226_v22  ;;  %v10232_v32 = vld [vmem:[#allocation68_spill] sm:$0xff]  ;;  %v10233_v43 = vld [vmem:[#allocation69_spill] sm:$0xff] }
 0x2dd   : > { %v4999_v55 = vpop.f32.mrf.mxu1  ;;  %v6768_v8 = vpack.c.bf16 %v5407_v38, %v5407_v38  ;;  %v7425_v54 = vpop.f32.mrf.mxu0 }
 0x2de   : > { %v6771_v7 = vpack.c.bf16 %v5410_v41, %v5410_v41  ;;  %v5408_v56 = vmax.f32 %v5152_v49, %v5280_v21  ;;  %v5285_v40 = vmul.f32 0.2, %v5157_v51  ;;  %v5155_v29 = vadd.f32 %v4980_v6, %v4415_v0  ;;  %v10234_v41 = vld [vmem:[#allocation59_spill] sm:$0xff] }
 0x2df   : > { %v7562_v61 = vpop.f32.mrf.mxu1  ;;  %6048 = vst.msk [vmem:[%s9212_s28 + $0x1b0] sm:$0xf] %vm5939_vm5, %v6768_v8  ;;  %v4418_v27 = vadd.f32 %v7425_v54, %v10227_v28  ;;  %v4243_v23 = vpop.f32.mrf.mxu0 }
 0x2e0   : > { %6051 = vst.msk [vmem:[%s9212_s28 + $0x1bc] sm:$0xf] %vm5939_vm5, %v6771_v7  ;;  %v6769_v12 = vpack.c.bf16 %v5408_v56, %v5408_v56  ;;  %v5413_v25 = vmax.f32 %v5157_v51, %v5285_v40  ;;  %v5283_v3 = vmul.f32 0.2, %v5155_v29  ;;  %v4416_v9 = vadd.f32 %v4243_v23, %v10228_v63  ;;  %v10235_v56 = vld [vmem:[#allocation62_spill] sm:$0xff]  ;;  %v10236_v23 = vld [vmem:[#allocation71_spill] sm:$0xff] }
 0x2e1   : > { %v5158_v47 = vadd.f32 %v7555_v5, %v4418_v27  ;;  %v7428_v10 = vpop.f32.mrf.mxu0  ;;  %v5012_v60 = vpop.f32.mrf.mxu1 }
 0x2e2   : > { %6049 = vst.msk [vmem:[%s9212_s28 + $0x1b4] sm:$0xf] %vm5939_vm5, %v6769_v12  ;;  %v6774_v6 = vpack.c.bf16 %v5413_v25, %v5413_v25  ;;  %v5411_v15 = vmax.f32 %v5155_v29, %v5283_v3  ;;  %v5156_v34 = vadd.f32 %v4983_v35, %v4416_v9  ;;  %v4421_v30 = vadd.f32 %v7428_v10, %v10229_v44 }
 0x2e3   : > { %v5286_v13 = vmul.f32 0.2, %v5158_v47  ;;  %v4256_v58 = vpop.f32.mrf.mxu0  ;;  %v7563_v52 = vpop.f32.mrf.mxu1 }
 0x2e4   : > { %6054 = vst.msk [vmem:[%s9212_s28 + $0x1c8] sm:$0xf] %vm5939_vm5, %v6774_v6  ;;  %v6772_v20 = vpack.c.bf16 %v5411_v15, %v5411_v15  ;;  %v5284_v33 = vmul.f32 0.2, %v5156_v34  ;;  %v5161_v18 = vadd.f32 %v7558_v17, %v4421_v30  ;;  %v4419_v5 = vadd.f32 %v4256_v58, %v10230_v48  ;;  %v10237_v6 = vld [vmem:[#allocation75_spill] sm:$0xff]  ;;  %v10238_v58 = vld [vmem:[#allocation64_spill] sm:$0xff] }
 0x2e5   : > { %v5414_v26 = vmax.f32 %v5158_v47, %v5286_v13  ;;  %v7429_v4 = vpop.f32.mrf.mxu0  ;;  %v5015_v62 = vpop.f32.mrf.mxu1 }
 0x2e6   : > { %6052 = vst.msk [vmem:[%s9212_s28 + $0x1c0] sm:$0xf] %vm5939_vm5, %v6772_v20  ;;  %v5412_v11 = vmax.f32 %v5156_v34, %v5284_v33  ;;  %v5289_v35 = vmul.f32 0.2, %v5161_v18  ;;  %v5159_v14 = vadd.f32 %v4996_v46, %v4419_v5  ;;  %v4422_v16 = vadd.f32 %v7429_v4, %v10231_v53 }
 0x2e7   : > { %v6775_v2 = vpack.c.bf16 %v5414_v26, %v5414_v26  ;;  %v4259_v1 = vpop.f32.mrf.mxu0  ;;  %v7566_v0 = vpop.f32.mrf.mxu1 }
 0x2e8   : > { %v6773_v39 = vpack.c.bf16 %v5412_v11, %v5412_v11  ;;  %v5417_v36 = vmax.f32 %v5161_v18, %v5289_v35  ;;  %v5287_v17 = vmul.f32 0.2, %v5159_v14  ;;  %v5162_v19 = vadd.f32 %v7559_v24, %v4422_v16 }
 0x2e9   : > { %6055 = vst.msk [vmem:[%s9212_s28 + $0x1cc] sm:$0xf] %vm5939_vm5, %v6775_v2  ;;  %v4420_v45 = vadd.f32 %v4259_v1, %v10232_v32  ;;  %v7432_v42 = vpop.f32.mrf.mxu0  ;;  %v5028_v3 = vpop.f32.mrf.mxu1  ;;  %v10240_v1 = vld [vmem:[#allocation78_spill] sm:$0xff] }
 0x2ea   : > { %6053 = vst.msk [vmem:[%s9212_s28 + $0x1c4] sm:$0xf] %vm5939_vm5, %v6773_v39  ;;  %v6778_v50 = vpack.c.bf16 %v5417_v36, %v5417_v36  ;;  %v5415_v46 = vmax.f32 %v5159_v14, %v5287_v17  ;;  %v5290_v37 = vmul.f32 0.2, %v5162_v19  ;;  %v4425_v49 = vadd.f32 %v7432_v42, %v10233_v43 }
 0x2eb   : > { %v5160_v59 = vadd.f32 %v4999_v55, %v4420_v45  ;;  %v4272_v57 = vpop.f32.mrf.mxu0  ;;  %v7567_v18 = vpop.f32.mrf.mxu1 }
 0x2ec   : > { %6058 = vst.msk [vmem:[%s9212_s28 + $0x1d8] sm:$0xf] %vm5939_vm5, %v6778_v50  ;;  %v6776_v24 = vpack.c.bf16 %v5415_v46, %v5415_v46  ;;  %v5418_v38 = vmax.f32 %v5162_v19, %v5290_v37  ;;  %v5165_v31 = vadd.f32 %v7562_v61, %v4425_v49  ;;  %v4423_v21 = vadd.f32 %v4272_v57, %v10234_v41 }
 0x2ed   : > { %v5288_v51 = vmul.f32 0.2, %v5160_v59  ;;  %v7433_v22 = vpop.f32.mrf.mxu0  ;;  %v5031_v17 = vpop.f32.mrf.mxu1 }
 0x2ee   : > { %6056 = vst.msk [vmem:[%s9212_s28 + $0x1d0] sm:$0xf] %vm5939_vm5, %v6776_v24  ;;  %v6779_v8 = vpack.c.bf16 %v5418_v38, %v5418_v38  ;;  %v5293_v54 = vmul.f32 0.2, %v5165_v31  ;;  %v5163_v7 = vadd.f32 %v5012_v60, %v4423_v21  ;;  %v4426_v55 = vadd.f32 %v7433_v22, %v10235_v56 }
 0x2ef   : > { %v5416_v40 = vmax.f32 %v5160_v59, %v5288_v51  ;;  %v4275_v29 = vpop.f32.mrf.mxu0 }
 0x2f0   : > { %6059 = vst.msk [vmem:[%s9212_s28 + $0x1dc] sm:$0xf] %vm5939_vm5, %v6779_v8  ;;  %v5421_v28 = vmax.f32 %v5165_v31, %v5293_v54  ;;  %v5291_v61 = vmul.f32 0.2, %v5163_v7  ;;  %v5166_v27 = vadd.f32 %v7563_v52, %v4426_v55  ;;  %v4424_v12 = vadd.f32 %v4275_v29, %v10236_v23  ;;  %v10239_v52 = vld [vmem:[#allocation66_spill] sm:$0xff] }
 0x2f1   : > { %v6777_v25 = vpack.c.bf16 %v5416_v40, %v5416_v40  ;;  %v7436_v63 = vpop.f32.mrf.mxu0 }
 0x2f2   : > { %v6782_v9 = vpack.c.bf16 %v5421_v28, %v5421_v28  ;;  %v5419_v47 = vmax.f32 %v5163_v7, %v5291_v61  ;;  %v5294_v10 = vmul.f32 0.2, %v5166_v27  ;;  %v5164_v60 = vadd.f32 %v5015_v62, %v4424_v12 }
 0x2f3   : > { %6057 = vst.msk [vmem:[%s9212_s28 + $0x1d4] sm:$0xf] %vm5939_vm5, %v6777_v25  ;;  %v4429_v15 = vadd.f32 %v7436_v63, %v10237_v6  ;;  %v4288_v34 = vpop.f32.mrf.mxu0 }
 0x2f4   : > { %6062 = vst.msk [vmem:[%s9212_s28 + $0x1e8] sm:$0xf] %vm5939_vm5, %v6782_v9  ;;  %v6780_v44 = vpack.c.bf16 %v5419_v47, %v5419_v47  ;;  %v5422_v30 = vmax.f32 %v5166_v27, %v5294_v10  ;;  %v5292_v13 = vmul.f32 0.2, %v5164_v60  ;;  %v4427_v20 = vadd.f32 %v4288_v34, %v10238_v58 }
 0x2f5   : > { %v5169_v33 = vadd.f32 %v7566_v0, %v4429_v15  ;;  %v7437_v48 = vpop.f32.mrf.mxu0 }
 0x2f6   : > { %6060 = vst.msk [vmem:[%s9212_s28 + $0x1e0] sm:$0xf] %vm5939_vm5, %v6780_v44  ;;  %v6783_v5 = vpack.c.bf16 %v5422_v30, %v5422_v30  ;;  %v5420_v26 = vmax.f32 %v5164_v60, %v5292_v13  ;;  %v5167_v4 = vadd.f32 %v5028_v3, %v4427_v20  ;;  %v4430_v11 = vadd.f32 %v7437_v48, %v10239_v52 }
 0x2f7   : > { %v5297_v35 = vmul.f32 0.2, %v5169_v33  ;;  %v4291_v14 = vpop.f32.mrf.mxu0 }
 0x2f8   : > { %6063 = vst.msk [vmem:[%s9212_s28 + $0x1ec] sm:$0xf] %vm5939_vm5, %v6783_v5  ;;  %v6781_v53 = vpack.c.bf16 %v5420_v26, %v5420_v26  ;;  %v5295_v16 = vmul.f32 0.2, %v5167_v4  ;;  %v5170_v2 = vadd.f32 %v7567_v18, %v4430_v11  ;;  %v4428_v39 = vadd.f32 %v4291_v14, %v10240_v1 }
 0x2f9   : > { %v5425_v36 = vmax.f32 %v5169_v33, %v5297_v35 }
 0x2fa   : > { %6061 = vst.msk [vmem:[%s9212_s28 + $0x1e4] sm:$0xf] %vm5939_vm5, %v6781_v53  ;;  %v5423_v19 = vmax.f32 %v5167_v4, %v5295_v16  ;;  %v5298_v32 = vmul.f32 0.2, %v5170_v2  ;;  %v5168_v45 = vadd.f32 %v5031_v17, %v4428_v39 }
 0x2fb   : > { %v6786_v42 = vpack.c.bf16 %v5425_v36, %v5425_v36 }
 0x2fc   : > { %v6784_v62 = vpack.c.bf16 %v5423_v19, %v5423_v19  ;;  %v5426_v50 = vmax.f32 %v5170_v2, %v5298_v32  ;;  %v5296_v46 = vmul.f32 0.2, %v5168_v45 }
 0x2fd   : > { %6066 = vst.msk [vmem:[%s9212_s28 + $0x1f8] sm:$0xf] %vm5939_vm5, %v6786_v42 }
 0x2fe   : > { %6064 = vst.msk [vmem:[%s9212_s28 + $0x1f0] sm:$0xf] %vm5939_vm5, %v6784_v62  ;;  %v6787_v37 = vpack.c.bf16 %v5426_v50, %v5426_v50  ;;  %v5424_v43 = vmax.f32 %v5168_v45, %v5296_v46 }
 0x300   : > { %6067 = vst.msk [vmem:[%s9212_s28 + $0x1fc] sm:$0xf] %vm5939_vm5, %v6787_v37  ;;  %v6785_v49 = vpack.c.bf16 %v5424_v43, %v5424_v43 }
 0x302   : > { %6065 = vst.msk [vmem:[%s9212_s28 + $0x1f4] sm:$0xf] %vm5939_vm5, %v6785_v49 }
 0x303 PF: > { %s12_s9 = sadd.s32 1, %s7655_s9  }
 0x304   : > { %p9_p5 = scmp.ge.s32.totalorder %s12_s9, 4  }
 0x306   :  { %11 = sbr.rel (!%p9_p5) target bundleno = 1 (0x1), region = 61 }

// kernel: discriminator_forward.6
= control target key start
LH: loop header
LB: loop body
LE: loop exit
PB: predicated region body
PF: predicated region fallthrough
CT: control target
= control target key end

     0   :  { %s2609_s15 = smov 0   ;;  %s3369_s0 = inlined_call_operand.vmem [shape: bf16[2,17,17,32], index: 0, kind: input, shape index: {}]   ;;  %s3370_s1 = inlined_call_operand.vmem [shape: bf16[4,32,16], index: 1, kind: input, shape index: {}]   ;;  %s3371_s2 = inlined_call_operand.vmem [shape: bf16[512,16], index: 2, kind: output, shape index: {0}]   ;;  %s3372_s3 = inlined_call_operand.vmem [shape: f32[2,1,16], index: 3, kind: output, shape index: {1}]   ;;  %s3373_s4 = inlined_call_operand.vmem [shape: f32[2,1,16], index: 4, kind: output, shape index: {2}]  }
   0x1 LB: > { %s2615_s16 = sadd.s32 4294967295, %s2582_s15   ;;  %p2138_p0 = scmp.ge.s32.totalorder %s2582_s15, 1  ;;  %s2582_s15 = sphi %s2609_s15, %s15_s15  }
   0x2   : > { %p167_p1 = scmp.lt.s32.totalorder %s2582_s15, 3 }
   0x4   : > { %p168_p2 = pnand %p2138_p0, %p167_p1 }
   0x6   : > { %171 = sbr.rel (%p168_p2) target bundleno = 384 (0x180), region = 28 }
   0xb   : > { %v2551_v0 = vld [vmem:[%s3370_s1 + $0x8] sm:$0xff]   ;;  %p199_p3 = scmp.lt.s32.totalorder %s2615_s16, 1  ;;  %v2552_v1 = vld [vmem:[%s3370_s1 + $0x18] sm:$0xff]   ;;  %v2553_v2 = vld [vmem:[%s3370_s1] sm:$0xff]   ;;  %vm272_vm0 = vsmask.f32 3328 }
   0xc   : > { %2434 = vmatprep.subr.bf16.mxu1 %v2551_v0  ;;  %2398 = vmatprep.subr.bf16.mxu0 %v2552_v1  ;;  %v2554_v3 = vld [vmem:[%s3370_s1 + $0x10] sm:$0xff]   ;;  %vm273_vm1 = vsmask.f32 7440  ;;  %v2639_v4 = vld [vmem:[%s3370_s1 + $0x28] sm:$0xff]   ;;  %vm724_vm2 = vcmask 261120   ;;  %v2558_v5 = vld [vmem:[%s3370_s1 + $0x38] sm:$0xff]  }
   0xd   : > { %s2630_s23 = scalar_select %p199_p3, %s2615_s16, 1  ;;  %2435 = vmatpush3.bf16.msra.mxu1 %v2551_v0  ;;  %2399 = vmatpush3.bf16.msra.mxu0 %v2552_v1  ;;  %v2568_v33 = vld [vmem:[%s3370_s1 + $0x30] sm:$0xff]   ;;  %vm2665_vm3 = vmor %vm272_vm0, %vm273_vm1  ;;  %vm1995_vm4 = vcmask 125952   ;;  %vm1693_vm5 = vcmask 130048   ;;  %vm1763_vm6 = vcmask 122880  }
   0xe   : > { %2436 = vmatprep.subr.bf16.mxu1 %v2553_v2  ;;  %2400 = vmatprep.subr.bf16.mxu0 %v2554_v3  ;;  %s2140_s12 = sshll.u32 %s2615_s16, 5 }
   0xf   : > { %s2542_s26 = smul.u32 204, %s2630_s23  ;;  %p205_p4 = scmp.lt.s32.totalorder %s2140_s12, 63 }
  0x10   : > { %s212_s20 = scalar_lea.vmem %s3372_s3, %s2630_s23  ;;  %s215_s24 = scalar_lea.vmem %s3373_s4, %s2630_s23 }
  0x11   : > { %s2644_s5 = scalar_lea.vmem %s3369_s0, %s2542_s26  ;;  %2437 = vmatpush3.bf16.msra.mxu1 %v2553_v2  ;;  %2401 = vmatpush3.bf16.msra.mxu0 %v2554_v3  ;;  %s3401_s12 = smov (!%p205_p4, %s2140_s12), 63 }
  0x12   : > { %v217_v6 = vld [vmem:[%s2644_s5] sm:$0xf]  ;;  %v218_v7 = vld [vmem:[%s2644_s5 + $0x4] sm:$0xf]  ;;  %v220_v8 = vld [vmem:[%s2644_s5 + $0xc] sm:$0xf]  ;;  %2506 = vmatprep.subr.bf16.mxu1 %v2558_v5  ;;  %2470 = vmatprep.subr.bf16.mxu0 %v2639_v4 }
  0x13   : > { %v276_v9 = vshrl.u32 %v217_v6, 16  ;;  %v279_v10 = vshll.u32 %v217_v6, 16  ;;  %v285_v11 = vshll.u32 %v218_v7, 16  ;;  %v289_v12 = vshrl.u32 %v218_v7, 16  ;;  %v221_v13 = vld [vmem:[%s2644_s5 + $0x10] sm:$0xf] }
  0x14   : > { %v2180_v14 = vcombine.low %v217_v6, %v218_v7  ;;  %v300_v15 = vshrl.u32 %v220_v8, 16  ;;  %v303_v16 = vshll.u32 %v220_v8, 16  ;;  %v309_v17 = vshll.u32 %v221_v13, 16  ;;  %v219_v18 = vld [vmem:[%s2644_s5 + $0x8] sm:$0x1]  ;;  %s2141_s13 = sshll.u32 %s3401_s12, 2 }
  0x15   : > { %v278_v19 = vrot.slane %v276_v9, 4  ;;  %v281_v20 = vrot.slane %v279_v10, 5  ;;  %v287_v21 = vrot.slane %v285_v11, 5  ;;  %v291_v22 = vrot.slane %v289_v12, 4  ;;  %v222_v23 = vld [vmem:[%s2644_s5 + $0x14] sm:$0x1]  ;;  %s3120_s17 = scalar_lea.vmem %s3371_s2, %s2141_s13 }
  0x16   : > { %2438 = vmatprep.mubr.msk.bf16.mxu1 %vm724_vm2, %v2180_v14  ;;  %v302_v24 = vrot.slane %v300_v15, 4  ;;  %v305_v25 = vrot.slane %v303_v16, 5  ;;  %v311_v26 = vrot.slane %v309_v17, 5  ;;  %v313_v27 = vshrl.u32 %v221_v13, 16  ;;  %v223_v28 = vld [vmem:[%s2644_s5 + $0x18] sm:$0xf] }
  0x17   : > { %v2658_v29 = vcombine.low %v220_v8, %v221_v13  ;;  %v282_v30 = vor.u32 %v281_v20, %v278_v19  ;;  %v292_v31 = vor.u32 %v291_v22, %v287_v21  ;;  %v295_v32 = vshll.u32 %v219_v18, 16  ;;  %v224_v38 = vld [vmem:[%s2644_s5 + $0x1c] sm:$0xf]  ;;  %v226_v48 = vld [vmem:[%s2644_s5 + $0x24] sm:$0xf] }
  0x18   : > { %v315_v34 = vrot.slane %v313_v27, 4  ;;  %v306_v36 = vor.u32 %v305_v25, %v302_v24  ;;  %v319_v37 = vshll.u32 %v222_v23, 16  ;;  %v324_v39 = vshrl.u32 %v223_v28, 16  ;;  %v227_v53 = vld [vmem:[%s2644_s5 + $0x28] sm:$0xf]  ;;  %v2567_v10 = vld [vmem:[%s3370_s1 + $0x20] sm:$0xff]  }
  0x19   : > { %2439 = vmatmul.mubr.msk.bf16.vlgmr.msra.gmra.mxu1 %vm724_vm2, %v2658_v29  ;;  %v283_v40 = vrot.slane %v282_v30, 4  ;;  %v293_v41 = vrot.slane %v292_v31, 4  ;;  %v297_v42 = vrot.slane %v295_v32, 5  ;;  %v327_v43 = vshll.u32 %v223_v28, 16  ;;  %v225_v58 = vld [vmem:[%s2644_s5 + $0x20] sm:$0x1] }
  0x1a   : > { %v307_v44 = vrot.slane %v306_v36, 4  ;;  %v316_v45 = vor.u32 %v315_v34, %v311_v26  ;;  %v321_v46 = vrot.slane %v319_v37, 5  ;;  %2507 = vmatpush3.bf16.msra.mxu1 %v2558_v5  ;;  %v326_v47 = vrot.slane %v324_v39, 4  ;;  %v228_v63 = vld [vmem:[%s2644_s5 + $0x2c] sm:$0x1] }
  0x1b   : > { %v288_v49 = vsel %vm2665_vm3, %v283_v40, %v287_v21  ;;  %v298_v50 = vsel %vm2665_vm3, %v293_v41, %v297_v42  ;;  %v329_v51 = vrot.slane %v327_v43, 5  ;;  %v333_v52 = vshll.u32 %v224_v38, 16  ;;  %2508 = vmatprep.subr.bf16.mxu1 %v2568_v33  ;;  %v229_v5 = vld [vmem:[%s2644_s5 + $0x30] sm:$0xf]  ;;  %v230_v18 = vld [vmem:[%s2644_s5 + $0x34] sm:$0xf] }
  0x1c   : > { %v2146_v54 = vcombine.low %v288_v49, %v298_v50  ;;  %v312_v55 = vsel %vm2665_vm3, %v307_v44, %v311_v26  ;;  %v317_v56 = vrot.slane %v316_v45, 4  ;;  %v337_v57 = vshrl.u32 %v224_v38, 16  ;;  %v231_v39 = vld [vmem:[%s2644_s5 + $0x38] sm:$0x1]  ;;  %v234_v40 = vld [vmem:[%s2644_s5 + $0x44] sm:$0x1] }
  0x1d   : > { %v335_v59 = vrot.slane %v333_v52, 5  ;;  %v2681_v60 = vcombine.low %v223_v28, %v224_v38  ;;  %v348_v61 = vshrl.u32 %v226_v48, 16  ;;  %v351_v62 = vshll.u32 %v226_v48, 16  ;;  %v232_v28 = vld [vmem:[%s2644_s5 + $0x3c] sm:$0xf] }
  0x1e   : > { %2402 = vmatprep.mubr.msk.bf16.mxu0 %vm724_vm2, %v2146_v54  ;;  %v322_v0 = vsel %vm2665_vm3, %v317_v56, %v321_v46  ;;  %v339_v1 = vrot.slane %v337_v57, 4  ;;  %v357_v2 = vshll.u32 %v227_v53, 16  ;;  %v361_v3 = vshrl.u32 %v227_v53, 16  ;;  %2509 = vmatpush3.bf16.msra.mxu1 %v2568_v33  ;;  %v235_v45 = vld [vmem:[%s2644_s5 + $0x48] sm:$0xf] }
  0x1f   : > { %v2688_v6 = vcombine.low %v312_v55, %v322_v0  ;;  %2442 = vmatprep.mubr.msk.bf16.mxu1 %vm724_vm2, %v2681_v60  ;;  %v350_v7 = vrot.slane %v348_v61, 4  ;;  %v353_v8 = vrot.slane %v351_v62, 5  ;;  %v2692_v9 = vcombine.low %v226_v48, %v227_v53  ;;  %v236_v62 = vld [vmem:[%s2644_s5 + $0x4c] sm:$0xf] }
  0x20   : > { %v359_v11 = vrot.slane %v357_v2, 5  ;;  %v363_v12 = vrot.slane %v361_v3, 4  ;;  %v330_v13 = vor.u32 %v329_v51, %v326_v47  ;;  %v340_v14 = vor.u32 %v339_v1, %v335_v59 }
  0x21   : > { %2403 = vmatmul.mubr.msk.bf16.vlgmr.msra.gmra.mxu0 %vm724_vm2, %v2688_v6  ;;  %2443 = vmatmul.mubr.msk.bf16.gmra.mxu1 %vm724_vm2, %v2692_v9  ;;  %v343_v15 = vshll.u32 %v225_v58, 16  ;;  %v354_v16 = vor.u32 %v353_v8, %v350_v7  ;;  %v367_v17 = vshll.u32 %v228_v63, 16  ;;  %v372_v19 = vshrl.u32 %v229_v5, 16 }
  0x22   : > { %2471 = vmatpush3.bf16.msra.mxu0 %v2639_v4  ;;  %v331_v20 = vrot.slane %v330_v13, 4  ;;  %v341_v21 = vrot.slane %v340_v14, 4  ;;  %v364_v22 = vor.u32 %v363_v12, %v359_v11  ;;  %v375_v23 = vshll.u32 %v229_v5, 16  ;;  %v233_v4 = vld [vmem:[%s2644_s5 + $0x40] sm:$0xf] }
  0x23   : > { %v345_v24 = vrot.slane %v343_v15, 5  ;;  %v355_v25 = vrot.slane %v354_v16, 4  ;;  %v369_v26 = vrot.slane %v367_v17, 5  ;;  %v374_v27 = vrot.slane %v372_v19, 4  ;;  %2472 = vmatprep.subr.bf16.mxu0 %v2567_v10  ;;  %v239_v16 = vld [vmem:[%s2644_s5 + $0x58] sm:$0xf] }
  0x24   : > { %v336_v30 = vsel %vm2665_vm3, %v331_v20, %v335_v59  ;;  %v365_v31 = vrot.slane %v364_v22, 4  ;;  %v377_v32 = vrot.slane %v375_v23, 5  ;;  %v381_v33 = vshll.u32 %v230_v18, 16 }
  0x25   : > { %v346_v34 = vsel %vm2665_vm3, %v341_v21, %v345_v24  ;;  %v360_v36 = vsel %vm2665_vm3, %v355_v25, %v359_v11  ;;  %v385_v37 = vshrl.u32 %v230_v18, 16  ;;  %v2711_v38 = vcombine.low %v229_v5, %v230_v18  ;;  %v238_v11 = vld [vmem:[%s2644_s5 + $0x54] sm:$0xf]  ;;  %v237_v21 = vld [vmem:[%s2644_s5 + $0x50] sm:$0x1] }
  0x26   : > { %v2715_v41 = vcombine.low %v336_v30, %v346_v34  ;;  %v370_v42 = vsel %vm2665_vm3, %v365_v31, %v369_v26  ;;  %v383_v43 = vrot.slane %v381_v33, 5  ;;  %v396_v44 = vshrl.u32 %v232_v28, 16  ;;  %2473 = vmatpush3.bf16.msra.mxu0 %v2567_v10  ;;  %v240_v26 = vld [vmem:[%s2644_s5 + $0x5c] sm:$0x1] }
  0x27   : > { %v2720_v46 = vcombine.low %v360_v36, %v370_v42  ;;  %v387_v47 = vrot.slane %v385_v37, 4  ;;  %2446 = vmatprep.mubr.msk.bf16.mxu1 %vm724_vm2, %v2711_v38  ;;  %v399_v48 = vshll.u32 %v232_v28, 16  ;;  %v405_v49 = vshll.u32 %v233_v4, 16 }
  0x28   : > { %2406 = vmatprep.mubr.msk.bf16.mxu0 %vm724_vm2, %v2715_v41  ;;  %v398_v50 = vrot.slane %v396_v44, 4  ;;  %v409_v51 = vshrl.u32 %v233_v4, 16  ;;  %v2726_v52 = vcombine.low %v232_v28, %v233_v4  ;;  %v378_v53 = vor.u32 %v377_v32, %v374_v27  ;;  %v241_v32 = vld [vmem:[%s2644_s5 + $0x60] sm:$0xf] }
  0x29   : > { %2407 = vmatmul.mubr.msk.bf16.gmra.mxu0 %vm724_vm2, %v2720_v46  ;;  %v401_v54 = vrot.slane %v399_v48, 5  ;;  %v407_v55 = vrot.slane %v405_v49, 5  ;;  %v388_v56 = vor.u32 %v387_v47, %v383_v43  ;;  %v391_v57 = vshll.u32 %v231_v39, 16  ;;  %v242_v47 = vld [vmem:[%s2644_s5 + $0x64] sm:$0xf] }
  0x2a   : > { %v411_v58 = vrot.slane %v409_v51, 4  ;;  %2447 = vmatmul.mubr.msk.bf16.gmra.mxu1 %vm724_vm2, %v2726_v52  ;;  %v379_v59 = vrot.slane %v378_v53, 4  ;;  %v415_v61 = vshll.u32 %v234_v40, 16  ;;  %v420_v63 = vshrl.u32 %v235_v45, 16 }
  0x2b   : > { %v389_v0 = vrot.slane %v388_v56, 4  ;;  %v393_v1 = vrot.slane %v391_v57, 5  ;;  %v402_v2 = vor.u32 %v401_v54, %v398_v50  ;;  %v423_v3 = vshll.u32 %v235_v45, 16 }
  0x2c   : > { %v384_v5 = vsel %vm2665_vm3, %v379_v59, %v383_v43  ;;  %v412_v7 = vor.u32 %v411_v58, %v407_v55  ;;  %v417_v8 = vrot.slane %v415_v61, 5  ;;  %v422_v10 = vrot.slane %v420_v63, 4  ;;  %v244_v58 = vld [vmem:[%s2644_s5 + $0x6c] sm:$0xf] }
  0x2d   : > { %v394_v12 = vsel %vm2665_vm3, %v389_v0, %v393_v1  ;;  %v403_v13 = vrot.slane %v402_v2, 4  ;;  %v425_v14 = vrot.slane %v423_v3, 5  ;;  %v429_v15 = vshll.u32 %v236_v62, 16  ;;  %v245_v0 = vld [vmem:[%s2644_s5 + $0x70] sm:$0xf] }
  0x2e   : > { %v2739_v17 = vcombine.low %v384_v5, %v394_v12  ;;  %v413_v18 = vrot.slane %v412_v7, 4  ;;  %v433_v19 = vshrl.u32 %v236_v62, 16  ;;  %v2741_v20 = vcombine.low %v235_v45, %v236_v62  ;;  %v243_v12 = vld [vmem:[%s2644_s5 + $0x68] sm:$0x1] }
  0x2f   : > { %v408_v22 = vsel %vm2665_vm3, %v403_v13, %v407_v55  ;;  %v431_v23 = vrot.slane %v429_v15, 5  ;;  %v444_v24 = vshrl.u32 %v238_v11, 16  ;;  %v447_v25 = vshll.u32 %v238_v11, 16  ;;  %v246_v13 = vld [vmem:[%s2644_s5 + $0x74] sm:$0x1] }
  0x30   : > { %2410 = vmatprep.mubr.msk.bf16.mxu0 %vm724_vm2, %v2739_v17  ;;  %v418_v27 = vsel %vm2665_vm3, %v413_v18, %v417_v8  ;;  %v435_v28 = vrot.slane %v433_v19, 4  ;;  %2450 = vmatprep.mubr.msk.bf16.mxu1 %vm724_vm2, %v2741_v20  ;;  %v453_v30 = vshll.u32 %v239_v16, 16  ;;  %v457_v31 = vshrl.u32 %v239_v16, 16  ;;  %v247_v19 = vld [vmem:[%s2644_s5 + $0x78] sm:$0xf] }
  0x31   : > { %v2754_v33 = vcombine.low %v408_v22, %v418_v27  ;;  %v446_v4 = vrot.slane %v444_v24, 4  ;;  %v449_v34 = vrot.slane %v447_v25, 5  ;;  %v2756_v36 = vcombine.low %v238_v11, %v239_v16 }
  0x32   : > { %v455_v37 = vrot.slane %v453_v30, 5  ;;  %v459_v39 = vrot.slane %v457_v31, 4  ;;  %v426_v40 = vor.u32 %v425_v14, %v422_v10  ;;  %v436_v42 = vor.u32 %v435_v28, %v431_v23 }
  0x33   : > { %2411 = vmatmul.mubr.msk.bf16.gmra.mxu0 %vm724_vm2, %v2754_v33  ;;  %2451 = vmatmul.mubr.msk.bf16.gmra.mxu1 %vm724_vm2, %v2756_v36  ;;  %v439_v43 = vshll.u32 %v237_v21, 16  ;;  %v450_v44 = vor.u32 %v449_v34, %v446_v4  ;;  %v463_v45 = vshll.u32 %v240_v26, 16  ;;  %v468_v48 = vshrl.u32 %v241_v32, 16  ;;  %v248_v4 = vld [vmem:[%s2644_s5 + $0x7c] sm:$0xf] }
  0x34   : > { %v427_v49 = vrot.slane %v426_v40, 4  ;;  %v437_v50 = vrot.slane %v436_v42, 4  ;;  %v460_v51 = vor.u32 %v459_v39, %v455_v37  ;;  %v471_v53 = vshll.u32 %v241_v32, 16 }
  0x35   : > { %v441_v54 = vrot.slane %v439_v43, 5  ;;  %v451_v55 = vrot.slane %v450_v44, 4  ;;  %v465_v56 = vrot.slane %v463_v45, 5  ;;  %v470_v57 = vrot.slane %v468_v48, 4  ;;  %v250_v48 = vld [vmem:[%s2644_s5 + $0x84] sm:$0xf] }
  0x36   : > { %v432_v59 = vsel %vm2665_vm3, %v427_v49, %v431_v23  ;;  %v461_v61 = vrot.slane %v460_v51, 4  ;;  %v473_v62 = vrot.slane %v471_v53, 5  ;;  %v477_v63 = vshll.u32 %v242_v47, 16 }
  0x37   : > { %v442_v1 = vsel %vm2665_vm3, %v437_v50, %v441_v54  ;;  %v456_v2 = vsel %vm2665_vm3, %v451_v55, %v455_v37  ;;  %v481_v3 = vshrl.u32 %v242_v47, 16  ;;  %v2771_v5 = vcombine.low %v241_v32, %v242_v47  ;;  %v251_v54 = vld [vmem:[%s2644_s5 + $0x88] sm:$0xf] }
  0x38   : > { %v2773_v7 = vcombine.low %v432_v59, %v442_v1  ;;  %v466_v8 = vsel %vm2665_vm3, %v461_v61, %v465_v56  ;;  %v479_v10 = vrot.slane %v477_v63, 5  ;;  %v492_v11 = vshrl.u32 %v244_v58, 16  ;;  %v249_v59 = vld [vmem:[%s2644_s5 + $0x80] sm:$0x1]  ;;  %v252_v1 = vld [vmem:[%s2644_s5 + $0x8c] sm:$0x1] }
  0x39   : > { %v2779_v14 = vcombine.low %v456_v2, %v466_v8  ;;  %v483_v15 = vrot.slane %v481_v3, 4  ;;  %2454 = vmatprep.mubr.msk.bf16.mxu1 %vm724_vm2, %v2771_v5  ;;  %v495_v16 = vshll.u32 %v244_v58, 16  ;;  %v501_v18 = vshll.u32 %v245_v0, 16 }
  0x3a   : > { %2414 = vmatprep.mubr.msk.bf16.mxu0 %vm724_vm2, %v2773_v7  ;;  %v494_v21 = vrot.slane %v492_v11, 4  ;;  %v505_v22 = vshrl.u32 %v245_v0, 16  ;;  %v2786_v23 = vcombine.low %v244_v58, %v245_v0  ;;  %v474_v24 = vor.u32 %v473_v62, %v470_v57  ;;  %v253_v11 = vld [vmem:[%s2644_s5 + $0x90] sm:$0xf] }
  0x3b   : > { %2415 = vmatmul.mubr.msk.bf16.gmra.mxu0 %vm724_vm2, %v2779_v14  ;;  %v497_v25 = vrot.slane %v495_v16, 5  ;;  %v503_v26 = vrot.slane %v501_v18, 5  ;;  %v484_v27 = vor.u32 %v483_v15, %v479_v10  ;;  %v487_v28 = vshll.u32 %v243_v12, 16 }
  0x3c   : > { %v507_v30 = vrot.slane %v505_v22, 4  ;;  %2455 = vmatmul.mubr.msk.bf16.gmra.mxu1 %vm724_vm2, %v2786_v23  ;;  %v475_v31 = vrot.slane %v474_v24, 4  ;;  %v511_v32 = vshll.u32 %v246_v13, 16  ;;  %v516_v34 = vshrl.u32 %v247_v19, 16 }
  0x3d   : > { %v485_v37 = vrot.slane %v484_v27, 4  ;;  %v489_v39 = vrot.slane %v487_v28, 5  ;;  %v498_v40 = vor.u32 %v497_v25, %v494_v21  ;;  %v519_v42 = vshll.u32 %v247_v19, 16  ;;  %v254_v27 = vld [vmem:[%s2644_s5 + $0x94] sm:$0xf] }
  0x3e   : > { %v480_v43 = vsel %vm2665_vm3, %v475_v31, %v479_v10  ;;  %v508_v44 = vor.u32 %v507_v30, %v503_v26  ;;  %v513_v45 = vrot.slane %v511_v32, 5  ;;  %v518_v47 = vrot.slane %v516_v34, 4 }
  0x3f   : > { %v490_v49 = vsel %vm2665_vm3, %v485_v37, %v489_v39  ;;  %v499_v50 = vrot.slane %v498_v40, 4  ;;  %v521_v51 = vrot.slane %v519_v42, 5  ;;  %v525_v53 = vshll.u32 %v248_v4, 16  ;;  %v256_v42 = vld [vmem:[%s2644_s5 + $0x9c] sm:$0xf] }
  0x40   : > { %v2799_v55 = vcombine.low %v480_v43, %v490_v49  ;;  %v509_v56 = vrot.slane %v508_v44, 4  ;;  %v529_v57 = vshrl.u32 %v248_v4, 16  ;;  %v2801_v58 = vcombine.low %v247_v19, %v248_v4 }
  0x41   : > { %v504_v61 = vsel %vm2665_vm3, %v499_v50, %v503_v26  ;;  %v527_v62 = vrot.slane %v525_v53, 5  ;;  %v540_v63 = vshrl.u32 %v250_v48, 16  ;;  %v543_v0 = vshll.u32 %v250_v48, 16 }
  0x42   : > { %2418 = vmatprep.mubr.msk.bf16.mxu0 %vm724_vm2, %v2799_v55  ;;  %v514_v2 = vsel %vm2665_vm3, %v509_v56, %v513_v45  ;;  %v531_v3 = vrot.slane %v529_v57, 4  ;;  %2458 = vmatprep.mubr.msk.bf16.mxu1 %vm724_vm2, %v2801_v58  ;;  %v549_v8 = vshll.u32 %v251_v54, 16  ;;  %v553_v10 = vshrl.u32 %v251_v54, 16 }
  0x43   : > { %v2814_v12 = vcombine.low %v504_v61, %v514_v2  ;;  %v542_v13 = vrot.slane %v540_v63, 4  ;;  %v545_v15 = vrot.slane %v543_v0, 5  ;;  %v2816_v16 = vcombine.low %v250_v48, %v251_v54  ;;  %v257_v48 = vld [vmem:[%s2644_s5 + $0xa0] sm:$0xf]  ;;  %v255_v61 = vld [vmem:[%s2644_s5 + $0x98] sm:$0x1] }
  0x44   : > { %v551_v18 = vrot.slane %v549_v8, 5  ;;  %v555_v19 = vrot.slane %v553_v10, 4  ;;  %v522_v21 = vor.u32 %v521_v51, %v518_v47  ;;  %v532_v22 = vor.u32 %v531_v3, %v527_v62  ;;  %v259_v3 = vld [vmem:[%s2644_s5 + $0xa8] sm:$0xf] }
  0x45   : > { %2419 = vmatmul.mubr.msk.bf16.gmra.mxu0 %vm724_vm2, %v2814_v12  ;;  %2459 = vmatmul.mubr.msk.bf16.gmra.mxu1 %vm724_vm2, %v2816_v16  ;;  %v535_v24 = vshll.u32 %v249_v59, 16  ;;  %v546_v25 = vor.u32 %v545_v15, %v542_v13  ;;  %v559_v26 = vshll.u32 %v252_v1, 16  ;;  %v564_v28 = vshrl.u32 %v253_v11, 16 }
  0x46   : > { %v523_v30 = vrot.slane %v522_v21, 4  ;;  %v533_v31 = vrot.slane %v532_v22, 4  ;;  %v556_v32 = vor.u32 %v555_v19, %v551_v18  ;;  %v567_v4 = vshll.u32 %v253_v11, 16 }
  0x47   : > { %v537_v34 = vrot.slane %v535_v24, 5  ;;  %v547_v37 = vrot.slane %v546_v25, 4  ;;  %v561_v39 = vrot.slane %v559_v26, 5  ;;  %v566_v40 = vrot.slane %v564_v28, 4  ;;  %v260_v26 = vld [vmem:[%s2644_s5 + $0xac] sm:$0xf] }
  0x48   : > { %v528_v43 = vsel %vm2665_vm3, %v523_v30, %v527_v62  ;;  %v557_v44 = vrot.slane %v556_v32, 4  ;;  %v569_v45 = vrot.slane %v567_v4, 5  ;;  %v573_v47 = vshll.u32 %v254_v27, 16  ;;  %v258_v62 = vld [vmem:[%s2644_s5 + $0xa4] sm:$0x1] }
  0x49   : > { %v538_v49 = vsel %vm2665_vm3, %v533_v31, %v537_v34  ;;  %v552_v50 = vsel %vm2665_vm3, %v547_v37, %v551_v18  ;;  %v577_v51 = vshrl.u32 %v254_v27, 16  ;;  %v2831_v53 = vcombine.low %v253_v11, %v254_v27 }
  0x4a   : > { %v2833_v54 = vcombine.low %v528_v43, %v538_v49  ;;  %v562_v56 = vsel %vm2665_vm3, %v557_v44, %v561_v39  ;;  %v575_v57 = vrot.slane %v573_v47, 5  ;;  %v588_v59 = vshrl.u32 %v256_v42, 16  ;;  %v263_v47 = vld [vmem:[%s2644_s5 + $0xb8] sm:$0xf] }
  0x4b   : > { %v2839_v63 = vcombine.low %v552_v50, %v562_v56  ;;  %v579_v0 = vrot.slane %v577_v51, 4  ;;  %2462 = vmatprep.mubr.msk.bf16.mxu1 %vm724_vm2, %v2831_v53  ;;  %v591_v1 = vshll.u32 %v256_v42, 16  ;;  %v597_v2 = vshll.u32 %v257_v48, 16 }
  0x4c   : > { %2422 = vmatprep.mubr.msk.bf16.mxu0 %vm724_vm2, %v2833_v54  ;;  %v590_v8 = vrot.slane %v588_v59, 4  ;;  %v601_v10 = vshrl.u32 %v257_v48, 16  ;;  %v2846_v11 = vcombine.low %v256_v42, %v257_v48  ;;  %v570_v13 = vor.u32 %v569_v45, %v566_v40  ;;  %v262_v40 = vld [vmem:[%s2644_s5 + $0xb4] sm:$0xf] }
  0x4d   : > { %2423 = vmatmul.mubr.msk.bf16.gmra.mxu0 %vm724_vm2, %v2839_v63  ;;  %v593_v15 = vrot.slane %v591_v1, 5  ;;  %v599_v18 = vrot.slane %v597_v2, 5  ;;  %v580_v19 = vor.u32 %v579_v0, %v575_v57  ;;  %v583_v21 = vshll.u32 %v255_v61, 16 }
  0x4e   : > { %v603_v22 = vrot.slane %v601_v10, 4  ;;  %2463 = vmatmul.mubr.msk.bf16.gmra.mxu1 %vm724_vm2, %v2846_v11  ;;  %v571_v24 = vrot.slane %v570_v13, 4  ;;  %v607_v25 = vshll.u32 %v258_v62, 16  ;;  %v612_v27 = vshrl.u32 %v259_v3, 16  ;;  %v261_v62 = vld [vmem:[%s2644_s5 + $0xb0] sm:$0x1] }
  0x4f   : > { %v581_v28 = vrot.slane %v580_v19, 4  ;;  %v585_v30 = vrot.slane %v583_v21, 5  ;;  %v594_v31 = vor.u32 %v593_v15, %v590_v8  ;;  %v615_v32 = vshll.u32 %v259_v3, 16  ;;  %v264_v8 = vld [vmem:[%s2644_s5 + $0xbc] sm:$0x1] }
  0x50   : > { %v576_v4 = vsel %vm2665_vm3, %v571_v24, %v575_v57  ;;  %v604_v34 = vor.u32 %v603_v22, %v599_v18  ;;  %v609_v37 = vrot.slane %v607_v25, 5  ;;  %v614_v39 = vrot.slane %v612_v27, 4 }
  0x51   : > { %v586_v42 = vsel %vm2665_vm3, %v581_v28, %v585_v30  ;;  %v595_v43 = vrot.slane %v594_v31, 4  ;;  %v617_v44 = vrot.slane %v615_v32, 5  ;;  %v621_v45 = vshll.u32 %v260_v26, 16 }
  0x52   : > { %v2859_v48 = vcombine.low %v576_v4, %v586_v42  ;;  %v605_v49 = vrot.slane %v604_v34, 4  ;;  %v625_v50 = vshrl.u32 %v260_v26, 16  ;;  %v2861_v51 = vcombine.low %v259_v3, %v260_v26 }
  0x53   : > { %v600_v56 = vsel %vm2665_vm3, %v595_v43, %v599_v18  ;;  %v623_v57 = vrot.slane %v621_v45, 5  ;;  %v636_v59 = vshrl.u32 %v262_v40, 16  ;;  %v639_v61 = vshll.u32 %v262_v40, 16 }
  0x54   : > { %2426 = vmatprep.mubr.msk.bf16.mxu0 %vm724_vm2, %v2859_v48  ;;  %v610_v0 = vsel %vm2665_vm3, %v605_v49, %v609_v37  ;;  %v627_v1 = vrot.slane %v625_v50, 4  ;;  %2466 = vmatprep.mubr.msk.bf16.mxu1 %vm724_vm2, %v2861_v51  ;;  %v645_v2 = vshll.u32 %v263_v47, 16  ;;  %v649_v3 = vshrl.u32 %v263_v47, 16 }
  0x55   : > { %v2159_v10 = vcombine.low %v600_v56, %v610_v0  ;;  %v638_v13 = vrot.slane %v636_v59, 4  ;;  %v641_v15 = vrot.slane %v639_v61, 5  ;;  %v2873_v18 = vcombine.low %v262_v40, %v263_v47 }
  0x56   : > { %v647_v19 = vrot.slane %v645_v2, 5  ;;  %v651_v21 = vrot.slane %v649_v3, 4  ;;  %v618_v22 = vor.u32 %v617_v44, %v614_v39  ;;  %v628_v24 = vor.u32 %v627_v1, %v623_v57 }
  0x57   : > { %2427 = vmatmul.mubr.msk.bf16.gmra.mxu0 %vm724_vm2, %v2159_v10  ;;  %2467 = vmatmul.mubr.msk.bf16.gmra.mxu1 %vm724_vm2, %v2873_v18  ;;  %v631_v25 = vshll.u32 %v261_v62, 16  ;;  %v642_v26 = vor.u32 %v641_v15, %v638_v13  ;;  %v655_v27 = vshll.u32 %v264_v8, 16 }
  0x58   : > { %v619_v28 = vrot.slane %v618_v22, 4  ;;  %v629_v30 = vrot.slane %v628_v24, 4  ;;  %v652_v31 = vor.u32 %v651_v21, %v647_v19  ;;  %2510 = vmatprep.mubr.msk.bf16.mxu1 %vm724_vm2, %v2688_v6 }
  0x59   : > { %v633_v32 = vrot.slane %v631_v25, 5  ;;  %v643_v4 = vrot.slane %v642_v26, 4  ;;  %v657_v34 = vrot.slane %v655_v27, 5 }
  0x5a   : > { %v624_v37 = vsel %vm2665_vm3, %v619_v28, %v623_v57  ;;  %v653_v39 = vrot.slane %v652_v31, 4 }
  0x5b   : > { %v634_v40 = vsel %vm2665_vm3, %v629_v30, %v633_v32  ;;  %v648_v42 = vsel %vm2665_vm3, %v643_v4, %v647_v19 }
  0x5c   : > { %v2160_v43 = vcombine.low %v624_v37, %v634_v40  ;;  %v658_v44 = vsel %vm2665_vm3, %v653_v39, %v657_v34 }
  0x5d   : > { %v2161_v45 = vcombine.low %v648_v42, %v658_v44 }
  0x5e   : > { %2430 = vmatprep.mubr.msk.bf16.mxu0 %vm724_vm2, %v2160_v43 }
  0x5f   : > { %2431 = vmatmul.mubr.msk.bf16.gmra.mxu0 %vm724_vm2, %v2161_v45  ;;  %2511 = vmatmul.mubr.msk.bf16.vlgmr.msra.gmra.mxu1 %vm724_vm2, %v2715_v41 }
  0x60   : > { %2474 = vmatprep.mubr.msk.bf16.mxu0 %vm724_vm2, %v2658_v29  ;;  %2514 = vmatprep.mubr.msk.bf16.mxu1 %vm724_vm2, %v2720_v46  ;;  %v265_v29 = vld [vmem:[%s2644_s5 + $0xc0] sm:$0xf] }
  0x61   : > { %v1454_v6 = vshrl.u32 %v265_v29, 16 }
  0x63   : > { %v1456_v46 = vrot.slane %v1454_v6, 4 }
  0x67   : > { %2475 = vmatmul.mubr.msk.bf16.vlgmr.msra.gmra.mxu0 %vm724_vm2, %v2681_v60  ;;  %2515 = vmatmul.mubr.msk.bf16.gmra.mxu1 %vm724_vm2, %v2739_v17  ;;  %v266_v60 = vld [vmem:[%s2644_s5 + $0xc4] sm:$0xf] }
  0x68   : > { %2478 = vmatprep.mubr.msk.bf16.mxu0 %vm724_vm2, %v2692_v9  ;;  %2518 = vmatprep.mubr.msk.bf16.mxu1 %vm724_vm2, %v2754_v33  ;;  %v1457_v9 = vshll.u32 %v265_v29, 16  ;;  %v1467_v41 = vshrl.u32 %v266_v60, 16  ;;  %v267_v33 = vld [vmem:[%s2644_s5 + $0xc8] sm:$0x1] }
  0x6f   : > { %2479 = vmatmul.mubr.msk.bf16.gmra.mxu0 %vm724_vm2, %v2711_v38  ;;  %2519 = vmatmul.mubr.msk.bf16.gmra.mxu1 %vm724_vm2, %v2773_v7  ;;  %v1463_v38 = vshll.u32 %v266_v60, 16  ;;  %v1473_v7 = vshll.u32 %v267_v33, 16 }
  0x70   : > { %2482 = vmatprep.mubr.msk.bf16.mxu0 %vm724_vm2, %v2726_v52  ;;  %2522 = vmatprep.mubr.msk.bf16.mxu1 %vm724_vm2, %v2779_v14  ;;  %v1459_v52 = vrot.slane %v1457_v9, 5 }
  0x71   : > { %v1465_v17 = vrot.slane %v1463_v38, 5 }
  0x77   : > { %2483 = vmatmul.mubr.msk.bf16.gmra.mxu0 %vm724_vm2, %v2741_v20  ;;  %2523 = vmatmul.mubr.msk.bf16.gmra.mxu1 %vm724_vm2, %v2799_v55  ;;  %v1469_v20 = vrot.slane %v1467_v41, 4  ;;  %v1475_v55 = vrot.slane %v1473_v7, 5 }
  0x78   : > { %2486 = vmatprep.mubr.msk.bf16.mxu0 %vm724_vm2, %v2756_v36  ;;  %2526 = vmatprep.mubr.msk.bf16.mxu1 %vm724_vm2, %v2814_v12  ;;  %v1460_v36 = vor.u32 %v1459_v52, %v1456_v46 }
  0x7a   : > { %v1461_v14 = vrot.slane %v1460_v36, 4 }
  0x7f   : > { %2487 = vmatmul.mubr.msk.bf16.gmra.mxu0 %vm724_vm2, %v2771_v5  ;;  %2527 = vmatmul.mubr.msk.bf16.gmra.mxu1 %vm724_vm2, %v2833_v54  ;;  %v1470_v5 = vor.u32 %v1469_v20, %v1465_v17 }
  0x80   : > { %2490 = vmatprep.mubr.msk.bf16.mxu0 %vm724_vm2, %v2786_v23  ;;  %2530 = vmatprep.mubr.msk.bf16.mxu1 %vm724_vm2, %v2839_v63 }
  0x81   : > { %v1471_v23 = vrot.slane %v1470_v5, 4 }
  0x83   : > { %v1476_v12 = vsel %vm2665_vm3, %v1471_v23, %v1475_v55 }
  0x87   : > { %2491 = vmatmul.mubr.msk.bf16.gmra.mxu0 %vm724_vm2, %v2801_v58  ;;  %2531 = vmatmul.mubr.msk.bf16.gmra.mxu1 %vm724_vm2, %v2859_v48  ;;  %v1466_v58 = vsel %vm2665_vm3, %v1461_v14, %v1465_v17 }
  0x88   : > { %2494 = vmatprep.mubr.msk.bf16.mxu0 %vm724_vm2, %v2816_v16  ;;  %2534 = vmatprep.mubr.msk.bf16.mxu1 %vm724_vm2, %v2159_v10  ;;  %v2241_v16 = vcombine.low %v1466_v58, %v1476_v12 }
  0x8f   : > { %2495 = vmatmul.mubr.msk.bf16.gmra.mxu0 %vm724_vm2, %v2831_v53  ;;  %2535 = vmatmul.mubr.msk.bf16.gmra.mxu1 %vm724_vm2, %v2160_v43  ;;  %v2218_v53 = vcombine.low %v265_v29, %v266_v60 }
  0x90   : > { %2498 = vmatprep.mubr.msk.bf16.mxu0 %vm724_vm2, %v2846_v11  ;;  %2538 = vmatprep.mubr.msk.bf16.mxu1 %vm724_vm2, %v2161_v45 }
  0x97   : > { %2499 = vmatmul.mubr.msk.bf16.gmra.mxu0 %vm724_vm2, %v2861_v51  ;;  %2539 = vmatmul.mubr.msk.bf16.gmra.mxu1 %vm724_vm2, %v2241_v16 }
  0x98   : > { %2502 = vmatprep.mubr.msk.bf16.mxu0 %vm724_vm2, %v2873_v18 }
  0x9f   : > { %2503 = vmatmul.mubr.msk.bf16.gmra.mxu0 %vm724_vm2, %v2218_v53 }
  0xd9   : > { %v2954_v54 = vpop.f32.mrf.mxu1 }
  0xdb   : > { %v2956_v63 = vpop.f32.mrf.mxu1 }
  0xdd   : > { %v2958_v11 = vpop.f32.mrf.mxu1 }
  0xdf   : > { %v2960_v35 = vpop.f32.mrf.mxu1 }
  0xe1   : > { %v2962_v47 = vpop.f32.mrf.mxu0  ;;  %v2964_v48 = vpop.f32.mrf.mxu1 }
  0xe3   : > { %v2966_v49 = vpop.f32.mrf.mxu0  ;;  %v2968_v50 = vpop.f32.mrf.mxu1 }
  0xe5   : > { %v2970_v51 = vpop.f32.mrf.mxu0  ;;  %v2972_v56 = vpop.f32.mrf.mxu1 }
  0xe7   : > { %v2974_v57 = vpop.f32.mrf.mxu0  ;;  %v2976_v59 = vpop.f32.mrf.mxu1 }
  0xe9   : > { %v2978_v61 = vpop.f32.mrf.mxu0 }
  0xea   : > { %v2980_v62 = vpop.f32.mrf.mxu1 }
  0xeb   : > { %v2982_v0 = vpop.f32.mrf.mxu0 }
  0xec   : > { %v2984_v1 = vpop.f32.mrf.mxu1 }
  0xed   : > { %v2986_v2 = vpop.f32.mrf.mxu0 }
  0xee   : > { %v2988_v3 = vpop.f32.mrf.mxu1 }
  0xef   : > { %v2990_v8 = vpop.f32.mrf.mxu0 }
  0xf0   : > { %v2992_v10 = vpop.f32.mrf.mxu1 }
  0xf3   : > { %v2994_v13 = vpop.f32.mrf.mxu0  ;;  %v2996_v15 = vpop.f32.mrf.mxu1 }
  0xf5   : > { %v2998_v18 = vpop.f32.mrf.mxu0  ;;  %v3000_v19 = vpop.f32.mrf.mxu1 }
  0xf7   : > { %v2413_v21 = vpop.f32.mrf.mxu0  ;;  %v3002_v22 = vpop.f32.mrf.mxu1 }
  0xf9   : > { %v3004_v24 = vpop.f32.mrf.mxu0  ;;  %v3006_v25 = vpop.f32.mrf.mxu1 }
  0xfb   : > { %v3008_v26 = vpop.f32.mrf.mxu0 }
  0xfc   : > { %v3010_v27 = vpop.f32.mrf.mxu1 }
  0xfd   : > { %v3012_v28 = vpop.f32.mrf.mxu0 }
  0xfe   : > { %v3014_v30 = vpop.f32.mrf.mxu1 }
  0xff   : > { %v3016_v31 = vpop.f32.mrf.mxu0 }
 0x100   : > { %v3018_v32 = vpop.f32.mrf.mxu1 }
 0x101   : > { %v858_v4 = vpop.f32.mrf.mxu0 }
 0x102   : > { %v3020_v34 = vpop.f32.mrf.mxu1 }
 0x105   : > { %v2420_v37 = vpop.f32.mrf.mxu0  ;;  %v3022_v39 = vpop.f32.mrf.mxu1 }
 0x107   : > { %v3024_v40 = vpop.f32.mrf.mxu0  ;;  %v3026_v42 = vpop.f32.mrf.mxu1 }
 0x109   : > { %v2421_v43 = vpop.f32.mrf.mxu0  ;;  %v3028_v44 = vpop.f32.mrf.mxu1 }
 0x10b   : > { %v3030_v45 = vpop.f32.mrf.mxu0  ;;  %v3032_v29 = vpop.f32.mrf.mxu1 }
 0x10d   : > { %v2424_v60 = vpop.f32.mrf.mxu0 }
 0x10e   : > { %v3034_v6 = vpop.f32.mrf.mxu1 }
 0x10f   : > { %3376 = vst [vmem:[#allocation2_spill] sm:$0xff] %v3034_v6  ;;  %v887_v9 = vpop.f32.mrf.mxu0  ;;  %v1133_v6 = vadd.f32 %v2964_v48, %v2978_v61  ;;  %v3093_v48 = vadd.f32 %v2988_v3, %v2413_v21  ;;  %v3105_v61 = vadd.f32 %v3000_v19, %v3012_v28  ;;  %v3136_v19 = vadd.f32 %v3022_v39, %v2424_v60 }
 0x110   : > { %v3036_v38 = vpop.f32.mrf.mxu1  ;;  %v3139_v21 = vadd.f32 %v3026_v42, %v887_v9 }
 0x111   : > { %3377 = vst [vmem:[#allocation3_spill] sm:$0xff] %v3036_v38  ;;  %v3038_v41 = vpop.f32.mrf.mxu0 }
 0x112   : > { %v3040_v46 = vpop.f32.mrf.mxu1 }
 0x113   : > { %3378 = vst [vmem:[#allocation4_spill] sm:$0xff] %v3040_v46  ;;  %v890_v52 = vpop.f32.mrf.mxu0  ;;  %v1120_v46 = vadd.f32 %v2958_v11, %v2970_v51  ;;  %v3082_v11 = vadd.f32 %v2976_v59, %v2990_v8  ;;  %v3097_v51 = vadd.f32 %v2992_v10, %v3004_v24  ;;  %v3126_v8 = vadd.f32 %v3014_v30, %v3024_v40 }
 0x114   : > { %v3042_v17 = vpop.f32.mrf.mxu1  ;;  %v3129_v10 = vadd.f32 %v3018_v32, %v2421_v43 }
 0x115   : > { %3379 = vst [vmem:[#allocation5_spill] sm:$0xff] %v3042_v17 }
 0x116   : > { %v3388_v28 = vld [vmem:[#allocation2_spill] sm:$0xff] }
 0x117   : > { %v2428_v20 = vpop.f32.mrf.mxu0  ;;  %v3044_v33 = vpop.f32.mrf.mxu1 }
 0x118   : > { %3380 = vst [vmem:[#allocation6_spill] sm:$0xff] %v3044_v33  ;;  %v3149_v30 = vadd.f32 %v3388_v28, %v2428_v20  ;;  %v3389_v32 = vld [vmem:[#allocation3_spill] sm:$0xff] }
 0x119   : > { %v903_v36 = vpop.f32.mrf.mxu0  ;;  %v3046_v5 = vpop.f32.mrf.mxu1 }
 0x11a   : > { %3381 = vst [vmem:[#allocation7_spill] sm:$0xff] %v3046_v5 }
 0x11b   : > { %v2429_v7 = vpop.f32.mrf.mxu0  ;;  %v3048_v14 = vpop.f32.mrf.mxu1 }
 0x11c   : > { %3382 = vst [vmem:[#allocation8_spill] sm:$0xff] %v3048_v14 }
 0x11d   : > { %v3050_v23 = vpop.f32.mrf.mxu0  ;;  %v3052_v55 = vpop.f32.mrf.mxu1 }
 0x11e   : > { %3383 = vst [vmem:[#allocation9_spill] sm:$0xff] %v3050_v23  ;;  %3384 = vst [vmem:[#allocation10_spill] sm:$0xff] %v3052_v55  ;;  %v1117_v23 = vadd.f32 %v2954_v54, %v2962_v47  ;;  %v1109_v55 = vadd.f32 %v2956_v63, %v2966_v49  ;;  %v3077_v54 = vadd.f32 %v2972_v56, %v2986_v2 }
 0x11f   : > { %v2432_v58 = vpop.f32.mrf.mxu0  ;;  %v2512_v12 = vpop.f32.mrf.mxu1  ;;  %v3090_v47 = vadd.f32 %v2984_v1, %v2998_v18  ;;  %v3101_v56 = vadd.f32 %v2996_v15, %v3008_v26  ;;  %v3115_v1 = vadd.f32 %v3010_v27, %v2420_v37  ;;  %v3133_v18 = vadd.f32 %v3020_v34, %v3030_v45  ;;  %v3390_v34 = vld [vmem:[#allocation4_spill] sm:$0xff]  ;;  %v3392_v45 = vld [vmem:[#allocation5_spill] sm:$0xff]  ;;  %v3393_v60 = vld [vmem:[#allocation6_spill] sm:$0xff] }
 0x120   : > { %v3143_v26 = vadd.f32 %v3028_v44, %v3038_v41  ;;  %v3146_v27 = vadd.f32 %v3032_v29, %v890_v52  ;;  %v3157_v37 = vadd.f32 %v3390_v34, %v2429_v7  ;;  %v3166_v9 = vadd.f32 %v3393_v60, %v2432_v58 }
 0x121   : > { %v3055_v16 = vpop.f32.mrf.mxu0  ;;  %v1534_v53 = vpop.f32.mrf.mxu1 }
 0x122   : > { %3385 = vst [vmem:[#allocation11_spill] sm:$0xff] %v3055_v16  ;;  %v1112_v16 = vadd.f32 %v2960_v35, %v2974_v57  ;;  %v3086_v35 = vadd.f32 %v2980_v62, %v2994_v13  ;;  %v3109_v62 = vadd.f32 %v3002_v22, %v3016_v31 }
 0x123   : > { %v3057_v17 = vpop.f32.mrf.mxu0  ;;  %v2513_v33 = vpop.f32.mrf.mxu1 }
 0x124   : > { %3386 = vst [vmem:[#allocation12_spill] sm:$0xff] %v3057_v17 }
 0x125   : > { %v3061_v5 = vpop.f32.mrf.mxu0  ;;  %v1537_v14 = vpop.f32.mrf.mxu1  ;;  %v3391_v44 = vld [vmem:[#allocation9_spill] sm:$0xff] }
 0x126   : > { %3387 = vst [vmem:[#allocation13_spill] sm:$0xff] %v3061_v5  ;;  %v1125_v5 = vadd.f32 %v2968_v50, %v2982_v0  ;;  %v3112_v0 = vadd.f32 %v3006_v25, %v858_v4  ;;  %v3154_v4 = vadd.f32 %v3389_v32, %v903_v36  ;;  %v3163_v29 = vadd.f32 %v3392_v45, %v3391_v44 }
 0x127   : > { %v2476_v17 = vpop.f32.mrf.mxu0  ;;  %v2516_v38 = vpop.f32.mrf.mxu1 }
 0x128   : > { %v1423_v63 = vadd.f32 %v2476_v17, %v1117_v23  ;;  %v3395_v17 = vld [vmem:[#allocation7_spill] sm:$0xff] }
 0x129   : > { %v1294_v49 = vpop.f32.mrf.mxu0  ;;  %v1550_v50 = vpop.f32.mrf.mxu1  ;;  %v3394_v52 = vld [vmem:[#allocation11_spill] sm:$0xff] }
 0x12a   : > { %v1663_v57 = vadd.f32 %v2512_v12, %v1423_v63  ;;  %v1421_v59 = vadd.f32 %v1294_v49, %v1109_v55  ;;  %v3172_v20 = vadd.f32 %v3395_v17, %v3394_v52 }
 0x12b   : > { %v2477_v2 = vpop.f32.mrf.mxu0  ;;  %v3122_v3 = vpop.f32.mrf.mxu1  ;;  %v3396_v12 = vld [vmem:[#allocation12_spill] sm:$0xff] }
 0x12c   : > { %v2296_v13 = vpack.c.bf16 %v1663_v57, %v1663_v57  ;;  %v1661_v15 = vadd.f32 %v1534_v53, %v1421_v59  ;;  %v1424_v22 = vadd.f32 %v2477_v2, %v1120_v46  ;;  %v1767_v41 = vmul.f32 %v1663_v57, %v1663_v57 }
 0x12d   : > { %v1297_v24 = vpop.f32.mrf.mxu0  ;;  %v1553_v25 = vpop.f32.mrf.mxu1 }
 0x12e   : > { %1998 = vst.msk [vmem:[%s3120_s17 + $0x8] sm:$0xf] %vm1995_vm4, %v2296_v13  ;;  %v2294_v31 = vpack.c.bf16 %v1661_v15, %v1661_v15  ;;  %v1664_v39 = vadd.f32 %v2513_v33, %v1424_v22  ;;  %v1422_v40 = vadd.f32 %v1297_v24, %v1112_v16  ;;  %v1765_v33 = vmul.f32 %v1661_v15, %v1661_v15  ;;  %v3397_v16 = vld [vmem:[#allocation8_spill] sm:$0xff] }
 0x12f   : > { %v2480_v42 = vpop.f32.mrf.mxu0  ;;  %v3159_v43 = vpop.f32.mrf.mxu1  ;;  %v3178_v53 = vadd.f32 %v3397_v16, %v3396_v12  ;;  %v1694_v58 = vsel %vm1693_vm5, %v1661_v15, 0.0  ;;  %v1697_v24 = vsel %vm1693_vm5, %v1663_v57, 0.0  ;;  %v1800_v28 = vsel %vm1693_vm5, %v1767_v41, 0.0 }
 0x130   : > { %1996 = vst.msk [vmem:[%s3120_s17] sm:$0xf] %vm1995_vm4, %v2294_v31  ;;  %v1427_v46 = vadd.f32 %v2480_v42, %v1133_v6  ;;  %v2297_v36 = vpack.c.bf16 %v1664_v39, %v1664_v39  ;;  %v1662_v7 = vadd.f32 %v1537_v14, %v1422_v40  ;;  %v1768_v6 = vmul.f32 %v1664_v39, %v1664_v39 }
 0x131   : > { %v1310_v23 = vpop.f32.mrf.mxu0  ;;  %v3174_v55 = vpop.f32.mrf.mxu1  ;;  %v1797_v15 = vsel %vm1693_vm5, %v1765_v33, 0.0  ;;  %v1699_v44 = vsel %vm1693_vm5, %v1664_v39, 0.0 }
 0x132   : > { %v1667_v63 = vadd.f32 %v2516_v38, %v1427_v46  ;;  %v1425_v49 = vadd.f32 %v1310_v23, %v1125_v5  ;;  %1999 = vst.msk [vmem:[%s3120_s17 + $0xc] sm:$0xf] %vm1995_vm4, %v2297_v36  ;;  %v1695_v59 = vsel %vm1693_vm5, %v1662_v7, 0.0  ;;  %v1766_v2 = vmul.f32 %v1662_v7, %v1662_v7 }
 0x133   : > { %v2295_v13 = vpack.c.bf16 %v1662_v7, %v1662_v7  ;;  %v2481_v14 = vpop.f32.mrf.mxu0  ;;  %v2521_v22 = vpop.f32.mrf.mxu1  ;;  %v1696_v31 = vadd.f32 %v1695_v59, %v1694_v58  ;;  %v1802_v41 = vsel %vm1693_vm5, %v1768_v6, 0.0 }
 0x134   : > { %v2300_v32 = vpack.c.bf16 %v1667_v63, %v1667_v63  ;;  %v1798_v38 = vsel %vm1693_vm5, %v1766_v2, 0.0  ;;  %v1665_v5 = vadd.f32 %v1550_v50, %v1425_v49  ;;  %v1428_v34 = vadd.f32 %v2481_v14, %v3077_v54 }
 0x135   : > { %1997 = vst.msk [vmem:[%s3120_s17 + $0x4] sm:$0xf] %vm1995_vm4, %v2295_v13  ;;  %v1313_v40 = vpop.f32.mrf.mxu0  ;;  %v3191_v42 = vpop.f32.mrf.mxu1  ;;  %v1698_v45 = vadd.f32 %v1697_v24, %v1696_v31  ;;  %v1799_v57 = vadd.f32 %v1798_v38, %v1797_v15  ;;  %v1771_v23 = vmul.f32 %v1667_v63, %v1667_v63 }
 0x136   : > { %2002 = vst.msk [vmem:[%s3120_s17 + $0x18] sm:$0xf] %vm1995_vm4, %v2300_v32  ;;  %v1426_v60 = vadd.f32 %v1313_v40, %v3082_v11  ;;  %v1769_v46 = vmul.f32 %v1665_v5, %v1665_v5  ;;  %v2298_v52 = vpack.c.bf16 %v1665_v5, %v1665_v5  ;;  %v1668_v50 = vadd.f32 %v3122_v3, %v1428_v34 }
 0x137   : > { %v2484_v17 = vpop.f32.mrf.mxu0  ;;  %v3199_v54 = vpop.f32.mrf.mxu1  ;;  %v1801_v33 = vadd.f32 %v1800_v28, %v1799_v57  ;;  %v1700_v36 = vadd.f32 %v1699_v44, %v1698_v45  ;;  %v1701_v12 = vsel %vm1693_vm5, %v1665_v5, 0.0  ;;  %v1705_v5 = vsel %vm1693_vm5, %v1667_v63, 0.0 }
 0x138   : > { %v1666_v39 = vadd.f32 %v1553_v25, %v1426_v60  ;;  %v1431_v7 = vadd.f32 %v2484_v17, %v3086_v35  ;;  %v1804_v11 = vsel %vm1693_vm5, %v1769_v46, 0.0  ;;  %2000 = vst.msk [vmem:[%s3120_s17 + $0x10] sm:$0xf] %vm1995_vm4, %v2298_v52  ;;  %v2301_v16 = vpack.c.bf16 %v1668_v50, %v1668_v50 }
 0x139   : > { %v1326_v58 = vpop.f32.mrf.mxu0  ;;  %v1582_v49 = vpop.f32.mrf.mxu1  ;;  %v1702_v3 = vadd.f32 %v1701_v12, %v1700_v36  ;;  %v1803_v6 = vadd.f32 %v1802_v41, %v1801_v33  ;;  %v1772_v13 = vmul.f32 %v1668_v50, %v1668_v50  ;;  %v1808_v34 = vsel %vm1693_vm5, %v1771_v23, 0.0 }
 0x13a   : > { %v1703_v59 = vsel %vm1693_vm5, %v1666_v39, 0.0  ;;  %v1770_v2 = vmul.f32 %v1666_v39, %v1666_v39  ;;  %2003 = vst.msk [vmem:[%s3120_s17 + $0x1c] sm:$0xf] %vm1995_vm4, %v2301_v16  ;;  %v2299_v35 = vpack.c.bf16 %v1666_v39, %v1666_v39  ;;  %v1671_v25 = vadd.f32 %v3159_v43, %v1431_v7 }
 0x13b   : > { %v1429_v14 = vadd.f32 %v1326_v58, %v3090_v47  ;;  %v2485_v24 = vpop.f32.mrf.mxu0  ;;  %v3211_v28 = vpop.f32.mrf.mxu1  ;;  %v1805_v31 = vadd.f32 %v1804_v11, %v1803_v6  ;;  %v1704_v32 = vadd.f32 %v1703_v59, %v1702_v3  ;;  %v1810_v63 = vsel %vm1693_vm5, %v1772_v13, 0.0 }
 0x13c   : > { %v1806_v15 = vsel %vm1693_vm5, %v1770_v2, 0.0  ;;  %v1432_v38 = vadd.f32 %v2485_v24, %v3093_v48  ;;  %2001 = vst.msk [vmem:[%s3120_s17 + $0x14] sm:$0xf] %vm1995_vm4, %v2299_v35  ;;  %v2304_v40 = vpack.c.bf16 %v1671_v25, %v1671_v25  ;;  %v1707_v48 = vsel %vm1693_vm5, %v1668_v50, 0.0 }
 0x13d   : > { %v1669_v43 = vadd.f32 %v3174_v55, %v1429_v14  ;;  %v1329_v47 = vpop.f32.mrf.mxu0  ;;  %v3220_v44 = vpop.f32.mrf.mxu1  ;;  %v1706_v45 = vadd.f32 %v1705_v5, %v1704_v32  ;;  %v1807_v57 = vadd.f32 %v1806_v15, %v1805_v31  ;;  %v1775_v36 = vmul.f32 %v1671_v25, %v1671_v25 }
 0x13e   : > { %v1672_v60 = vadd.f32 %v2521_v22, %v1432_v38  ;;  %v1430_v41 = vadd.f32 %v1329_v47, %v3097_v51  ;;  %2006 = vst.msk [vmem:[%s3120_s17 + $0x28] sm:$0xf] %vm1995_vm4, %v2304_v40  ;;  %v1713_v15 = vsel %vm1693_vm5, %v1671_v25, 0.0 }
 0x13f   : > { %v1773_v46 = vmul.f32 %v1669_v43, %v1669_v43  ;;  %v2302_v52 = vpack.c.bf16 %v1669_v43, %v1669_v43  ;;  %v2488_v17 = vpop.f32.mrf.mxu0  ;;  %v2528_v33 = vpop.f32.mrf.mxu1  ;;  %v1809_v55 = vadd.f32 %v1808_v34, %v1807_v57  ;;  %v1708_v39 = vadd.f32 %v1707_v48, %v1706_v45 }
 0x140   : > { %v1709_v7 = vsel %vm1693_vm5, %v1669_v43, 0.0  ;;  %v1776_v22 = vmul.f32 %v1672_v60, %v1672_v60  ;;  %v2305_v51 = vpack.c.bf16 %v1672_v60, %v1672_v60  ;;  %v1670_v50 = vadd.f32 %v3191_v42, %v1430_v41 }
 0x141   : > { %2004 = vst.msk [vmem:[%s3120_s17 + $0x20] sm:$0xf] %vm1995_vm4, %v2302_v52  ;;  %v1435_v23 = vadd.f32 %v2488_v17, %v3101_v56  ;;  %v1342_v12 = vpop.f32.mrf.mxu0  ;;  %v3232_v11 = vpop.f32.mrf.mxu1  ;;  %v1710_v16 = vadd.f32 %v1709_v7, %v1708_v39  ;;  %v1811_v58 = vadd.f32 %v1810_v63, %v1809_v55  ;;  %v1812_v3 = vsel %vm1693_vm5, %v1773_v46, 0.0 }
 0x142   : > { %v1433_v6 = vadd.f32 %v1342_v12, %v3105_v61  ;;  %2007 = vst.msk [vmem:[%s3120_s17 + $0x2c] sm:$0xf] %vm1995_vm4, %v2305_v51  ;;  %v1711_v59 = vsel %vm1693_vm5, %v1670_v50, 0.0  ;;  %v1774_v2 = vmul.f32 %v1670_v50, %v1670_v50  ;;  %v2303_v13 = vpack.c.bf16 %v1670_v50, %v1670_v50 }
 0x143   : > { %v1675_v42 = vadd.f32 %v3199_v54, %v1435_v23  ;;  %v2489_v35 = vpop.f32.mrf.mxu0  ;;  %v3240_v56 = vpop.f32.mrf.mxu1  ;;  %v1813_v14 = vadd.f32 %v1812_v3, %v1811_v58  ;;  %v1712_v24 = vadd.f32 %v1711_v59, %v1710_v16  ;;  %v1816_v61 = vsel %vm1693_vm5, %v1775_v36, 0.0 }
 0x144   : > { %v1673_v31 = vadd.f32 %v1582_v49, %v1433_v6  ;;  %v1436_v32 = vadd.f32 %v2489_v35, %v3109_v62  ;;  %v1814_v38 = vsel %vm1693_vm5, %v1774_v2, 0.0  ;;  %2005 = vst.msk [vmem:[%s3120_s17 + $0x24] sm:$0xf] %vm1995_vm4, %v2303_v13  ;;  %v1715_v40 = vsel %vm1693_vm5, %v1672_v60, 0.0 }
 0x145   : > { %v2308_v5 = vpack.c.bf16 %v1675_v42, %v1675_v42  ;;  %v1345_v34 = vpop.f32.mrf.mxu0  ;;  %v1601_v54 = vpop.f32.mrf.mxu1  ;;  %v1714_v43 = vadd.f32 %v1713_v15, %v1712_v24  ;;  %v1815_v47 = vadd.f32 %v1814_v38, %v1813_v14  ;;  %v1818_v49 = vsel %vm1693_vm5, %v1776_v22, 0.0 }
 0x146   : > { %v1777_v45 = vmul.f32 %v1673_v31, %v1673_v31  ;;  %v2306_v62 = vpack.c.bf16 %v1673_v31, %v1673_v31  ;;  %v1676_v25 = vadd.f32 %v3211_v28, %v1436_v32  ;;  %v1434_v57 = vadd.f32 %v1345_v34, %v3112_v0 }
 0x147   : > { %2010 = vst.msk [vmem:[%s3120_s17 + $0x38] sm:$0xf] %vm1995_vm4, %v2308_v5  ;;  %v2492_v41 = vpop.f32.mrf.mxu0  ;;  %v3254_v48 = vpop.f32.mrf.mxu1  ;;  %v1817_v63 = vadd.f32 %v1816_v61, %v1815_v47  ;;  %v1779_v46 = vmul.f32 %v1675_v42, %v1675_v42  ;;  %v1716_v60 = vadd.f32 %v1715_v40, %v1714_v43  ;;  %v1717_v17 = vsel %vm1693_vm5, %v1673_v31, 0.0 }
 0x148   : > { %v1439_v52 = vadd.f32 %v2492_v41, %v3115_v1  ;;  %v1820_v55 = vsel %vm1693_vm5, %v1777_v45, 0.0  ;;  %2008 = vst.msk [vmem:[%s3120_s17 + $0x30] sm:$0xf] %vm1995_vm4, %v2306_v62  ;;  %v2309_v36 = vpack.c.bf16 %v1676_v25, %v1676_v25  ;;  %v1674_v28 = vadd.f32 %v3220_v44, %v1434_v57 }
 0x149   : > { %v1358_v39 = vpop.f32.mrf.mxu0  ;;  %v3262_v0 = vpop.f32.mrf.mxu1  ;;  %v1718_v7 = vadd.f32 %v1717_v17, %v1716_v60  ;;  %v1819_v22 = vadd.f32 %v1818_v49, %v1817_v63  ;;  %v1780_v23 = vmul.f32 %v1676_v25, %v1676_v25  ;;  %v1721_v44 = vsel %vm1693_vm5, %v1675_v42, 0.0 }
 0x14a   : > { %v1679_v51 = vadd.f32 %v2528_v33, %v1439_v52  ;;  %v1437_v50 = vadd.f32 %v1358_v39, %v3126_v8  ;;  %2011 = vst.msk [vmem:[%s3120_s17 + $0x3c] sm:$0xf] %vm1995_vm4, %v2309_v36  ;;  %v1719_v1 = vsel %vm1693_vm5, %v1674_v28, 0.0  ;;  %v1778_v12 = vmul.f32 %v1674_v28, %v1674_v28 }
 0x14b   : > { %v2307_v16 = vpack.c.bf16 %v1674_v28, %v1674_v28  ;;  %v2493_v58 = vpop.f32.mrf.mxu0  ;;  %v2533_v3 = vpop.f32.mrf.mxu1  ;;  %v1824_v6 = vsel %vm1693_vm5, %v1779_v46, 0.0  ;;  %v1821_v59 = vadd.f32 %v1820_v55, %v1819_v22  ;;  %v1720_v2 = vadd.f32 %v1719_v1, %v1718_v7 }
 0x14c   : > { %v1822_v33 = vsel %vm1693_vm5, %v1778_v12, 0.0  ;;  %v2312_v8 = vpack.c.bf16 %v1679_v51, %v1679_v51  ;;  %v1677_v13 = vadd.f32 %v3232_v11, %v1437_v50  ;;  %v1440_v35 = vadd.f32 %v2493_v58, %v3129_v10 }
 0x14d   : > { %2009 = vst.msk [vmem:[%s3120_s17 + $0x34] sm:$0xf] %vm1995_vm4, %v2307_v16  ;;  %v1361_v14 = vpop.f32.mrf.mxu0  ;;  %v1617_v24 = vpop.f32.mrf.mxu1  ;;  %v1723_v31 = vsel %vm1693_vm5, %v1676_v25, 0.0  ;;  %v1722_v32 = vadd.f32 %v1721_v44, %v1720_v2  ;;  %v1823_v42 = vadd.f32 %v1822_v33, %v1821_v59  ;;  %v1826_v61 = vsel %vm1693_vm5, %v1780_v23, 0.0 }
 0x14e   : > { %v1438_v15 = vadd.f32 %v1361_v14, %v3133_v18  ;;  %2014 = vst.msk [vmem:[%s3120_s17 + $0x48] sm:$0xf] %vm1995_vm4, %v2312_v8  ;;  %v1781_v38 = vmul.f32 %v1677_v13, %v1677_v13  ;;  %v2310_v5 = vpack.c.bf16 %v1677_v13, %v1677_v13  ;;  %v1680_v34 = vadd.f32 %v3240_v56, %v1440_v35 }
 0x14f   : > { %v2496_v11 = vpop.f32.mrf.mxu0  ;;  %v2536_v40 = vpop.f32.mrf.mxu1  ;;  %v1825_v10 = vadd.f32 %v1824_v6, %v1823_v42  ;;  %v1724_v43 = vadd.f32 %v1723_v31, %v1722_v32  ;;  %v1783_v49 = vmul.f32 %v1679_v51, %v1679_v51  ;;  %v1725_v62 = vsel %vm1693_vm5, %v1677_v13, 0.0 }
 0x150   : > { %v1678_v47 = vadd.f32 %v1601_v54, %v1438_v15  ;;  %v1443_v45 = vadd.f32 %v2496_v11, %v3136_v19  ;;  %v1828_v18 = vsel %vm1693_vm5, %v1781_v38, 0.0  ;;  %2012 = vst.msk [vmem:[%s3120_s17 + $0x40] sm:$0xf] %vm1995_vm4, %v2310_v5  ;;  %v2313_v25 = vpack.c.bf16 %v1680_v34, %v1680_v34 }
 0x151   : > { %v1374_v57 = vpop.f32.mrf.mxu0  ;;  %v1630_v41 = vpop.f32.mrf.mxu1  ;;  %v1726_v63 = vadd.f32 %v1725_v62, %v1724_v43  ;;  %v1827_v56 = vadd.f32 %v1826_v61, %v1825_v10  ;;  %v1784_v52 = vmul.f32 %v1680_v34, %v1680_v34  ;;  %v1729_v50 = vsel %vm1693_vm5, %v1679_v51, 0.0  ;;  %v3398_v62 = vld [vmem:[#allocation13_spill] sm:$0xff] }
 0x152   : > { %v1727_v46 = vsel %vm1693_vm5, %v1678_v47, 0.0  ;;  %v1782_v60 = vmul.f32 %v1678_v47, %v1678_v47  ;;  %2015 = vst.msk [vmem:[%s3120_s17 + $0x4c] sm:$0xf] %vm1995_vm4, %v2313_v25  ;;  %v2311_v19 = vpack.c.bf16 %v1678_v47, %v1678_v47  ;;  %v1683_v54 = vadd.f32 %v3254_v48, %v1443_v45 }
 0x153   : > { %v1441_v17 = vadd.f32 %v1374_v57, %v3139_v21  ;;  %v2497_v55 = vpop.f32.mrf.mxu0  ;;  %v2537_v36 = vpop.f32.mrf.mxu1  ;;  %v1829_v28 = vadd.f32 %v1828_v18, %v1827_v56  ;;  %v1728_v39 = vadd.f32 %v1727_v46, %v1726_v63  ;;  %v1832_v23 = vsel %vm1693_vm5, %v1783_v49, 0.0  ;;  %v3399_v18 = vld [vmem:[#allocation10_spill] sm:$0xff] }
 0x154   : > { %v1830_v7 = vsel %vm1693_vm5, %v1782_v60, 0.0  ;;  %v1444_v22 = vadd.f32 %v2497_v55, %v3143_v26  ;;  %2013 = vst.msk [vmem:[%s3120_s17 + $0x44] sm:$0xf] %vm1995_vm4, %v2311_v19  ;;  %v2316_v1 = vpack.c.bf16 %v1683_v54, %v1683_v54  ;;  %v1731_v6 = vsel %vm1693_vm5, %v1680_v34, 0.0 }
 0x155   : > { %v1681_v48 = vadd.f32 %v3262_v0, %v1441_v17  ;;  %v1377_v12 = vpop.f32.mrf.mxu0  ;;  %v1730_v21 = vadd.f32 %v1729_v50, %v1728_v39  ;;  %v1831_v16 = vadd.f32 %v1830_v7, %v1829_v28  ;;  %v1834_v26 = vsel %vm1693_vm5, %v1784_v52, 0.0  ;;  %v1633_v33 = vpop.f32.mrf.mxu1 }
 0x156   : > { %v1684_v58 = vadd.f32 %v2533_v3, %v1444_v22  ;;  %v1442_v44 = vadd.f32 %v1377_v12, %v3146_v27  ;;  %2018 = vst.msk [vmem:[%s3120_s17 + $0x58] sm:$0xf] %vm1995_vm4, %v2316_v1  ;;  %v1787_v0 = vmul.f32 %v1683_v54, %v1683_v54  ;;  %v1224_v25 = vadd.f32 %v3399_v18, %v3398_v62 }
 0x157   : > { %v1785_v51 = vmul.f32 %v1681_v48, %v1681_v48  ;;  %v2314_v59 = vpack.c.bf16 %v1681_v48, %v1681_v48  ;;  %v2500_v2 = vpop.f32.mrf.mxu0  ;;  %v1833_v8 = vadd.f32 %v1832_v23, %v1831_v16  ;;  %v1732_v13 = vadd.f32 %v1731_v6, %v1730_v21 }
 0x158   : > { %v1733_v35 = vsel %vm1693_vm5, %v1681_v48, 0.0  ;;  %v1788_v3 = vmul.f32 %v1684_v58, %v1684_v58  ;;  %v2317_v27 = vpack.c.bf16 %v1684_v58, %v1684_v58  ;;  %v1682_v14 = vadd.f32 %v1617_v24, %v1442_v44  ;;  %v2540_v24 = vpop.f32.mrf.mxu1 }
 0x159   : > { %2016 = vst.msk [vmem:[%s3120_s17 + $0x50] sm:$0xf] %vm1995_vm4, %v2314_v59  ;;  %v1447_v31 = vadd.f32 %v2500_v2, %v3149_v30  ;;  %v1390_v32 = vpop.f32.mrf.mxu0  ;;  %v1734_v42 = vadd.f32 %v1733_v35, %v1732_v13  ;;  %v1835_v15 = vadd.f32 %v1834_v26, %v1833_v8  ;;  %v1836_v61 = vsel %vm1693_vm5, %v1785_v51, 0.0 }
 0x15a   : > { %v1445_v38 = vadd.f32 %v1390_v32, %v3154_v4  ;;  %2019 = vst.msk [vmem:[%s3120_s17 + $0x5c] sm:$0xf] %vm1995_vm4, %v2317_v27  ;;  %v1735_v5 = vsel %vm1693_vm5, %v1682_v14, 0.0  ;;  %v1786_v34 = vmul.f32 %v1682_v14, %v1682_v14  ;;  %v2315_v11 = vpack.c.bf16 %v1682_v14, %v1682_v14  ;;  %v1646_v17 = vpop.f32.mrf.mxu1 }
 0x15b   : > { %v1687_v10 = vadd.f32 %v2536_v40, %v1447_v31  ;;  %v2501_v43 = vpop.f32.mrf.mxu0  ;;  %v1837_v47 = vadd.f32 %v1836_v61, %v1835_v15  ;;  %v1736_v30 = vadd.f32 %v1735_v5, %v1734_v42  ;;  %v1737_v4 = vsel %vm1693_vm5, %v1683_v54, 0.0 }
 0x15c   : > { %v1685_v45 = vadd.f32 %v1630_v41, %v1445_v38  ;;  %v1448_v49 = vadd.f32 %v2501_v43, %v3157_v37  ;;  %v1838_v57 = vsel %vm1693_vm5, %v1786_v34, 0.0  ;;  %2017 = vst.msk [vmem:[%s3120_s17 + $0x54] sm:$0xf] %vm1995_vm4, %v2315_v11  ;;  %v1840_v40 = vsel %vm1693_vm5, %v1787_v0, 0.0  ;;  %v2541_v26 = vpop.f32.mrf.mxu1 }
 0x15d   : > { %v2320_v63 = vpack.c.bf16 %v1687_v10, %v1687_v10  ;;  %v1393_v56 = vpop.f32.mrf.mxu0  ;;  %v1739_v46 = vsel %vm1693_vm5, %v1684_v58, 0.0  ;;  %v1738_v60 = vadd.f32 %v1737_v4, %v1736_v30  ;;  %v1839_v41 = vadd.f32 %v1838_v57, %v1837_v47 }
 0x15e   : > { %v1789_v37 = vmul.f32 %v1685_v45, %v1685_v45  ;;  %v2318_v52 = vpack.c.bf16 %v1685_v45, %v1685_v45  ;;  %v1688_v19 = vadd.f32 %v2537_v36, %v1448_v49  ;;  %v1446_v54 = vadd.f32 %v1393_v56, %v3163_v29  ;;  %v1649_v38 = vpop.f32.mrf.mxu1 }
 0x15f   : > { %2022 = vst.msk [vmem:[%s3120_s17 + $0x68] sm:$0xf] %vm1995_vm4, %v2320_v63  ;;  %v2504_v55 = vpop.f32.mrf.mxu0  ;;  %v1842_v28 = vsel %vm1693_vm5, %v1788_v3, 0.0  ;;  %v1841_v39 = vadd.f32 %v1840_v40, %v1839_v41  ;;  %v1740_v7 = vadd.f32 %v1739_v46, %v1738_v60  ;;  %v1791_v50 = vmul.f32 %v1687_v10, %v1687_v10 }
 0x160   : > { %v1451_v22 = vadd.f32 %v2504_v55, %v3166_v9  ;;  %v1741_v23 = vsel %vm1693_vm5, %v1685_v45, 0.0  ;;  %2020 = vst.msk [vmem:[%s3120_s17 + $0x60] sm:$0xf] %vm1995_vm4, %v2318_v52  ;;  %v2321_v1 = vpack.c.bf16 %v1688_v19, %v1688_v19  ;;  %v1686_v48 = vadd.f32 %v1633_v33, %v1446_v54 }
 0x161   : > { %v1406_v12 = vpop.f32.mrf.mxu0  ;;  %v1742_v36 = vadd.f32 %v1741_v23, %v1740_v7  ;;  %v1843_v29 = vadd.f32 %v1842_v28, %v1841_v39  ;;  %v1844_v58 = vsel %vm1693_vm5, %v1789_v37, 0.0  ;;  %v1745_v59 = vsel %vm1693_vm5, %v1687_v10, 0.0 }
 0x162   : > { %v1691_v21 = vadd.f32 %v2540_v24, %v1451_v22  ;;  %v1449_v16 = vadd.f32 %v1406_v12, %v3172_v20  ;;  %2023 = vst.msk [vmem:[%s3120_s17 + $0x6c] sm:$0xf] %vm1995_vm4, %v2321_v1  ;;  %v1743_v9 = vsel %vm1693_vm5, %v1686_v48, 0.0  ;;  %v1790_v44 = vmul.f32 %v1686_v48, %v1686_v48 }
 0x163   : > { %v2319_v6 = vpack.c.bf16 %v1686_v48, %v1686_v48  ;;  %v2505_v51 = vpop.f32.mrf.mxu0  ;;  %v1845_v2 = vadd.f32 %v1844_v58, %v1843_v29  ;;  %v1792_v33 = vmul.f32 %v1688_v19, %v1688_v19  ;;  %v1744_v8 = vadd.f32 %v1743_v9, %v1742_v36 }
 0x164   : > { %v1846_v0 = vsel %vm1693_vm5, %v1790_v44, 0.0  ;;  %v2324_v20 = vpack.c.bf16 %v1691_v21, %v1691_v21  ;;  %v1689_v13 = vadd.f32 %v1646_v17, %v1449_v16  ;;  %v1452_v35 = vadd.f32 %v2505_v51, %v3178_v53 }
 0x165   : > { %2021 = vst.msk [vmem:[%s3120_s17 + $0x64] sm:$0xf] %vm1995_vm4, %v2319_v6  ;;  %v1409_v3 = vpop.f32.mrf.mxu0  ;;  %v1848_v27 = vsel %vm1693_vm5, %v1791_v50, 0.0  ;;  %v1746_v14 = vadd.f32 %v1745_v59, %v1744_v8  ;;  %v1847_v31 = vadd.f32 %v1846_v0, %v1845_v2  ;;  %v1747_v42 = vsel %vm1693_vm5, %v1688_v19, 0.0 }
 0x166   : > { %v1450_v32 = vadd.f32 %v1409_v3, %v1224_v25  ;;  %2026 = vst.msk [vmem:[%s3120_s17 + $0x78] sm:$0xf] %vm1995_vm4, %v2324_v20  ;;  %v1793_v15 = vmul.f32 %v1689_v13, %v1689_v13  ;;  %v2322_v61 = vpack.c.bf16 %v1689_v13, %v1689_v13  ;;  %v1692_v5 = vadd.f32 %v2541_v26, %v1452_v35 }
 0x167   : > { %v1849_v34 = vadd.f32 %v1848_v27, %v1847_v31  ;;  %v1748_v11 = vadd.f32 %v1747_v42, %v1746_v14  ;;  %v1850_v53 = vsel %vm1693_vm5, %v1792_v33, 0.0  ;;  %v1749_v43 = vsel %vm1693_vm5, %v1689_v13, 0.0 }
 0x168   : > { %v1690_v10 = vadd.f32 %v1649_v38, %v1450_v32  ;;  %2024 = vst.msk [vmem:[%s3120_s17 + $0x70] sm:$0xf] %vm1995_vm4, %v2322_v61  ;;  %v2325_v24 = vpack.c.bf16 %v1692_v5, %v1692_v5  ;;  %v1795_v62 = vmul.f32 %v1691_v21, %v1691_v21  ;;  %v1852_v18 = vsel %vm1693_vm5, %v1793_v15, 0.0 }
 0x169   : > { %v1750_v47 = vadd.f32 %v1749_v43, %v1748_v11  ;;  %v1851_v30 = vadd.f32 %v1850_v53, %v1849_v34  ;;  %v1753_v56 = vsel %vm1693_vm5, %v1691_v21, 0.0  ;;  %v1796_v40 = vmul.f32 %v1692_v5, %v1692_v5 }
 0x16a   : > { %v1751_v45 = vsel %vm1693_vm5, %v1690_v10, 0.0  ;;  %v1794_v49 = vmul.f32 %v1690_v10, %v1690_v10  ;;  %2027 = vst.msk [vmem:[%s3120_s17 + $0x7c] sm:$0xf] %vm1995_vm4, %v2325_v24  ;;  %v2323_v25 = vpack.c.bf16 %v1690_v10, %v1690_v10  ;;  %v1856_v41 = vsel %vm1693_vm5, %v1795_v62, 0.0 }
 0x16b   : > { %v1853_v4 = vadd.f32 %v1852_v18, %v1851_v30  ;;  %v1752_v57 = vadd.f32 %v1751_v45, %v1750_v47  ;;  %v1755_v37 = vsel %vm1693_vm5, %v1692_v5, 0.0  ;;  %v1858_v54 = vsel %vm1693_vm5, %v1796_v40, 0.0 }
 0x16c   : > { %v1854_v63 = vsel %vm1693_vm5, %v1794_v49, 0.0  ;;  %2025 = vst.msk [vmem:[%s3120_s17 + $0x74] sm:$0xf] %vm1995_vm4, %v2323_v25 }
 0x16d   : > { %v1754_v46 = vadd.f32 %v1753_v56, %v1752_v57  ;;  %v1855_v60 = vadd.f32 %v1854_v63, %v1853_v4 }
 0x16f   : > { %v1756_v52 = vadd.f32 %v1755_v37, %v1754_v46  ;;  %v1857_v19 = vadd.f32 %v1856_v41, %v1855_v60 }
 0x171   : > { %v1757_v17 = vrot.slane %v1756_v52, 4  ;;  %v1859_v55 = vadd.f32 %v1858_v54, %v1857_v19 }
 0x173   : > { %v1758_v28 = vadd.f32 %v1757_v17, %v1756_v52  ;;  %v1860_v39 = vrot.slane %v1859_v55, 4 }
 0x175   : > { %v1759_v7 = vrot.slane %v1758_v28, 2  ;;  %v1861_v22 = vadd.f32 %v1860_v39, %v1859_v55 }
 0x177   : > { %v1760_v50 = vadd.f32 %v1759_v7, %v1758_v28  ;;  %v1862_v23 = vrot.slane %v1861_v22, 2 }
 0x179   : > { %v1761_v1 = vrot.slane %v1760_v50, 1  ;;  %v1863_v48 = vadd.f32 %v1862_v23, %v1861_v22 }
 0x17b   : > { %v1762_v12 = vadd.f32 %v1761_v1, %v1760_v50  ;;  %v1864_v36 = vrot.slane %v1863_v48, 1 }
 0x17d   : > { %1764 = vst.msk [vmem:[%s212_s20] sm:$0x1] %vm1763_vm6, %v1762_v12  ;;  %v1865_v29 = vadd.f32 %v1864_v36, %v1863_v48 }
 0x17f   : > { %1866 = vst.msk [vmem:[%s215_s24] sm:$0x1] %vm1763_vm6, %v1865_v29 }
 0x180 PF: > { %s15_s15 = sadd.s32 1, %s2582_s15  }
 0x181   : > { %p12_p5 = scmp.ge.s32.totalorder %s15_s15, 4  }
 0x183   :  { %14 = sbr.rel (!%p12_p5) target bundleno = 1 (0x1), region = 85 }

// kernel: discriminator_forward.7
= control target key start
LH: loop header
LB: loop body
LE: loop exit
PB: predicated region body
PF: predicated region fallthrough
CT: control target
= control target key end

     0   :  { %vm663_vm0 = vcmask 523264   ;;  %vm379_vm1 = vsmask.f32 3328  ;;  %vm380_vm2 = vsmask.f32 7440  ;;  %vm1492_vm4 = vcmask 257024   ;;  %s2646_s3 = inlined_call_operand.vmem [shape: bf16[4,64,32], index: 3, kind: input, shape index: {}]   ;;  %s2647_s0 = inlined_call_operand.vmem [shape: bf16[2,9,9,64], index: 0, kind: input, shape index: {}]   ;;  %s2648_s1 = inlined_call_operand.vmem [shape: f32[1,9,9,64], index: 1, kind: input, shape index: {}]   ;;  %s2649_s2 = inlined_call_operand.vmem [shape: f32[1,9,9,64], index: 2, kind: input, shape index: {}]   ;;  %s2650_s4 = inlined_call_operand.vmem [shape: bf16[128,32], index: 4, kind: output, shape index: {0}]   ;;  %s2651_s5 = inlined_call_operand.vmem [shape: f32[1,1,32], index: 5, kind: output, shape index: {1}]   ;;  %s2652_s6 = inlined_call_operand.vmem [shape: f32[1,1,32], index: 6, kind: output, shape index: {2}]  }
   0x1   :  { %v1889_v0 = vld [vmem:[%s2646_s3 + $0x18] sm:$0xff]   ;;  %v1891_v2 = vld [vmem:[%s2646_s3 + $0x10] sm:$0xff]   ;;  %v1893_v4 = vld [vmem:[%s2646_s3 + $0x8] sm:$0xff]   ;;  %vm1334_vm5 = vcmask 261120   ;;  %vm1372_vm6 = vcmask 253952  }
   0x2   :  { %v1890_v1 = vld [vmem:[%s2646_s3 + $0x38] sm:$0xff]   ;;  %1817 = vmatprep.subr.bf16.mxu1 %v1889_v0  ;;  %v1892_v3 = vld [vmem:[%s2646_s3 + $0x30] sm:$0xff]   ;;  %v1894_v5 = vld [vmem:[%s2646_s3 + $0x28] sm:$0xff]  }
   0x3   :  { %1818 = vmatpush3.bf16.msra.mxu1 %v1889_v0  ;;  %1793 = vmatprep.subr.bf16.mxu0 %v1890_v1  ;;  %v1895_v6 = vld [vmem:[%s2646_s3] sm:$0xff]   ;;  %v39_v8 = vld [vmem:[%s2647_s0 + $0x48] ss:$8 sps:$4 sm:$0xff]   ;;  %v24_v29 = vld [vmem:[%s2647_s0 + $0xc] sm:$0x1] }
   0x4   :  { %1794 = vmatpush3.bf16.msra.mxu0 %v1890_v1  ;;  %1819 = vmatprep.subr.bf16.mxu1 %v1891_v2  ;;  %v21_v7 = vld [vmem:[%s2647_s0] ss:$8 sps:$4 sm:$0xff]   ;;  %v75_v13 = vunpack.c.l.bf16 %v39_v8  ;;  %v77_v14 = vunpack.c.h.bf16 %v39_v8  ;;  %v95_v15 = vld [vmem:[%s2648_s1 + $0x10] sm:$0xff]  ;;  %v22_v25 = vld [vmem:[%s2647_s0 + $0x4] sm:$0x1]  ;;  %v60_v47 = vunpack.c.l.bf16 %v24_v29 }
   0x5   :  { %1795 = vmatprep.subr.bf16.mxu0 %v1892_v3  ;;  %v93_v9 = vld [vmem:[%s2648_s1] sm:$0xff]  ;;  %v57_v11 = vunpack.c.l.bf16 %v21_v7  ;;  %v59_v12 = vunpack.c.h.bf16 %v21_v7  ;;  %v149_v17 = vld [vmem:[%s2649_s2 + $0x10] sm:$0xff]  ;;  %v28_v35 = vld [vmem:[%s2647_s0 + $0x1c] sm:$0x1]  ;;  %v58_v43 = vunpack.c.l.bf16 %v22_v25 }
   0x6   :  { %v1896_v10 = vld [vmem:[%s2646_s3 + $0x20] sm:$0xff]   ;;  %v25_v18 = vld [vmem:[%s2647_s0 + $0x10] ss:$8 sps:$4 sm:$0xff]   ;;  %v129_v21 = vmul.f32 %v93_v9, %v75_v13  ;;  %v131_v22 = vmul.f32 %v95_v15, %v77_v14  ;;  %v26_v30 = vld [vmem:[%s2647_s0 + $0x14] sm:$0x1]  ;;  %v64_v52 = vunpack.c.l.bf16 %v28_v35 }
   0x7   :  { %1820 = vmatpush3.bf16.msra.mxu1 %v1891_v2  ;;  %v147_v16 = vld [vmem:[%s2649_s2] sm:$0xff]  ;;  %v111_v19 = vmul.f32 %v93_v9, %v57_v11  ;;  %v113_v20 = vmul.f32 %v95_v15, %v59_v12  ;;  %v1993_v24 = vld [vmem:[%s2648_s1 + $0x30] sm:$0xff]  ;;  %v61_v26 = vunpack.c.l.bf16 %v25_v18  ;;  %v63_v27 = vunpack.c.h.bf16 %v25_v18  ;;  %v40_v41 = vld [vmem:[%s2647_s0 + $0x4c] sm:$0x1] }
   0x8   :  { %1796 = vmatpush3.bf16.msra.mxu0 %v1892_v3  ;;  %1821 = vmatprep.subr.bf16.mxu1 %v1893_v4  ;;  %v1988_v23 = vld [vmem:[%s2648_s1 + $0x20] sm:$0xff]  ;;  %v2009_v33 = vadd.f32 %v147_v16, %v129_v21  ;;  %v2014_v34 = vld [vmem:[%s2649_s2 + $0x30] sm:$0xff]  ;;  %v2024_v37 = vadd.f32 %v149_v17, %v131_v22  ;;  %v44_v46 = vld [vmem:[%s2647_s0 + $0x5c] sm:$0x1]  ;;  %v62_v48 = vunpack.c.l.bf16 %v26_v30  ;;  %v76_v0 = vunpack.c.l.bf16 %v40_v41 }
   0x9   :  { %1797 = vmatprep.subr.bf16.mxu0 %v1894_v5  ;;  %v2001_v28 = vld [vmem:[%s2649_s2 + $0x20] sm:$0xff]  ;;  %v165_v31 = vadd.f32 %v147_v16, %v111_v19  ;;  %v167_v32 = vadd.f32 %v149_v17, %v113_v20  ;;  %v115_v38 = vmul.f32 %v1988_v23, %v61_v26  ;;  %v117_v39 = vmul.f32 %v1993_v24, %v63_v27  ;;  %v42_v42 = vld [vmem:[%s2647_s0 + $0x54] sm:$0x1]  ;;  %v94_v53 = vld [vmem:[%s2648_s1 + $0x8] sm:$0x1] }
   0xa   :  { %v2022_v36 = vld [vmem:[%s2647_s0 + $0x20] ss:$8 sps:$4 sm:$0xff]   ;;  %v30_v40 = vld [vmem:[%s2647_s0 + $0x24] sm:$0x1]  ;;  %v2041_v49 = vmul.f32 0.2, %v2009_v33  ;;  %v78_v1 = vunpack.c.l.bf16 %v42_v42  ;;  %v130_v26 = vmul.f32 %v94_v53, %v76_v0  ;;  %vm2144_vm3 = vmor %vm379_vm1, %vm380_vm2 }
   0xb   :  { %1822 = vmatpush3.bf16.msra.mxu1 %v1893_v4  ;;  %v201_v44 = vmul.f32 0.2, %v165_v31  ;;  %v203_v45 = vmul.f32 0.2, %v167_v32  ;;  %v169_v50 = vadd.f32 %v2001_v28, %v115_v38  ;;  %v171_v51 = vadd.f32 %v2014_v34, %v117_v39  ;;  %v96_v54 = vld [vmem:[%s2648_s1 + $0x18] sm:$0x1] }
   0xc   :  { %1798 = vmatpush3.bf16.msra.mxu0 %v1894_v5  ;;  %1823 = vmatprep.subr.bf16.mxu1 %v1895_v6  ;;  %v65_v57 = vunpack.c.l.bf16 %v2022_v36  ;;  %v66_v58 = vunpack.c.l.bf16 %v30_v40  ;;  %v98_v59 = vld [vmem:[%s2648_s1 + $0x28] sm:$0x1]  ;;  %v2060_v60 = vld [vmem:[%s2648_s1 + $0x38] sm:$0x1]  ;;  %v2065_v61 = vld [vmem:[%s2648_s1 + $0x40] sm:$0xff]  ;;  %v80_v5 = vunpack.c.l.bf16 %v44_v46  ;;  %v114_v12 = vmul.f32 %v96_v54, %v60_v47 }
   0xd   :  { %1799 = vmatprep.subr.bf16.mxu0 %v1896_v10  ;;  %v237_v55 = vmax.f32 %v165_v31, %v201_v44  ;;  %v2051_v56 = vmax.f32 %v167_v32, %v203_v45  ;;  %v205_v62 = vmul.f32 0.2, %v169_v50  ;;  %v207_v63 = vmul.f32 0.2, %v171_v51  ;;  %v2070_v2 = vld [vmem:[%s2648_s1 + $0x48] sm:$0x1] }
   0xe   :  { %v148_v7 = vld [vmem:[%s2649_s2 + $0x8] sm:$0x1]  ;;  %v150_v8 = vld [vmem:[%s2649_s2 + $0x18] sm:$0x1]  ;;  %v116_v13 = vmul.f32 %v98_v59, %v62_v48  ;;  %v2094_v15 = vld [vmem:[%s2649_s2 + $0x40] sm:$0xff]  ;;  %v118_v18 = vmul.f32 %v2060_v60, %v64_v52  ;;  %v119_v19 = vmul.f32 %v2065_v61, %v65_v57  ;;  %v120_v25 = vmul.f32 %v2070_v2, %v66_v58 }
   0xf   :  { %1824 = vmatpush3.bf16.msra.mxu1 %v1895_v6  ;;  %2660 = vst [vmem:[#allocation2_spill] sm:$0xff] %v2051_v56  ;;  %v1677_v3 = vpack.c.bf16 %v237_v55, %v237_v55  ;;  %v1709_v4 = vpack.c.bf16 %v2051_v56, %v237_v55  ;;  %v112_v6 = vmul.f32 %v94_v53, %v58_v43  ;;  %v152_v9 = vld [vmem:[%s2649_s2 + $0x28] sm:$0x1]  ;;  %v2089_v14 = vld [vmem:[%s2649_s2 + $0x38] sm:$0x1] }
  0x10   :  { %1800 = vmatpush3.bf16.msra.mxu0 %v1896_v10  ;;  %v2082_v10 = vmax.f32 %v169_v50, %v205_v62  ;;  %v2084_v11 = vmax.f32 %v171_v51, %v207_v63  ;;  %v2102_v20 = vld [vmem:[%s2646_s3 + $0x58] sm:$0xff]   ;;  %v132_v27 = vmul.f32 %v96_v54, %v78_v1  ;;  %v2113_v29 = vld [vmem:[%s2649_s2 + $0x48] sm:$0x1]  ;;  %v2116_v30 = vmul.f32 0.2, %v2024_v37 }
  0x11   :  { %v383_v16 = vshrl.u32 %v1677_v3, 16  ;;  %v386_v17 = vshll.u32 %v1677_v3, 16  ;;  %1825 = vmatprep.mubr.msk.bf16.mxu1 %vm663_vm0, %v1709_v4  ;;  %v1898_v21 = vld [vmem:[%s2646_s3 + $0x78] sm:$0xff]   ;;  %v1679_v31 = vpack.c.bf16 %v2051_v56, %v2051_v56  ;;  %v134_v32 = vmul.f32 %v98_v59, %v80_v5  ;;  %1841 = vmatprep.subr.bf16.mxu0 %v2102_v20 }
  0x12   :  { %2661 = vst [vmem:[#allocation3_spill] sm:$0xff] %v2082_v10  ;;  %2662 = vst [vmem:[#allocation4_spill] sm:$0xff] %v2084_v11  ;;  %v1710_v22 = vpack.c.bf16 %v2084_v11, %v2082_v10  ;;  %v166_v35 = vadd.f32 %v148_v7, %v112_v6  ;;  %1865 = vmatprep.subr.bf16.mxu1 %v1898_v21  ;;  %v168_v38 = vadd.f32 %v150_v8, %v114_v12 }
  0x13   :  { %v170_v39 = vadd.f32 %v152_v9, %v116_v13  ;;  %v172_v40 = vadd.f32 %v2089_v14, %v118_v18  ;;  %v173_v41 = vadd.f32 %v2094_v15, %v119_v19  ;;  %v385_v42 = vrot.slane %v383_v16, 4 }
  0x14   :  { %1826 = vmatmul.mubr.msk.bf16.vlgmr.msra.gmra.mxu1 %vm663_vm0, %v1710_v22  ;;  %v388_v43 = vrot.slane %v386_v17, 5  ;;  %v174_v44 = vadd.f32 %v2113_v29, %v120_v25  ;;  %v2125_v45 = vadd.f32 %v148_v7, %v130_v26  ;;  %v2127_v46 = vadd.f32 %v150_v8, %v132_v27  ;;  %v1900_v7 = vld [vmem:[%s2646_s3 + $0x70] sm:$0xff]  }
  0x15   :  { %1866 = vmatpush3.bf16.msra.mxu1 %v1898_v21  ;;  %v202_v47 = vmul.f32 0.2, %v166_v35  ;;  %v204_v48 = vmul.f32 0.2, %v168_v38  ;;  %v206_v50 = vmul.f32 0.2, %v170_v39  ;;  %v2129_v51 = vadd.f32 %v152_v9, %v134_v32 }
  0x16   :  { %v208_v52 = vmul.f32 0.2, %v172_v40  ;;  %v209_v53 = vmul.f32 0.2, %v173_v41  ;;  %v210_v54 = vmul.f32 0.2, %v174_v44  ;;  %v1681_v58 = vpack.c.bf16 %v2082_v10, %v2082_v10  ;;  %1867 = vmatprep.subr.bf16.mxu1 %v1900_v7 }
  0x17   :  { %v238_v55 = vmax.f32 %v166_v35, %v202_v47  ;;  %v240_v57 = vmax.f32 %v168_v38, %v204_v48  ;;  %v1683_v59 = vpack.c.bf16 %v2084_v11, %v2084_v11  ;;  %v242_v62 = vmax.f32 %v170_v39, %v206_v50  ;;  %v2153_v50 = vld [vmem:[%s2648_s1 + $0x50] sm:$0xff] }
  0x18   :  { %v244_v63 = vmax.f32 %v172_v40, %v208_v52  ;;  %v2135_v0 = vmax.f32 %v173_v41, %v209_v53  ;;  %v246_v1 = vmax.f32 %v174_v44, %v210_v54  ;;  %v389_v5 = vor.u32 %v388_v43, %v385_v42  ;;  %v1902_v52 = vld [vmem:[%s2646_s3 + $0x68] sm:$0xff]  }
  0x19   :  { %v1678_v3 = vpack.c.bf16 %v238_v55, %v238_v55  ;;  %v1680_v4 = vpack.c.bf16 %v240_v57, %v240_v57  ;;  %v397_v6 = vshrl.u32 %v1679_v31, 16  ;;  %v1682_v8 = vpack.c.bf16 %v242_v62, %v242_v62  ;;  %1868 = vmatpush3.bf16.msra.mxu1 %v1900_v7 }
  0x1a   :  { %2663 = vst [vmem:[#allocation5_spill] sm:$0xff] %v2135_v0  ;;  %v1684_v9 = vpack.c.bf16 %v244_v63, %v244_v63  ;;  %v1685_v12 = vpack.c.bf16 %v2135_v0, %v2135_v0  ;;  %v1686_v13 = vpack.c.bf16 %v246_v1, %v246_v1  ;;  %v390_v16 = vrot.slane %v389_v5, 4  ;;  %1869 = vmatprep.subr.bf16.mxu1 %v1902_v52 }
  0x1b   :  { %v392_v17 = vshll.u32 %v1678_v3, 16  ;;  %v399_v18 = vrot.slane %v397_v6, 4  ;;  %v400_v19 = vshll.u32 %v1679_v31, 16  ;;  %v406_v22 = vshll.u32 %v1680_v4, 16  ;;  %v2170_v4 = vld [vmem:[%s2648_s1 + $0x60] sm:$0xff] }
  0x1c   :  { %v411_v25 = vshrl.u32 %v1681_v58, 16  ;;  %v414_v26 = vshll.u32 %v1681_v58, 16  ;;  %v420_v27 = vshll.u32 %v1682_v8, 16  ;;  %v425_v38 = vshrl.u32 %v1683_v59, 16  ;;  %v2161_v58 = vld [vmem:[%s2649_s2 + $0x50] sm:$0xff] }
  0x1d   :  { %v394_v32 = vrot.slane %v392_v17, 5  ;;  %v402_v35 = vrot.slane %v400_v19, 5  ;;  %v428_v39 = vshll.u32 %v1683_v59, 16  ;;  %v408_v40 = vrot.slane %v406_v22, 5  ;;  %v33_v59 = vld [vmem:[%s2647_s0 + $0x30] ss:$8 sps:$4 sm:$0xff]   ;;  %1870 = vmatpush3.bf16.msra.mxu1 %v1902_v52 }
  0x1e   :  { %v413_v41 = vrot.slane %v411_v25, 4  ;;  %v416_v42 = vrot.slane %v414_v26, 5  ;;  %v422_v31 = vrot.slane %v420_v27, 5  ;;  %v427_v47 = vrot.slane %v425_v38, 4  ;;  %v34_v19 = vld [vmem:[%s2647_s0 + $0x34] sm:$0x1] }
  0x1f   :  { %v395_v43 = vsel %vm2144_vm3, %v390_v16, %v394_v32  ;;  %v403_v44 = vor.u32 %v402_v35, %v399_v18  ;;  %v430_v48 = vrot.slane %v428_v39, 5  ;;  %v434_v54 = vshll.u32 %v1684_v9, 16  ;;  %v2175_v9 = vld [vmem:[%s2648_s1 + $0x70] sm:$0xff]  ;;  %v2191_v18 = vld [vmem:[%s2649_s2 + $0x60] sm:$0xff]  ;;  %v36_v35 = vld [vmem:[%s2647_s0 + $0x3c] sm:$0x1] }
  0x20   :  { %v417_v53 = vor.u32 %v416_v42, %v413_v41  ;;  %v439_v55 = vshrl.u32 %v1685_v12, 16  ;;  %v442_v57 = vshll.u32 %v1685_v12, 16  ;;  %v448_v1 = vshll.u32 %v1686_v13, 16  ;;  %v32_v12 = vld [vmem:[%s2647_s0 + $0x2c] sm:$0x1]  ;;  %v2204_v32 = vld [vmem:[%s2649_s2 + $0x70] sm:$0xff] }
  0x21   :  { %v404_v62 = vrot.slane %v403_v44, 4  ;;  %v431_v63 = vor.u32 %v430_v48, %v427_v47  ;;  %v67_v3 = vunpack.c.h.bf16 %v2022_v36  ;;  %v436_v6 = vrot.slane %v434_v54, 5  ;;  %v2217_v42 = vld [vmem:[%s2648_s1 + $0x58] sm:$0x1]  ;;  %v2229_v52 = vld [vmem:[%s2648_s1 + $0x68] sm:$0x1] }
  0x22   :  { %v418_v5 = vrot.slane %v417_v53, 4  ;;  %v441_v7 = vrot.slane %v439_v55, 4  ;;  %v444_v8 = vrot.slane %v442_v57, 5  ;;  %v2181_v36 = vmul.f32 0.2, %v2125_v45  ;;  %v1904_v53 = vld [vmem:[%s2646_s3 + $0x60] sm:$0xff]  }
  0x23   :  { %v2185_v13 = vsel %vm2144_vm3, %v404_v62, %v408_v40  ;;  %v432_v16 = vrot.slane %v431_v63, 4  ;;  %v121_v17 = vmul.f32 %v2153_v50, %v67_v3  ;;  %v69_v27 = vunpack.c.l.bf16 %v33_v59  ;;  %v2238_v57 = vld [vmem:[%s2649_s2 + $0x58] sm:$0x1]  ;;  %1871 = vmatprep.subr.bf16.mxu1 %v1904_v53 }
  0x24   :  { %v2198_v22 = vsel %vm2144_vm3, %v418_v5, %v422_v31  ;;  %v445_v25 = vor.u32 %v444_v8, %v441_v7  ;;  %v1561_v26 = vcombine.low %v395_v43, %v2185_v13  ;;  %v450_v39 = vrot.slane %v448_v1, 5  ;;  %v1899_v31 = vld [vmem:[%s2646_s3 + $0x50] sm:$0xff]   ;;  %v2243_v63 = vld [vmem:[%s2648_s1 + $0x78] sm:$0x1]  ;;  %1872 = vmatpush3.bf16.msra.mxu1 %v1904_v53 }
  0x25   :  { %v2211_v38 = vsel %vm2144_vm3, %v432_v16, %v436_v6  ;;  %v175_v40 = vadd.f32 %v2161_v58, %v121_v17  ;;  %v71_v41 = vunpack.c.h.bf16 %v33_v59  ;;  %v123_v47 = vmul.f32 %v2170_v4, %v69_v27  ;;  %v2254_v6 = vld [vmem:[%s2649_s2 + $0x68] sm:$0x1] }
  0x26   :  { %2666 = vst [vmem:[#allocation6_spill] sm:$0xff] %v2211_v38  ;;  %v446_v43 = vrot.slane %v445_v25, 4  ;;  %v1562_v44 = vcombine.low %v2198_v22, %v2211_v38  ;;  %1801 = vmatprep.mubr.msk.bf16.mxu0 %vm663_vm0, %v1561_v26  ;;  %v68_v48 = vunpack.c.l.bf16 %v32_v12  ;;  %v70_v59 = vunpack.c.l.bf16 %v34_v19  ;;  %v2272_v19 = vld [vmem:[%s2649_s2 + $0x78] sm:$0x1]  ;;  %v1901_v26 = vld [vmem:[%s2646_s3 + $0x48] sm:$0xff]  }
  0x27   :  { %v211_v54 = vmul.f32 0.2, %v175_v40  ;;  %v125_v55 = vmul.f32 %v2175_v9, %v71_v41  ;;  %v72_v62 = vunpack.c.l.bf16 %v36_v35  ;;  %v2246_v1 = vmul.f32 0.2, %v2127_v46 }
  0x28   :  { %1802 = vmatmul.mubr.msk.bf16.vlgmr.msra.gmra.mxu0 %vm663_vm0, %v1562_v44  ;;  %v177_v3 = vadd.f32 %v2191_v18, %v123_v47  ;;  %v122_v5 = vmul.f32 %v2217_v42, %v68_v48  ;;  %v2258_v7 = vmax.f32 %v2009_v33, %v2041_v49  ;;  %v2262_v8 = vsel %vm2144_vm3, %v446_v43, %v450_v39 }
  0x29   :  { %1842 = vmatpush3.bf16.msra.mxu0 %v2102_v20  ;;  %v2265_v12 = vmax.f32 %v175_v40, %v211_v54  ;;  %v179_v16 = vadd.f32 %v2204_v32, %v125_v55  ;;  %v124_v17 = vmul.f32 %v2229_v52, %v70_v59  ;;  %v126_v49 = vmul.f32 %v2243_v63, %v72_v62 }
  0x2a   :  { %v213_v25 = vmul.f32 0.2, %v177_v3  ;;  %v176_v33 = vadd.f32 %v2238_v57, %v122_v5  ;;  %1843 = vmatprep.subr.bf16.mxu0 %v1899_v31  ;;  %v2278_v20 = vmax.f32 %v2024_v37, %v2116_v30  ;;  %v1693_v30 = vpack.c.bf16 %v2258_v7, %v2258_v7 }
  0x2b   :  { %2667 = vst [vmem:[#allocation7_spill] sm:$0xff] %v2265_v12  ;;  %v1687_v27 = vpack.c.bf16 %v2265_v12, %v2265_v12  ;;  %v1711_v35 = vpack.c.bf16 %v2265_v12, %v2135_v0  ;;  %v215_v39 = vmul.f32 0.2, %v179_v16  ;;  %v178_v40 = vadd.f32 %v2254_v6, %v124_v17 }
  0x2c   :  { %v2288_v41 = vmax.f32 %v177_v3, %v213_v25  ;;  %v212_v43 = vmul.f32 0.2, %v176_v33  ;;  %v180_v37 = vadd.f32 %v2272_v19, %v126_v49  ;;  %v2300_v62 = vpack.c.bf16 %v2278_v20, %v2278_v20  ;;  %v1903_v3 = vld [vmem:[%s2646_s3 + $0x40] sm:$0xff]  }
  0x2d   :  { %1829 = vmatprep.mubr.msk.bf16.mxu1 %vm663_vm0, %v1711_v35  ;;  %v2294_v44 = vmax.f32 %v179_v16, %v215_v39  ;;  %v453_v47 = vshrl.u32 %v1687_v27, 16  ;;  %v456_v48 = vshll.u32 %v1687_v27, 16  ;;  %v214_v54 = vmul.f32 0.2, %v178_v40  ;;  %1844 = vmatpush3.bf16.msra.mxu0 %v1899_v31 }
  0x2e   :  { %2668 = vst [vmem:[#allocation8_spill] sm:$0xff] %v2288_v41  ;;  %v1689_v55 = vpack.c.bf16 %v2288_v41, %v2288_v41  ;;  %v248_v53 = vmax.f32 %v176_v33, %v212_v43  ;;  %v216_v59 = vmul.f32 0.2, %v180_v37  ;;  %1845 = vmatprep.subr.bf16.mxu0 %v1901_v26 }
  0x2f   :  { %v1691_v5 = vpack.c.bf16 %v2294_v44, %v2294_v44  ;;  %v1712_v31 = vpack.c.bf16 %v2294_v44, %v2288_v41  ;;  %v455_v16 = vrot.slane %v453_v47, 4  ;;  %v458_v17 = vrot.slane %v456_v48, 5 }
  0x30   :  { %v1688_v25 = vpack.c.bf16 %v248_v53, %v248_v53  ;;  %v250_v33 = vmax.f32 %v178_v40, %v214_v54  ;;  %v252_v49 = vmax.f32 %v180_v37, %v216_v59  ;;  %v467_v27 = vshrl.u32 %v1689_v55, 16 }
  0x31   :  { %1830 = vmatmul.mubr.msk.bf16.gmra.mxu1 %vm663_vm0, %v1712_v31  ;;  %v459_v35 = vor.u32 %v458_v17, %v455_v16  ;;  %v470_v39 = vshll.u32 %v1689_v55, 16  ;;  %v481_v43 = vshrl.u32 %v1691_v5, 16  ;;  %v484_v12 = vshll.u32 %v1691_v5, 16  ;;  %1846 = vmatpush3.bf16.msra.mxu0 %v1901_v26  ;;  %v43_v26 = vld [vmem:[%s2647_s0 + $0x58] ss:$8 sps:$4 sm:$0xff]  }
  0x32   :  { %v462_v0 = vshll.u32 %v1688_v25, 16  ;;  %v1690_v11 = vpack.c.bf16 %v250_v33, %v250_v33  ;;  %v1692_v10 = vpack.c.bf16 %v252_v49, %v252_v49  ;;  %v469_v56 = vrot.slane %v467_v27, 4  ;;  %1847 = vmatprep.subr.bf16.mxu0 %v1903_v3 }
  0x33   :  { %v460_v38 = vrot.slane %v459_v35, 4  ;;  %v472_v41 = vrot.slane %v470_v39, 5  ;;  %v483_v47 = vrot.slane %v481_v43, 4  ;;  %v486_v48 = vrot.slane %v484_v12, 5  ;;  %v47_v39 = vld [vmem:[%s2647_s0 + $0x68] ss:$8 sps:$4 sm:$0xff]  }
  0x34   :  { %v464_v53 = vrot.slane %v462_v0, 5  ;;  %v476_v40 = vshll.u32 %v1690_v11, 16  ;;  %v490_v37 = vshll.u32 %v1692_v10, 16  ;;  %v495_v54 = vshrl.u32 %v1693_v30, 16 }
  0x35   :  { %v473_v59 = vor.u32 %v472_v41, %v469_v56  ;;  %v487_v31 = vor.u32 %v486_v48, %v483_v47  ;;  %v498_v16 = vshll.u32 %v1693_v30, 16  ;;  %v1713_v55 = vpack.c.bf16 %v2278_v20, %v2258_v7  ;;  %1848 = vmatpush3.bf16.msra.mxu0 %v1903_v3 }
  0x36   :  { %v2317_v5 = vsel %vm2144_vm3, %v460_v38, %v464_v53  ;;  %v478_v12 = vrot.slane %v476_v40, 5  ;;  %v492_v0 = vrot.slane %v490_v37, 5  ;;  %v497_v11 = vrot.slane %v495_v54, 4 }
  0x37   :  { %v1563_v56 = vcombine.low %v2262_v8, %v2317_v5  ;;  %v474_v10 = vrot.slane %v473_v59, 4  ;;  %v488_v41 = vrot.slane %v487_v31, 4  ;;  %v500_v30 = vrot.slane %v498_v16, 5  ;;  %1833 = vmatprep.mubr.msk.bf16.mxu1 %vm663_vm0, %v1713_v55 }
  0x38   :  { %v79_v7 = vunpack.c.l.bf16 %v43_v26  ;;  %v81_v17 = vunpack.c.h.bf16 %v43_v26  ;;  %v256_v3 = vmax.f32 %v2125_v45, %v2181_v36  ;;  %v258_v38 = vmax.f32 %v2127_v46, %v2246_v1  ;;  %v46_v45 = vld [vmem:[%s2647_s0 + $0x64] sm:$0x1] }
  0x39   :  { %1805 = vmatprep.mubr.msk.bf16.mxu0 %vm663_vm0, %v1563_v56  ;;  %v2329_v25 = vsel %vm2144_vm3, %v474_v10, %v478_v12  ;;  %v2333_v33 = vsel %vm2144_vm3, %v488_v41, %v492_v0  ;;  %v501_v49 = vor.u32 %v500_v30, %v497_v11  ;;  %v509_v27 = vshrl.u32 %v2300_v62, 16 }
  0x3a   :  { %v1564_v46 = vcombine.low %v2329_v25, %v2333_v33  ;;  %v133_v36 = vmul.f32 %v1988_v23, %v79_v7  ;;  %v135_v1 = vmul.f32 %v1993_v24, %v81_v17  ;;  %v1694_v35 = vpack.c.bf16 %v256_v3, %v256_v3 }
  0x3b   :  { %v1696_v43 = vpack.c.bf16 %v258_v38, %v258_v38  ;;  %v502_v47 = vrot.slane %v501_v49, 4  ;;  %v511_v48 = vrot.slane %v509_v27, 4  ;;  %v512_v53 = vshll.u32 %v2300_v62, 16 }
  0x3c   :  { %1806 = vmatmul.mubr.msk.bf16.gmra.mxu0 %vm663_vm0, %v1564_v46  ;;  %v187_v40 = vadd.f32 %v2001_v28, %v133_v36  ;;  %v189_v37 = vadd.f32 %v2014_v34, %v135_v1  ;;  %v504_v54 = vshll.u32 %v1694_v35, 16  ;;  %v82_v23 = vunpack.c.l.bf16 %v46_v45 }
  0x3d   :  { %v514_v59 = vrot.slane %v512_v53, 5  ;;  %v518_v24 = vshll.u32 %v1696_v43, 16  ;;  %v224_v31 = vmul.f32 0.2, %v2129_v51  ;;  %v83_v16 = vunpack.c.l.bf16 %v47_v39 }
  0x3e   :  { %v223_v55 = vmul.f32 0.2, %v187_v40  ;;  %v225_v26 = vmul.f32 0.2, %v189_v37  ;;  %v506_v12 = vrot.slane %v504_v54, 5  ;;  %v136_v0 = vmul.f32 %v2060_v60, %v82_v23 }
  0x3f   :  { %v515_v11 = vor.u32 %v514_v59, %v511_v48  ;;  %v520_v62 = vrot.slane %v518_v24, 5  ;;  %v260_v56 = vmax.f32 %v2129_v51, %v224_v31  ;;  %v85_v10 = vunpack.c.h.bf16 %v47_v39  ;;  %v51_v39 = vld [vmem:[%s2647_s0 + $0x78] ss:$8 sps:$4 sm:$0xff]   ;;  %v48_v54 = vld [vmem:[%s2647_s0 + $0x6c] sm:$0x1] }
  0x40   :  { %v2353_v28 = vmax.f32 %v187_v40, %v223_v55  ;;  %v2355_v34 = vmax.f32 %v189_v37, %v225_v26  ;;  %v507_v41 = vsel %vm2144_vm3, %v502_v47, %v506_v12  ;;  %v190_v30 = vadd.f32 %v2089_v14, %v136_v0  ;;  %v50_v0 = vld [vmem:[%s2647_s0 + $0x74] sm:$0x1] }
  0x41   :  { %v516_v7 = vrot.slane %v515_v11, 4  ;;  %v1698_v17 = vpack.c.bf16 %v260_v56, %v260_v56  ;;  %v137_v3 = vmul.f32 %v2065_v61, %v83_v16  ;;  %v139_v60 = vmul.f32 %v2153_v50, %v85_v10 }
  0x42   :  { %v1697_v38 = vpack.c.bf16 %v2353_v28, %v2353_v28  ;;  %v1699_v51 = vpack.c.bf16 %v2355_v34, %v2355_v34  ;;  %v1714_v49 = vpack.c.bf16 %v2355_v34, %v2353_v28  ;;  %v226_v27 = vmul.f32 0.2, %v190_v30 }
  0x43   :  { %v2370_v45 = vsel %vm2144_vm3, %v516_v7, %v520_v62  ;;  %v532_v14 = vshll.u32 %v1698_v17, 16  ;;  %v191_v46 = vadd.f32 %v2094_v15, %v137_v3  ;;  %v193_v61 = vadd.f32 %v2161_v58, %v139_v60 }
  0x44   :  { %1834 = vmatmul.mubr.msk.bf16.gmra.mxu1 %vm663_vm0, %v1714_v49  ;;  %v1565_v50 = vcombine.low %v507_v41, %v2370_v45  ;;  %v262_v36 = vmax.f32 %v190_v30, %v226_v27  ;;  %v523_v1 = vshrl.u32 %v1697_v38, 16  ;;  %v526_v35 = vshll.u32 %v1697_v38, 16 }
  0x45   :  { %v534_v43 = vrot.slane %v532_v14, 5  ;;  %v537_v47 = vshrl.u32 %v1699_v51, 16  ;;  %v540_v48 = vshll.u32 %v1699_v51, 16  ;;  %v227_v53 = vmul.f32 0.2, %v191_v46 }
  0x46   :  { %1809 = vmatprep.mubr.msk.bf16.mxu0 %vm663_vm0, %v1565_v50  ;;  %v1700_v15 = vpack.c.bf16 %v262_v36, %v262_v36  ;;  %v525_v40 = vrot.slane %v523_v1, 4  ;;  %v528_v58 = vrot.slane %v526_v35, 5  ;;  %v229_v37 = vmul.f32 0.2, %v193_v61  ;;  %v52_v50 = vld [vmem:[%s2647_s0 + $0x7c] sm:$0x1] }
  0x47   :  { %v539_v23 = vrot.slane %v537_v47, 4  ;;  %v542_v59 = vrot.slane %v540_v48, 5  ;;  %v2383_v24 = vmax.f32 %v191_v46, %v227_v53  ;;  %v87_v31 = vunpack.c.l.bf16 %v51_v39 }
  0x48   :  { %v529_v16 = vor.u32 %v528_v58, %v525_v40  ;;  %v546_v55 = vshll.u32 %v1700_v15, 16  ;;  %v2385_v26 = vmax.f32 %v193_v61, %v229_v37  ;;  %v89_v12 = vunpack.c.h.bf16 %v51_v39 }
  0x49   :  { %v543_v11 = vor.u32 %v542_v59, %v539_v23  ;;  %v1701_v62 = vpack.c.bf16 %v2383_v24, %v2383_v24  ;;  %v141_v56 = vmul.f32 %v2170_v4, %v87_v31  ;;  %v84_v10 = vunpack.c.l.bf16 %v48_v54 }
  0x4a   :  { %v530_v41 = vrot.slane %v529_v16, 4  ;;  %v548_v30 = vrot.slane %v546_v55, 5  ;;  %v1703_v7 = vpack.c.bf16 %v2385_v26, %v2385_v26  ;;  %v1715_v17 = vpack.c.bf16 %v2385_v26, %v2383_v24 }
  0x4b   :  { %v544_v3 = vrot.slane %v543_v11, 4  ;;  %v143_v60 = vmul.f32 %v2175_v9, %v89_v12  ;;  %v195_v38 = vadd.f32 %v2191_v18, %v141_v56  ;;  %v86_v51 = vunpack.c.l.bf16 %v50_v0 }
  0x4c   :  { %v2401_v49 = vsel %vm2144_vm3, %v530_v41, %v534_v43  ;;  %1837 = vmatprep.mubr.msk.bf16.mxu1 %vm663_vm0, %v1715_v17  ;;  %v138_v4 = vmul.f32 %v2070_v2, %v84_v10  ;;  %v551_v27 = vshrl.u32 %v1701_v62, 16  ;;  %v554_v14 = vshll.u32 %v1701_v62, 16 }
  0x4d   :  { %v2407_v46 = vsel %vm2144_vm3, %v544_v3, %v548_v30  ;;  %v197_v61 = vadd.f32 %v2204_v32, %v143_v60  ;;  %v231_v9 = vmul.f32 0.2, %v195_v38  ;;  %v140_v18 = vmul.f32 %v2217_v42, %v86_v51  ;;  %v54_v42 = vld [vmem:[%s2647_s0 + $0x84] sm:$0x1] }
  0x4e   :  { %v1566_v36 = vcombine.low %v2401_v49, %v2407_v46  ;;  %v192_v2 = vadd.f32 %v2113_v29, %v138_v4  ;;  %v553_v1 = vrot.slane %v551_v27, 4  ;;  %v556_v35 = vrot.slane %v554_v14, 5 }
  0x4f   :  { %v233_v39 = vmul.f32 0.2, %v197_v61  ;;  %v2417_v43 = vmax.f32 %v195_v38, %v231_v9  ;;  %v194_v47 = vadd.f32 %v2238_v57, %v140_v18  ;;  %v565_v32 = vshrl.u32 %v1703_v7, 16  ;;  %v2669_v9 = vld [vmem:[#allocation6_spill] sm:$0xff] }
  0x50   :  { %v1641_v48 = vcombine.low %v2185_v13, %v2198_v22  ;;  %1810 = vmatmul.mubr.msk.bf16.gmra.mxu0 %vm663_vm0, %v1566_v36  ;;  %v228_v53 = vmul.f32 0.2, %v192_v2  ;;  %v568_v15 = vshll.u32 %v1703_v7, 16  ;;  %v88_v29 = vunpack.c.l.bf16 %v52_v50 }
  0x51   :  { %v2426_v40 = vmax.f32 %v197_v61, %v233_v39  ;;  %v1705_v58 = vpack.c.bf16 %v2417_v43, %v2417_v43  ;;  %v230_v37 = vmul.f32 0.2, %v194_v47  ;;  %v567_v57 = vrot.slane %v565_v32, 4 }
  0x52   :  { %v264_v54 = vmax.f32 %v192_v2, %v228_v53  ;;  %v557_v23 = vor.u32 %v556_v35, %v553_v1  ;;  %v570_v59 = vrot.slane %v568_v15, 5  ;;  %v90_v31 = vunpack.c.l.bf16 %v54_v42  ;;  %v38_v2 = vld [vmem:[%s2647_s0 + $0x44] sm:$0x1]  ;;  %v110_v53 = vld [vmem:[%s2648_s1 + $0x88] sm:$0x1] }
  0x53   :  { %v1707_v16 = vpack.c.bf16 %v2426_v40, %v2426_v40  ;;  %v1716_v13 = vpack.c.bf16 %v2426_v40, %v2417_v43  ;;  %v266_v22 = vmax.f32 %v194_v47, %v230_v37  ;;  %v142_v55 = vmul.f32 %v2229_v52, %v88_v29  ;;  %v37_v52 = vld [vmem:[%s2647_s0 + $0x40] ss:$72 sps:$4 sm:$0xff]  }
  0x54   :  { %v1702_v12 = vpack.c.bf16 %v264_v54, %v264_v54  ;;  %v571_v0 = vor.u32 %v570_v59, %v567_v57  ;;  %v144_v11 = vmul.f32 %v2243_v63, %v90_v31  ;;  %v579_v62 = vshrl.u32 %v1705_v58, 16  ;;  %v56_v59 = vld [vmem:[%s2647_s0 + $0x8c] sm:$0x1] }
  0x55   :  { %1838 = vmatmul.mubr.msk.bf16.gmra.mxu1 %vm663_vm0, %v1716_v13  ;;  %v1704_v56 = vpack.c.bf16 %v266_v22, %v266_v22  ;;  %v196_v10 = vadd.f32 %v2254_v6, %v142_v55  ;;  %v582_v41 = vshll.u32 %v1705_v58, 16  ;;  %v593_v30 = vshrl.u32 %v1707_v16, 16 }
  0x56   :  { %v558_v7 = vrot.slane %v557_v23, 4  ;;  %v560_v17 = vshll.u32 %v1702_v12, 16  ;;  %v198_v3 = vadd.f32 %v2272_v19, %v144_v11  ;;  %v581_v60 = vrot.slane %v579_v62, 4  ;;  %1873 = vmatprep.mubr.msk.bf16.mxu1 %vm663_vm0, %v1641_v48  ;;  %v164_v23 = vld [vmem:[%s2649_s2 + $0x88] sm:$0x1] }
  0x57   :  { %v572_v63 = vrot.slane %v571_v0, 4  ;;  %v574_v38 = vshll.u32 %v1704_v56, 16  ;;  %v232_v51 = vmul.f32 0.2, %v196_v10  ;;  %v584_v4 = vrot.slane %v582_v41, 5 }
  0x58   :  { %v562_v27 = vrot.slane %v560_v17, 5  ;;  %v234_v14 = vmul.f32 0.2, %v198_v3  ;;  %v595_v6 = vrot.slane %v593_v30, 4  ;;  %v596_v61 = vshll.u32 %v1707_v16, 16  ;;  %v2670_v30 = vld [vmem:[#allocation2_spill] sm:$0xff] }
  0x59   :  { %v1642_v18 = vcombine.low %v2669_v9, %v2262_v8  ;;  %v576_v50 = vrot.slane %v574_v38, 5  ;;  %v268_v19 = vmax.f32 %v196_v10, %v232_v51  ;;  %v585_v36 = vor.u32 %v584_v4, %v581_v60  ;;  %v109_v8 = vld [vmem:[%s2648_s1 + $0x80] sm:$0xff] }
  0x5a   :  { %v2450_v1 = vsel %vm2144_vm3, %v558_v7, %v562_v27  ;;  %v270_v35 = vmax.f32 %v198_v3, %v234_v14  ;;  %v598_v39 = vrot.slane %v596_v61, 5  ;;  %v1643_v47 = vcombine.low %v2317_v5, %v2329_v25  ;;  %v163_v25 = vld [vmem:[%s2649_s2 + $0x80] sm:$0xff]  ;;  %v2671_v7 = vld [vmem:[#allocation3_spill] sm:$0xff] }
  0x5b   :  { %v2459_v32 = vsel %vm2144_vm3, %v572_v63, %v576_v50  ;;  %v1706_v42 = vpack.c.bf16 %v268_v19, %v268_v19  ;;  %v73_v48 = vunpack.c.l.bf16 %v37_v52  ;;  %v74_v5 = vunpack.c.l.bf16 %v38_v2 }
  0x5c   :  { %v1567_v15 = vcombine.low %v2450_v1, %v2459_v32  ;;  %v1708_v29 = vpack.c.bf16 %v270_v35, %v270_v35  ;;  %v599_v58 = vor.u32 %v598_v39, %v595_v6  ;;  %v586_v37 = vrot.slane %v585_v36, 4  ;;  %v2672_v35 = vld [vmem:[#allocation4_spill] sm:$0xff]  ;;  %v2673_v39 = vld [vmem:[#allocation5_spill] sm:$0xff] }
  0x5d   :  { %v588_v57 = vshll.u32 %v1706_v42, 16  ;;  %1874 = vmatmul.mubr.msk.bf16.vlgmr.msra.gmra.mxu1 %vm663_vm0, %v1642_v18  ;;  %v127_v54 = vmul.f32 %v109_v8, %v73_v48  ;;  %v128_v13 = vmul.f32 %v110_v53, %v74_v5  ;;  %v91_v11 = vunpack.c.h.bf16 %v37_v52 }
  0x5e   :  { %1813 = vmatprep.mubr.msk.bf16.mxu0 %vm663_vm0, %v1567_v15  ;;  %v600_v31 = vrot.slane %v599_v58, 4  ;;  %v602_v16 = vshll.u32 %v1708_v29, 16  ;;  %1877 = vmatprep.mubr.msk.bf16.mxu1 %vm663_vm0, %v1643_v47  ;;  %v92_v62 = vunpack.c.l.bf16 %v56_v59  ;;  %v1717_v17 = vpack.c.bf16 %v2671_v7, %v2670_v30  ;;  %v2675_v15 = vld [vmem:[#allocation8_spill] sm:$0xff] }
  0x5f   :  { %v590_v22 = vrot.slane %v588_v57, 5  ;;  %v181_v55 = vadd.f32 %v163_v25, %v127_v54  ;;  %v182_v0 = vadd.f32 %v164_v23, %v128_v13  ;;  %v145_v60 = vmul.f32 %v109_v8, %v91_v11 }
  0x60   :  { %v604_v12 = vrot.slane %v602_v16, 5  ;;  %v146_v51 = vmul.f32 %v110_v53, %v92_v62  ;;  %v1718_v47 = vpack.c.bf16 %v2673_v39, %v2672_v35  ;;  %v2674_v53 = vld [vmem:[#allocation7_spill] sm:$0xff] }
  0x61   :  { %v591_v56 = vsel %vm2144_vm3, %v586_v37, %v590_v22  ;;  %v217_v10 = vmul.f32 0.2, %v181_v55  ;;  %v218_v3 = vmul.f32 0.2, %v182_v0  ;;  %v199_v27 = vadd.f32 %v163_v25, %v145_v60 }
  0x62   :  { %v605_v41 = vsel %vm2144_vm3, %v600_v31, %v604_v12  ;;  %v200_v6 = vadd.f32 %v164_v23, %v146_v51  ;;  %v1719_v29 = vpack.c.bf16 %v2675_v15, %v2674_v53  ;;  %v1645_v22 = vcombine.low %v2370_v45, %v2401_v49 }
  0x63   :  { %v1568_v63 = vcombine.low %v591_v56, %v605_v41  ;;  %v253_v38 = vmax.f32 %v181_v55, %v217_v10  ;;  %v254_v4 = vmax.f32 %v182_v0, %v218_v3  ;;  %v235_v9 = vmul.f32 0.2, %v199_v27 }
  0x64   :  { %v236_v19 = vmul.f32 0.2, %v200_v6  ;;  %v1721_v0 = vpack.c.bf16 %v2353_v28, %v2278_v20  ;;  %v1646_v45 = vcombine.low %v2407_v46, %v2450_v1  ;;  %v1722_v49 = vpack.c.bf16 %v2383_v24, %v2355_v34 }
  0x65   :  { %1814 = vmatmul.mubr.msk.bf16.gmra.mxu0 %vm663_vm0, %v1568_v63  ;;  %v1725_v52 = vpack.c.bf16 %v253_v38, %v253_v38  ;;  %v1720_v14 = vpack.c.bf16 %v253_v38, %v2294_v44  ;;  %v1726_v61 = vpack.c.bf16 %v254_v4, %v254_v4  ;;  %v271_v2 = vmax.f32 %v199_v27, %v235_v9 }
  0x66   :  { %1849 = vmatprep.mubr.msk.bf16.mxu0 %vm663_vm0, %v1717_v17  ;;  %v272_v48 = vmax.f32 %v200_v6, %v236_v19  ;;  %v1723_v20 = vpack.c.bf16 %v2417_v43, %v2385_v26 }
  0x67   :  { %v1127_v18 = vshrl.u32 %v1725_v52, 16  ;;  %v1130_v50 = vshll.u32 %v1725_v52, 16  ;;  %v1136_v36 = vshll.u32 %v1726_v61, 16  ;;  %v1727_v44 = vpack.c.bf16 %v271_v2, %v271_v2 }
  0x68   :  { %v1724_v58 = vpack.c.bf16 %v271_v2, %v2426_v40  ;;  %v1728_v37 = vpack.c.bf16 %v272_v48, %v272_v48 }
  0x69   :  { %v1129_v8 = vrot.slane %v1127_v18, 4  ;;  %v1132_v42 = vrot.slane %v1130_v50, 5  ;;  %v1138_v25 = vrot.slane %v1136_v36, 5  ;;  %v1141_v57 = vshrl.u32 %v1727_v44, 16 }
  0x6a   :  { %v1144_v54 = vshll.u32 %v1727_v44, 16  ;;  %v1150_v59 = vshll.u32 %v1728_v37, 16 }
  0x6b   :  { %v1133_v5 = vor.u32 %v1132_v42, %v1129_v8  ;;  %v1143_v31 = vrot.slane %v1141_v57, 4 }
  0x6c   :  { %v1146_v16 = vrot.slane %v1144_v54, 5  ;;  %v1152_v12 = vrot.slane %v1150_v59, 5 }
  0x6d   :  { %1850 = vmatmul.mubr.msk.bf16.vlgmr.msra.gmra.mxu0 %vm663_vm0, %v1718_v47  ;;  %v1134_v23 = vrot.slane %v1133_v5, 4 }
  0x6e   :  { %1853 = vmatprep.mubr.msk.bf16.mxu0 %vm663_vm0, %v1719_v29  ;;  %v1147_v55 = vor.u32 %v1146_v16, %v1143_v31 }
  0x6f   :  { %v1139_v13 = vsel %vm2144_vm3, %v1134_v23, %v1138_v25 }
  0x70   :  { %v1644_v40 = vcombine.low %v2333_v33, %v1139_v13  ;;  %v1148_v11 = vrot.slane %v1147_v55, 4  ;;  %v1647_v33 = vcombine.low %v2459_v32, %v591_v56 }
  0x72   :  { %1878 = vmatmul.mubr.msk.bf16.gmra.mxu1 %vm663_vm0, %v1644_v40  ;;  %v1153_v62 = vsel %vm2144_vm3, %v1148_v11, %v1152_v12 }
  0x73   :  { %1881 = vmatprep.mubr.msk.bf16.mxu1 %vm663_vm0, %v1645_v22  ;;  %v1648_v10 = vcombine.low %v605_v41, %v1153_v62 }
  0x75   :  { %1854 = vmatmul.mubr.msk.bf16.gmra.mxu0 %vm663_vm0, %v1720_v14 }
  0x76   :  { %1857 = vmatprep.mubr.msk.bf16.mxu0 %vm663_vm0, %v1721_v0 }
  0x7a   :  { %1882 = vmatmul.mubr.msk.bf16.gmra.mxu1 %vm663_vm0, %v1646_v45 }
  0x7b   :  { %1885 = vmatprep.mubr.msk.bf16.mxu1 %vm663_vm0, %v1647_v33 }
  0x7d   :  { %1858 = vmatmul.mubr.msk.bf16.gmra.mxu0 %vm663_vm0, %v1722_v49 }
  0x7e   :  { %1861 = vmatprep.mubr.msk.bf16.mxu0 %vm663_vm0, %v1723_v20 }
  0x82   :  { %1886 = vmatmul.mubr.msk.bf16.gmra.mxu1 %vm663_vm0, %v1648_v10 }
  0x85   :  { %1862 = vmatmul.mubr.msk.bf16.gmra.mxu0 %vm663_vm0, %v1724_v58 }
  0xd4   :  { %v1827_v21 = vpop.f32.mrf.mxu1 }
  0xd6   :  { %v875_v28 = vpop.f32.mrf.mxu1 }
  0xd8   :  { %v1828_v46 = vpop.f32.mrf.mxu1 }
  0xda   :  { %v878_v1 = vpop.f32.mrf.mxu1 }
  0xe8   :  { %v1803_v34 = vpop.f32.mrf.mxu0 }
  0xe9   :  { %v884_v42 = vadd.f32 %v1827_v21, %v1803_v34 }
  0xea   :  { %v722_v32 = vpop.f32.mrf.mxu0 }
  0xeb   :  { %v876_v53 = vadd.f32 %v875_v28, %v722_v32 }
  0xec   :  { %v1804_v41 = vpop.f32.mrf.mxu0 }
  0xed   :  { %v887_v25 = vadd.f32 %v1828_v46, %v1804_v41 }
  0xee   :  { %v725_v43 = vpop.f32.mrf.mxu0 }
  0xef   :  { %v879_v59 = vadd.f32 %v878_v1, %v725_v43 }
  0xf1   :  { %v1831_v24 = vpop.f32.mrf.mxu1 }
  0xf3   :  { %v891_v56 = vpop.f32.mrf.mxu1 }
  0xf5   :  { %v1832_v26 = vpop.f32.mrf.mxu1 }
  0xf7   :  { %v894_v30 = vpop.f32.mrf.mxu1 }
  0xfc   :  { %v1807_v7 = vpop.f32.mrf.mxu0 }
  0xfd   :  { %v900_v31 = vadd.f32 %v1831_v24, %v1807_v7 }
  0xfe   :  { %v738_v3 = vpop.f32.mrf.mxu0 }
  0xff   :  { %v892_v16 = vadd.f32 %v891_v56, %v738_v3 }
 0x100   :  { %v1808_v63 = vpop.f32.mrf.mxu0 }
 0x101   :  { %v903_v40 = vadd.f32 %v1832_v26, %v1808_v63 }
 0x102   :  { %v741_v51 = vpop.f32.mrf.mxu0 }
 0x103   :  { %v895_v55 = vadd.f32 %v894_v30, %v741_v51 }
 0x104   :  { %v1835_v17 = vpop.f32.mrf.mxu1 }
 0x106   :  { %v907_v60 = vpop.f32.mrf.mxu1 }
 0x108   :  { %v1836_v38 = vpop.f32.mrf.mxu1 }
 0x10a   :  { %v910_v4 = vpop.f32.mrf.mxu1 }
 0x110   :  { %v1811_v27 = vpop.f32.mrf.mxu0 }
 0x111   :  { %v916_v12 = vadd.f32 %v1835_v17, %v1811_v27 }
 0x112   :  { %v754_v6 = vpop.f32.mrf.mxu0 }
 0x113   :  { %v2528_v62 = vadd.f32 %v907_v60, %v754_v6 }
 0x114   :  { %v1812_v9 = vpop.f32.mrf.mxu0 }
 0x115   :  { %v1839_v52 = vpop.f32.mrf.mxu1  ;;  %v2530_v10 = vadd.f32 %v1836_v38, %v1812_v9 }
 0x116   :  { %v757_v50 = vpop.f32.mrf.mxu0 }
 0x117   :  { %v923_v14 = vpop.f32.mrf.mxu1  ;;  %v2532_v20 = vadd.f32 %v910_v4, %v757_v50 }
 0x119   :  { %v1840_v61 = vpop.f32.mrf.mxu1 }
 0x11b   :  { %v2520_v18 = vpop.f32.mrf.mxu1 }
 0x11d   :  { %v1875_v19 = vpop.f32.mrf.mxu1 }
 0x11f   :  { %v1255_v2 = vpop.f32.mrf.mxu1 }
 0x121   :  { %v1876_v47 = vpop.f32.mrf.mxu1 }
 0x123   :  { %v1258_v29 = vpop.f32.mrf.mxu1 }
 0x125   :  { %v1815_v36 = vpop.f32.mrf.mxu0 }
 0x126   :  { %v2534_v21 = vadd.f32 %v1839_v52, %v1815_v36 }
 0x127   :  { %v770_v35 = vpop.f32.mrf.mxu0 }
 0x128   :  { %v2540_v34 = vadd.f32 %v923_v14, %v770_v35 }
 0x129   :  { %v1816_v39 = vpop.f32.mrf.mxu0 }
 0x12a   :  { %v2542_v26 = vadd.f32 %v1840_v61, %v1816_v39 }
 0x12b   :  { %v2522_v8 = vpop.f32.mrf.mxu0 }
 0x12d   :  { %v1851_v48 = vpop.f32.mrf.mxu0 }
 0x12e   :  { %v1106_v15 = vadd.f32 %v1851_v48, %v884_v42 }
 0x12f   :  { %v1041_v44 = vpop.f32.mrf.mxu0 }
 0x130   :  { %v1320_v58 = vadd.f32 %v1875_v19, %v1106_v15  ;;  %v1104_v5 = vadd.f32 %v1041_v44, %v876_v53 }
 0x131   :  { %v1852_v37 = vpop.f32.mrf.mxu0 }
 0x132   :  { %v1731_v57 = vpack.c.bf16 %v1320_v58, %v1320_v58  ;;  %v1318_v54 = vadd.f32 %v1255_v2, %v1104_v5  ;;  %v1879_v23 = vpop.f32.mrf.mxu1  ;;  %v1107_v13 = vadd.f32 %v1852_v37, %v887_v25  ;;  %v1376_v28 = vmul.f32 %v1320_v58, %v1320_v58 }
 0x133   :  { %v1044_v22 = vpop.f32.mrf.mxu0  ;;  %v1338_v4 = vsel %vm1334_vm5, %v1320_v58, 0.0 }
 0x134   :  { %1495 = vst.msk [vmem:[%s2650_s4 + $0x8] sm:$0xf] %vm1492_vm4, %v1731_v57  ;;  %v1729_v0 = vpack.c.bf16 %v1318_v54, %v1318_v54  ;;  %v1271_v11 = vpop.f32.mrf.mxu1  ;;  %v1321_v45 = vadd.f32 %v1876_v47, %v1107_v13  ;;  %v1105_v33 = vadd.f32 %v1044_v22, %v879_v59  ;;  %v1374_v24 = vmul.f32 %v1318_v54, %v1318_v54 }
 0x135   :  { %v1855_v49 = vpop.f32.mrf.mxu0  ;;  %v1335_v43 = vsel %vm1334_vm5, %v1318_v54, 0.0  ;;  %v1393_v27 = vsel %vm1334_vm5, %v1376_v28, 0.0 }
 0x136   :  { %1493 = vst.msk [vmem:[%s2650_s4] sm:$0xf] %vm1492_vm4, %v1729_v0  ;;  %v1110_v46 = vadd.f32 %v1855_v49, %v900_v31  ;;  %v1880_v1 = vpop.f32.mrf.mxu1  ;;  %v1732_v32 = vpack.c.bf16 %v1321_v45, %v1321_v45  ;;  %v1319_v56 = vadd.f32 %v1258_v29, %v1105_v33  ;;  %v1377_v3 = vmul.f32 %v1321_v45, %v1321_v45 }
 0x137   :  { %v1057_v41 = vpop.f32.mrf.mxu0  ;;  %v1390_v61 = vsel %vm1334_vm5, %v1374_v24, 0.0  ;;  %v1340_v2 = vsel %vm1334_vm5, %v1321_v45, 0.0 }
 0x138   :  { %v1324_v30 = vadd.f32 %v1879_v23, %v1110_v46  ;;  %v1108_v7 = vadd.f32 %v1057_v41, %v892_v16  ;;  %v1274_v17 = vpop.f32.mrf.mxu1  ;;  %1496 = vst.msk [vmem:[%s2650_s4 + $0xc] sm:$0xf] %vm1492_vm4, %v1732_v32  ;;  %v1336_v60 = vsel %vm1334_vm5, %v1319_v56, 0.0  ;;  %v1375_v63 = vmul.f32 %v1319_v56, %v1319_v56 }
 0x139   :  { %v1730_v38 = vpack.c.bf16 %v1319_v56, %v1319_v56  ;;  %v1856_v51 = vpop.f32.mrf.mxu0  ;;  %v1337_v52 = vadd.f32 %v1336_v60, %v1335_v43  ;;  %v1395_v48 = vsel %vm1334_vm5, %v1377_v3, 0.0  ;;  %v927_v56 = vadd.f32 %v2520_v18, %v2522_v8 }
 0x13a   :  { %v1735_v14 = vpack.c.bf16 %v1324_v30, %v1324_v30  ;;  %v1883_v6 = vpop.f32.mrf.mxu1  ;;  %v1391_v9 = vsel %vm1334_vm5, %v1375_v63, 0.0  ;;  %v1322_v50 = vadd.f32 %v1271_v11, %v1108_v7  ;;  %v1111_v19 = vadd.f32 %v1856_v51, %v903_v40 }
 0x13b   :  { %1494 = vst.msk [vmem:[%s2650_s4 + $0x4] sm:$0xf] %vm1492_vm4, %v1730_v38  ;;  %v1060_v36 = vpop.f32.mrf.mxu0  ;;  %v1339_v35 = vadd.f32 %v1338_v4, %v1337_v52  ;;  %v1392_v39 = vadd.f32 %v1391_v9, %v1390_v61  ;;  %v1380_v54 = vmul.f32 %v1324_v30, %v1324_v30  ;;  %v1346_v41 = vsel %vm1334_vm5, %v1324_v30, 0.0 }
 0x13c   :  { %1499 = vst.msk [vmem:[%s2650_s4 + $0x18] sm:$0xf] %vm1492_vm4, %v1735_v14  ;;  %v1109_v47 = vadd.f32 %v1060_v36, %v895_v55  ;;  %v1287_v42 = vpop.f32.mrf.mxu1  ;;  %v1378_v53 = vmul.f32 %v1322_v50, %v1322_v50  ;;  %v1733_v15 = vpack.c.bf16 %v1322_v50, %v1322_v50  ;;  %v1325_v29 = vadd.f32 %v1880_v1, %v1111_v19 }
 0x13d   :  { %v1859_v44 = vpop.f32.mrf.mxu0  ;;  %v1394_v58 = vadd.f32 %v1393_v27, %v1392_v39  ;;  %v1341_v5 = vadd.f32 %v1340_v2, %v1339_v35  ;;  %v1342_v23 = vsel %vm1334_vm5, %v1322_v50, 0.0 }
 0x13e   :  { %v1323_v25 = vadd.f32 %v1274_v17, %v1109_v47  ;;  %v1114_v37 = vadd.f32 %v1859_v44, %v916_v12  ;;  %v1884_v57 = vpop.f32.mrf.mxu1  ;;  %v1397_v59 = vsel %vm1334_vm5, %v1378_v53, 0.0  ;;  %1497 = vst.msk [vmem:[%s2650_s4 + $0x10] sm:$0xf] %vm1492_vm4, %v1733_v15  ;;  %v1736_v31 = vpack.c.bf16 %v1325_v29, %v1325_v29 }
 0x13f   :  { %v1073_v16 = vpop.f32.mrf.mxu0  ;;  %v1343_v13 = vadd.f32 %v1342_v23, %v1341_v5  ;;  %v1396_v22 = vadd.f32 %v1395_v48, %v1394_v58  ;;  %v1381_v12 = vmul.f32 %v1325_v29, %v1325_v29  ;;  %v1348_v38 = vsel %vm1334_vm5, %v1325_v29, 0.0 }
 0x140   :  { %v1344_v40 = vsel %vm1334_vm5, %v1323_v25, 0.0  ;;  %v1379_v55 = vmul.f32 %v1323_v25, %v1323_v25  ;;  %v1290_v0 = vpop.f32.mrf.mxu1  ;;  %1500 = vst.msk [vmem:[%s2650_s4 + $0x1c] sm:$0xf] %vm1492_vm4, %v1736_v31  ;;  %v1734_v11 = vpack.c.bf16 %v1323_v25, %v1323_v25  ;;  %v1328_v45 = vadd.f32 %v1883_v6, %v1114_v37 }
 0x141   :  { %v1112_v33 = vadd.f32 %v1073_v16, %v2528_v62  ;;  %v1860_v49 = vpop.f32.mrf.mxu0  ;;  %v1398_v28 = vadd.f32 %v1397_v59, %v1396_v22  ;;  %v1345_v46 = vadd.f32 %v1344_v40, %v1343_v13  ;;  %v1403_v51 = vsel %vm1334_vm5, %v1381_v12, 0.0 }
 0x142   :  { %v1399_v1 = vsel %vm1334_vm5, %v1379_v55, 0.0  ;;  %v1115_v24 = vadd.f32 %v1860_v49, %v2530_v10  ;;  %v1887_v32 = vpop.f32.mrf.mxu1  ;;  %1498 = vst.msk [vmem:[%s2650_s4 + $0x14] sm:$0xf] %vm1492_vm4, %v1734_v11  ;;  %v1739_v43 = vpack.c.bf16 %v1328_v45, %v1328_v45  ;;  %v1401_v10 = vsel %vm1334_vm5, %v1380_v54, 0.0 }
 0x143   :  { %v1326_v62 = vadd.f32 %v1287_v42, %v1112_v33  ;;  %v1076_v7 = vpop.f32.mrf.mxu0  ;;  %v1347_v17 = vadd.f32 %v1346_v41, %v1345_v46  ;;  %v1400_v3 = vadd.f32 %v1399_v1, %v1398_v28  ;;  %v1384_v27 = vmul.f32 %v1328_v45, %v1328_v45 }
 0x144   :  { %v1329_v60 = vadd.f32 %v1884_v57, %v1115_v24  ;;  %v1113_v63 = vadd.f32 %v1076_v7, %v2532_v20  ;;  %1503 = vst.msk [vmem:[%s2650_s4 + $0x28] sm:$0xf] %vm1492_vm4, %v1739_v43  ;;  %v1303_v14 = vpop.f32.mrf.mxu1  ;;  %v1354_v5 = vsel %vm1334_vm5, %v1328_v45, 0.0 }
 0x145   :  { %v1382_v18 = vmul.f32 %v1326_v62, %v1326_v62  ;;  %v1737_v8 = vpack.c.bf16 %v1326_v62, %v1326_v62  ;;  %v1863_v30 = vpop.f32.mrf.mxu0  ;;  %v1402_v4 = vadd.f32 %v1401_v10, %v1400_v3  ;;  %v1349_v52 = vadd.f32 %v1348_v38, %v1347_v17 }
 0x146   :  { %v1350_v20 = vsel %vm1334_vm5, %v1326_v62, 0.0  ;;  %v1740_v6 = vpack.c.bf16 %v1329_v60, %v1329_v60  ;;  %v1327_v61 = vadd.f32 %v1290_v0, %v1113_v63  ;;  %v1118_v9 = vadd.f32 %v1863_v30, %v2534_v21  ;;  %v1888_v29 = vpop.f32.mrf.mxu1 }
 0x147   :  { %1501 = vst.msk [vmem:[%s2650_s4 + $0x20] sm:$0xf] %vm1492_vm4, %v1737_v8  ;;  %v1089_v50 = vpop.f32.mrf.mxu0  ;;  %v1351_v19 = vadd.f32 %v1350_v20, %v1349_v52  ;;  %v1404_v36 = vadd.f32 %v1403_v51, %v1402_v4  ;;  %v1405_v2 = vsel %vm1334_vm5, %v1382_v18, 0.0  ;;  %v1409_v54 = vsel %vm1334_vm5, %v1384_v27, 0.0 }
 0x148   :  { %v1116_v35 = vadd.f32 %v1089_v50, %v2540_v34  ;;  %1504 = vst.msk [vmem:[%s2650_s4 + $0x2c] sm:$0xf] %vm1492_vm4, %v1740_v6  ;;  %v1352_v39 = vsel %vm1334_vm5, %v1327_v61, 0.0  ;;  %v1383_v47 = vmul.f32 %v1327_v61, %v1327_v61  ;;  %v1738_v42 = vpack.c.bf16 %v1327_v61, %v1327_v61  ;;  %v1306_v0 = vpop.f32.mrf.mxu1 }
 0x149   :  { %v1332_v48 = vadd.f32 %v1887_v32, %v1118_v9  ;;  %v1864_v53 = vpop.f32.mrf.mxu0  ;;  %v1406_v15 = vadd.f32 %v1405_v2, %v1404_v36  ;;  %v1353_v21 = vadd.f32 %v1352_v39, %v1351_v19  ;;  %v1385_v34 = vmul.f32 %v1329_v60, %v1329_v60 }
 0x14a   :  { %v1330_v44 = vadd.f32 %v1303_v14, %v1116_v35  ;;  %v1119_v58 = vadd.f32 %v1864_v53, %v2542_v26  ;;  %v1407_v25 = vsel %vm1334_vm5, %v1383_v47, 0.0  ;;  %1502 = vst.msk [vmem:[%s2650_s4 + $0x24] sm:$0xf] %vm1492_vm4, %v1738_v42  ;;  %v1356_v23 = vsel %vm1334_vm5, %v1329_v60, 0.0 }
 0x14b   :  { %v1743_v37 = vpack.c.bf16 %v1332_v48, %v1332_v48  ;;  %v1092_v57 = vpop.f32.mrf.mxu0  ;;  %v1355_v59 = vadd.f32 %v1354_v5, %v1353_v21  ;;  %v1408_v31 = vadd.f32 %v1407_v25, %v1406_v15  ;;  %v1411_v12 = vsel %vm1334_vm5, %v1385_v34, 0.0 }
 0x14c   :  { %v1386_v26 = vmul.f32 %v1330_v44, %v1330_v44  ;;  %v1741_v16 = vpack.c.bf16 %v1330_v44, %v1330_v44  ;;  %v1333_v13 = vadd.f32 %v1888_v29, %v1119_v58  ;;  %v1117_v22 = vadd.f32 %v1092_v57, %v927_v56 }
 0x14d   :  { %1507 = vst.msk [vmem:[%s2650_s4 + $0x38] sm:$0xf] %vm1492_vm4, %v1743_v37  ;;  %v1410_v40 = vadd.f32 %v1409_v54, %v1408_v31  ;;  %v1357_v55 = vadd.f32 %v1356_v23, %v1355_v59  ;;  %v1358_v11 = vsel %vm1334_vm5, %v1330_v44, 0.0  ;;  %v1388_v49 = vmul.f32 %v1332_v48, %v1332_v48 }
 0x14e   :  { %1505 = vst.msk [vmem:[%s2650_s4 + $0x30] sm:$0xf] %vm1492_vm4, %v1741_v16  ;;  %v1744_v45 = vpack.c.bf16 %v1333_v13, %v1333_v13  ;;  %v1331_v33 = vadd.f32 %v1306_v0, %v1117_v22  ;;  %v1413_v1 = vsel %vm1334_vm5, %v1386_v26, 0.0  ;;  %v1362_v62 = vsel %vm1334_vm5, %v1332_v48, 0.0 }
 0x14f   :  { %v1359_v28 = vadd.f32 %v1358_v11, %v1357_v55  ;;  %v1412_v46 = vadd.f32 %v1411_v12, %v1410_v40  ;;  %v1389_v7 = vmul.f32 %v1333_v13, %v1333_v13  ;;  %v1417_v63 = vsel %vm1334_vm5, %v1388_v49, 0.0 }
 0x150   :  { %1508 = vst.msk [vmem:[%s2650_s4 + $0x3c] sm:$0xf] %vm1492_vm4, %v1744_v45  ;;  %v1360_v24 = vsel %vm1334_vm5, %v1331_v33, 0.0  ;;  %v1387_v32 = vmul.f32 %v1331_v33, %v1331_v33  ;;  %v1742_v56 = vpack.c.bf16 %v1331_v33, %v1331_v33  ;;  %v1364_v10 = vsel %vm1334_vm5, %v1333_v13, 0.0 }
 0x151   :  { %v1414_v41 = vadd.f32 %v1413_v1, %v1412_v46  ;;  %v1361_v43 = vadd.f32 %v1360_v24, %v1359_v28  ;;  %v1419_v8 = vsel %vm1334_vm5, %v1389_v7, 0.0 }
 0x152   :  { %v1415_v17 = vsel %vm1334_vm5, %v1387_v32, 0.0  ;;  %1506 = vst.msk [vmem:[%s2650_s4 + $0x34] sm:$0xf] %vm1492_vm4, %v1742_v56 }
 0x153   :  { %v1363_v3 = vadd.f32 %v1362_v62, %v1361_v43  ;;  %v1416_v60 = vadd.f32 %v1415_v17, %v1414_v41 }
 0x155   :  { %v1365_v38 = vadd.f32 %v1364_v10, %v1363_v3  ;;  %v1418_v18 = vadd.f32 %v1417_v63, %v1416_v60 }
 0x157   :  { %v1366_v30 = vrot.slane %v1365_v38, 4  ;;  %v1420_v51 = vadd.f32 %v1419_v8, %v1418_v18 }
 0x159   :  { %v1367_v4 = vadd.f32 %v1366_v30, %v1365_v38  ;;  %v1421_v27 = vrot.slane %v1420_v51, 4 }
 0x15b   :  { %v1368_v52 = vrot.slane %v1367_v4, 2  ;;  %v1422_v14 = vadd.f32 %v1421_v27, %v1420_v51 }
 0x15d   :  { %v1369_v20 = vadd.f32 %v1368_v52, %v1367_v4  ;;  %v1423_v6 = vrot.slane %v1422_v14, 2 }
 0x15f   :  { %v1370_v61 = vrot.slane %v1369_v20, 1  ;;  %v1424_v9 = vadd.f32 %v1423_v6, %v1422_v14 }
 0x161   :  { %v1371_v50 = vadd.f32 %v1370_v61, %v1369_v20  ;;  %v1425_v19 = vrot.slane %v1424_v9, 1 }
 0x163   :  { %1373 = vst.msk [vmem:[%s2651_s5] sm:$0x1] %vm1372_vm6, %v1371_v50  ;;  %v1426_v36 = vadd.f32 %v1425_v19, %v1424_v9 }
 0x165   :  { %1427 = vst.msk [vmem:[%s2652_s6] sm:$0x1] %vm1372_vm6, %v1426_v36 }

// kernel: tile.13
= control target key start
LH: loop header
LB: loop body
LE: loop exit
PB: predicated region body
PF: predicated region fallthrough
CT: control target
= control target key end

     0   :  { %s28_s0 = inlined_call_operand.vmem [shape: f32[64], index: 0, kind: input, shape index: {}]   ;;  %s29_s1 = inlined_call_operand.vmem [shape: f32[16,64], index: 1, kind: output, shape index: {}]  }
   0x1   :  { %v4_v0 = vld [vmem:[%s28_s0] ss:$0 sm:$0xff] }
   0x2   :  { %5 = vst [vmem:[%s29_s1] sm:$0xff] %v4_v0  ;;  %8 = vst [vmem:[%s29_s1 + $0x8] sm:$0xff] %v4_v0 }

// kernel: tile.14
= control target key start
LH: loop header
LB: loop body
LE: loop exit
PB: predicated region body
PF: predicated region fallthrough
CT: control target
= control target key end

     0   :  { %vm3_vm0 = vcmask 523264   ;;  %vm10_vm1 = vcmask 1048064   ;;  %s125_s0 = inlined_call_operand.vmem [shape: f32[16,64], index: 0, kind: input, shape index: {}]   ;;  %s126_s1 = inlined_call_operand.vmem [shape: f32[1,1024], index: 1, kind: output, shape index: {}]  }
   0x1   :  { %v75_v0 = vld [vmem:[%s125_s0 + $0x1] ss:$2 sm:$0xff]   ;;  %v2_v1 = vld [vmem:[%s125_s0] ss:$2 sm:$0xff]   ;;  %s84_s0 = smov 64  }
   0x2   :  { %8 = vrot.lane.b32.xlu0 %v75_v0, %s84_s0  ;;  %4 = vst.msk [vmem:[#allocation0] ss:$8 sm:$0xf] %vm3_vm0, %v2_v1   ;;  %5 = vst.msk [vmem:[#allocation0] ss:$8 sm:$0xf0] %vm3_vm0, %v2_v1  }
  0x74   :  { %v9_v2 = vpop.permute.xlu0 %8  }
  0x75   :  { %11 = vst.msk [vmem:[#allocation0] ss:$8 sm:$0xf] %vm10_vm1, %v9_v2   ;;  %12 = vst.msk [vmem:[#allocation0] ss:$8 sm:$0xf0] %vm10_vm1, %v9_v2  }
  0x7c   :  { %v17_v3 = vld [vmem:[#allocation0] sm:$0x1]  ;;  %v22_v4 = vld [vmem:[#allocation0 + $0x8] sm:$0x1]  ;;  %v28_v5 = vld [vmem:[#allocation0 + $0x10] sm:$0x1] }
  0x7d   :  { %20 = vst [vmem:[%s126_s1] sm:$0x1] %v17_v3  ;;  %76 = vst [vmem:[%s126_s1 + $0x1] sm:$0x1] %v22_v4  ;;  %v35_v6 = vld [vmem:[#allocation0 + $0x18] sm:$0x1] }
  0x7e   :  { %77 = vst [vmem:[%s126_s1 + $0x2] sm:$0x1] %v28_v5  ;;  %v42_v7 = vld [vmem:[#allocation0 + $0x20] sm:$0x1]  ;;  %v49_v8 = vld [vmem:[#allocation0 + $0x28] sm:$0x1] }
  0x7f   :  { %78 = vst [vmem:[%s126_s1 + $0x3] sm:$0x1] %v35_v6  ;;  %79 = vst [vmem:[%s126_s1 + $0x4] sm:$0x1] %v42_v7  ;;  %v56_v9 = vld [vmem:[#allocation0 + $0x30] sm:$0x1] }
  0x80   :  { %80 = vst [vmem:[%s126_s1 + $0x5] sm:$0x1] %v49_v8  ;;  %v63_v10 = vld [vmem:[#allocation0 + $0x38] sm:$0x1]  ;;  %81 = vst [vmem:[%s126_s1 + $0x6] sm:$0x1] %v56_v9 }
  0x81   :  { %82 = vst [vmem:[%s126_s1 + $0x7] sm:$0x1] %v63_v10 }

// kernel: discriminator_forward.8
= control target key start
LH: loop header
LB: loop body
LE: loop exit
PB: predicated region body
PF: predicated region fallthrough
CT: control target
= control target key end

     0   :  { %v128_v8 = vlaneseq  ;;  %v1261_v12 = vmov 1983009808   ;;  %vm189_vm0 = vsmask.f32 1280  ;;  %vm190_vm1 = vsmask.f32 3336  ;;  %s1671_s3 = inlined_call_operand.vmem [shape: bf16[4,128,64], index: 3, kind: input, shape index: {}]   ;;  %s1672_s0 = inlined_call_operand.vmem [shape: bf16[2,5,5,128], index: 0, kind: input, shape index: {}]   ;;  %s1673_s1 = inlined_call_operand.vmem [shape: f32[1,5,5,128], index: 1, kind: input, shape index: {}]   ;;  %s1674_s2 = inlined_call_operand.vmem [shape: f32[1,5,5,128], index: 2, kind: input, shape index: {}]   ;;  %s1675_s4 = inlined_call_operand.vmem [shape: bf16[32,64], index: 4, kind: output, shape index: {0}]   ;;  %s1676_s5 = inlined_call_operand.vmem [shape: f32[1,1,64], index: 5, kind: output, shape index: {1}]   ;;  %s1677_s6 = inlined_call_operand.vmem [shape: f32[1,1,64], index: 6, kind: output, shape index: {2}]  }
   0x1   :  { %v1229_v0 = vld [vmem:[%s1671_s3 + $0x78] sm:$0xff]   ;;  %v1231_v2 = vld [vmem:[%s1671_s3 + $0x70] sm:$0xff]   ;;  %v1233_v4 = vld [vmem:[%s1671_s3 + $0x68] sm:$0xff]   ;;  %v126_v13 = vunpack.c.l.s4 %v1261_v12  ;;  %vm192_vm2 = vsmask.f32 5392  ;;  %vm995_vm7 = vcmask 519168  }
   0x2   :  { %v1230_v1 = vld [vmem:[%s1671_s3 + $0x38] sm:$0xff]   ;;  %1148 = vmatprep.subr.bf16.mxu0 %v1229_v0  ;;  %v1232_v3 = vld [vmem:[%s1671_s3 + $0x30] sm:$0xff]   ;;  %v1234_v5 = vld [vmem:[%s1671_s3 + $0x28] sm:$0xff]   ;;  %v129_v15 = vshrl.u32 %v128_v8, 7  ;;  %vm194_vm3 = vsmask.f32 7448 }
   0x3   :  { %1168 = vmatprep.subr.bf16.mxu1 %v1230_v1  ;;  %1149 = vmatpush3.bf16.msra.mxu0 %v1229_v0  ;;  %v1235_v6 = vld [vmem:[%s1671_s3 + $0x60] sm:$0xff]   ;;  %v1237_v9 = vld [vmem:[%s1671_s3 + $0x58] sm:$0xff]   ;;  %v1239_v11 = vld [vmem:[%s1671_s3 + $0x50] sm:$0xff]   ;;  %v127_v32 = vunpack.c.0.s8 %v126_v13  ;;  %vm945_vm8 = vcmask 523264   ;;  %vm959_vm9 = vcmask 516096  }
   0x4   :  { %1169 = vmatpush3.bf16.msra.mxu1 %v1230_v1  ;;  %1150 = vmatprep.subr.bf16.mxu0 %v1231_v2  ;;  %v1236_v7 = vld [vmem:[%s1671_s3 + $0x20] sm:$0xff]   ;;  %v1238_v10 = vld [vmem:[%s1671_s3 + $0x18] sm:$0xff]   ;;  %v1333_v14 = vld [vmem:[%s1671_s3 + $0x10] sm:$0xff]  }
   0x5   :  { %1170 = vmatprep.subr.bf16.mxu1 %v1232_v3  ;;  %v21_v16 = vld [vmem:[%s1672_s0] sm:$0x7]  ;;  %v22_v17 = vld [vmem:[%s1672_s0 + $0x4] sm:$0x7]  ;;  %v23_v18 = vld [vmem:[%s1672_s0 + $0x8] sm:$0x7]  ;;  %v1406_v59 = vsub.s32 %v127_v32, %v129_v15 }
   0x6   :  { %v24_v19 = vld [vmem:[%s1672_s0 + $0xc] sm:$0x7]  ;;  %v25_v20 = vld [vmem:[%s1672_s0 + $0x10] sm:$0x7]  ;;  %v26_v21 = vld [vmem:[%s1672_s0 + $0x14] sm:$0x7]  ;;  %v31_v22 = vunpack.c.l.bf16 %v21_v16  ;;  %v32_v23 = vunpack.c.l.bf16 %v22_v17  ;;  %v33_v24 = vunpack.c.l.bf16 %v23_v18 }
   0x7   :  { %1151 = vmatpush3.bf16.msra.mxu0 %v1231_v2  ;;  %v1356_v25 = vld [vmem:[%s1671_s3 + $0x48] sm:$0xff]   ;;  %v27_v26 = vld [vmem:[%s1672_s0 + $0x18] sm:$0x7]  ;;  %v28_v27 = vld [vmem:[%s1672_s0 + $0x1c] sm:$0x7]  ;;  %v34_v29 = vunpack.c.l.bf16 %v24_v19  ;;  %v35_v30 = vunpack.c.l.bf16 %v25_v20  ;;  %v36_v31 = vunpack.c.l.bf16 %v26_v21 }
   0x8   :  { %1171 = vmatpush3.bf16.msra.mxu1 %v1232_v3  ;;  %1152 = vmatprep.subr.bf16.mxu0 %v1233_v4  ;;  %v29_v28 = vld [vmem:[%s1672_s0 + $0x20] sm:$0x7]  ;;  %v1242_v33 = vld [vmem:[%s1671_s3 + $0x8] sm:$0xff]   ;;  %v30_v34 = vld [vmem:[%s1672_s0 + $0x24] sm:$0x7]  ;;  %v37_v35 = vunpack.c.l.bf16 %v27_v26  ;;  %v38_v36 = vunpack.c.l.bf16 %v28_v27 }
   0x9   :  { %1172 = vmatprep.subr.bf16.mxu1 %v1234_v5  ;;  %v39_v37 = vunpack.c.l.bf16 %v29_v28  ;;  %v41_v38 = vld [vmem:[%s1673_s1] sm:$0x1f]  ;;  %v42_v39 = vld [vmem:[%s1673_s1 + $0x8] sm:$0x1f]  ;;  %v40_v40 = vunpack.c.l.bf16 %v30_v34  ;;  %v43_v41 = vld [vmem:[%s1673_s1 + $0x10] sm:$0x1f] }
   0xa   :  { %v44_v42 = vld [vmem:[%s1673_s1 + $0x18] sm:$0x1f]  ;;  %v45_v43 = vld [vmem:[%s1673_s1 + $0x20] sm:$0x1f]  ;;  %v46_v44 = vmul.f32 %v41_v38, %v31_v22  ;;  %v47_v45 = vmul.f32 %v42_v39, %v32_v23  ;;  %v51_v46 = vmul.f32 %v41_v38, %v36_v31  ;;  %v48_v47 = vmul.f32 %v43_v41, %v33_v24  ;;  %v57_v52 = vld [vmem:[%s1674_s2 + $0x8] sm:$0x1f] }
   0xb   :  { %1153 = vmatpush3.bf16.msra.mxu0 %v1233_v4  ;;  %v49_v48 = vmul.f32 %v44_v42, %v34_v29  ;;  %v50_v49 = vmul.f32 %v45_v43, %v35_v30  ;;  %v52_v50 = vmul.f32 %v42_v39, %v37_v35  ;;  %v56_v51 = vld [vmem:[%s1674_s2] sm:$0x1f]  ;;  %v58_v53 = vld [vmem:[%s1674_s2 + $0x10] sm:$0x1f]  ;;  %v53_v54 = vmul.f32 %v43_v41, %v38_v36  ;;  %v59_v56 = vld [vmem:[%s1674_s2 + $0x18] sm:$0x1f] }
   0xc   :  { %1173 = vmatpush3.bf16.msra.mxu1 %v1234_v5  ;;  %1154 = vmatprep.subr.bf16.mxu0 %v1235_v6  ;;  %v54_v55 = vmul.f32 %v44_v42, %v39_v37  ;;  %v1404_v57 = vld [vmem:[%s1674_s2 + $0x20] sm:$0x1f]  ;;  %v61_v58 = vadd.f32 %v56_v51, %v46_v44  ;;  %v62_v61 = vadd.f32 %v57_v52, %v47_v45  ;;  %v1430_v13 = vld [vmem:[%s1671_s3 + $0xb8] sm:$0xff]   ;;  %vm1471_vm4 = vmor %vm189_vm0, %vm190_vm1 }
   0xd   :  { %1174 = vmatprep.subr.bf16.mxu1 %v1236_v7  ;;  %v1243_v60 = vld [vmem:[%s1671_s3 + $0x40] sm:$0xff]   ;;  %v63_v62 = vadd.f32 %v58_v53, %v48_v47  ;;  %v64_v63 = vadd.f32 %v59_v56, %v49_v48  ;;  %v65_v0 = vadd.f32 %v1404_v57, %v50_v49  ;;  %v1414_v1 = vmul.f32 %v45_v43, %v40_v40  ;;  %vm193_vm5 = vmor %vm1471_vm4, %vm192_vm2 }
   0xe   :  { %v1416_v2 = vadd.f32 %v56_v51, %v51_v46  ;;  %v1418_v3 = vadd.f32 %v57_v52, %v52_v50  ;;  %v71_v4 = vmul.f32 0.2, %v61_v58  ;;  %v1244_v5 = vld [vmem:[%s1671_s3] sm:$0xff]   ;;  %v72_v8 = vmul.f32 0.2, %v62_v61  ;;  %vm1486_vm6 = vmor %vm193_vm5, %vm194_vm3 }
   0xf   :  { %1155 = vmatpush3.bf16.msra.mxu0 %v1235_v6  ;;  %v1423_v6 = vadd.f32 %v58_v53, %v53_v54 }
  0x10   :  { %1175 = vmatpush3.bf16.msra.mxu1 %v1236_v7  ;;  %1156 = vmatprep.subr.bf16.mxu0 %v1237_v9  ;;  %v1425_v7 = vadd.f32 %v59_v56, %v54_v55  ;;  %v81_v12 = vmax.f32 %v61_v58, %v71_v4  ;;  %v1438_v16 = vmul.f32 0.2, %v1416_v2  ;;  %v1445_v20 = vmul.f32 0.2, %v1418_v3  ;;  %v1260_v55 = vld [vmem:[%s1671_s3 + $0xc0] sm:$0xff]  }
  0x11   :  { %1176 = vmatprep.subr.bf16.mxu1 %v1238_v10  ;;  %v1453_v24 = vmul.f32 0.2, %v1423_v6 }
  0x12   :  { %v91_v19 = vpack.c.bf16 %v81_v12, %v81_v12  ;;  %v1477_v34 = vmul.f32 0.2, %v1425_v7 }
  0x13   :  { %1157 = vmatpush3.bf16.msra.mxu0 %v1237_v9  ;;  %v73_v9 = vmul.f32 0.2, %v63_v62 }
  0x14   :  { %1177 = vmatpush3.bf16.msra.mxu1 %v1238_v10  ;;  %1158 = vmatprep.subr.bf16.mxu0 %v1239_v11  ;;  %v74_v10 = vmul.f32 0.2, %v64_v63  ;;  %v131_v28 = vrot.slane %v91_v19, %v1406_v59 }
  0x15   :  { %1178 = vmatprep.subr.bf16.mxu1 %v1333_v14  ;;  %v1435_v15 = vmax.f32 %v63_v62, %v73_v9 }
  0x16   :  { %v1440_v17 = vmax.f32 %v64_v63, %v74_v10  ;;  %v132_v35 = vcombine.high %v131_v28, %v131_v28  ;;  %v197_v37 = vshrl.u32 %v131_v28, 16  ;;  %v200_v38 = vshll.u32 %v131_v28, 16 }
  0x17   :  { %1159 = vmatpush3.bf16.msra.mxu0 %v1239_v11  ;;  %v75_v11 = vmul.f32 0.2, %v65_v0  ;;  %v93_v22 = vpack.c.bf16 %v1435_v15, %v1435_v15 }
  0x18   :  { %1179 = vmatpush3.bf16.msra.mxu1 %v1333_v14  ;;  %1160 = vmatprep.subr.bf16.mxu0 %v1356_v25  ;;  %v1433_v14 = vmax.f32 %v62_v61, %v72_v8  ;;  %v94_v26 = vpack.c.bf16 %v1440_v17, %v1440_v17  ;;  %v1037_v29 = vpack.c.bf16 %v1440_v17, %v1435_v15  ;;  %v199_v44 = vrot.slane %v197_v37, 6 }
  0x19   :  { %1180 = vmatprep.subr.bf16.mxu1 %v1242_v33  ;;  %v1442_v18 = vmax.f32 %v65_v0, %v75_v11  ;;  %v147_v31 = vrot.slane %v93_v22, %v1406_v59  ;;  %v202_v45 = vrot.slane %v200_v38, 7  ;;  %v206_v46 = vshll.u32 %v132_v35, 16 }
  0x1a   :  { %v92_v21 = vpack.c.bf16 %v1433_v14, %v1433_v14  ;;  %v1036_v23 = vpack.c.bf16 %v1433_v14, %v81_v12  ;;  %v155_v36 = vrot.slane %v94_v26, %v1406_v59  ;;  %v70_v22 = vadd.f32 %v1404_v57, %v1414_v1 }
  0x1b   :  { %1161 = vmatpush3.bf16.msra.mxu0 %v1356_v25  ;;  %v1458_v25 = vld [vmem:[%s1671_s3 + $0xf8] sm:$0xff]   ;;  %v95_v27 = vpack.c.bf16 %v1442_v18, %v1442_v18  ;;  %v148_v40 = vcombine.high %v147_v31, %v147_v31  ;;  %v225_v50 = vshrl.u32 %v147_v31, 16  ;;  %v203_v51 = vor.u32 %v202_v45, %v199_v44 }
  0x1c   :  { %1181 = vmatpush3.bf16.msra.mxu1 %v1242_v33  ;;  %1162 = vmatprep.subr.bf16.mxu0 %v1243_v60  ;;  %v139_v30 = vrot.slane %v92_v21, %v1406_v59  ;;  %v466_v33 = vrot.slane %v1036_v23, %v1406_v59  ;;  %v156_v43 = vcombine.high %v155_v36, %v155_v36  ;;  %v208_v52 = vrot.slane %v206_v46, 7 }
  0x1d   :  { %1182 = vmatprep.subr.bf16.mxu1 %v1244_v5  ;;  %v228_v53 = vshll.u32 %v147_v31, 16  ;;  %v234_v54 = vshll.u32 %v148_v40, 16  ;;  %v239_v61 = vshrl.u32 %v155_v36, 16  ;;  %v204_v62 = vrot.slane %v203_v51, 2 }
  0x1e   :  { %v140_v39 = vcombine.high %v139_v30, %v139_v30  ;;  %v211_v41 = vshrl.u32 %v139_v30, 16  ;;  %v214_v42 = vshll.u32 %v139_v30, 16  ;;  %v242_v4 = vshll.u32 %v155_v36, 16 }
  0x1f   :  { %1163 = vmatpush3.bf16.msra.mxu0 %v1243_v60  ;;  %v227_v60 = vrot.slane %v225_v50, 6  ;;  %v230_v63 = vrot.slane %v228_v53, 7  ;;  %v236_v0 = vrot.slane %v234_v54, 7  ;;  %v241_v8 = vrot.slane %v239_v61, 6 }
  0x20   :  { %1183 = vmatpush3.bf16.msra.mxu1 %v1244_v5  ;;  %1188 = vmatprep.subr.bf16.mxu0 %v1430_v13  ;;  %v213_v47 = vrot.slane %v211_v41, 6  ;;  %v216_v48 = vrot.slane %v214_v42, 7  ;;  %v220_v49 = vshll.u32 %v140_v39, 16  ;;  %v248_v9 = vshll.u32 %v156_v43, 16 }
  0x21   :  { %1208 = vmatprep.subr.bf16.mxu1 %v1458_v25  ;;  %v753_v10 = vrot.slane %v95_v27, %v1406_v59  ;;  %v209_v11 = vsel %vm1486_vm6, %v204_v62, %v208_v52  ;;  %v231_v12 = vor.u32 %v230_v63, %v227_v60  ;;  %v244_v19 = vrot.slane %v242_v4, 7 }
  0x22   :  { %v217_v56 = vor.u32 %v216_v48, %v213_v47  ;;  %v222_v58 = vrot.slane %v220_v49, 7  ;;  %v473_v21 = vrot.slane %v1037_v29, %v1406_v59  ;;  %v250_v32 = vrot.slane %v248_v9, 7 }
  0x23   :  { %v754_v26 = vcombine.high %v753_v10, %v753_v10  ;;  %v764_v28 = vshrl.u32 %v753_v10, 16  ;;  %v232_v30 = vrot.slane %v231_v12, 2  ;;  %v245_v31 = vor.u32 %v244_v19, %v241_v8 }
  0x24   :  { %v218_v5 = vrot.slane %v217_v56, 2  ;;  %v767_v27 = vshll.u32 %v753_v10, 16  ;;  %v474_v38 = vcombine.low %v466_v33, %v473_v21  ;;  %v80_v39 = vmul.f32 0.2, %v70_v22 }
  0x25   :  { %v766_v36 = vrot.slane %v764_v28, 6  ;;  %v773_v37 = vshll.u32 %v754_v26, 16  ;;  %v1503_v29 = vsel %vm1486_vm6, %v232_v30, %v236_v0  ;;  %v246_v57 = vrot.slane %v245_v31, 2 }
  0x26   :  { %v1498_v23 = vsel %vm1486_vm6, %v218_v5, %v222_v58  ;;  %v769_v1 = vrot.slane %v767_v27, 7  ;;  %1184 = vmatprep.mubr.bf16.mxu1 %v474_v38  ;;  %v1507_v40 = vmax.f32 %v1416_v2, %v1438_v16  ;;  %v1511_v41 = vmax.f32 %v1418_v3, %v1445_v20 }
  0x27   :  { %v325_v35 = vcombine.low %v209_v11, %v1498_v23  ;;  %v1515_v42 = vsel %vm1486_vm6, %v246_v57, %v250_v32  ;;  %v1519_v43 = vmax.f32 %v1423_v6, %v1453_v24  ;;  %v1523_v44 = vmax.f32 %v1425_v7, %v1477_v34 }
  0x28   :  { %v770_v33 = vor.u32 %v769_v1, %v766_v36  ;;  %v326_v2 = vcombine.low %v1503_v29, %v1515_v42  ;;  %v96_v3 = vpack.c.bf16 %v1507_v40, %v1507_v40  ;;  %v97_v20 = vpack.c.bf16 %v1511_v41, %v1511_v41 }
  0x29   :  { %v333_v16 = vrot.slane %v325_v35, %v1406_v59  ;;  %v98_v45 = vpack.c.bf16 %v1519_v43, %v1519_v43  ;;  %v99_v6 = vpack.c.bf16 %v1523_v44, %v1523_v44  ;;  %v775_v24 = vrot.slane %v773_v37, 7 }
  0x2a   :  { %v340_v7 = vrot.slane %v326_v2, %v1406_v59  ;;  %v163_v34 = vrot.slane %v96_v3, %v1406_v59  ;;  %v171_v46 = vrot.slane %v97_v20, %v1406_v59  ;;  %v771_v47 = vrot.slane %v770_v33, 2 }
  0x2b   :  { %v1539_v48 = vmax.f32 %v70_v22, %v80_v39  ;;  %v179_v49 = vrot.slane %v98_v45, %v1406_v59  ;;  %v187_v50 = vrot.slane %v99_v6, %v1406_v59  ;;  %v1038_v54 = vpack.c.bf16 %v1511_v41, %v1507_v40 }
  0x2c   :  { %v341_v51 = vcombine.low %v333_v16, %v340_v7  ;;  %v164_v52 = vcombine.high %v163_v34, %v163_v34  ;;  %v172_v53 = vcombine.high %v171_v46, %v171_v46  ;;  %v253_v60 = vshrl.u32 %v163_v34, 16 }
  0x2d   :  { %v180_v56 = vcombine.high %v179_v49, %v179_v49  ;;  %v188_v58 = vcombine.high %v187_v50, %v187_v50  ;;  %v256_v61 = vshll.u32 %v163_v34, 16  ;;  %v267_v63 = vshrl.u32 %v171_v46, 16 }
  0x2e   :  { %1164 = vmatprep.mubr.bf16.mxu0 %v341_v51  ;;  %v262_v62 = vshll.u32 %v164_v52, 16  ;;  %v270_v0 = vshll.u32 %v171_v46, 16  ;;  %v276_v4 = vshll.u32 %v172_v53, 16  ;;  %v255_v5 = vrot.slane %v253_v60, 6 }
  0x2f   :  { %v258_v8 = vrot.slane %v256_v61, 7  ;;  %v281_v9 = vshrl.u32 %v179_v49, 16  ;;  %v284_v10 = vshll.u32 %v179_v49, 16  ;;  %v269_v12 = vrot.slane %v267_v63, 6  ;;  %v1250_v63 = vld [vmem:[%s1671_s3 + $0xe8] sm:$0xff]  }
  0x30   :  { %v264_v11 = vrot.slane %v262_v62, 7  ;;  %v272_v19 = vrot.slane %v270_v0, 7  ;;  %v278_v21 = vrot.slane %v276_v4, 7  ;;  %v290_v30 = vshll.u32 %v180_v56, 16  ;;  %v1247_v4 = vld [vmem:[%s1671_s3 + $0xb0] sm:$0xff]  }
  0x31   :  { %v259_v22 = vor.u32 %v258_v8, %v255_v5  ;;  %v283_v26 = vrot.slane %v281_v9, 6  ;;  %v286_v28 = vrot.slane %v284_v10, 7  ;;  %v295_v32 = vshrl.u32 %v187_v50, 16 }
  0x32   :  { %v273_v31 = vor.u32 %v272_v19, %v269_v12  ;;  %v298_v27 = vshll.u32 %v187_v50, 16  ;;  %v304_v35 = vshll.u32 %v188_v58, 16  ;;  %v776_v36 = vsel %vm1486_vm6, %v771_v47, %v775_v24 }
  0x33   :  { %v260_v37 = vrot.slane %v259_v22, 2  ;;  %v287_v38 = vor.u32 %v286_v28, %v283_v26  ;;  %v1039_v57 = vpack.c.bf16 %v1523_v44, %v1519_v43  ;;  %v292_v39 = vrot.slane %v290_v30, 7  ;;  %v1256_v28 = vld [vmem:[%s1671_s3 + $0xd0] sm:$0xff]   ;;  %v1253_v30 = vld [vmem:[%s1671_s3 + $0x98] sm:$0xff]  }
  0x34   :  { %v274_v1 = vrot.slane %v273_v31, 2  ;;  %v297_v40 = vrot.slane %v295_v32, 6  ;;  %v300_v33 = vrot.slane %v298_v27, 7  ;;  %v808_v2 = vcombine.low %v1498_v23, %v1503_v29  ;;  %v1258_v32 = vld [vmem:[%s1671_s3 + $0xc8] sm:$0xff]   ;;  %v1255_v27 = vld [vmem:[%s1671_s3 + $0x90] sm:$0xff]  }
  0x35   :  { %v100_v16 = vpack.c.bf16 %v1539_v48, %v1539_v48  ;;  %v265_v3 = vsel %vm1486_vm6, %v260_v37, %v264_v11  ;;  %v288_v20 = vrot.slane %v287_v38, 2  ;;  %v306_v7 = vrot.slane %v304_v35, 7  ;;  %v1249_v11 = vld [vmem:[%s1671_s3 + $0xa8] sm:$0xff]  }
  0x36   :  { %v1557_v45 = vsel %vm1486_vm6, %v274_v1, %v278_v21  ;;  %v301_v6 = vor.u32 %v300_v33, %v297_v40  ;;  %v483_v24 = vrot.slane %v1038_v54, %v1406_v59  ;;  %v809_v34 = vcombine.low %v1515_v42, %v776_v36  ;;  %v1248_v54 = vld [vmem:[%s1671_s3 + $0xf0] sm:$0xff]   ;;  %v1251_v21 = vld [vmem:[%s1671_s3 + $0xa0] sm:$0xff]   ;;  %v1257_v37 = vld [vmem:[%s1671_s3 + $0x88] sm:$0xff]  }
  0x37   :  { %v342_v46 = vcombine.low %v265_v3, %v1557_v45  ;;  %v1564_v23 = vsel %vm1486_vm6, %v288_v20, %v292_v39  ;;  %v490_v47 = vrot.slane %v1039_v57, %v1406_v59  ;;  %v761_v49 = vrot.slane %v100_v16, %v1406_v59  ;;  %v1259_v40 = vld [vmem:[%s1671_s3 + $0x80] sm:$0xff]  }
  0x38   :  { %v302_v29 = vrot.slane %v301_v6, 2  ;;  %v1064_v50 = vpack.c.bf16 %v1435_v15, %v1433_v14  ;;  %v1065_v51 = vpack.c.bf16 %v1442_v18, %v1440_v17  ;;  %v816_v56 = vrot.slane %v808_v2, %v1406_v59 }
  0x39   :  { %v350_v52 = vrot.slane %v342_v46, %v1406_v59  ;;  %v491_v53 = vcombine.low %v483_v24, %v490_v47  ;;  %v823_v17 = vrot.slane %v809_v34, %v1406_v59  ;;  %v778_v60 = vshrl.u32 %v761_v49, 16 }
  0x3a   :  { %v1574_v42 = vsel %vm1486_vm6, %v302_v29, %v306_v7  ;;  %v618_v14 = vrot.slane %v1064_v50, %v1406_v59  ;;  %v625_v15 = vrot.slane %v1065_v51, %v1406_v59  ;;  %v781_v61 = vshll.u32 %v761_v49, 16 }
  0x3b   :  { %v343_v58 = vcombine.low %v1564_v23, %v1574_v42  ;;  %1185 = vmatmul.mubr.bf16.vlgmr.msra.gmra.mxu1 %v491_v53  ;;  %v824_v62 = vcombine.low %v816_v56, %v823_v17  ;;  %v762_v8 = vcombine.high %v761_v49, %v761_v49  ;;  %v780_v9 = vrot.slane %v778_v60, 6 }
  0x3c   :  { %1209 = vmatpush3.bf16.msra.mxu1 %v1458_v25  ;;  %v626_v5 = vcombine.low %v618_v14, %v625_v15  ;;  %v783_v10 = vrot.slane %v781_v61, 7  ;;  %v1252_v25 = vld [vmem:[%s1671_s3 + $0xe0] sm:$0xff]   ;;  %v825_v35 = vcombine.low %v1557_v45, %v1564_v23  ;;  %v1066_v1 = vpack.c.bf16 %v1519_v43, %v1511_v41 }
  0x3d   :  { %v357_v18 = vrot.slane %v343_v58, %v1406_v59  ;;  %1210 = vmatprep.subr.bf16.mxu1 %v1248_v54  ;;  %1224 = vmatprep.mubr.bf16.mxu1 %v824_v62  ;;  %v787_v19 = vshll.u32 %v762_v8, 16  ;;  %v1067_v39 = vpack.c.bf16 %v1539_v48, %v1523_v44 }
  0x3e   :  { %v784_v12 = vor.u32 %v783_v10, %v780_v9  ;;  %v833_v38 = vrot.slane %v825_v35, %v1406_v59  ;;  %v635_v2 = vrot.slane %v1066_v1, %v1406_v59 }
  0x3f   :  { %v358_v0 = vcombine.low %v350_v52, %v357_v18  ;;  %v789_v26 = vrot.slane %v787_v19, 7  ;;  %v642_v16 = vrot.slane %v1067_v39, %v1406_v59 }
  0x40   :  { %1211 = vmatpush3.bf16.msra.mxu1 %v1248_v54  ;;  %v785_v22 = vrot.slane %v784_v12, 2 }
  0x41   :  { %1165 = vmatmul.mubr.bf16.vlgmr.msra.gmra.mxu0 %v358_v0  ;;  %1212 = vmatprep.subr.bf16.mxu1 %v1250_v63  ;;  %v643_v41 = vcombine.low %v635_v2, %v642_v16 }
  0x42   :  { %1189 = vmatpush3.bf16.msra.mxu0 %v1430_v13  ;;  %1204 = vmatprep.mubr.bf16.mxu0 %v626_v5  ;;  %v1254_v13 = vld [vmem:[%s1671_s3 + $0xd8] sm:$0xff]   ;;  %v790_v31 = vsel %vm1486_vm6, %v785_v22, %v789_v26 }
  0x43   :  { %1190 = vmatprep.subr.bf16.mxu0 %v1247_v4  ;;  %v826_v36 = vcombine.low %v1574_v42, %v790_v31 }
  0x44   :  { %1213 = vmatpush3.bf16.msra.mxu1 %v1250_v63 }
  0x45   :  { %1214 = vmatprep.subr.bf16.mxu1 %v1252_v25  ;;  %v840_v57 = vrot.slane %v826_v36, %v1406_v59 }
  0x46   :  { %1191 = vmatpush3.bf16.msra.mxu0 %v1247_v4 }
  0x47   :  { %1192 = vmatprep.subr.bf16.mxu0 %v1249_v11  ;;  %v841_v33 = vcombine.low %v833_v38, %v840_v57 }
  0x48   :  { %1215 = vmatpush3.bf16.msra.mxu1 %v1252_v25 }
  0x49   :  { %1216 = vmatprep.subr.bf16.mxu1 %v1254_v13 }
  0x4a   :  { %1193 = vmatpush3.bf16.msra.mxu0 %v1249_v11 }
  0x4b   :  { %1194 = vmatprep.subr.bf16.mxu0 %v1251_v21 }
  0x4c   :  { %1217 = vmatpush3.bf16.msra.mxu1 %v1254_v13 }
  0x4d   :  { %1218 = vmatprep.subr.bf16.mxu1 %v1256_v28 }
  0x4e   :  { %1195 = vmatpush3.bf16.msra.mxu0 %v1251_v21 }
  0x4f   :  { %1196 = vmatprep.subr.bf16.mxu0 %v1253_v30 }
  0x50   :  { %1219 = vmatpush3.bf16.msra.mxu1 %v1256_v28 }
  0x51   :  { %1220 = vmatprep.subr.bf16.mxu1 %v1258_v32 }
  0x52   :  { %1197 = vmatpush3.bf16.msra.mxu0 %v1253_v30 }
  0x53   :  { %1198 = vmatprep.subr.bf16.mxu0 %v1255_v27 }
  0x54   :  { %1221 = vmatpush3.bf16.msra.mxu1 %v1258_v32 }
  0x55   :  { %1222 = vmatprep.subr.bf16.mxu1 %v1260_v55 }
  0x56   :  { %1199 = vmatpush3.bf16.msra.mxu0 %v1255_v27 }
  0x57   :  { %1200 = vmatprep.subr.bf16.mxu0 %v1257_v37 }
  0x58   :  { %1223 = vmatpush3.bf16.msra.mxu1 %v1260_v55 }
  0x5a   :  { %1201 = vmatpush3.bf16.msra.mxu0 %v1257_v37 }
  0x5b   :  { %1202 = vmatprep.subr.bf16.mxu0 %v1259_v40  ;;  %1225 = vmatmul.mubr.bf16.vlgmr.msra.gmra.mxu1 %v841_v33 }
  0x5e   :  { %1203 = vmatpush3.bf16.msra.mxu0 %v1259_v40 }
  0x61   :  { %1205 = vmatmul.mubr.bf16.vlgmr.msra.gmra.mxu0 %v643_v41 }
  0xfb   :  { %v1186_v43 = vpop.f32.mrf.mxu1 }
  0xfd   :  { %v576_v48 = vpop.f32.mrf.mxu1 }
  0xff   :  { %v1187_v20 = vpop.f32.mrf.mxu1 }
 0x101   :  { %v1166_v44 = vpop.f32.mrf.mxu0  ;;  %v579_v6 = vpop.f32.mrf.mxu1 }
 0x102   :  { %v585_v34 = vadd.f32 %v1186_v43, %v1166_v44 }
 0x103   :  { %v443_v3 = vpop.f32.mrf.mxu0 }
 0x104   :  { %v577_v23 = vadd.f32 %v576_v48, %v443_v3 }
 0x105   :  { %v1167_v45 = vpop.f32.mrf.mxu0 }
 0x106   :  { %v588_v51 = vadd.f32 %v1187_v20, %v1167_v45 }
 0x107   :  { %v446_v24 = vpop.f32.mrf.mxu0 }
 0x108   :  { %v580_v56 = vadd.f32 %v579_v6, %v446_v24 }
 0x11b   :  { %v1226_v7 = vpop.f32.mrf.mxu1 }
 0x11d   :  { %v926_v59 = vpop.f32.mrf.mxu1 }
 0x11f   :  { %v1227_v54 = vpop.f32.mrf.mxu1 }
 0x121   :  { %v1206_v46 = vpop.f32.mrf.mxu0  ;;  %v929_v60 = vpop.f32.mrf.mxu1 }
 0x122   :  { %v745_v29 = vadd.f32 %v1206_v46, %v585_v34 }
 0x123   :  { %v728_v47 = vpop.f32.mrf.mxu0 }
 0x124   :  { %v943_v49 = vadd.f32 %v1226_v7, %v745_v29  ;;  %v743_v50 = vadd.f32 %v728_v47, %v577_v23 }
 0x125   :  { %v1207_v42 = vpop.f32.mrf.mxu0 }
 0x126   :  { %v1106_v52 = vpack.c.bf16 %v943_v49, %v943_v49  ;;  %v941_v53 = vadd.f32 %v926_v59, %v743_v50  ;;  %v746_v58 = vadd.f32 %v1207_v42, %v588_v51  ;;  %v963_v0 = vmul.f32 %v943_v49, %v943_v49 }
 0x127   :  { %v731_v14 = vpop.f32.mrf.mxu0  ;;  %v949_v25 = vsel %vm945_vm8, %v943_v49, 0.0 }
 0x128   :  { %998 = vst.msk [vmem:[%s1675_s4 + $0x8] sm:$0xf] %vm995_vm7, %v1106_v52  ;;  %v1104_v15 = vpack.c.bf16 %v941_v53, %v941_v53  ;;  %v944_v17 = vadd.f32 %v1227_v54, %v746_v58  ;;  %v744_v18 = vadd.f32 %v731_v14, %v580_v56  ;;  %v961_v61 = vmul.f32 %v941_v53, %v941_v53 }
 0x129   :  { %v946_v4 = vsel %vm945_vm8, %v941_v53, 0.0  ;;  %v968_v22 = vsel %vm945_vm8, %v963_v0, 0.0 }
 0x12a   :  { %996 = vst.msk [vmem:[%s1675_s4] sm:$0xf] %vm995_vm7, %v1104_v15  ;;  %v1107_v62 = vpack.c.bf16 %v944_v17, %v944_v17  ;;  %v942_v63 = vadd.f32 %v929_v60, %v744_v18  ;;  %v965_v11 = vsel %vm945_vm8, %v961_v61, 0.0  ;;  %v964_v12 = vmul.f32 %v944_v17, %v944_v17 }
 0x12b   :  { %v951_v26 = vsel %vm945_vm8, %v944_v17, 0.0 }
 0x12c   :  { %999 = vst.msk [vmem:[%s1675_s4 + $0xc] sm:$0xf] %vm995_vm7, %v1107_v62  ;;  %v947_v5 = vsel %vm945_vm8, %v942_v63, 0.0  ;;  %v962_v8 = vmul.f32 %v942_v63, %v942_v63  ;;  %v1105_v9 = vpack.c.bf16 %v942_v63, %v942_v63  ;;  %v970_v31 = vsel %vm945_vm8, %v964_v12, 0.0 }
 0x12d   :  { %v948_v10 = vadd.f32 %v947_v5, %v946_v4 }
 0x12e   :  { %v966_v19 = vsel %vm945_vm8, %v962_v8, 0.0  ;;  %997 = vst.msk [vmem:[%s1675_s4 + $0x4] sm:$0xf] %vm995_vm7, %v1105_v9 }
 0x12f   :  { %v950_v13 = vadd.f32 %v949_v25, %v948_v10  ;;  %v967_v21 = vadd.f32 %v966_v19, %v965_v11 }
 0x131   :  { %v952_v28 = vadd.f32 %v951_v26, %v950_v13  ;;  %v969_v30 = vadd.f32 %v968_v22, %v967_v21 }
 0x133   :  { %v953_v32 = vrot.slane %v952_v28, 4  ;;  %v971_v27 = vadd.f32 %v970_v31, %v969_v30 }
 0x135   :  { %v954_v35 = vadd.f32 %v953_v32, %v952_v28  ;;  %v972_v36 = vrot.slane %v971_v27, 4 }
 0x137   :  { %v955_v55 = vrot.slane %v954_v35, 2  ;;  %v973_v37 = vadd.f32 %v972_v36, %v971_v27 }
 0x139   :  { %v956_v38 = vadd.f32 %v955_v55, %v954_v35  ;;  %v974_v57 = vrot.slane %v973_v37, 2 }
 0x13b   :  { %v957_v1 = vrot.slane %v956_v38, 1  ;;  %v975_v39 = vadd.f32 %v974_v57, %v973_v37 }
 0x13d   :  { %v958_v40 = vadd.f32 %v957_v1, %v956_v38  ;;  %v976_v33 = vrot.slane %v975_v39, 1 }
 0x13f   :  { %960 = vst.msk [vmem:[%s1676_s5] sm:$0x1] %vm959_vm9, %v958_v40  ;;  %v977_v2 = vadd.f32 %v976_v33, %v975_v39 }
 0x141   :  { %978 = vst.msk [vmem:[%s1677_s6] sm:$0x1] %vm959_vm9, %v977_v2 }

// kernel: discriminator_forward.9
= control target key start
LH: loop header
LB: loop body
LE: loop exit
PB: predicated region body
PF: predicated region fallthrough
CT: control target
= control target key end

     0   :  { %v23_v20 = vlaneseq  ;;  %v1125_v28 = vmov 1983009808   ;;  %s1380_s3 = inlined_call_operand.vmem [shape: bf16[1024,128], index: 3, kind: input, shape index: {}]   ;;  %s1381_s1 = inlined_call_operand.vmem [shape: f32[1,1024], index: 1, kind: input, shape index: {}]   ;;  %s1382_s2 = inlined_call_operand.vmem [shape: f32[1,1024], index: 2, kind: input, shape index: {}]   ;;  %s1383_s0 = inlined_call_operand.vmem [shape: bf16[2,1024], index: 0, kind: input, shape index: {}]   ;;  %s1384_s4 = inlined_call_operand.vmem [shape: f32[2,128], index: 4, kind: output, shape index: {}]  }
   0x1   :  { %v1057_v0 = vld [vmem:[%s1380_s3 + $0x78] sm:$0xff]   ;;  %v1061_v4 = vld [vmem:[%s1380_s3 + $0x70] sm:$0xff]   ;;  %v1065_v8 = vld [vmem:[%s1380_s3 + $0x68] sm:$0xff]   ;;  %v58_v29 = vunpack.c.l.s4 %v1125_v28 }
   0x2   :  { %v1058_v1 = vld [vmem:[%s1380_s3 + $0xf8] sm:$0xff]   ;;  %968 = vmatprep.subr.bf16.mxu0 %v1057_v0  ;;  %v1062_v5 = vld [vmem:[%s1380_s3 + $0xf0] sm:$0xff]   ;;  %v1066_v9 = vld [vmem:[%s1380_s3 + $0xe8] sm:$0xff]   ;;  %v1223_v25 = vshrl.u32 %v23_v20, 7 }
   0x3   :  { %v1059_v2 = vld [vmem:[%s1380_s3 + $0x38] sm:$0xff]   ;;  %990 = vmatprep.subr.bf16.mxu1 %v1058_v1  ;;  %v1063_v6 = vld [vmem:[%s1380_s3 + $0x30] sm:$0xff]   ;;  %v1067_v10 = vld [vmem:[%s1380_s3 + $0x28] sm:$0xff]   ;;  %v59_v37 = vunpack.c.0.s8 %v58_v29 }
   0x4   :  { %v1060_v3 = vld [vmem:[%s1380_s3 + $0xb8] sm:$0xff]   ;;  %969 = vmatpush3.bf16.msra.mxu0 %v1059_v2  ;;  %v1064_v7 = vld [vmem:[%s1380_s3 + $0xb0] sm:$0xff]   ;;  %v1068_v11 = vld [vmem:[%s1380_s3 + $0xa8] sm:$0xff]   ;;  %v25_v32 = vsub.s32 0, %v1223_v25  ;;  %v29_v34 = vsub.s32 1, %v1223_v25  ;;  %v33_v36 = vsub.s32 2, %v1223_v25 }
   0x5   :  { %991 = vmatpush3.bf16.msra.mxu1 %v1060_v3  ;;  %970 = vmatprep.subr.bf16.mxu0 %v1061_v4  ;;  %v1069_v12 = vld [vmem:[%s1380_s3 + $0x60] sm:$0xff]   ;;  %v1073_v16 = vld [vmem:[%s1380_s3 + $0x58] sm:$0xff]   ;;  %v1077_v21 = vld [vmem:[%s1380_s3 + $0x50] sm:$0xff]   ;;  %v37_v39 = vsub.s32 3, %v1223_v25  ;;  %v1260_v45 = vsub.s32 %v59_v37, %v1223_v25  ;;  %v41_v58 = vsub.s32 4, %v1223_v25  ;;  %v45_v59 = vsub.s32 5, %v1223_v25 }
   0x6   :  { %992 = vmatprep.subr.bf16.mxu1 %v1062_v5  ;;  %v1070_v13 = vld [vmem:[%s1380_s3 + $0xe0] sm:$0xff]   ;;  %v1074_v17 = vld [vmem:[%s1380_s3 + $0xd8] sm:$0xff]   ;;  %v1078_v22 = vld [vmem:[%s1380_s3 + $0xd0] sm:$0xff]   ;;  %v49_v62 = vsub.s32 6, %v1223_v25  ;;  %v53_v63 = vsub.s32 7, %v1223_v25 }
   0x7   :  { %v1071_v14 = vld [vmem:[%s1380_s3 + $0x20] sm:$0xff]   ;;  %v1075_v18 = vld [vmem:[%s1380_s3 + $0x18] sm:$0xff]   ;;  %v1079_v23 = vld [vmem:[%s1380_s3 + $0x10] sm:$0xff]  }
   0x8   :  { %971 = vmatpush3.bf16.msra.mxu0 %v1063_v6  ;;  %v1072_v15 = vld [vmem:[%s1380_s3 + $0xa0] sm:$0xff]   ;;  %v1076_v19 = vld [vmem:[%s1380_s3 + $0x98] sm:$0xff]   ;;  %v1080_v24 = vld [vmem:[%s1380_s3 + $0x90] sm:$0xff]  }
   0x9   :  { %993 = vmatpush3.bf16.msra.mxu1 %v1064_v7  ;;  %972 = vmatprep.subr.bf16.mxu0 %v1065_v8  ;;  %v1081_v26 = vld [vmem:[%s1380_s3 + $0x48] sm:$0xff]   ;;  %v1085_v33 = vld [vmem:[%s1380_s3 + $0x40] sm:$0xff]   ;;  %v1089_v46 = vld [vmem:[%s1380_s3 + $0x178] sm:$0xff]  }
   0xa   :  { %994 = vmatprep.subr.bf16.mxu1 %v1066_v9  ;;  %v1082_v27 = vld [vmem:[%s1380_s3 + $0xc8] sm:$0xff]   ;;  %v1086_v35 = vld [vmem:[%s1380_s3 + $0xc0] sm:$0xff]   ;;  %v1090_v51 = vld [vmem:[%s1380_s3 + $0x1f8] sm:$0xff]  }
   0xb   :  { %v1083_v30 = vld [vmem:[%s1380_s3 + $0x8] sm:$0xff]   ;;  %v1087_v38 = vld [vmem:[%s1380_s3] sm:$0xff]   ;;  %v1093_v37 = vld [vmem:[%s1380_s3 + $0x170] sm:$0xff]  }
   0xc   :  { %973 = vmatpush3.bf16.msra.mxu0 %v1067_v10  ;;  %v1084_v31 = vld [vmem:[%s1380_s3 + $0x88] sm:$0xff]   ;;  %v1088_v40 = vld [vmem:[%s1380_s3 + $0x80] sm:$0xff]  }
   0xd   :  { %995 = vmatpush3.bf16.msra.mxu1 %v1068_v11  ;;  %974 = vmatprep.subr.bf16.mxu0 %v1069_v12  ;;  %v21_v41 = vld [vmem:[%s1381_s1] sm:$0xff] }
   0xe   :  { %996 = vmatprep.subr.bf16.mxu1 %v1070_v13  ;;  %v93_v42 = vld [vmem:[%s1382_s2] sm:$0xff]  ;;  %v26_v43 = vrot.slane %v21_v41, %v25_v32  ;;  %v30_v44 = vrot.slane %v21_v41, %v29_v34  ;;  %v34_v47 = vrot.slane %v21_v41, %v33_v36  ;;  %v38_v48 = vrot.slane %v21_v41, %v37_v39 }
   0xf   :  { %v98_v49 = vrot.slane %v93_v42, %v25_v32  ;;  %v102_v50 = vrot.slane %v93_v42, %v29_v34  ;;  %v18_v52 = vld [vmem:[%s1383_s0] sm:$0xff]  ;;  %v106_v54 = vrot.slane %v93_v42, %v33_v36  ;;  %v110_v55 = vrot.slane %v93_v42, %v37_v39  ;;  %v1092_v39 = vld [vmem:[%s1380_s3 + $0x1b8] sm:$0xff]  }
  0x10   :  { %975 = vmatpush3.bf16.msra.mxu0 %v1071_v14  ;;  %v55_v53 = vcombine.low %v26_v43, %v30_v44  ;;  %v56_v56 = vcombine.low %v34_v47, %v38_v48  ;;  %v19_v0 = vunpack.c.l.bf16 %v18_v52  ;;  %v42_v5 = vrot.slane %v21_v41, %v41_v58  ;;  %v1095_v43 = vld [vmem:[%s1380_s3 + $0x130] sm:$0xff]   ;;  %v1097_v44 = vld [vmem:[%s1380_s3 + $0x168] sm:$0xff]  }
  0x11   :  { %997 = vmatpush3.bf16.msra.mxu1 %v1072_v15  ;;  %976 = vmatprep.subr.bf16.mxu0 %v1073_v16  ;;  %v127_v57 = vcombine.low %v98_v49, %v102_v50  ;;  %v128_v61 = vcombine.low %v106_v54, %v110_v55  ;;  %v46_v6 = vrot.slane %v21_v41, %v45_v59  ;;  %v1098_v47 = vld [vmem:[%s1380_s3 + $0x1e8] sm:$0xff]   ;;  %v1101_v50 = vld [vmem:[%s1380_s3 + $0x160] sm:$0xff]   ;;  %v1105_v55 = vld [vmem:[%s1380_s3 + $0x158] sm:$0xff]  }
  0x12   :  { %998 = vmatprep.subr.bf16.mxu1 %v1074_v17  ;;  %v63_v60 = vrot.slane %v55_v53, %v1260_v45  ;;  %v70_v1 = vrot.slane %v56_v56, %v1260_v45  ;;  %v50_v8 = vrot.slane %v21_v41, %v49_v62  ;;  %v54_v9 = vrot.slane %v21_v41, %v53_v63  ;;  %v1099_v49 = vld [vmem:[%s1380_s3 + $0x128] sm:$0xff]   ;;  %v1103_v54 = vld [vmem:[%s1380_s3 + $0x120] sm:$0xff]  }
  0x13   :  { %v135_v2 = vrot.slane %v127_v57, %v1260_v45  ;;  %v142_v3 = vrot.slane %v128_v61, %v1260_v45  ;;  %v72_v12 = vcombine.low %v42_v5, %v46_v6  ;;  %v114_v13 = vrot.slane %v93_v42, %v41_v58  ;;  %v1104_v57 = vld [vmem:[%s1380_s3 + $0x1a0] sm:$0xff]   ;;  %v1106_v58 = vld [vmem:[%s1380_s3 + $0x1d8] sm:$0xff]   ;;  %v1111_v5 = vld [vmem:[%s1380_s3 + $0x110] sm:$0xff]  }
  0x14   :  { %977 = vmatpush3.bf16.msra.mxu0 %v1075_v18  ;;  %v71_v4 = vcombine.low %v63_v60, %v70_v1  ;;  %v73_v14 = vcombine.low %v50_v8, %v54_v9  ;;  %v118_v15 = vrot.slane %v93_v42, %v45_v59  ;;  %v122_v16 = vrot.slane %v93_v42, %v49_v62  ;;  %v1107_v61 = vld [vmem:[%s1380_s3 + $0x118] sm:$0xff]   ;;  %v1109_v62 = vld [vmem:[%s1380_s3 + $0x150] sm:$0xff]   ;;  %v1114_v8 = vld [vmem:[%s1380_s3 + $0x1c8] sm:$0xff]  }
  0x15   :  { %999 = vmatpush3.bf16.msra.mxu1 %v1076_v19  ;;  %978 = vmatprep.subr.bf16.mxu0 %v1077_v21  ;;  %v143_v7 = vcombine.low %v135_v2, %v142_v3  ;;  %v126_v17 = vrot.slane %v93_v42, %v53_v63  ;;  %v80_v20 = vrot.slane %v72_v12, %v1260_v45  ;;  %v1108_v1 = vld [vmem:[%s1380_s3 + $0x198] sm:$0xff]   ;;  %v1110_v2 = vld [vmem:[%s1380_s3 + $0x1d0] sm:$0xff]   ;;  %v1115_v9 = vld [vmem:[%s1380_s3 + $0x108] sm:$0xff]  }
  0x16   :  { %1000 = vmatprep.subr.bf16.mxu1 %v1078_v22  ;;  %v91_v10 = vmul.f32 %v71_v4, %v19_v0  ;;  %v87_v21 = vrot.slane %v73_v14, %v1260_v45  ;;  %v144_v22 = vcombine.low %v114_v13, %v118_v15  ;;  %v1118_v12 = vld [vmem:[%s1380_s3 + $0x1c0] sm:$0xff]  }
  0x17   :  { %v1119_v13 = vld [vmem:[%s1380_s3 + $0x100] sm:$0xff]  }
  0x18   :  { %979 = vmatpush3.bf16.msra.mxu0 %v1079_v23  ;;  %v163_v11 = vadd.f32 %v143_v7, %v91_v10  ;;  %v145_v23 = vcombine.low %v122_v16, %v126_v17  ;;  %v1112_v7 = vld [vmem:[%s1380_s3 + $0x190] sm:$0xff]   ;;  %v1117_v10 = vld [vmem:[%s1380_s3 + $0x140] sm:$0xff]  }
  0x19   :  { %1001 = vmatpush3.bf16.msra.mxu1 %v1080_v24  ;;  %980 = vmatprep.subr.bf16.mxu0 %v1081_v26  ;;  %v20_v26 = vunpack.c.h.bf16 %v18_v52  ;;  %v1102_v52 = vld [vmem:[%s1380_s3 + $0x1e0] sm:$0xff]  }
  0x1a   :  { %1002 = vmatprep.subr.bf16.mxu1 %v1082_v27  ;;  %v165_v18 = vmul.f32 0.2, %v163_v11  ;;  %v159_v32 = vrot.slane %v145_v23, %v1260_v45  ;;  %v1120_v14 = vld [vmem:[%s1380_s3 + $0x180] sm:$0xff]  }
  0x1c   :  { %981 = vmatpush3.bf16.msra.mxu0 %v1083_v30  ;;  %v167_v19 = vmax.f32 %v163_v11, %v165_v18  ;;  %v88_v30 = vcombine.low %v80_v20, %v87_v21  ;;  %v1116_v11 = vld [vmem:[%s1380_s3 + $0x188] sm:$0xff]  }
  0x1d   :  { %1003 = vmatpush3.bf16.msra.mxu1 %v1084_v31  ;;  %982 = vmatprep.subr.bf16.mxu0 %v1085_v33  ;;  %v152_v31 = vrot.slane %v144_v22, %v1260_v45 }
  0x1e   :  { %1004 = vmatprep.subr.bf16.mxu1 %v1086_v35  ;;  %v178_v24 = vrot.slane %v167_v19, %v1260_v45  ;;  %v171_v25 = vcombine.high %v167_v19, %v167_v19  ;;  %v1091_v35 = vld [vmem:[%s1380_s3 + $0x138] sm:$0xff]   ;;  %v92_v41 = vmul.f32 %v88_v30, %v20_v26 }
  0x1f   :  { %v160_v42 = vcombine.low %v152_v31, %v159_v32 }
  0x20   :  { %983 = vmatpush3.bf16.msra.mxu0 %v1087_v38  ;;  %v186_v27 = vcombine.high %v178_v24, %v178_v24  ;;  %v185_v28 = vrot.slane %v171_v25, %v1260_v45  ;;  %v213_v29 = vpack.c.bf16 %v178_v24, %v178_v24 }
  0x21   :  { %1005 = vmatpush3.bf16.msra.mxu1 %v1088_v40  ;;  %1012 = vmatprep.subr.bf16.mxu0 %v1089_v46  ;;  %v1094_v40 = vld [vmem:[%s1380_s3 + $0x1f0] sm:$0xff]   ;;  %v164_v48 = vadd.f32 %v160_v42, %v92_v41 }
  0x22   :  { %1034 = vmatprep.subr.bf16.mxu1 %v1090_v51  ;;  %v214_v33 = vpack.c.bf16 %v186_v27, %v186_v27  ;;  %v187_v34 = vcombine.high %v185_v28, %v185_v28  ;;  %v215_v36 = vpack.c.bf16 %v185_v28, %v185_v28  ;;  %v1096_v46 = vld [vmem:[%s1380_s3 + $0x1b0] sm:$0xff]   ;;  %v1100_v51 = vld [vmem:[%s1380_s3 + $0x1a8] sm:$0xff]  }
  0x23   :  { %v166_v53 = vmul.f32 0.2, %v164_v48 }
  0x24   :  { %765 = vmatprep.mubr.bf16.mxu0 %v214_v33  ;;  %v216_v38 = vpack.c.bf16 %v187_v34, %v187_v34 }
  0x25   :  { %766 = vmatmul.mubr.bf16.vlgmr.msra.gmra.mxu0 %v213_v29  ;;  %v168_v56 = vmax.f32 %v164_v48, %v166_v53 }
  0x26   :  { %805 = vmatprep.mubr.bf16.mxu1 %v216_v38  ;;  %1013 = vmatpush3.bf16.msra.mxu0 %v1091_v35 }
  0x27   :  { %806 = vmatmul.mubr.bf16.vlgmr.msra.gmra.mxu1 %v215_v36  ;;  %1014 = vmatprep.subr.bf16.mxu0 %v1093_v37  ;;  %v195_v59 = vrot.slane %v168_v56, %v1260_v45  ;;  %v188_v60 = vcombine.high %v168_v56, %v168_v56 }
  0x28   :  { %1035 = vmatpush3.bf16.msra.mxu1 %v1092_v39 }
  0x29   :  { %1036 = vmatprep.subr.bf16.mxu1 %v1094_v40  ;;  %v203_v63 = vcombine.high %v195_v59, %v195_v59  ;;  %v202_v0 = vrot.slane %v188_v60, %v1260_v45  ;;  %v1113_v45 = vld [vmem:[%s1380_s3 + $0x148] sm:$0xff]   ;;  %v217_v15 = vpack.c.bf16 %v195_v59, %v195_v59 }
  0x2a   :  { %1015 = vmatpush3.bf16.msra.mxu0 %v1095_v43 }
  0x2b   :  { %1016 = vmatprep.subr.bf16.mxu0 %v1097_v44  ;;  %v218_v3 = vpack.c.bf16 %v203_v63, %v203_v63  ;;  %v204_v4 = vcombine.high %v202_v0, %v202_v0  ;;  %v219_v16 = vpack.c.bf16 %v202_v0, %v202_v0 }
  0x2c   :  { %1037 = vmatpush3.bf16.msra.mxu1 %v1096_v46 }
  0x2d   :  { %1038 = vmatprep.subr.bf16.mxu1 %v1098_v47  ;;  %845 = vmatprep.mubr.bf16.mxu0 %v218_v3  ;;  %v220_v6 = vpack.c.bf16 %v204_v4, %v204_v4 }
  0x2e   :  { %1017 = vmatpush3.bf16.msra.mxu0 %v1099_v49 }
  0x2f   :  { %1018 = vmatprep.subr.bf16.mxu0 %v1101_v50  ;;  %885 = vmatprep.mubr.bf16.mxu1 %v220_v6 }
  0x30   :  { %1039 = vmatpush3.bf16.msra.mxu1 %v1100_v51 }
  0x31   :  { %1040 = vmatprep.subr.bf16.mxu1 %v1102_v52 }
  0x32   :  { %1019 = vmatpush3.bf16.msra.mxu0 %v1103_v54 }
  0x33   :  { %1020 = vmatprep.subr.bf16.mxu0 %v1105_v55 }
  0x34   :  { %1041 = vmatpush3.bf16.msra.mxu1 %v1104_v57 }
  0x35   :  { %1042 = vmatprep.subr.bf16.mxu1 %v1106_v58 }
  0x36   :  { %1021 = vmatpush3.bf16.msra.mxu0 %v1107_v61 }
  0x37   :  { %1022 = vmatprep.subr.bf16.mxu0 %v1109_v62 }
  0x38   :  { %1043 = vmatpush3.bf16.msra.mxu1 %v1108_v1 }
  0x39   :  { %1044 = vmatprep.subr.bf16.mxu1 %v1110_v2 }
  0x3a   :  { %1023 = vmatpush3.bf16.msra.mxu0 %v1111_v5 }
  0x3b   :  { %1024 = vmatprep.subr.bf16.mxu0 %v1113_v45 }
  0x3c   :  { %1045 = vmatpush3.bf16.msra.mxu1 %v1112_v7 }
  0x3d   :  { %1046 = vmatprep.subr.bf16.mxu1 %v1114_v8 }
  0x3e   :  { %1025 = vmatpush3.bf16.msra.mxu0 %v1115_v9 }
  0x3f   :  { %1026 = vmatprep.subr.bf16.mxu0 %v1117_v10 }
  0x40   :  { %1047 = vmatpush3.bf16.msra.mxu1 %v1116_v11 }
  0x41   :  { %1048 = vmatprep.subr.bf16.mxu1 %v1118_v12 }
  0x42   :  { %1027 = vmatpush3.bf16.msra.mxu0 %v1119_v13 }
  0x44   :  { %1049 = vmatpush3.bf16.msra.mxu1 %v1120_v14 }
  0x45   :  { %846 = vmatmul.mubr.bf16.vlgmr.msra.gmra.mxu0 %v217_v15 }
  0x47   :  { %886 = vmatmul.mubr.bf16.vlgmr.msra.gmra.mxu1 %v219_v16 }
  0xe5   :  { %v984_v17 = vpop.f32.mrf.mxu0 }
  0xe7   :  { %v1006_v18 = vpop.f32.mrf.mxu1  ;;  %v985_v19 = vpop.f32.mrf.mxu0 }
  0xe8   :  { %v986_v25 = vadd.f32 %v985_v19, %v984_v17 }
  0xe9   :  { %v1007_v20 = vpop.f32.mrf.mxu1  ;;  %v987_v21 = vpop.f32.mrf.mxu0 }
  0xea   :  { %v1008_v26 = vadd.f32 %v1007_v20, %v1006_v18 }
  0xeb   :  { %v1009_v22 = vpop.f32.mrf.mxu1  ;;  %v988_v23 = vpop.f32.mrf.mxu0 }
  0xec   :  { %v808_v30 = vadd.f32 %v1008_v26, %v986_v25 }
  0xed   :  { %v1010_v24 = vpop.f32.mrf.mxu1 }
 0x105   :  { %v1028_v27 = vpop.f32.mrf.mxu0 }
 0x107   :  { %v1050_v28 = vpop.f32.mrf.mxu1  ;;  %v1029_v29 = vpop.f32.mrf.mxu0 }
 0x108   :  { %v1030_v31 = vadd.f32 %v1029_v29, %v1028_v27 }
 0x109   :  { %v1051_v32 = vpop.f32.mrf.mxu1  ;;  %v1031_v33 = vpop.f32.mrf.mxu0 }
 0x10a   :  { %v848_v34 = vadd.f32 %v1030_v31, %v808_v30  ;;  %v1052_v35 = vadd.f32 %v1051_v32, %v1050_v28 }
 0x10b   :  { %v1053_v36 = vpop.f32.mrf.mxu1  ;;  %v1032_v37 = vpop.f32.mrf.mxu0 }
 0x10c   :  { %v888_v38 = vadd.f32 %v1052_v35, %v848_v34 }
 0x10d   :  { %v1054_v39 = vpop.f32.mrf.mxu1 }
 0x10e   :  { %v893_v40 = vsub.f32 0.0, %v888_v38 }
 0x110   :  { %v894_v41 = vmul.f32 1.442695, %v893_v40 }
 0x112   :  { %1121 = vpow2.f32 %v894_v41 }
 0x11f   :  { %v1122_v42 = vpop.eup %1121 }
 0x120   :  { %v896_v43 = vadd.f32 1.0, %v1122_v42 }
 0x122   :  { %1123 = vrcp.f32 %v896_v43 }
 0x12f   :  { %v1124_v44 = vpop.eup %1123 }
 0x130   :  { %899 = vst [vmem:[%s1384_s4] sm:$0x3] %v1124_v44 }

</bundles_post_ra>
